<compile_context>
chip_gen: v7x
topology: tpu7x:2x2x1
jax: 0.10.0
libtpu: 0.0.40
codegen_flags: <defaults>
</compile_context>

<pallas_src>
import math
from functools import partial

import jax
import jax.numpy as jnp
from jax.experimental import pallas as pl
from jax.experimental.pallas import tpu as pltpu

# ----------------------------- hyper-parameters -----------------------------
TIMESTEPS   = 100                 # stored by the module, unused in forward
LATENT_DIM  = 32                  # d_model (divisible by NHEAD)
NUM_CLASSES = 10
IMAGE_SIZE  = 8
NUM_CH      = 3
NHEAD       = 8
HEAD_DIM    = LATENT_DIM // NHEAD
DIM_FF      = 256
NUM_LAYERS  = 6
LN_EPS      = 1e-5
OUT_DIM     = IMAGE_SIZE * IMAGE_SIZE * NUM_CH        # 192
OUT_PAD     = 256                                     # lane-dense padded fc_out width

# MXU operand dtype.  bf16 is native on the v5e/v6e/v7x MXU (f32 operands pay a
# multi-pass penalty); accumulation stays f32.  Set to jnp.float32 for strict
# numerical parity with the f32 torch reference.
MXU_DTYPE = jnp.bfloat16


# ----------------------------- in-kernel helpers -----------------------------
def _mm(a, b):
    """Single 2D MXU matmul with f32 accumulation (operands cast to MXU_DTYPE)."""
    return jnp.dot(a.astype(MXU_DTYPE), b.astype(MXU_DTYPE),
                   preferred_element_type=jnp.float32)


def _layernorm(x, g, b):
    mu = jnp.mean(x, axis=-1, keepdims=True)
    xc = x - mu
    var = jnp.mean(xc * xc, axis=-1, keepdims=True)
    return xc * jax.lax.rsqrt(var + LN_EPS) * g + b


def _attend(q, k, v, seq_len, n_batch, hp, hpt):
    """Multi-head scaled-dot-product attention core.

    q, k, v: (seq_len*n_batch, D) projected activations, rows sequence-major
    (row = l*n_batch + n); q is already scaled by 1/sqrt(head_dim) (folded into
    the projection weights host-side).  All (i, j) query/key pairs are batched
    along the sublane axis so per-head score pooling (@hp, (D,NHEAD)) and the
    head->lane expansion (@hpt) are a single MXU matmul each.  Softmax/context
    reductions over the key axis are tiny static elementwise unrolls.
    """
    D = LATENT_DIM
    s2n = seq_len * seq_len * n_batch
    q4 = q.reshape(seq_len, 1, n_batch, D)
    k4 = k.reshape(1, seq_len, n_batch, D)
    v3 = v.reshape(seq_len, n_batch, D)

    qk = (q4 * k4).reshape(s2n, D)                                  # all (i,j) pairs
    s4 = _mm(qk, hp).reshape(seq_len, seq_len, n_batch, NHEAD)      # per-head scores

    # softmax over the key axis j (axis 1)
    m = s4[:, 0:1]
    for j in range(1, seq_len):
        m = jnp.maximum(m, s4[:, j:j + 1])
    p4 = jnp.exp(s4 - m)
    denom = p4[:, 0:1]
    for j in range(1, seq_len):
        denom = denom + p4[:, j:j + 1]
    w4 = p4 * pl.reciprocal(denom, approx=True)                     # EUP, not VPU divide

    # expand per-head weights to D lanes with one matmul, then weighted V sum
    wd = _mm(w4.reshape(s2n, NHEAD), hpt).reshape(seq_len, seq_len, n_batch, D)
    ctx = wd[:, 0] * v3[0]
    for j in range(1, seq_len):
        ctx = ctx + wd[:, j] * v3[j]
    return ctx.reshape(seq_len * n_batch, D)                        # heads already concat on D


# --------------------------------- fused kernel -------------------------------
def _fused_kernel(x_ref, add_ref, hp_ref, hpt_ref,
                  sqkv_w_ref, sqkv_b_ref, sao_w_ref, sao_b_ref,
                  cq_w_ref, cq_b_ref, ckv_w_ref, ckv_b_ref,
                  cao_w_ref, cao_b_ref,
                  w1_ref, b1_ref, w2_ref, b2_ref,
                  lg_ref, lb_ref, fcw_ref, fcb_ref,
                  out_ref, *, seq_len, n_batch):
    D = LATENT_DIM
    hp = hp_ref[...]                               # hoisted: reused by every layer
    hpt = hpt_ref[...]

    # conditional embedding add: x + class_embedding + positional_encoding
    h = x_ref[...] + add_ref[...]
    mem = h                                        # decoder memory = x_cond (fixed)

    # cross-attention K/V for ALL layers in one wide matmul (mem is constant)
    memkv = _mm(mem, ckv_w_ref[...]) + ckv_b_ref[...]          # (rows, L*2*D)

    for layer in range(NUM_LAYERS):                # static unroll over stacked weights
        g = layer * 3                              # [norm1, norm2, norm3]

        # --- self-attention block (fused QKV projection; post-norm) ---
        qkv = _mm(h, sqkv_w_ref[layer]) + sqkv_b_ref[layer]    # (rows, 3D)
        sa = _attend(qkv[:, 0:D], qkv[:, D:2 * D], qkv[:, 2 * D:3 * D],
                     seq_len, n_batch, hp, hpt)
        sa = _mm(sa, sao_w_ref[layer]) + sao_b_ref[layer]
        h = _layernorm(h + sa, lg_ref[g + 0], lb_ref[g + 0])

        # --- cross-attention block (K/V hoisted above the loop) ---
        cq = _mm(h, cq_w_ref[layer]) + cq_b_ref[layer]
        o = layer * 2 * D
        ca = _attend(cq, memkv[:, o:o + D], memkv[:, o + D:o + 2 * D],
                     seq_len, n_batch, hp, hpt)
        ca = _mm(ca, cao_w_ref[layer]) + cao_b_ref[layer]
        h = _layernorm(h + ca, lg_ref[g + 1], lb_ref[g + 1])

        # --- feed-forward block: linear2(relu(linear1(x))) ---
        ff = _mm(jnp.maximum(_mm(h, w1_ref[layer]) + b1_ref[layer], 0.0),
                 w2_ref[layer]) + b2_ref[layer]
        h = _layernorm(h + ff, lg_ref[g + 2], lb_ref[g + 2])

    # fc_out, padded to OUT_PAD lanes (lane-dense final store)
    out_ref[...] = _mm(h, fcw_ref[...]) + fcb_ref[...]


# ------------------------------ parameters ------------------------------------
def init_params(key):
    """Deterministic synthetic parameters (weights stored as (in, out), stacked per layer)."""
    D, FF, L = LATENT_DIM, DIM_FF, NUM_LAYERS
    kit = iter(jax.random.split(key, 128))

    def nrm(shape, scale=0.05):
        return (scale * jax.random.normal(next(kit), shape)).astype(jnp.float32)

    # attention scale folded into the q projection (scores = (q*s)·k = x@(s*Wq)+s*bq)
    scale = 1.0 / math.sqrt(HEAD_DIM)

    sa_qkv_w, sa_qkv_b, sa_o_w, sa_o_b = [], [], [], []
    ca_q_w, ca_q_b, ca_kv_w, ca_kv_b, ca_o_w, ca_o_b = [], [], [], [], [], []
    for _ in range(L):
        wq, wk, wv = nrm((D, D)), nrm((D, D)), nrm((D, D))
        bq, bk, bv = nrm((1, D)), nrm((1, D)), nrm((1, D))
        sa_qkv_w.append(jnp.concatenate([wq * scale, wk, wv], axis=1))   # (D, 3D)
        sa_qkv_b.append(jnp.concatenate([bq * scale, bk, bv], axis=1))   # (1, 3D)
        sa_o_w.append(nrm((D, D))); sa_o_b.append(nrm((1, D)))

        cwq, cbq = nrm((D, D)), nrm((1, D))
        ca_q_w.append(cwq * scale); ca_q_b.append(cbq * scale)
        cwk, cwv = nrm((D, D)), nrm((D, D))
        cbk, cbv = nrm((1, D)), nrm((1, D))
        ca_kv_w.append(jnp.concatenate([cwk, cwv], axis=1))              # (D, 2D)
        ca_kv_b.append(jnp.concatenate([cbk, cbv], axis=1))              # (1, 2D)
        ca_o_w.append(nrm((D, D))); ca_o_b.append(nrm((1, D)))

    params = {
        "class_embedding": nrm((NUM_CLASSES, D), 1.0),
        "sa_qkv_w": jnp.stack(sa_qkv_w),                 # (L, D, 3D)
        "sa_qkv_b": jnp.stack(sa_qkv_b),                 # (L, 1, 3D)
        "sa_o_w":  jnp.stack(sa_o_w),                    # (L, D, D)
        "sa_o_b":  jnp.stack(sa_o_b),                    # (L, 1, D)
        "ca_q_w":  jnp.stack(ca_q_w),                    # (L, D, D)
        "ca_q_b":  jnp.stack(ca_q_b),                    # (L, 1, D)
        "ca_kv_w": jnp.concatenate(ca_kv_w, axis=1),     # (D, L*2*D) = (32, 384)
        "ca_kv_b": jnp.concatenate(ca_kv_b, axis=1),     # (1, 384)
        "ca_o_w":  jnp.stack(ca_o_w),                    # (L, D, D)
        "ca_o_b":  jnp.stack(ca_o_b),                    # (L, 1, D)
        "ffn_w1":  nrm((L, D, FF)),
        "ffn_b1":  nrm((L, 1, FF)),
        "ffn_w2":  nrm((L, FF, D)),
        "ffn_b2":  nrm((L, 1, D)),
        "ln_g": jnp.ones((L * 3, 1, D), jnp.float32),
        "ln_b": jnp.zeros((L * 3, 1, D), jnp.float32),
    }
    fc_w = nrm((D, OUT_DIM))
    fc_b = nrm((1, OUT_DIM))
    # zero-pad fc_out to 256 lanes so the final store is two full 128-lane vregs
    params["fc_w_pad"] = jnp.pad(fc_w, ((0, 0), (0, OUT_PAD - OUT_DIM)))
    params["fc_b_pad"] = jnp.pad(fc_b, ((0, 0), (0, OUT_PAD - OUT_DIM)))
    return params


def _head_pool():
    """(D, NHEAD) indicator: hp[d, h] = 1 iff lane d belongs to head h (and its transpose)."""
    d_idx = jnp.arange(LATENT_DIM)[:, None] // HEAD_DIM
    h_idx = jnp.arange(NHEAD)[None, :]
    hp = (d_idx == h_idx).astype(MXU_DTYPE)
    return hp, hp.T


def positional_encoding(num_positions, d):
    # TODO(synk): the reference positional_encoding has an extra unsqueeze that
    # makes the broadcast shape-inconsistent (would raise in torch for A1 != D/2);
    # we implement the intended standard sinusoidal encoding over axis 1 instead.
    pos = jnp.arange(num_positions, dtype=jnp.float32)[:, None]
    div = jnp.exp(jnp.arange(0, d, 2, dtype=jnp.float32) * (-math.log(10000.0) / d))
    pe = jnp.zeros((num_positions, d), jnp.float32)
    pe = pe.at[:, 0::2].set(jnp.sin(pos * div))
    pe = pe.at[:, 1::2].set(jnp.cos(pos * div))
    return pe


# ------------------------------ forward ---------------------------------------
def conditional_transformer_forward(params, x, t, labels):
    """x: (A0, A1, D) float32; t: unused by the reference forward; labels: (A0,) int."""
    A0, A1, D = x.shape
    del t  # the reference forward never uses t

    lab = params["class_embedding"][labels]          # (A0, D): varies along seq axis A0
    pos = positional_encoding(A1, D)                 # (A1, D): varies along batch axis A1

    # flat sequence-major layout (row = a0*A1 + a1); wrapper-side glue only
    x2d = x.reshape(A0 * A1, D).astype(jnp.float32)
    add2d = (lab[:, None, :] + pos[None, :, :]).reshape(A0 * A1, D)
    hp, hpt = _head_pool()

    # matmul weights cast once host-side (no-op when MXU_DTYPE == float32);
    # biases / layernorm params stay f32 for f32 elementwise math.
    w = lambda name: params[name].astype(MXU_DTYPE)

    kernel = partial(_fused_kernel, seq_len=A0, n_batch=A1)
    n_in = 22
    out2d = pl.pallas_call(
        kernel,
        out_shape=jax.ShapeDtypeStruct((A0 * A1, OUT_PAD), jnp.float32),
        in_specs=[pl.BlockSpec(memory_space=pltpu.MemorySpace.VMEM)] * n_in,
        out_specs=pl.BlockSpec(memory_space=pltpu.MemorySpace.VMEM),
    )(x2d, add2d, hp, hpt,
      w("sa_qkv_w"), params["sa_qkv_b"],
      w("sa_o_w"), params["sa_o_b"],
      w("ca_q_w"), params["ca_q_b"],
      w("ca_kv_w"), params["ca_kv_b"],
      w("ca_o_w"), params["ca_o_b"],
      w("ffn_w1"), params["ffn_b1"], w("ffn_w2"), params["ffn_b2"],
      params["ln_g"], params["ln_b"],
      w("fc_w_pad"), params["fc_b_pad"])

    out = out2d[:, :OUT_DIM]                          # drop the lane padding
    # row order a0*A1 + a1 already matches torch's .view(-1, C, H, W)
    return out.reshape(A0 * A1, NUM_CH, IMAGE_SIZE, IMAGE_SIZE)


# ------------------------------ main -------------------------------------------
if __name__ == "__main__":
    key = jax.random.PRNGKey(0)
    pkey, xkey, lkey = jax.random.split(key, 3)

    params = init_params(pkey)

    A0, A1 = 2, 8                                     # x shape as fed to the module
    x = jax.random.normal(xkey, (A0, A1, LATENT_DIM), jnp.float32)
    t = jnp.zeros((A0,), jnp.int32)                   # parity arg, unused in forward
    labels = jax.random.randint(lkey, (A0,), 0, NUM_CLASSES)

    fwd = jax.jit(conditional_transformer_forward)
    out = fwd(params, x, t, labels)
    jax.block_until_ready(out)

    assert out.shape == (A0 * A1, NUM_CH, IMAGE_SIZE, IMAGE_SIZE), out.shape
    assert out.dtype == jnp.float32
    print("KERNEL_OK")
</pallas_src>

<mosaic_0001>
module attributes {stable_mosaic.version = 11 : i64} {
  func.func @_fused_kernel(%arg0: memref<16x32xf32, #tpu.memory_space<vmem>>, %arg1: memref<16x32xf32, #tpu.memory_space<vmem>>, %arg2: memref<32x8xbf16, #tpu.memory_space<vmem>>, %arg3: memref<8x32xbf16, #tpu.memory_space<vmem>>, %arg4: memref<6x32x96xbf16, #tpu.memory_space<vmem>>, %arg5: memref<6x1x96xf32, #tpu.memory_space<vmem>>, %arg6: memref<6x32x32xbf16, #tpu.memory_space<vmem>>, %arg7: memref<6x1x32xf32, #tpu.memory_space<vmem>>, %arg8: memref<6x32x32xbf16, #tpu.memory_space<vmem>>, %arg9: memref<6x1x32xf32, #tpu.memory_space<vmem>>, %arg10: memref<32x384xbf16, #tpu.memory_space<vmem>>, %arg11: memref<1x384xf32, #tpu.memory_space<vmem>>, %arg12: memref<6x32x32xbf16, #tpu.memory_space<vmem>>, %arg13: memref<6x1x32xf32, #tpu.memory_space<vmem>>, %arg14: memref<6x32x256xbf16, #tpu.memory_space<vmem>>, %arg15: memref<6x1x256xf32, #tpu.memory_space<vmem>>, %arg16: memref<6x256x32xbf16, #tpu.memory_space<vmem>>, %arg17: memref<6x1x32xf32, #tpu.memory_space<vmem>>, %arg18: memref<18x1x32xf32, #tpu.memory_space<vmem>>, %arg19: memref<18x1x32xf32, #tpu.memory_space<vmem>>, %arg20: memref<32x256xbf16, #tpu.memory_space<vmem>>, %arg21: memref<1x256xf32, #tpu.memory_space<vmem>>, %arg22: memref<16x256xf32, #tpu.memory_space<vmem>>) attributes {dimension_semantics = [], scalar_prefetch = 0 : i64, scratch_operands = 0 : i64, tpu.core_type = #tpu.core_type<tc>} {
    %c0 = arith.constant 0 : index
    %c0_0 = arith.constant 0 : index
    %0 = vector.load %arg2[%c0, %c0_0] : memref<32x8xbf16, #tpu.memory_space<vmem>>, vector<32x8xbf16>
    %c0_1 = arith.constant 0 : index
    %c0_2 = arith.constant 0 : index
    %1 = vector.load %arg3[%c0_1, %c0_2] : memref<8x32xbf16, #tpu.memory_space<vmem>>, vector<8x32xbf16>
    %c0_3 = arith.constant 0 : index
    %c0_4 = arith.constant 0 : index
    %2 = vector.load %arg0[%c0_3, %c0_4] : memref<16x32xf32, #tpu.memory_space<vmem>>, vector<16x32xf32>
    %c0_5 = arith.constant 0 : index
    %c0_6 = arith.constant 0 : index
    %3 = vector.load %arg1[%c0_5, %c0_6] : memref<16x32xf32, #tpu.memory_space<vmem>>, vector<16x32xf32>
    %4 = arith.addf %2, %3 : vector<16x32xf32>
    %c0_7 = arith.constant 0 : index
    %c0_8 = arith.constant 0 : index
    %5 = vector.load %arg10[%c0_7, %c0_8] : memref<32x384xbf16, #tpu.memory_space<vmem>>, vector<32x384xbf16>
    %6 = arith.truncf %4 : vector<16x32xf32> to vector<16x32xbf16>
    %cst = arith.constant dense<0.000000e+00> : vector<16x384xf32>
    %7 = tpu.matmul %6, %5, %cst {dimension_numbers = #tpu.dot_dimension_numbers<[1], [0], [0], [1], [0, 0, 1, 1], [], []>} : vector<16x32xbf16>, vector<32x384xbf16>, vector<16x384xf32> -> vector<16x384xf32>
    %c0_9 = arith.constant 0 : index
    %c0_10 = arith.constant 0 : index
    %8 = vector.load %arg11[%c0_9, %c0_10] : memref<1x384xf32, #tpu.memory_space<vmem>>, vector<1x384xf32>
    %9 = vector.broadcast %8 : vector<1x384xf32> to vector<16x384xf32>
    %10 = arith.addf %7, %9 : vector<16x384xf32>
    %c0_11 = arith.constant 0 : index
    %c0_12 = arith.constant 0 : index
    %c0_13 = arith.constant 0 : index
    %11 = vector.load %arg4[%c0_11, %c0_12, %c0_13] : memref<6x32x96xbf16, #tpu.memory_space<vmem>>, vector<1x32x96xbf16>
    %12 = vector.shape_cast %11 : vector<1x32x96xbf16> to vector<32x96xbf16>
    %13 = arith.truncf %4 : vector<16x32xf32> to vector<16x32xbf16>
    %cst_14 = arith.constant dense<0.000000e+00> : vector<16x96xf32>
    %14 = tpu.matmul %13, %12, %cst_14 {dimension_numbers = #tpu.dot_dimension_numbers<[1], [0], [0], [1], [0, 0, 1, 1], [], []>} : vector<16x32xbf16>, vector<32x96xbf16>, vector<16x96xf32> -> vector<16x96xf32>
    %c0_15 = arith.constant 0 : index
    %c0_16 = arith.constant 0 : index
    %c0_17 = arith.constant 0 : index
    %15 = vector.load %arg5[%c0_15, %c0_16, %c0_17] : memref<6x1x96xf32, #tpu.memory_space<vmem>>, vector<1x1x96xf32>
    %16 = vector.shape_cast %15 : vector<1x1x96xf32> to vector<1x96xf32>
    %17 = vector.broadcast %16 : vector<1x96xf32> to vector<16x96xf32>
    %18 = arith.addf %14, %17 : vector<16x96xf32>
    %19 = vector.extract_strided_slice %18 {offsets = [0, 0], sizes = [16, 32], strides = [1, 1]} : vector<16x96xf32> to vector<16x32xf32>
    %20 = vector.extract_strided_slice %18 {offsets = [0, 32], sizes = [16, 32], strides = [1, 1]} : vector<16x96xf32> to vector<16x32xf32>
    %21 = vector.extract_strided_slice %18 {offsets = [0, 64], sizes = [16, 32], strides = [1, 1]} : vector<16x96xf32> to vector<16x32xf32>
    %22 = vector.shape_cast %19 : vector<16x32xf32> to vector<2x1x8x32xf32>
    %23 = vector.shape_cast %20 : vector<16x32xf32> to vector<1x2x8x32xf32>
    %24 = vector.shape_cast %21 : vector<16x32xf32> to vector<2x8x32xf32>
    %25 = vector.broadcast %22 : vector<2x1x8x32xf32> to vector<2x2x8x32xf32>
    %26 = vector.broadcast %23 : vector<1x2x8x32xf32> to vector<2x2x8x32xf32>
    %27 = arith.mulf %25, %26 : vector<2x2x8x32xf32>
    %28 = vector.shape_cast %27 : vector<2x2x8x32xf32> to vector<32x32xf32>
    %29 = arith.truncf %28 : vector<32x32xf32> to vector<32x32xbf16>
    %cst_18 = arith.constant dense<0.000000e+00> : vector<32x8xf32>
    %30 = tpu.matmul %29, %0, %cst_18 {dimension_numbers = #tpu.dot_dimension_numbers<[1], [0], [0], [1], [0, 0, 1, 1], [], []>} : vector<32x32xbf16>, vector<32x8xbf16>, vector<32x8xf32> -> vector<32x8xf32>
    %31 = vector.shape_cast %30 : vector<32x8xf32> to vector<2x2x8x8xf32>
    %32 = vector.extract_strided_slice %31 {offsets = [0, 0, 0, 0], sizes = [2, 1, 8, 8], strides = [1, 1, 1, 1]} : vector<2x2x8x8xf32> to vector<2x1x8x8xf32>
    %33 = vector.extract_strided_slice %31 {offsets = [0, 1, 0, 0], sizes = [2, 1, 8, 8], strides = [1, 1, 1, 1]} : vector<2x2x8x8xf32> to vector<2x1x8x8xf32>
    %34 = arith.maximumf %32, %33 : vector<2x1x8x8xf32>
    %35 = vector.broadcast %34 : vector<2x1x8x8xf32> to vector<2x2x8x8xf32>
    %36 = arith.subf %31, %35 : vector<2x2x8x8xf32>
    %37 = math.exp %36 : vector<2x2x8x8xf32>
    %38 = vector.extract_strided_slice %37 {offsets = [0, 0, 0, 0], sizes = [2, 1, 8, 8], strides = [1, 1, 1, 1]} : vector<2x2x8x8xf32> to vector<2x1x8x8xf32>
    %39 = vector.extract_strided_slice %37 {offsets = [0, 1, 0, 0], sizes = [2, 1, 8, 8], strides = [1, 1, 1, 1]} : vector<2x2x8x8xf32> to vector<2x1x8x8xf32>
    %40 = arith.addf %38, %39 : vector<2x1x8x8xf32>
    %41 = tpu.reciprocal %40 {approx = true} : vector<2x1x8x8xf32> -> vector<2x1x8x8xf32>
    %42 = vector.broadcast %41 : vector<2x1x8x8xf32> to vector<2x2x8x8xf32>
    %43 = arith.mulf %37, %42 : vector<2x2x8x8xf32>
    %44 = vector.shape_cast %43 : vector<2x2x8x8xf32> to vector<32x8xf32>
    %45 = arith.truncf %44 : vector<32x8xf32> to vector<32x8xbf16>
    %cst_19 = arith.constant dense<0.000000e+00> : vector<32x32xf32>
    %46 = tpu.matmul %45, %1, %cst_19 {dimension_numbers = #tpu.dot_dimension_numbers<[1], [0], [0], [1], [0, 0, 1, 1], [], []>} : vector<32x8xbf16>, vector<8x32xbf16>, vector<32x32xf32> -> vector<32x32xf32>
    %47 = vector.shape_cast %46 : vector<32x32xf32> to vector<2x2x8x32xf32>
    %48 = vector.extract_strided_slice %47 {offsets = [0, 0, 0, 0], sizes = [2, 1, 8, 32], strides = [1, 1, 1, 1]} : vector<2x2x8x32xf32> to vector<2x1x8x32xf32>
    %49 = vector.shape_cast %48 : vector<2x1x8x32xf32> to vector<2x8x32xf32>
    %50 = vector.extract_strided_slice %24 {offsets = [0, 0, 0], sizes = [1, 8, 32], strides = [1, 1, 1]} : vector<2x8x32xf32> to vector<1x8x32xf32>
    %51 = vector.shape_cast %50 : vector<1x8x32xf32> to vector<8x32xf32>
    %52 = vector.shape_cast %51 : vector<8x32xf32> to vector<1x8x32xf32>
    %53 = vector.broadcast %52 : vector<1x8x32xf32> to vector<2x8x32xf32>
    %54 = arith.mulf %49, %53 : vector<2x8x32xf32>
    %55 = vector.extract_strided_slice %47 {offsets = [0, 1, 0, 0], sizes = [2, 1, 8, 32], strides = [1, 1, 1, 1]} : vector<2x2x8x32xf32> to vector<2x1x8x32xf32>
    %56 = vector.shape_cast %55 : vector<2x1x8x32xf32> to vector<2x8x32xf32>
    %57 = vector.extract_strided_slice %24 {offsets = [1, 0, 0], sizes = [1, 8, 32], strides = [1, 1, 1]} : vector<2x8x32xf32> to vector<1x8x32xf32>
    %58 = vector.shape_cast %57 : vector<1x8x32xf32> to vector<8x32xf32>
    %59 = vector.shape_cast %58 : vector<8x32xf32> to vector<1x8x32xf32>
    %60 = vector.broadcast %59 : vector<1x8x32xf32> to vector<2x8x32xf32>
    %61 = arith.mulf %56, %60 : vector<2x8x32xf32>
    %62 = arith.addf %54, %61 : vector<2x8x32xf32>
    %63 = vector.shape_cast %62 : vector<2x8x32xf32> to vector<16x32xf32>
    %c0_20 = arith.constant 0 : index
    %c0_21 = arith.constant 0 : index
    %c0_22 = arith.constant 0 : index
    %64 = vector.load %arg6[%c0_20, %c0_21, %c0_22] : memref<6x32x32xbf16, #tpu.memory_space<vmem>>, vector<1x32x32xbf16>
    %65 = vector.shape_cast %64 : vector<1x32x32xbf16> to vector<32x32xbf16>
    %66 = arith.truncf %63 : vector<16x32xf32> to vector<16x32xbf16>
    %cst_23 = arith.constant dense<0.000000e+00> : vector<16x32xf32>
    %67 = tpu.matmul %66, %65, %cst_23 {dimension_numbers = #tpu.dot_dimension_numbers<[1], [0], [0], [1], [0, 0, 1, 1], [], []>} : vector<16x32xbf16>, vector<32x32xbf16>, vector<16x32xf32> -> vector<16x32xf32>
    %c0_24 = arith.constant 0 : index
    %c0_25 = arith.constant 0 : index
    %c0_26 = arith.constant 0 : index
    %68 = vector.load %arg7[%c0_24, %c0_25, %c0_26] : memref<6x1x32xf32, #tpu.memory_space<vmem>>, vector<1x1x32xf32>
    %69 = vector.shape_cast %68 : vector<1x1x32xf32> to vector<1x32xf32>
    %70 = vector.broadcast %69 : vector<1x32xf32> to vector<16x32xf32>
    %71 = arith.addf %67, %70 : vector<16x32xf32>
    %72 = arith.addf %4, %71 : vector<16x32xf32>
    %c0_27 = arith.constant 0 : index
    %c0_28 = arith.constant 0 : index
    %c0_29 = arith.constant 0 : index
    %73 = vector.load %arg18[%c0_27, %c0_28, %c0_29] : memref<18x1x32xf32, #tpu.memory_space<vmem>>, vector<1x1x32xf32>
    %74 = vector.shape_cast %73 : vector<1x1x32xf32> to vector<1x32xf32>
    %c0_30 = arith.constant 0 : index
    %c0_31 = arith.constant 0 : index
    %c0_32 = arith.constant 0 : index
    %75 = vector.load %arg19[%c0_30, %c0_31, %c0_32] : memref<18x1x32xf32, #tpu.memory_space<vmem>>, vector<1x1x32xf32>
    %76 = vector.shape_cast %75 : vector<1x1x32xf32> to vector<1x32xf32>
    %cst_33 = arith.constant dense<0.000000e+00> : vector<16xf32>
    %77 = vector.multi_reduction <add>, %72, %cst_33 [1] : vector<16x32xf32> to vector<16xf32>
    %78 = vector.shape_cast %77 : vector<16xf32> to vector<16x1xf32>
    %cst_34 = arith.constant 3.200000e+01 : f32
    %79 = vector.broadcast %cst_34 : f32 to vector<16x1xf32>
    %80 = arith.divf %78, %79 : vector<16x1xf32>
    %81 = vector.broadcast %80 : vector<16x1xf32> to vector<16x32xf32>
    %82 = arith.subf %72, %81 : vector<16x32xf32>
    %83 = arith.mulf %82, %82 : vector<16x32xf32>
    %cst_35 = arith.constant dense<0.000000e+00> : vector<16xf32>
    %84 = vector.multi_reduction <add>, %83, %cst_35 [1] : vector<16x32xf32> to vector<16xf32>
    %85 = vector.shape_cast %84 : vector<16xf32> to vector<16x1xf32>
    %cst_36 = arith.constant 3.200000e+01 : f32
    %86 = vector.broadcast %cst_36 : f32 to vector<16x1xf32>
    %87 = arith.divf %85, %86 : vector<16x1xf32>
    %cst_37 = arith.constant 9.99999974E-6 : f32
    %88 = vector.broadcast %cst_37 : f32 to vector<16x1xf32>
    %89 = arith.addf %87, %88 : vector<16x1xf32>
    %90 = math.rsqrt %89 : vector<16x1xf32>
    %91 = vector.broadcast %90 : vector<16x1xf32> to vector<16x32xf32>
    %92 = arith.mulf %82, %91 : vector<16x32xf32>
    %93 = vector.broadcast %74 : vector<1x32xf32> to vector<16x32xf32>
    %94 = arith.mulf %92, %93 : vector<16x32xf32>
    %95 = vector.broadcast %76 : vector<1x32xf32> to vector<16x32xf32>
    %96 = arith.addf %94, %95 : vector<16x32xf32>
    %c0_38 = arith.constant 0 : index
    %c0_39 = arith.constant 0 : index
    %c0_40 = arith.constant 0 : index
    %97 = vector.load %arg8[%c0_38, %c0_39, %c0_40] : memref<6x32x32xbf16, #tpu.memory_space<vmem>>, vector<1x32x32xbf16>
    %98 = vector.shape_cast %97 : vector<1x32x32xbf16> to vector<32x32xbf16>
    %99 = arith.truncf %96 : vector<16x32xf32> to vector<16x32xbf16>
    %cst_41 = arith.constant dense<0.000000e+00> : vector<16x32xf32>
    %100 = tpu.matmul %99, %98, %cst_41 {dimension_numbers = #tpu.dot_dimension_numbers<[1], [0], [0], [1], [0, 0, 1, 1], [], []>} : vector<16x32xbf16>, vector<32x32xbf16>, vector<16x32xf32> -> vector<16x32xf32>
    %c0_42 = arith.constant 0 : index
    %c0_43 = arith.constant 0 : index
    %c0_44 = arith.constant 0 : index
    %101 = vector.load %arg9[%c0_42, %c0_43, %c0_44] : memref<6x1x32xf32, #tpu.memory_space<vmem>>, vector<1x1x32xf32>
    %102 = vector.shape_cast %101 : vector<1x1x32xf32> to vector<1x32xf32>
    %103 = vector.broadcast %102 : vector<1x32xf32> to vector<16x32xf32>
    %104 = arith.addf %100, %103 : vector<16x32xf32>
    %105 = vector.extract_strided_slice %10 {offsets = [0, 0], sizes = [16, 32], strides = [1, 1]} : vector<16x384xf32> to vector<16x32xf32>
    %106 = vector.extract_strided_slice %10 {offsets = [0, 32], sizes = [16, 32], strides = [1, 1]} : vector<16x384xf32> to vector<16x32xf32>
    %107 = vector.shape_cast %104 : vector<16x32xf32> to vector<2x1x8x32xf32>
    %108 = vector.shape_cast %105 : vector<16x32xf32> to vector<1x2x8x32xf32>
    %109 = vector.shape_cast %106 : vector<16x32xf32> to vector<2x8x32xf32>
    %110 = vector.broadcast %107 : vector<2x1x8x32xf32> to vector<2x2x8x32xf32>
    %111 = vector.broadcast %108 : vector<1x2x8x32xf32> to vector<2x2x8x32xf32>
    %112 = arith.mulf %110, %111 : vector<2x2x8x32xf32>
    %113 = vector.shape_cast %112 : vector<2x2x8x32xf32> to vector<32x32xf32>
    %114 = arith.truncf %113 : vector<32x32xf32> to vector<32x32xbf16>
    %cst_45 = arith.constant dense<0.000000e+00> : vector<32x8xf32>
    %115 = tpu.matmul %114, %0, %cst_45 {dimension_numbers = #tpu.dot_dimension_numbers<[1], [0], [0], [1], [0, 0, 1, 1], [], []>} : vector<32x32xbf16>, vector<32x8xbf16>, vector<32x8xf32> -> vector<32x8xf32>
    %116 = vector.shape_cast %115 : vector<32x8xf32> to vector<2x2x8x8xf32>
    %117 = vector.extract_strided_slice %116 {offsets = [0, 0, 0, 0], sizes = [2, 1, 8, 8], strides = [1, 1, 1, 1]} : vector<2x2x8x8xf32> to vector<2x1x8x8xf32>
    %118 = vector.extract_strided_slice %116 {offsets = [0, 1, 0, 0], sizes = [2, 1, 8, 8], strides = [1, 1, 1, 1]} : vector<2x2x8x8xf32> to vector<2x1x8x8xf32>
    %119 = arith.maximumf %117, %118 : vector<2x1x8x8xf32>
    %120 = vector.broadcast %119 : vector<2x1x8x8xf32> to vector<2x2x8x8xf32>
    %121 = arith.subf %116, %120 : vector<2x2x8x8xf32>
    %122 = math.exp %121 : vector<2x2x8x8xf32>
    %123 = vector.extract_strided_slice %122 {offsets = [0, 0, 0, 0], sizes = [2, 1, 8, 8], strides = [1, 1, 1, 1]} : vector<2x2x8x8xf32> to vector<2x1x8x8xf32>
    %124 = vector.extract_strided_slice %122 {offsets = [0, 1, 0, 0], sizes = [2, 1, 8, 8], strides = [1, 1, 1, 1]} : vector<2x2x8x8xf32> to vector<2x1x8x8xf32>
    %125 = arith.addf %123, %124 : vector<2x1x8x8xf32>
    %126 = tpu.reciprocal %125 {approx = true} : vector<2x1x8x8xf32> -> vector<2x1x8x8xf32>
    %127 = vector.broadcast %126 : vector<2x1x8x8xf32> to vector<2x2x8x8xf32>
    %128 = arith.mulf %122, %127 : vector<2x2x8x8xf32>
    %129 = vector.shape_cast %128 : vector<2x2x8x8xf32> to vector<32x8xf32>
    %130 = arith.truncf %129 : vector<32x8xf32> to vector<32x8xbf16>
    %cst_46 = arith.constant dense<0.000000e+00> : vector<32x32xf32>
    %131 = tpu.matmul %130, %1, %cst_46 {dimension_numbers = #tpu.dot_dimension_numbers<[1], [0], [0], [1], [0, 0, 1, 1], [], []>} : vector<32x8xbf16>, vector<8x32xbf16>, vector<32x32xf32> -> vector<32x32xf32>
    %132 = vector.shape_cast %131 : vector<32x32xf32> to vector<2x2x8x32xf32>
    %133 = vector.extract_strided_slice %132 {offsets = [0, 0, 0, 0], sizes = [2, 1, 8, 32], strides = [1, 1, 1, 1]} : vector<2x2x8x32xf32> to vector<2x1x8x32xf32>
    %134 = vector.shape_cast %133 : vector<2x1x8x32xf32> to vector<2x8x32xf32>
    %135 = vector.extract_strided_slice %109 {offsets = [0, 0, 0], sizes = [1, 8, 32], strides = [1, 1, 1]} : vector<2x8x32xf32> to vector<1x8x32xf32>
    %136 = vector.shape_cast %135 : vector<1x8x32xf32> to vector<8x32xf32>
    %137 = vector.shape_cast %136 : vector<8x32xf32> to vector<1x8x32xf32>
    %138 = vector.broadcast %137 : vector<1x8x32xf32> to vector<2x8x32xf32>
    %139 = arith.mulf %134, %138 : vector<2x8x32xf32>
    %140 = vector.extract_strided_slice %132 {offsets = [0, 1, 0, 0], sizes = [2, 1, 8, 32], strides = [1, 1, 1, 1]} : vector<2x2x8x32xf32> to vector<2x1x8x32xf32>
    %141 = vector.shape_cast %140 : vector<2x1x8x32xf32> to vector<2x8x32xf32>
    %142 = vector.extract_strided_slice %109 {offsets = [1, 0, 0], sizes = [1, 8, 32], strides = [1, 1, 1]} : vector<2x8x32xf32> to vector<1x8x32xf32>
    %143 = vector.shape_cast %142 : vector<1x8x32xf32> to vector<8x32xf32>
    %144 = vector.shape_cast %143 : vector<8x32xf32> to vector<1x8x32xf32>
    %145 = vector.broadcast %144 : vector<1x8x32xf32> to vector<2x8x32xf32>
    %146 = arith.mulf %141, %145 : vector<2x8x32xf32>
    %147 = arith.addf %139, %146 : vector<2x8x32xf32>
    %148 = vector.shape_cast %147 : vector<2x8x32xf32> to vector<16x32xf32>
    %c0_47 = arith.constant 0 : index
    %c0_48 = arith.constant 0 : index
    %c0_49 = arith.constant 0 : index
    %149 = vector.load %arg12[%c0_47, %c0_48, %c0_49] : memref<6x32x32xbf16, #tpu.memory_space<vmem>>, vector<1x32x32xbf16>
    %150 = vector.shape_cast %149 : vector<1x32x32xbf16> to vector<32x32xbf16>
    %151 = arith.truncf %148 : vector<16x32xf32> to vector<16x32xbf16>
    %cst_50 = arith.constant dense<0.000000e+00> : vector<16x32xf32>
    %152 = tpu.matmul %151, %150, %cst_50 {dimension_numbers = #tpu.dot_dimension_numbers<[1], [0], [0], [1], [0, 0, 1, 1], [], []>} : vector<16x32xbf16>, vector<32x32xbf16>, vector<16x32xf32> -> vector<16x32xf32>
    %c0_51 = arith.constant 0 : index
    %c0_52 = arith.constant 0 : index
    %c0_53 = arith.constant 0 : index
    %153 = vector.load %arg13[%c0_51, %c0_52, %c0_53] : memref<6x1x32xf32, #tpu.memory_space<vmem>>, vector<1x1x32xf32>
    %154 = vector.shape_cast %153 : vector<1x1x32xf32> to vector<1x32xf32>
    %155 = vector.broadcast %154 : vector<1x32xf32> to vector<16x32xf32>
    %156 = arith.addf %152, %155 : vector<16x32xf32>
    %157 = arith.addf %96, %156 : vector<16x32xf32>
    %c1 = arith.constant 1 : index
    %c0_54 = arith.constant 0 : index
    %c0_55 = arith.constant 0 : index
    %158 = vector.load %arg18[%c1, %c0_54, %c0_55] : memref<18x1x32xf32, #tpu.memory_space<vmem>>, vector<1x1x32xf32>
    %159 = vector.shape_cast %158 : vector<1x1x32xf32> to vector<1x32xf32>
    %c1_56 = arith.constant 1 : index
    %c0_57 = arith.constant 0 : index
    %c0_58 = arith.constant 0 : index
    %160 = vector.load %arg19[%c1_56, %c0_57, %c0_58] : memref<18x1x32xf32, #tpu.memory_space<vmem>>, vector<1x1x32xf32>
    %161 = vector.shape_cast %160 : vector<1x1x32xf32> to vector<1x32xf32>
    %cst_59 = arith.constant dense<0.000000e+00> : vector<16xf32>
    %162 = vector.multi_reduction <add>, %157, %cst_59 [1] : vector<16x32xf32> to vector<16xf32>
    %163 = vector.shape_cast %162 : vector<16xf32> to vector<16x1xf32>
    %cst_60 = arith.constant 3.200000e+01 : f32
    %164 = vector.broadcast %cst_60 : f32 to vector<16x1xf32>
    %165 = arith.divf %163, %164 : vector<16x1xf32>
    %166 = vector.broadcast %165 : vector<16x1xf32> to vector<16x32xf32>
    %167 = arith.subf %157, %166 : vector<16x32xf32>
    %168 = arith.mulf %167, %167 : vector<16x32xf32>
    %cst_61 = arith.constant dense<0.000000e+00> : vector<16xf32>
    %169 = vector.multi_reduction <add>, %168, %cst_61 [1] : vector<16x32xf32> to vector<16xf32>
    %170 = vector.shape_cast %169 : vector<16xf32> to vector<16x1xf32>
    %cst_62 = arith.constant 3.200000e+01 : f32
    %171 = vector.broadcast %cst_62 : f32 to vector<16x1xf32>
    %172 = arith.divf %170, %171 : vector<16x1xf32>
    %cst_63 = arith.constant 9.99999974E-6 : f32
    %173 = vector.broadcast %cst_63 : f32 to vector<16x1xf32>
    %174 = arith.addf %172, %173 : vector<16x1xf32>
    %175 = math.rsqrt %174 : vector<16x1xf32>
    %176 = vector.broadcast %175 : vector<16x1xf32> to vector<16x32xf32>
    %177 = arith.mulf %167, %176 : vector<16x32xf32>
    %178 = vector.broadcast %159 : vector<1x32xf32> to vector<16x32xf32>
    %179 = arith.mulf %177, %178 : vector<16x32xf32>
    %180 = vector.broadcast %161 : vector<1x32xf32> to vector<16x32xf32>
    %181 = arith.addf %179, %180 : vector<16x32xf32>
    %c0_64 = arith.constant 0 : index
    %c0_65 = arith.constant 0 : index
    %c0_66 = arith.constant 0 : index
    %182 = vector.load %arg14[%c0_64, %c0_65, %c0_66] : memref<6x32x256xbf16, #tpu.memory_space<vmem>>, vector<1x32x256xbf16>
    %183 = vector.shape_cast %182 : vector<1x32x256xbf16> to vector<32x256xbf16>
    %184 = arith.truncf %181 : vector<16x32xf32> to vector<16x32xbf16>
    %cst_67 = arith.constant dense<0.000000e+00> : vector<16x256xf32>
    %185 = tpu.matmul %184, %183, %cst_67 {dimension_numbers = #tpu.dot_dimension_numbers<[1], [0], [0], [1], [0, 0, 1, 1], [], []>} : vector<16x32xbf16>, vector<32x256xbf16>, vector<16x256xf32> -> vector<16x256xf32>
    %c0_68 = arith.constant 0 : index
    %c0_69 = arith.constant 0 : index
    %c0_70 = arith.constant 0 : index
    %186 = vector.load %arg15[%c0_68, %c0_69, %c0_70] : memref<6x1x256xf32, #tpu.memory_space<vmem>>, vector<1x1x256xf32>
    %187 = vector.shape_cast %186 : vector<1x1x256xf32> to vector<1x256xf32>
    %188 = vector.broadcast %187 : vector<1x256xf32> to vector<16x256xf32>
    %189 = arith.addf %185, %188 : vector<16x256xf32>
    %cst_71 = arith.constant 0.000000e+00 : f32
    %190 = vector.broadcast %cst_71 : f32 to vector<16x256xf32>
    %191 = arith.maximumf %189, %190 : vector<16x256xf32>
    %c0_72 = arith.constant 0 : index
    %c0_73 = arith.constant 0 : index
    %c0_74 = arith.constant 0 : index
    %192 = vector.load %arg16[%c0_72, %c0_73, %c0_74] : memref<6x256x32xbf16, #tpu.memory_space<vmem>>, vector<1x256x32xbf16>
    %193 = vector.shape_cast %192 : vector<1x256x32xbf16> to vector<256x32xbf16>
    %194 = arith.truncf %191 : vector<16x256xf32> to vector<16x256xbf16>
    %cst_75 = arith.constant dense<0.000000e+00> : vector<16x32xf32>
    %195 = tpu.matmul %194, %193, %cst_75 {dimension_numbers = #tpu.dot_dimension_numbers<[1], [0], [0], [1], [0, 0, 1, 1], [], []>} : vector<16x256xbf16>, vector<256x32xbf16>, vector<16x32xf32> -> vector<16x32xf32>
    %c0_76 = arith.constant 0 : index
    %c0_77 = arith.constant 0 : index
    %c0_78 = arith.constant 0 : index
    %196 = vector.load %arg17[%c0_76, %c0_77, %c0_78] : memref<6x1x32xf32, #tpu.memory_space<vmem>>, vector<1x1x32xf32>
    %197 = vector.shape_cast %196 : vector<1x1x32xf32> to vector<1x32xf32>
    %198 = vector.broadcast %197 : vector<1x32xf32> to vector<16x32xf32>
    %199 = arith.addf %195, %198 : vector<16x32xf32>
    %200 = arith.addf %181, %199 : vector<16x32xf32>
    %c2 = arith.constant 2 : index
    %c0_79 = arith.constant 0 : index
    %c0_80 = arith.constant 0 : index
    %201 = vector.load %arg18[%c2, %c0_79, %c0_80] : memref<18x1x32xf32, #tpu.memory_space<vmem>>, vector<1x1x32xf32>
    %202 = vector.shape_cast %201 : vector<1x1x32xf32> to vector<1x32xf32>
    %c2_81 = arith.constant 2 : index
    %c0_82 = arith.constant 0 : index
    %c0_83 = arith.constant 0 : index
    %203 = vector.load %arg19[%c2_81, %c0_82, %c0_83] : memref<18x1x32xf32, #tpu.memory_space<vmem>>, vector<1x1x32xf32>
    %204 = vector.shape_cast %203 : vector<1x1x32xf32> to vector<1x32xf32>
    %cst_84 = arith.constant dense<0.000000e+00> : vector<16xf32>
    %205 = vector.multi_reduction <add>, %200, %cst_84 [1] : vector<16x32xf32> to vector<16xf32>
    %206 = vector.shape_cast %205 : vector<16xf32> to vector<16x1xf32>
    %cst_85 = arith.constant 3.200000e+01 : f32
    %207 = vector.broadcast %cst_85 : f32 to vector<16x1xf32>
    %208 = arith.divf %206, %207 : vector<16x1xf32>
    %209 = vector.broadcast %208 : vector<16x1xf32> to vector<16x32xf32>
    %210 = arith.subf %200, %209 : vector<16x32xf32>
    %211 = arith.mulf %210, %210 : vector<16x32xf32>
    %cst_86 = arith.constant dense<0.000000e+00> : vector<16xf32>
    %212 = vector.multi_reduction <add>, %211, %cst_86 [1] : vector<16x32xf32> to vector<16xf32>
    %213 = vector.shape_cast %212 : vector<16xf32> to vector<16x1xf32>
    %cst_87 = arith.constant 3.200000e+01 : f32
    %214 = vector.broadcast %cst_87 : f32 to vector<16x1xf32>
    %215 = arith.divf %213, %214 : vector<16x1xf32>
    %cst_88 = arith.constant 9.99999974E-6 : f32
    %216 = vector.broadcast %cst_88 : f32 to vector<16x1xf32>
    %217 = arith.addf %215, %216 : vector<16x1xf32>
    %218 = math.rsqrt %217 : vector<16x1xf32>
    %219 = vector.broadcast %218 : vector<16x1xf32> to vector<16x32xf32>
    %220 = arith.mulf %210, %219 : vector<16x32xf32>
    %221 = vector.broadcast %202 : vector<1x32xf32> to vector<16x32xf32>
    %222 = arith.mulf %220, %221 : vector<16x32xf32>
    %223 = vector.broadcast %204 : vector<1x32xf32> to vector<16x32xf32>
    %224 = arith.addf %222, %223 : vector<16x32xf32>
    %c1_89 = arith.constant 1 : index
    %c0_90 = arith.constant 0 : index
    %c0_91 = arith.constant 0 : index
    %225 = vector.load %arg4[%c1_89, %c0_90, %c0_91] : memref<6x32x96xbf16, #tpu.memory_space<vmem>>, vector<1x32x96xbf16>
    %226 = vector.shape_cast %225 : vector<1x32x96xbf16> to vector<32x96xbf16>
    %227 = arith.truncf %224 : vector<16x32xf32> to vector<16x32xbf16>
    %cst_92 = arith.constant dense<0.000000e+00> : vector<16x96xf32>
    %228 = tpu.matmul %227, %226, %cst_92 {dimension_numbers = #tpu.dot_dimension_numbers<[1], [0], [0], [1], [0, 0, 1, 1], [], []>} : vector<16x32xbf16>, vector<32x96xbf16>, vector<16x96xf32> -> vector<16x96xf32>
    %c1_93 = arith.constant 1 : index
    %c0_94 = arith.constant 0 : index
    %c0_95 = arith.constant 0 : index
    %229 = vector.load %arg5[%c1_93, %c0_94, %c0_95] : memref<6x1x96xf32, #tpu.memory_space<vmem>>, vector<1x1x96xf32>
    %230 = vector.shape_cast %229 : vector<1x1x96xf32> to vector<1x96xf32>
    %231 = vector.broadcast %230 : vector<1x96xf32> to vector<16x96xf32>
    %232 = arith.addf %228, %231 : vector<16x96xf32>
    %233 = vector.extract_strided_slice %232 {offsets = [0, 0], sizes = [16, 32], strides = [1, 1]} : vector<16x96xf32> to vector<16x32xf32>
    %234 = vector.extract_strided_slice %232 {offsets = [0, 32], sizes = [16, 32], strides = [1, 1]} : vector<16x96xf32> to vector<16x32xf32>
    %235 = vector.extract_strided_slice %232 {offsets = [0, 64], sizes = [16, 32], strides = [1, 1]} : vector<16x96xf32> to vector<16x32xf32>
    %236 = vector.shape_cast %233 : vector<16x32xf32> to vector<2x1x8x32xf32>
    %237 = vector.shape_cast %234 : vector<16x32xf32> to vector<1x2x8x32xf32>
    %238 = vector.shape_cast %235 : vector<16x32xf32> to vector<2x8x32xf32>
    %239 = vector.broadcast %236 : vector<2x1x8x32xf32> to vector<2x2x8x32xf32>
    %240 = vector.broadcast %237 : vector<1x2x8x32xf32> to vector<2x2x8x32xf32>
    %241 = arith.mulf %239, %240 : vector<2x2x8x32xf32>
    %242 = vector.shape_cast %241 : vector<2x2x8x32xf32> to vector<32x32xf32>
    %243 = arith.truncf %242 : vector<32x32xf32> to vector<32x32xbf16>
    %cst_96 = arith.constant dense<0.000000e+00> : vector<32x8xf32>
    %244 = tpu.matmul %243, %0, %cst_96 {dimension_numbers = #tpu.dot_dimension_numbers<[1], [0], [0], [1], [0, 0, 1, 1], [], []>} : vector<32x32xbf16>, vector<32x8xbf16>, vector<32x8xf32> -> vector<32x8xf32>
    %245 = vector.shape_cast %244 : vector<32x8xf32> to vector<2x2x8x8xf32>
    %246 = vector.extract_strided_slice %245 {offsets = [0, 0, 0, 0], sizes = [2, 1, 8, 8], strides = [1, 1, 1, 1]} : vector<2x2x8x8xf32> to vector<2x1x8x8xf32>
    %247 = vector.extract_strided_slice %245 {offsets = [0, 1, 0, 0], sizes = [2, 1, 8, 8], strides = [1, 1, 1, 1]} : vector<2x2x8x8xf32> to vector<2x1x8x8xf32>
    %248 = arith.maximumf %246, %247 : vector<2x1x8x8xf32>
    %249 = vector.broadcast %248 : vector<2x1x8x8xf32> to vector<2x2x8x8xf32>
    %250 = arith.subf %245, %249 : vector<2x2x8x8xf32>
    %251 = math.exp %250 : vector<2x2x8x8xf32>
    %252 = vector.extract_strided_slice %251 {offsets = [0, 0, 0, 0], sizes = [2, 1, 8, 8], strides = [1, 1, 1, 1]} : vector<2x2x8x8xf32> to vector<2x1x8x8xf32>
    %253 = vector.extract_strided_slice %251 {offsets = [0, 1, 0, 0], sizes = [2, 1, 8, 8], strides = [1, 1, 1, 1]} : vector<2x2x8x8xf32> to vector<2x1x8x8xf32>
    %254 = arith.addf %252, %253 : vector<2x1x8x8xf32>
    %255 = tpu.reciprocal %254 {approx = true} : vector<2x1x8x8xf32> -> vector<2x1x8x8xf32>
    %256 = vector.broadcast %255 : vector<2x1x8x8xf32> to vector<2x2x8x8xf32>
    %257 = arith.mulf %251, %256 : vector<2x2x8x8xf32>
    %258 = vector.shape_cast %257 : vector<2x2x8x8xf32> to vector<32x8xf32>
    %259 = arith.truncf %258 : vector<32x8xf32> to vector<32x8xbf16>
    %cst_97 = arith.constant dense<0.000000e+00> : vector<32x32xf32>
    %260 = tpu.matmul %259, %1, %cst_97 {dimension_numbers = #tpu.dot_dimension_numbers<[1], [0], [0], [1], [0, 0, 1, 1], [], []>} : vector<32x8xbf16>, vector<8x32xbf16>, vector<32x32xf32> -> vector<32x32xf32>
    %261 = vector.shape_cast %260 : vector<32x32xf32> to vector<2x2x8x32xf32>
    %262 = vector.extract_strided_slice %261 {offsets = [0, 0, 0, 0], sizes = [2, 1, 8, 32], strides = [1, 1, 1, 1]} : vector<2x2x8x32xf32> to vector<2x1x8x32xf32>
    %263 = vector.shape_cast %262 : vector<2x1x8x32xf32> to vector<2x8x32xf32>
    %264 = vector.extract_strided_slice %238 {offsets = [0, 0, 0], sizes = [1, 8, 32], strides = [1, 1, 1]} : vector<2x8x32xf32> to vector<1x8x32xf32>
    %265 = vector.shape_cast %264 : vector<1x8x32xf32> to vector<8x32xf32>
    %266 = vector.shape_cast %265 : vector<8x32xf32> to vector<1x8x32xf32>
    %267 = vector.broadcast %266 : vector<1x8x32xf32> to vector<2x8x32xf32>
    %268 = arith.mulf %263, %267 : vector<2x8x32xf32>
    %269 = vector.extract_strided_slice %261 {offsets = [0, 1, 0, 0], sizes = [2, 1, 8, 32], strides = [1, 1, 1, 1]} : vector<2x2x8x32xf32> to vector<2x1x8x32xf32>
    %270 = vector.shape_cast %269 : vector<2x1x8x32xf32> to vector<2x8x32xf32>
    %271 = vector.extract_strided_slice %238 {offsets = [1, 0, 0], sizes = [1, 8, 32], strides = [1, 1, 1]} : vector<2x8x32xf32> to vector<1x8x32xf32>
    %272 = vector.shape_cast %271 : vector<1x8x32xf32> to vector<8x32xf32>
    %273 = vector.shape_cast %272 : vector<8x32xf32> to vector<1x8x32xf32>
    %274 = vector.broadcast %273 : vector<1x8x32xf32> to vector<2x8x32xf32>
    %275 = arith.mulf %270, %274 : vector<2x8x32xf32>
    %276 = arith.addf %268, %275 : vector<2x8x32xf32>
    %277 = vector.shape_cast %276 : vector<2x8x32xf32> to vector<16x32xf32>
    %c1_98 = arith.constant 1 : index
    %c0_99 = arith.constant 0 : index
    %c0_100 = arith.constant 0 : index
    %278 = vector.load %arg6[%c1_98, %c0_99, %c0_100] : memref<6x32x32xbf16, #tpu.memory_space<vmem>>, vector<1x32x32xbf16>
    %279 = vector.shape_cast %278 : vector<1x32x32xbf16> to vector<32x32xbf16>
    %280 = arith.truncf %277 : vector<16x32xf32> to vector<16x32xbf16>
    %cst_101 = arith.constant dense<0.000000e+00> : vector<16x32xf32>
    %281 = tpu.matmul %280, %279, %cst_101 {dimension_numbers = #tpu.dot_dimension_numbers<[1], [0], [0], [1], [0, 0, 1, 1], [], []>} : vector<16x32xbf16>, vector<32x32xbf16>, vector<16x32xf32> -> vector<16x32xf32>
    %c1_102 = arith.constant 1 : index
    %c0_103 = arith.constant 0 : index
    %c0_104 = arith.constant 0 : index
    %282 = vector.load %arg7[%c1_102, %c0_103, %c0_104] : memref<6x1x32xf32, #tpu.memory_space<vmem>>, vector<1x1x32xf32>
    %283 = vector.shape_cast %282 : vector<1x1x32xf32> to vector<1x32xf32>
    %284 = vector.broadcast %283 : vector<1x32xf32> to vector<16x32xf32>
    %285 = arith.addf %281, %284 : vector<16x32xf32>
    %286 = arith.addf %224, %285 : vector<16x32xf32>
    %c3 = arith.constant 3 : index
    %c0_105 = arith.constant 0 : index
    %c0_106 = arith.constant 0 : index
    %287 = vector.load %arg18[%c3, %c0_105, %c0_106] : memref<18x1x32xf32, #tpu.memory_space<vmem>>, vector<1x1x32xf32>
    %288 = vector.shape_cast %287 : vector<1x1x32xf32> to vector<1x32xf32>
    %c3_107 = arith.constant 3 : index
    %c0_108 = arith.constant 0 : index
    %c0_109 = arith.constant 0 : index
    %289 = vector.load %arg19[%c3_107, %c0_108, %c0_109] : memref<18x1x32xf32, #tpu.memory_space<vmem>>, vector<1x1x32xf32>
    %290 = vector.shape_cast %289 : vector<1x1x32xf32> to vector<1x32xf32>
    %cst_110 = arith.constant dense<0.000000e+00> : vector<16xf32>
    %291 = vector.multi_reduction <add>, %286, %cst_110 [1] : vector<16x32xf32> to vector<16xf32>
    %292 = vector.shape_cast %291 : vector<16xf32> to vector<16x1xf32>
    %cst_111 = arith.constant 3.200000e+01 : f32
    %293 = vector.broadcast %cst_111 : f32 to vector<16x1xf32>
    %294 = arith.divf %292, %293 : vector<16x1xf32>
    %295 = vector.broadcast %294 : vector<16x1xf32> to vector<16x32xf32>
    %296 = arith.subf %286, %295 : vector<16x32xf32>
    %297 = arith.mulf %296, %296 : vector<16x32xf32>
    %cst_112 = arith.constant dense<0.000000e+00> : vector<16xf32>
    %298 = vector.multi_reduction <add>, %297, %cst_112 [1] : vector<16x32xf32> to vector<16xf32>
    %299 = vector.shape_cast %298 : vector<16xf32> to vector<16x1xf32>
    %cst_113 = arith.constant 3.200000e+01 : f32
    %300 = vector.broadcast %cst_113 : f32 to vector<16x1xf32>
    %301 = arith.divf %299, %300 : vector<16x1xf32>
    %cst_114 = arith.constant 9.99999974E-6 : f32
    %302 = vector.broadcast %cst_114 : f32 to vector<16x1xf32>
    %303 = arith.addf %301, %302 : vector<16x1xf32>
    %304 = math.rsqrt %303 : vector<16x1xf32>
    %305 = vector.broadcast %304 : vector<16x1xf32> to vector<16x32xf32>
    %306 = arith.mulf %296, %305 : vector<16x32xf32>
    %307 = vector.broadcast %288 : vector<1x32xf32> to vector<16x32xf32>
    %308 = arith.mulf %306, %307 : vector<16x32xf32>
    %309 = vector.broadcast %290 : vector<1x32xf32> to vector<16x32xf32>
    %310 = arith.addf %308, %309 : vector<16x32xf32>
    %c1_115 = arith.constant 1 : index
    %c0_116 = arith.constant 0 : index
    %c0_117 = arith.constant 0 : index
    %311 = vector.load %arg8[%c1_115, %c0_116, %c0_117] : memref<6x32x32xbf16, #tpu.memory_space<vmem>>, vector<1x32x32xbf16>
    %312 = vector.shape_cast %311 : vector<1x32x32xbf16> to vector<32x32xbf16>
    %313 = arith.truncf %310 : vector<16x32xf32> to vector<16x32xbf16>
    %cst_118 = arith.constant dense<0.000000e+00> : vector<16x32xf32>
    %314 = tpu.matmul %313, %312, %cst_118 {dimension_numbers = #tpu.dot_dimension_numbers<[1], [0], [0], [1], [0, 0, 1, 1], [], []>} : vector<16x32xbf16>, vector<32x32xbf16>, vector<16x32xf32> -> vector<16x32xf32>
    %c1_119 = arith.constant 1 : index
    %c0_120 = arith.constant 0 : index
    %c0_121 = arith.constant 0 : index
    %315 = vector.load %arg9[%c1_119, %c0_120, %c0_121] : memref<6x1x32xf32, #tpu.memory_space<vmem>>, vector<1x1x32xf32>
    %316 = vector.shape_cast %315 : vector<1x1x32xf32> to vector<1x32xf32>
    %317 = vector.broadcast %316 : vector<1x32xf32> to vector<16x32xf32>
    %318 = arith.addf %314, %317 : vector<16x32xf32>
    %319 = vector.extract_strided_slice %10 {offsets = [0, 64], sizes = [16, 32], strides = [1, 1]} : vector<16x384xf32> to vector<16x32xf32>
    %320 = vector.extract_strided_slice %10 {offsets = [0, 96], sizes = [16, 32], strides = [1, 1]} : vector<16x384xf32> to vector<16x32xf32>
    %321 = vector.shape_cast %318 : vector<16x32xf32> to vector<2x1x8x32xf32>
    %322 = vector.shape_cast %319 : vector<16x32xf32> to vector<1x2x8x32xf32>
    %323 = vector.shape_cast %320 : vector<16x32xf32> to vector<2x8x32xf32>
    %324 = vector.broadcast %321 : vector<2x1x8x32xf32> to vector<2x2x8x32xf32>
    %325 = vector.broadcast %322 : vector<1x2x8x32xf32> to vector<2x2x8x32xf32>
    %326 = arith.mulf %324, %325 : vector<2x2x8x32xf32>
    %327 = vector.shape_cast %326 : vector<2x2x8x32xf32> to vector<32x32xf32>
    %328 = arith.truncf %327 : vector<32x32xf32> to vector<32x32xbf16>
    %cst_122 = arith.constant dense<0.000000e+00> : vector<32x8xf32>
    %329 = tpu.matmul %328, %0, %cst_122 {dimension_numbers = #tpu.dot_dimension_numbers<[1], [0], [0], [1], [0, 0, 1, 1], [], []>} : vector<32x32xbf16>, vector<32x8xbf16>, vector<32x8xf32> -> vector<32x8xf32>
    %330 = vector.shape_cast %329 : vector<32x8xf32> to vector<2x2x8x8xf32>
    %331 = vector.extract_strided_slice %330 {offsets = [0, 0, 0, 0], sizes = [2, 1, 8, 8], strides = [1, 1, 1, 1]} : vector<2x2x8x8xf32> to vector<2x1x8x8xf32>
    %332 = vector.extract_strided_slice %330 {offsets = [0, 1, 0, 0], sizes = [2, 1, 8, 8], strides = [1, 1, 1, 1]} : vector<2x2x8x8xf32> to vector<2x1x8x8xf32>
    %333 = arith.maximumf %331, %332 : vector<2x1x8x8xf32>
    %334 = vector.broadcast %333 : vector<2x1x8x8xf32> to vector<2x2x8x8xf32>
    %335 = arith.subf %330, %334 : vector<2x2x8x8xf32>
    %336 = math.exp %335 : vector<2x2x8x8xf32>
    %337 = vector.extract_strided_slice %336 {offsets = [0, 0, 0, 0], sizes = [2, 1, 8, 8], strides = [1, 1, 1, 1]} : vector<2x2x8x8xf32> to vector<2x1x8x8xf32>
    %338 = vector.extract_strided_slice %336 {offsets = [0, 1, 0, 0], sizes = [2, 1, 8, 8], strides = [1, 1, 1, 1]} : vector<2x2x8x8xf32> to vector<2x1x8x8xf32>
    %339 = arith.addf %337, %338 : vector<2x1x8x8xf32>
    %340 = tpu.reciprocal %339 {approx = true} : vector<2x1x8x8xf32> -> vector<2x1x8x8xf32>
    %341 = vector.broadcast %340 : vector<2x1x8x8xf32> to vector<2x2x8x8xf32>
    %342 = arith.mulf %336, %341 : vector<2x2x8x8xf32>
    %343 = vector.shape_cast %342 : vector<2x2x8x8xf32> to vector<32x8xf32>
    %344 = arith.truncf %343 : vector<32x8xf32> to vector<32x8xbf16>
    %cst_123 = arith.constant dense<0.000000e+00> : vector<32x32xf32>
    %345 = tpu.matmul %344, %1, %cst_123 {dimension_numbers = #tpu.dot_dimension_numbers<[1], [0], [0], [1], [0, 0, 1, 1], [], []>} : vector<32x8xbf16>, vector<8x32xbf16>, vector<32x32xf32> -> vector<32x32xf32>
    %346 = vector.shape_cast %345 : vector<32x32xf32> to vector<2x2x8x32xf32>
    %347 = vector.extract_strided_slice %346 {offsets = [0, 0, 0, 0], sizes = [2, 1, 8, 32], strides = [1, 1, 1, 1]} : vector<2x2x8x32xf32> to vector<2x1x8x32xf32>
    %348 = vector.shape_cast %347 : vector<2x1x8x32xf32> to vector<2x8x32xf32>
    %349 = vector.extract_strided_slice %323 {offsets = [0, 0, 0], sizes = [1, 8, 32], strides = [1, 1, 1]} : vector<2x8x32xf32> to vector<1x8x32xf32>
    %350 = vector.shape_cast %349 : vector<1x8x32xf32> to vector<8x32xf32>
    %351 = vector.shape_cast %350 : vector<8x32xf32> to vector<1x8x32xf32>
    %352 = vector.broadcast %351 : vector<1x8x32xf32> to vector<2x8x32xf32>
    %353 = arith.mulf %348, %352 : vector<2x8x32xf32>
    %354 = vector.extract_strided_slice %346 {offsets = [0, 1, 0, 0], sizes = [2, 1, 8, 32], strides = [1, 1, 1, 1]} : vector<2x2x8x32xf32> to vector<2x1x8x32xf32>
    %355 = vector.shape_cast %354 : vector<2x1x8x32xf32> to vector<2x8x32xf32>
    %356 = vector.extract_strided_slice %323 {offsets = [1, 0, 0], sizes = [1, 8, 32], strides = [1, 1, 1]} : vector<2x8x32xf32> to vector<1x8x32xf32>
    %357 = vector.shape_cast %356 : vector<1x8x32xf32> to vector<8x32xf32>
    %358 = vector.shape_cast %357 : vector<8x32xf32> to vector<1x8x32xf32>
    %359 = vector.broadcast %358 : vector<1x8x32xf32> to vector<2x8x32xf32>
    %360 = arith.mulf %355, %359 : vector<2x8x32xf32>
    %361 = arith.addf %353, %360 : vector<2x8x32xf32>
    %362 = vector.shape_cast %361 : vector<2x8x32xf32> to vector<16x32xf32>
    %c1_124 = arith.constant 1 : index
    %c0_125 = arith.constant 0 : index
    %c0_126 = arith.constant 0 : index
    %363 = vector.load %arg12[%c1_124, %c0_125, %c0_126] : memref<6x32x32xbf16, #tpu.memory_space<vmem>>, vector<1x32x32xbf16>
    %364 = vector.shape_cast %363 : vector<1x32x32xbf16> to vector<32x32xbf16>
    %365 = arith.truncf %362 : vector<16x32xf32> to vector<16x32xbf16>
    %cst_127 = arith.constant dense<0.000000e+00> : vector<16x32xf32>
    %366 = tpu.matmul %365, %364, %cst_127 {dimension_numbers = #tpu.dot_dimension_numbers<[1], [0], [0], [1], [0, 0, 1, 1], [], []>} : vector<16x32xbf16>, vector<32x32xbf16>, vector<16x32xf32> -> vector<16x32xf32>
    %c1_128 = arith.constant 1 : index
    %c0_129 = arith.constant 0 : index
    %c0_130 = arith.constant 0 : index
    %367 = vector.load %arg13[%c1_128, %c0_129, %c0_130] : memref<6x1x32xf32, #tpu.memory_space<vmem>>, vector<1x1x32xf32>
    %368 = vector.shape_cast %367 : vector<1x1x32xf32> to vector<1x32xf32>
    %369 = vector.broadcast %368 : vector<1x32xf32> to vector<16x32xf32>
    %370 = arith.addf %366, %369 : vector<16x32xf32>
    %371 = arith.addf %310, %370 : vector<16x32xf32>
    %c4 = arith.constant 4 : index
    %c0_131 = arith.constant 0 : index
    %c0_132 = arith.constant 0 : index
    %372 = vector.load %arg18[%c4, %c0_131, %c0_132] : memref<18x1x32xf32, #tpu.memory_space<vmem>>, vector<1x1x32xf32>
    %373 = vector.shape_cast %372 : vector<1x1x32xf32> to vector<1x32xf32>
    %c4_133 = arith.constant 4 : index
    %c0_134 = arith.constant 0 : index
    %c0_135 = arith.constant 0 : index
    %374 = vector.load %arg19[%c4_133, %c0_134, %c0_135] : memref<18x1x32xf32, #tpu.memory_space<vmem>>, vector<1x1x32xf32>
    %375 = vector.shape_cast %374 : vector<1x1x32xf32> to vector<1x32xf32>
    %cst_136 = arith.constant dense<0.000000e+00> : vector<16xf32>
    %376 = vector.multi_reduction <add>, %371, %cst_136 [1] : vector<16x32xf32> to vector<16xf32>
    %377 = vector.shape_cast %376 : vector<16xf32> to vector<16x1xf32>
    %cst_137 = arith.constant 3.200000e+01 : f32
    %378 = vector.broadcast %cst_137 : f32 to vector<16x1xf32>
    %379 = arith.divf %377, %378 : vector<16x1xf32>
    %380 = vector.broadcast %379 : vector<16x1xf32> to vector<16x32xf32>
    %381 = arith.subf %371, %380 : vector<16x32xf32>
    %382 = arith.mulf %381, %381 : vector<16x32xf32>
    %cst_138 = arith.constant dense<0.000000e+00> : vector<16xf32>
    %383 = vector.multi_reduction <add>, %382, %cst_138 [1] : vector<16x32xf32> to vector<16xf32>
    %384 = vector.shape_cast %383 : vector<16xf32> to vector<16x1xf32>
    %cst_139 = arith.constant 3.200000e+01 : f32
    %385 = vector.broadcast %cst_139 : f32 to vector<16x1xf32>
    %386 = arith.divf %384, %385 : vector<16x1xf32>
    %cst_140 = arith.constant 9.99999974E-6 : f32
    %387 = vector.broadcast %cst_140 : f32 to vector<16x1xf32>
    %388 = arith.addf %386, %387 : vector<16x1xf32>
    %389 = math.rsqrt %388 : vector<16x1xf32>
    %390 = vector.broadcast %389 : vector<16x1xf32> to vector<16x32xf32>
    %391 = arith.mulf %381, %390 : vector<16x32xf32>
    %392 = vector.broadcast %373 : vector<1x32xf32> to vector<16x32xf32>
    %393 = arith.mulf %391, %392 : vector<16x32xf32>
    %394 = vector.broadcast %375 : vector<1x32xf32> to vector<16x32xf32>
    %395 = arith.addf %393, %394 : vector<16x32xf32>
    %c1_141 = arith.constant 1 : index
    %c0_142 = arith.constant 0 : index
    %c0_143 = arith.constant 0 : index
    %396 = vector.load %arg14[%c1_141, %c0_142, %c0_143] : memref<6x32x256xbf16, #tpu.memory_space<vmem>>, vector<1x32x256xbf16>
    %397 = vector.shape_cast %396 : vector<1x32x256xbf16> to vector<32x256xbf16>
    %398 = arith.truncf %395 : vector<16x32xf32> to vector<16x32xbf16>
    %cst_144 = arith.constant dense<0.000000e+00> : vector<16x256xf32>
    %399 = tpu.matmul %398, %397, %cst_144 {dimension_numbers = #tpu.dot_dimension_numbers<[1], [0], [0], [1], [0, 0, 1, 1], [], []>} : vector<16x32xbf16>, vector<32x256xbf16>, vector<16x256xf32> -> vector<16x256xf32>
    %c1_145 = arith.constant 1 : index
    %c0_146 = arith.constant 0 : index
    %c0_147 = arith.constant 0 : index
    %400 = vector.load %arg15[%c1_145, %c0_146, %c0_147] : memref<6x1x256xf32, #tpu.memory_space<vmem>>, vector<1x1x256xf32>
    %401 = vector.shape_cast %400 : vector<1x1x256xf32> to vector<1x256xf32>
    %402 = vector.broadcast %401 : vector<1x256xf32> to vector<16x256xf32>
    %403 = arith.addf %399, %402 : vector<16x256xf32>
    %cst_148 = arith.constant 0.000000e+00 : f32
    %404 = vector.broadcast %cst_148 : f32 to vector<16x256xf32>
    %405 = arith.maximumf %403, %404 : vector<16x256xf32>
    %c1_149 = arith.constant 1 : index
    %c0_150 = arith.constant 0 : index
    %c0_151 = arith.constant 0 : index
    %406 = vector.load %arg16[%c1_149, %c0_150, %c0_151] : memref<6x256x32xbf16, #tpu.memory_space<vmem>>, vector<1x256x32xbf16>
    %407 = vector.shape_cast %406 : vector<1x256x32xbf16> to vector<256x32xbf16>
    %408 = arith.truncf %405 : vector<16x256xf32> to vector<16x256xbf16>
    %cst_152 = arith.constant dense<0.000000e+00> : vector<16x32xf32>
    %409 = tpu.matmul %408, %407, %cst_152 {dimension_numbers = #tpu.dot_dimension_numbers<[1], [0], [0], [1], [0, 0, 1, 1], [], []>} : vector<16x256xbf16>, vector<256x32xbf16>, vector<16x32xf32> -> vector<16x32xf32>
    %c1_153 = arith.constant 1 : index
    %c0_154 = arith.constant 0 : index
    %c0_155 = arith.constant 0 : index
    %410 = vector.load %arg17[%c1_153, %c0_154, %c0_155] : memref<6x1x32xf32, #tpu.memory_space<vmem>>, vector<1x1x32xf32>
    %411 = vector.shape_cast %410 : vector<1x1x32xf32> to vector<1x32xf32>
    %412 = vector.broadcast %411 : vector<1x32xf32> to vector<16x32xf32>
    %413 = arith.addf %409, %412 : vector<16x32xf32>
    %414 = arith.addf %395, %413 : vector<16x32xf32>
    %c5 = arith.constant 5 : index
    %c0_156 = arith.constant 0 : index
    %c0_157 = arith.constant 0 : index
    %415 = vector.load %arg18[%c5, %c0_156, %c0_157] : memref<18x1x32xf32, #tpu.memory_space<vmem>>, vector<1x1x32xf32>
    %416 = vector.shape_cast %415 : vector<1x1x32xf32> to vector<1x32xf32>
    %c5_158 = arith.constant 5 : index
    %c0_159 = arith.constant 0 : index
    %c0_160 = arith.constant 0 : index
    %417 = vector.load %arg19[%c5_158, %c0_159, %c0_160] : memref<18x1x32xf32, #tpu.memory_space<vmem>>, vector<1x1x32xf32>
    %418 = vector.shape_cast %417 : vector<1x1x32xf32> to vector<1x32xf32>
    %cst_161 = arith.constant dense<0.000000e+00> : vector<16xf32>
    %419 = vector.multi_reduction <add>, %414, %cst_161 [1] : vector<16x32xf32> to vector<16xf32>
    %420 = vector.shape_cast %419 : vector<16xf32> to vector<16x1xf32>
    %cst_162 = arith.constant 3.200000e+01 : f32
    %421 = vector.broadcast %cst_162 : f32 to vector<16x1xf32>
    %422 = arith.divf %420, %421 : vector<16x1xf32>
    %423 = vector.broadcast %422 : vector<16x1xf32> to vector<16x32xf32>
    %424 = arith.subf %414, %423 : vector<16x32xf32>
    %425 = arith.mulf %424, %424 : vector<16x32xf32>
    %cst_163 = arith.constant dense<0.000000e+00> : vector<16xf32>
    %426 = vector.multi_reduction <add>, %425, %cst_163 [1] : vector<16x32xf32> to vector<16xf32>
    %427 = vector.shape_cast %426 : vector<16xf32> to vector<16x1xf32>
    %cst_164 = arith.constant 3.200000e+01 : f32
    %428 = vector.broadcast %cst_164 : f32 to vector<16x1xf32>
    %429 = arith.divf %427, %428 : vector<16x1xf32>
    %cst_165 = arith.constant 9.99999974E-6 : f32
    %430 = vector.broadcast %cst_165 : f32 to vector<16x1xf32>
    %431 = arith.addf %429, %430 : vector<16x1xf32>
    %432 = math.rsqrt %431 : vector<16x1xf32>
    %433 = vector.broadcast %432 : vector<16x1xf32> to vector<16x32xf32>
    %434 = arith.mulf %424, %433 : vector<16x32xf32>
    %435 = vector.broadcast %416 : vector<1x32xf32> to vector<16x32xf32>
    %436 = arith.mulf %434, %435 : vector<16x32xf32>
    %437 = vector.broadcast %418 : vector<1x32xf32> to vector<16x32xf32>
    %438 = arith.addf %436, %437 : vector<16x32xf32>
    %c2_166 = arith.constant 2 : index
    %c0_167 = arith.constant 0 : index
    %c0_168 = arith.constant 0 : index
    %439 = vector.load %arg4[%c2_166, %c0_167, %c0_168] : memref<6x32x96xbf16, #tpu.memory_space<vmem>>, vector<1x32x96xbf16>
    %440 = vector.shape_cast %439 : vector<1x32x96xbf16> to vector<32x96xbf16>
    %441 = arith.truncf %438 : vector<16x32xf32> to vector<16x32xbf16>
    %cst_169 = arith.constant dense<0.000000e+00> : vector<16x96xf32>
    %442 = tpu.matmul %441, %440, %cst_169 {dimension_numbers = #tpu.dot_dimension_numbers<[1], [0], [0], [1], [0, 0, 1, 1], [], []>} : vector<16x32xbf16>, vector<32x96xbf16>, vector<16x96xf32> -> vector<16x96xf32>
    %c2_170 = arith.constant 2 : index
    %c0_171 = arith.constant 0 : index
    %c0_172 = arith.constant 0 : index
    %443 = vector.load %arg5[%c2_170, %c0_171, %c0_172] : memref<6x1x96xf32, #tpu.memory_space<vmem>>, vector<1x1x96xf32>
    %444 = vector.shape_cast %443 : vector<1x1x96xf32> to vector<1x96xf32>
    %445 = vector.broadcast %444 : vector<1x96xf32> to vector<16x96xf32>
    %446 = arith.addf %442, %445 : vector<16x96xf32>
    %447 = vector.extract_strided_slice %446 {offsets = [0, 0], sizes = [16, 32], strides = [1, 1]} : vector<16x96xf32> to vector<16x32xf32>
    %448 = vector.extract_strided_slice %446 {offsets = [0, 32], sizes = [16, 32], strides = [1, 1]} : vector<16x96xf32> to vector<16x32xf32>
    %449 = vector.extract_strided_slice %446 {offsets = [0, 64], sizes = [16, 32], strides = [1, 1]} : vector<16x96xf32> to vector<16x32xf32>
    %450 = vector.shape_cast %447 : vector<16x32xf32> to vector<2x1x8x32xf32>
    %451 = vector.shape_cast %448 : vector<16x32xf32> to vector<1x2x8x32xf32>
    %452 = vector.shape_cast %449 : vector<16x32xf32> to vector<2x8x32xf32>
    %453 = vector.broadcast %450 : vector<2x1x8x32xf32> to vector<2x2x8x32xf32>
    %454 = vector.broadcast %451 : vector<1x2x8x32xf32> to vector<2x2x8x32xf32>
    %455 = arith.mulf %453, %454 : vector<2x2x8x32xf32>
    %456 = vector.shape_cast %455 : vector<2x2x8x32xf32> to vector<32x32xf32>
    %457 = arith.truncf %456 : vector<32x32xf32> to vector<32x32xbf16>
    %cst_173 = arith.constant dense<0.000000e+00> : vector<32x8xf32>
    %458 = tpu.matmul %457, %0, %cst_173 {dimension_numbers = #tpu.dot_dimension_numbers<[1], [0], [0], [1], [0, 0, 1, 1], [], []>} : vector<32x32xbf16>, vector<32x8xbf16>, vector<32x8xf32> -> vector<32x8xf32>
    %459 = vector.shape_cast %458 : vector<32x8xf32> to vector<2x2x8x8xf32>
    %460 = vector.extract_strided_slice %459 {offsets = [0, 0, 0, 0], sizes = [2, 1, 8, 8], strides = [1, 1, 1, 1]} : vector<2x2x8x8xf32> to vector<2x1x8x8xf32>
    %461 = vector.extract_strided_slice %459 {offsets = [0, 1, 0, 0], sizes = [2, 1, 8, 8], strides = [1, 1, 1, 1]} : vector<2x2x8x8xf32> to vector<2x1x8x8xf32>
    %462 = arith.maximumf %460, %461 : vector<2x1x8x8xf32>
    %463 = vector.broadcast %462 : vector<2x1x8x8xf32> to vector<2x2x8x8xf32>
    %464 = arith.subf %459, %463 : vector<2x2x8x8xf32>
    %465 = math.exp %464 : vector<2x2x8x8xf32>
    %466 = vector.extract_strided_slice %465 {offsets = [0, 0, 0, 0], sizes = [2, 1, 8, 8], strides = [1, 1, 1, 1]} : vector<2x2x8x8xf32> to vector<2x1x8x8xf32>
    %467 = vector.extract_strided_slice %465 {offsets = [0, 1, 0, 0], sizes = [2, 1, 8, 8], strides = [1, 1, 1, 1]} : vector<2x2x8x8xf32> to vector<2x1x8x8xf32>
    %468 = arith.addf %466, %467 : vector<2x1x8x8xf32>
    %469 = tpu.reciprocal %468 {approx = true} : vector<2x1x8x8xf32> -> vector<2x1x8x8xf32>
    %470 = vector.broadcast %469 : vector<2x1x8x8xf32> to vector<2x2x8x8xf32>
    %471 = arith.mulf %465, %470 : vector<2x2x8x8xf32>
    %472 = vector.shape_cast %471 : vector<2x2x8x8xf32> to vector<32x8xf32>
    %473 = arith.truncf %472 : vector<32x8xf32> to vector<32x8xbf16>
    %cst_174 = arith.constant dense<0.000000e+00> : vector<32x32xf32>
    %474 = tpu.matmul %473, %1, %cst_174 {dimension_numbers = #tpu.dot_dimension_numbers<[1], [0], [0], [1], [0, 0, 1, 1], [], []>} : vector<32x8xbf16>, vector<8x32xbf16>, vector<32x32xf32> -> vector<32x32xf32>
    %475 = vector.shape_cast %474 : vector<32x32xf32> to vector<2x2x8x32xf32>
    %476 = vector.extract_strided_slice %475 {offsets = [0, 0, 0, 0], sizes = [2, 1, 8, 32], strides = [1, 1, 1, 1]} : vector<2x2x8x32xf32> to vector<2x1x8x32xf32>
    %477 = vector.shape_cast %476 : vector<2x1x8x32xf32> to vector<2x8x32xf32>
    %478 = vector.extract_strided_slice %452 {offsets = [0, 0, 0], sizes = [1, 8, 32], strides = [1, 1, 1]} : vector<2x8x32xf32> to vector<1x8x32xf32>
    %479 = vector.shape_cast %478 : vector<1x8x32xf32> to vector<8x32xf32>
    %480 = vector.shape_cast %479 : vector<8x32xf32> to vector<1x8x32xf32>
    %481 = vector.broadcast %480 : vector<1x8x32xf32> to vector<2x8x32xf32>
    %482 = arith.mulf %477, %481 : vector<2x8x32xf32>
    %483 = vector.extract_strided_slice %475 {offsets = [0, 1, 0, 0], sizes = [2, 1, 8, 32], strides = [1, 1, 1, 1]} : vector<2x2x8x32xf32> to vector<2x1x8x32xf32>
    %484 = vector.shape_cast %483 : vector<2x1x8x32xf32> to vector<2x8x32xf32>
    %485 = vector.extract_strided_slice %452 {offsets = [1, 0, 0], sizes = [1, 8, 32], strides = [1, 1, 1]} : vector<2x8x32xf32> to vector<1x8x32xf32>
    %486 = vector.shape_cast %485 : vector<1x8x32xf32> to vector<8x32xf32>
    %487 = vector.shape_cast %486 : vector<8x32xf32> to vector<1x8x32xf32>
    %488 = vector.broadcast %487 : vector<1x8x32xf32> to vector<2x8x32xf32>
    %489 = arith.mulf %484, %488 : vector<2x8x32xf32>
    %490 = arith.addf %482, %489 : vector<2x8x32xf32>
    %491 = vector.shape_cast %490 : vector<2x8x32xf32> to vector<16x32xf32>
    %c2_175 = arith.constant 2 : index
    %c0_176 = arith.constant 0 : index
    %c0_177 = arith.constant 0 : index
    %492 = vector.load %arg6[%c2_175, %c0_176, %c0_177] : memref<6x32x32xbf16, #tpu.memory_space<vmem>>, vector<1x32x32xbf16>
    %493 = vector.shape_cast %492 : vector<1x32x32xbf16> to vector<32x32xbf16>
    %494 = arith.truncf %491 : vector<16x32xf32> to vector<16x32xbf16>
    %cst_178 = arith.constant dense<0.000000e+00> : vector<16x32xf32>
    %495 = tpu.matmul %494, %493, %cst_178 {dimension_numbers = #tpu.dot_dimension_numbers<[1], [0], [0], [1], [0, 0, 1, 1], [], []>} : vector<16x32xbf16>, vector<32x32xbf16>, vector<16x32xf32> -> vector<16x32xf32>
    %c2_179 = arith.constant 2 : index
    %c0_180 = arith.constant 0 : index
    %c0_181 = arith.constant 0 : index
    %496 = vector.load %arg7[%c2_179, %c0_180, %c0_181] : memref<6x1x32xf32, #tpu.memory_space<vmem>>, vector<1x1x32xf32>
    %497 = vector.shape_cast %496 : vector<1x1x32xf32> to vector<1x32xf32>
    %498 = vector.broadcast %497 : vector<1x32xf32> to vector<16x32xf32>
    %499 = arith.addf %495, %498 : vector<16x32xf32>
    %500 = arith.addf %438, %499 : vector<16x32xf32>
    %c6 = arith.constant 6 : index
    %c0_182 = arith.constant 0 : index
    %c0_183 = arith.constant 0 : index
    %501 = vector.load %arg18[%c6, %c0_182, %c0_183] : memref<18x1x32xf32, #tpu.memory_space<vmem>>, vector<1x1x32xf32>
    %502 = vector.shape_cast %501 : vector<1x1x32xf32> to vector<1x32xf32>
    %c6_184 = arith.constant 6 : index
    %c0_185 = arith.constant 0 : index
    %c0_186 = arith.constant 0 : index
    %503 = vector.load %arg19[%c6_184, %c0_185, %c0_186] : memref<18x1x32xf32, #tpu.memory_space<vmem>>, vector<1x1x32xf32>
    %504 = vector.shape_cast %503 : vector<1x1x32xf32> to vector<1x32xf32>
    %cst_187 = arith.constant dense<0.000000e+00> : vector<16xf32>
    %505 = vector.multi_reduction <add>, %500, %cst_187 [1] : vector<16x32xf32> to vector<16xf32>
    %506 = vector.shape_cast %505 : vector<16xf32> to vector<16x1xf32>
    %cst_188 = arith.constant 3.200000e+01 : f32
    %507 = vector.broadcast %cst_188 : f32 to vector<16x1xf32>
    %508 = arith.divf %506, %507 : vector<16x1xf32>
    %509 = vector.broadcast %508 : vector<16x1xf32> to vector<16x32xf32>
    %510 = arith.subf %500, %509 : vector<16x32xf32>
    %511 = arith.mulf %510, %510 : vector<16x32xf32>
    %cst_189 = arith.constant dense<0.000000e+00> : vector<16xf32>
    %512 = vector.multi_reduction <add>, %511, %cst_189 [1] : vector<16x32xf32> to vector<16xf32>
    %513 = vector.shape_cast %512 : vector<16xf32> to vector<16x1xf32>
    %cst_190 = arith.constant 3.200000e+01 : f32
    %514 = vector.broadcast %cst_190 : f32 to vector<16x1xf32>
    %515 = arith.divf %513, %514 : vector<16x1xf32>
    %cst_191 = arith.constant 9.99999974E-6 : f32
    %516 = vector.broadcast %cst_191 : f32 to vector<16x1xf32>
    %517 = arith.addf %515, %516 : vector<16x1xf32>
    %518 = math.rsqrt %517 : vector<16x1xf32>
    %519 = vector.broadcast %518 : vector<16x1xf32> to vector<16x32xf32>
    %520 = arith.mulf %510, %519 : vector<16x32xf32>
    %521 = vector.broadcast %502 : vector<1x32xf32> to vector<16x32xf32>
    %522 = arith.mulf %520, %521 : vector<16x32xf32>
    %523 = vector.broadcast %504 : vector<1x32xf32> to vector<16x32xf32>
    %524 = arith.addf %522, %523 : vector<16x32xf32>
    %c2_192 = arith.constant 2 : index
    %c0_193 = arith.constant 0 : index
    %c0_194 = arith.constant 0 : index
    %525 = vector.load %arg8[%c2_192, %c0_193, %c0_194] : memref<6x32x32xbf16, #tpu.memory_space<vmem>>, vector<1x32x32xbf16>
    %526 = vector.shape_cast %525 : vector<1x32x32xbf16> to vector<32x32xbf16>
    %527 = arith.truncf %524 : vector<16x32xf32> to vector<16x32xbf16>
    %cst_195 = arith.constant dense<0.000000e+00> : vector<16x32xf32>
    %528 = tpu.matmul %527, %526, %cst_195 {dimension_numbers = #tpu.dot_dimension_numbers<[1], [0], [0], [1], [0, 0, 1, 1], [], []>} : vector<16x32xbf16>, vector<32x32xbf16>, vector<16x32xf32> -> vector<16x32xf32>
    %c2_196 = arith.constant 2 : index
    %c0_197 = arith.constant 0 : index
    %c0_198 = arith.constant 0 : index
    %529 = vector.load %arg9[%c2_196, %c0_197, %c0_198] : memref<6x1x32xf32, #tpu.memory_space<vmem>>, vector<1x1x32xf32>
    %530 = vector.shape_cast %529 : vector<1x1x32xf32> to vector<1x32xf32>
    %531 = vector.broadcast %530 : vector<1x32xf32> to vector<16x32xf32>
    %532 = arith.addf %528, %531 : vector<16x32xf32>
    %533 = vector.extract_strided_slice %10 {offsets = [0, 128], sizes = [16, 32], strides = [1, 1]} : vector<16x384xf32> to vector<16x32xf32>
    %534 = vector.extract_strided_slice %10 {offsets = [0, 160], sizes = [16, 32], strides = [1, 1]} : vector<16x384xf32> to vector<16x32xf32>
    %535 = vector.shape_cast %532 : vector<16x32xf32> to vector<2x1x8x32xf32>
    %536 = vector.shape_cast %533 : vector<16x32xf32> to vector<1x2x8x32xf32>
    %537 = vector.shape_cast %534 : vector<16x32xf32> to vector<2x8x32xf32>
    %538 = vector.broadcast %535 : vector<2x1x8x32xf32> to vector<2x2x8x32xf32>
    %539 = vector.broadcast %536 : vector<1x2x8x32xf32> to vector<2x2x8x32xf32>
    %540 = arith.mulf %538, %539 : vector<2x2x8x32xf32>
    %541 = vector.shape_cast %540 : vector<2x2x8x32xf32> to vector<32x32xf32>
    %542 = arith.truncf %541 : vector<32x32xf32> to vector<32x32xbf16>
    %cst_199 = arith.constant dense<0.000000e+00> : vector<32x8xf32>
    %543 = tpu.matmul %542, %0, %cst_199 {dimension_numbers = #tpu.dot_dimension_numbers<[1], [0], [0], [1], [0, 0, 1, 1], [], []>} : vector<32x32xbf16>, vector<32x8xbf16>, vector<32x8xf32> -> vector<32x8xf32>
    %544 = vector.shape_cast %543 : vector<32x8xf32> to vector<2x2x8x8xf32>
    %545 = vector.extract_strided_slice %544 {offsets = [0, 0, 0, 0], sizes = [2, 1, 8, 8], strides = [1, 1, 1, 1]} : vector<2x2x8x8xf32> to vector<2x1x8x8xf32>
    %546 = vector.extract_strided_slice %544 {offsets = [0, 1, 0, 0], sizes = [2, 1, 8, 8], strides = [1, 1, 1, 1]} : vector<2x2x8x8xf32> to vector<2x1x8x8xf32>
    %547 = arith.maximumf %545, %546 : vector<2x1x8x8xf32>
    %548 = vector.broadcast %547 : vector<2x1x8x8xf32> to vector<2x2x8x8xf32>
    %549 = arith.subf %544, %548 : vector<2x2x8x8xf32>
    %550 = math.exp %549 : vector<2x2x8x8xf32>
    %551 = vector.extract_strided_slice %550 {offsets = [0, 0, 0, 0], sizes = [2, 1, 8, 8], strides = [1, 1, 1, 1]} : vector<2x2x8x8xf32> to vector<2x1x8x8xf32>
    %552 = vector.extract_strided_slice %550 {offsets = [0, 1, 0, 0], sizes = [2, 1, 8, 8], strides = [1, 1, 1, 1]} : vector<2x2x8x8xf32> to vector<2x1x8x8xf32>
    %553 = arith.addf %551, %552 : vector<2x1x8x8xf32>
    %554 = tpu.reciprocal %553 {approx = true} : vector<2x1x8x8xf32> -> vector<2x1x8x8xf32>
    %555 = vector.broadcast %554 : vector<2x1x8x8xf32> to vector<2x2x8x8xf32>
    %556 = arith.mulf %550, %555 : vector<2x2x8x8xf32>
    %557 = vector.shape_cast %556 : vector<2x2x8x8xf32> to vector<32x8xf32>
    %558 = arith.truncf %557 : vector<32x8xf32> to vector<32x8xbf16>
    %cst_200 = arith.constant dense<0.000000e+00> : vector<32x32xf32>
    %559 = tpu.matmul %558, %1, %cst_200 {dimension_numbers = #tpu.dot_dimension_numbers<[1], [0], [0], [1], [0, 0, 1, 1], [], []>} : vector<32x8xbf16>, vector<8x32xbf16>, vector<32x32xf32> -> vector<32x32xf32>
    %560 = vector.shape_cast %559 : vector<32x32xf32> to vector<2x2x8x32xf32>
    %561 = vector.extract_strided_slice %560 {offsets = [0, 0, 0, 0], sizes = [2, 1, 8, 32], strides = [1, 1, 1, 1]} : vector<2x2x8x32xf32> to vector<2x1x8x32xf32>
    %562 = vector.shape_cast %561 : vector<2x1x8x32xf32> to vector<2x8x32xf32>
    %563 = vector.extract_strided_slice %537 {offsets = [0, 0, 0], sizes = [1, 8, 32], strides = [1, 1, 1]} : vector<2x8x32xf32> to vector<1x8x32xf32>
    %564 = vector.shape_cast %563 : vector<1x8x32xf32> to vector<8x32xf32>
    %565 = vector.shape_cast %564 : vector<8x32xf32> to vector<1x8x32xf32>
    %566 = vector.broadcast %565 : vector<1x8x32xf32> to vector<2x8x32xf32>
    %567 = arith.mulf %562, %566 : vector<2x8x32xf32>
    %568 = vector.extract_strided_slice %560 {offsets = [0, 1, 0, 0], sizes = [2, 1, 8, 32], strides = [1, 1, 1, 1]} : vector<2x2x8x32xf32> to vector<2x1x8x32xf32>
    %569 = vector.shape_cast %568 : vector<2x1x8x32xf32> to vector<2x8x32xf32>
    %570 = vector.extract_strided_slice %537 {offsets = [1, 0, 0], sizes = [1, 8, 32], strides = [1, 1, 1]} : vector<2x8x32xf32> to vector<1x8x32xf32>
    %571 = vector.shape_cast %570 : vector<1x8x32xf32> to vector<8x32xf32>
    %572 = vector.shape_cast %571 : vector<8x32xf32> to vector<1x8x32xf32>
    %573 = vector.broadcast %572 : vector<1x8x32xf32> to vector<2x8x32xf32>
    %574 = arith.mulf %569, %573 : vector<2x8x32xf32>
    %575 = arith.addf %567, %574 : vector<2x8x32xf32>
    %576 = vector.shape_cast %575 : vector<2x8x32xf32> to vector<16x32xf32>
    %c2_201 = arith.constant 2 : index
    %c0_202 = arith.constant 0 : index
    %c0_203 = arith.constant 0 : index
    %577 = vector.load %arg12[%c2_201, %c0_202, %c0_203] : memref<6x32x32xbf16, #tpu.memory_space<vmem>>, vector<1x32x32xbf16>
    %578 = vector.shape_cast %577 : vector<1x32x32xbf16> to vector<32x32xbf16>
    %579 = arith.truncf %576 : vector<16x32xf32> to vector<16x32xbf16>
    %cst_204 = arith.constant dense<0.000000e+00> : vector<16x32xf32>
    %580 = tpu.matmul %579, %578, %cst_204 {dimension_numbers = #tpu.dot_dimension_numbers<[1], [0], [0], [1], [0, 0, 1, 1], [], []>} : vector<16x32xbf16>, vector<32x32xbf16>, vector<16x32xf32> -> vector<16x32xf32>
    %c2_205 = arith.constant 2 : index
    %c0_206 = arith.constant 0 : index
    %c0_207 = arith.constant 0 : index
    %581 = vector.load %arg13[%c2_205, %c0_206, %c0_207] : memref<6x1x32xf32, #tpu.memory_space<vmem>>, vector<1x1x32xf32>
    %582 = vector.shape_cast %581 : vector<1x1x32xf32> to vector<1x32xf32>
    %583 = vector.broadcast %582 : vector<1x32xf32> to vector<16x32xf32>
    %584 = arith.addf %580, %583 : vector<16x32xf32>
    %585 = arith.addf %524, %584 : vector<16x32xf32>
    %c7 = arith.constant 7 : index
    %c0_208 = arith.constant 0 : index
    %c0_209 = arith.constant 0 : index
    %586 = vector.load %arg18[%c7, %c0_208, %c0_209] : memref<18x1x32xf32, #tpu.memory_space<vmem>>, vector<1x1x32xf32>
    %587 = vector.shape_cast %586 : vector<1x1x32xf32> to vector<1x32xf32>
    %c7_210 = arith.constant 7 : index
    %c0_211 = arith.constant 0 : index
    %c0_212 = arith.constant 0 : index
    %588 = vector.load %arg19[%c7_210, %c0_211, %c0_212] : memref<18x1x32xf32, #tpu.memory_space<vmem>>, vector<1x1x32xf32>
    %589 = vector.shape_cast %588 : vector<1x1x32xf32> to vector<1x32xf32>
    %cst_213 = arith.constant dense<0.000000e+00> : vector<16xf32>
    %590 = vector.multi_reduction <add>, %585, %cst_213 [1] : vector<16x32xf32> to vector<16xf32>
    %591 = vector.shape_cast %590 : vector<16xf32> to vector<16x1xf32>
    %cst_214 = arith.constant 3.200000e+01 : f32
    %592 = vector.broadcast %cst_214 : f32 to vector<16x1xf32>
    %593 = arith.divf %591, %592 : vector<16x1xf32>
    %594 = vector.broadcast %593 : vector<16x1xf32> to vector<16x32xf32>
    %595 = arith.subf %585, %594 : vector<16x32xf32>
    %596 = arith.mulf %595, %595 : vector<16x32xf32>
    %cst_215 = arith.constant dense<0.000000e+00> : vector<16xf32>
    %597 = vector.multi_reduction <add>, %596, %cst_215 [1] : vector<16x32xf32> to vector<16xf32>
    %598 = vector.shape_cast %597 : vector<16xf32> to vector<16x1xf32>
    %cst_216 = arith.constant 3.200000e+01 : f32
    %599 = vector.broadcast %cst_216 : f32 to vector<16x1xf32>
    %600 = arith.divf %598, %599 : vector<16x1xf32>
    %cst_217 = arith.constant 9.99999974E-6 : f32
    %601 = vector.broadcast %cst_217 : f32 to vector<16x1xf32>
    %602 = arith.addf %600, %601 : vector<16x1xf32>
    %603 = math.rsqrt %602 : vector<16x1xf32>
    %604 = vector.broadcast %603 : vector<16x1xf32> to vector<16x32xf32>
    %605 = arith.mulf %595, %604 : vector<16x32xf32>
    %606 = vector.broadcast %587 : vector<1x32xf32> to vector<16x32xf32>
    %607 = arith.mulf %605, %606 : vector<16x32xf32>
    %608 = vector.broadcast %589 : vector<1x32xf32> to vector<16x32xf32>
    %609 = arith.addf %607, %608 : vector<16x32xf32>
    %c2_218 = arith.constant 2 : index
    %c0_219 = arith.constant 0 : index
    %c0_220 = arith.constant 0 : index
    %610 = vector.load %arg14[%c2_218, %c0_219, %c0_220] : memref<6x32x256xbf16, #tpu.memory_space<vmem>>, vector<1x32x256xbf16>
    %611 = vector.shape_cast %610 : vector<1x32x256xbf16> to vector<32x256xbf16>
    %612 = arith.truncf %609 : vector<16x32xf32> to vector<16x32xbf16>
    %cst_221 = arith.constant dense<0.000000e+00> : vector<16x256xf32>
    %613 = tpu.matmul %612, %611, %cst_221 {dimension_numbers = #tpu.dot_dimension_numbers<[1], [0], [0], [1], [0, 0, 1, 1], [], []>} : vector<16x32xbf16>, vector<32x256xbf16>, vector<16x256xf32> -> vector<16x256xf32>
    %c2_222 = arith.constant 2 : index
    %c0_223 = arith.constant 0 : index
    %c0_224 = arith.constant 0 : index
    %614 = vector.load %arg15[%c2_222, %c0_223, %c0_224] : memref<6x1x256xf32, #tpu.memory_space<vmem>>, vector<1x1x256xf32>
    %615 = vector.shape_cast %614 : vector<1x1x256xf32> to vector<1x256xf32>
    %616 = vector.broadcast %615 : vector<1x256xf32> to vector<16x256xf32>
    %617 = arith.addf %613, %616 : vector<16x256xf32>
    %cst_225 = arith.constant 0.000000e+00 : f32
    %618 = vector.broadcast %cst_225 : f32 to vector<16x256xf32>
    %619 = arith.maximumf %617, %618 : vector<16x256xf32>
    %c2_226 = arith.constant 2 : index
    %c0_227 = arith.constant 0 : index
    %c0_228 = arith.constant 0 : index
    %620 = vector.load %arg16[%c2_226, %c0_227, %c0_228] : memref<6x256x32xbf16, #tpu.memory_space<vmem>>, vector<1x256x32xbf16>
    %621 = vector.shape_cast %620 : vector<1x256x32xbf16> to vector<256x32xbf16>
    %622 = arith.truncf %619 : vector<16x256xf32> to vector<16x256xbf16>
    %cst_229 = arith.constant dense<0.000000e+00> : vector<16x32xf32>
    %623 = tpu.matmul %622, %621, %cst_229 {dimension_numbers = #tpu.dot_dimension_numbers<[1], [0], [0], [1], [0, 0, 1, 1], [], []>} : vector<16x256xbf16>, vector<256x32xbf16>, vector<16x32xf32> -> vector<16x32xf32>
    %c2_230 = arith.constant 2 : index
    %c0_231 = arith.constant 0 : index
    %c0_232 = arith.constant 0 : index
    %624 = vector.load %arg17[%c2_230, %c0_231, %c0_232] : memref<6x1x32xf32, #tpu.memory_space<vmem>>, vector<1x1x32xf32>
    %625 = vector.shape_cast %624 : vector<1x1x32xf32> to vector<1x32xf32>
    %626 = vector.broadcast %625 : vector<1x32xf32> to vector<16x32xf32>
    %627 = arith.addf %623, %626 : vector<16x32xf32>
    %628 = arith.addf %609, %627 : vector<16x32xf32>
    %c8 = arith.constant 8 : index
    %c0_233 = arith.constant 0 : index
    %c0_234 = arith.constant 0 : index
    %629 = vector.load %arg18[%c8, %c0_233, %c0_234] : memref<18x1x32xf32, #tpu.memory_space<vmem>>, vector<1x1x32xf32>
    %630 = vector.shape_cast %629 : vector<1x1x32xf32> to vector<1x32xf32>
    %c8_235 = arith.constant 8 : index
    %c0_236 = arith.constant 0 : index
    %c0_237 = arith.constant 0 : index
    %631 = vector.load %arg19[%c8_235, %c0_236, %c0_237] : memref<18x1x32xf32, #tpu.memory_space<vmem>>, vector<1x1x32xf32>
    %632 = vector.shape_cast %631 : vector<1x1x32xf32> to vector<1x32xf32>
    %cst_238 = arith.constant dense<0.000000e+00> : vector<16xf32>
    %633 = vector.multi_reduction <add>, %628, %cst_238 [1] : vector<16x32xf32> to vector<16xf32>
    %634 = vector.shape_cast %633 : vector<16xf32> to vector<16x1xf32>
    %cst_239 = arith.constant 3.200000e+01 : f32
    %635 = vector.broadcast %cst_239 : f32 to vector<16x1xf32>
    %636 = arith.divf %634, %635 : vector<16x1xf32>
    %637 = vector.broadcast %636 : vector<16x1xf32> to vector<16x32xf32>
    %638 = arith.subf %628, %637 : vector<16x32xf32>
    %639 = arith.mulf %638, %638 : vector<16x32xf32>
    %cst_240 = arith.constant dense<0.000000e+00> : vector<16xf32>
    %640 = vector.multi_reduction <add>, %639, %cst_240 [1] : vector<16x32xf32> to vector<16xf32>
    %641 = vector.shape_cast %640 : vector<16xf32> to vector<16x1xf32>
    %cst_241 = arith.constant 3.200000e+01 : f32
    %642 = vector.broadcast %cst_241 : f32 to vector<16x1xf32>
    %643 = arith.divf %641, %642 : vector<16x1xf32>
    %cst_242 = arith.constant 9.99999974E-6 : f32
    %644 = vector.broadcast %cst_242 : f32 to vector<16x1xf32>
    %645 = arith.addf %643, %644 : vector<16x1xf32>
    %646 = math.rsqrt %645 : vector<16x1xf32>
    %647 = vector.broadcast %646 : vector<16x1xf32> to vector<16x32xf32>
    %648 = arith.mulf %638, %647 : vector<16x32xf32>
    %649 = vector.broadcast %630 : vector<1x32xf32> to vector<16x32xf32>
    %650 = arith.mulf %648, %649 : vector<16x32xf32>
    %651 = vector.broadcast %632 : vector<1x32xf32> to vector<16x32xf32>
    %652 = arith.addf %650, %651 : vector<16x32xf32>
    %c3_243 = arith.constant 3 : index
    %c0_244 = arith.constant 0 : index
    %c0_245 = arith.constant 0 : index
    %653 = vector.load %arg4[%c3_243, %c0_244, %c0_245] : memref<6x32x96xbf16, #tpu.memory_space<vmem>>, vector<1x32x96xbf16>
    %654 = vector.shape_cast %653 : vector<1x32x96xbf16> to vector<32x96xbf16>
    %655 = arith.truncf %652 : vector<16x32xf32> to vector<16x32xbf16>
    %cst_246 = arith.constant dense<0.000000e+00> : vector<16x96xf32>
    %656 = tpu.matmul %655, %654, %cst_246 {dimension_numbers = #tpu.dot_dimension_numbers<[1], [0], [0], [1], [0, 0, 1, 1], [], []>} : vector<16x32xbf16>, vector<32x96xbf16>, vector<16x96xf32> -> vector<16x96xf32>
    %c3_247 = arith.constant 3 : index
    %c0_248 = arith.constant 0 : index
    %c0_249 = arith.constant 0 : index
    %657 = vector.load %arg5[%c3_247, %c0_248, %c0_249] : memref<6x1x96xf32, #tpu.memory_space<vmem>>, vector<1x1x96xf32>
    %658 = vector.shape_cast %657 : vector<1x1x96xf32> to vector<1x96xf32>
    %659 = vector.broadcast %658 : vector<1x96xf32> to vector<16x96xf32>
    %660 = arith.addf %656, %659 : vector<16x96xf32>
    %661 = vector.extract_strided_slice %660 {offsets = [0, 0], sizes = [16, 32], strides = [1, 1]} : vector<16x96xf32> to vector<16x32xf32>
    %662 = vector.extract_strided_slice %660 {offsets = [0, 32], sizes = [16, 32], strides = [1, 1]} : vector<16x96xf32> to vector<16x32xf32>
    %663 = vector.extract_strided_slice %660 {offsets = [0, 64], sizes = [16, 32], strides = [1, 1]} : vector<16x96xf32> to vector<16x32xf32>
    %664 = vector.shape_cast %661 : vector<16x32xf32> to vector<2x1x8x32xf32>
    %665 = vector.shape_cast %662 : vector<16x32xf32> to vector<1x2x8x32xf32>
    %666 = vector.shape_cast %663 : vector<16x32xf32> to vector<2x8x32xf32>
    %667 = vector.broadcast %664 : vector<2x1x8x32xf32> to vector<2x2x8x32xf32>
    %668 = vector.broadcast %665 : vector<1x2x8x32xf32> to vector<2x2x8x32xf32>
    %669 = arith.mulf %667, %668 : vector<2x2x8x32xf32>
    %670 = vector.shape_cast %669 : vector<2x2x8x32xf32> to vector<32x32xf32>
    %671 = arith.truncf %670 : vector<32x32xf32> to vector<32x32xbf16>
    %cst_250 = arith.constant dense<0.000000e+00> : vector<32x8xf32>
    %672 = tpu.matmul %671, %0, %cst_250 {dimension_numbers = #tpu.dot_dimension_numbers<[1], [0], [0], [1], [0, 0, 1, 1], [], []>} : vector<32x32xbf16>, vector<32x8xbf16>, vector<32x8xf32> -> vector<32x8xf32>
    %673 = vector.shape_cast %672 : vector<32x8xf32> to vector<2x2x8x8xf32>
    %674 = vector.extract_strided_slice %673 {offsets = [0, 0, 0, 0], sizes = [2, 1, 8, 8], strides = [1, 1, 1, 1]} : vector<2x2x8x8xf32> to vector<2x1x8x8xf32>
    %675 = vector.extract_strided_slice %673 {offsets = [0, 1, 0, 0], sizes = [2, 1, 8, 8], strides = [1, 1, 1, 1]} : vector<2x2x8x8xf32> to vector<2x1x8x8xf32>
    %676 = arith.maximumf %674, %675 : vector<2x1x8x8xf32>
    %677 = vector.broadcast %676 : vector<2x1x8x8xf32> to vector<2x2x8x8xf32>
    %678 = arith.subf %673, %677 : vector<2x2x8x8xf32>
    %679 = math.exp %678 : vector<2x2x8x8xf32>
    %680 = vector.extract_strided_slice %679 {offsets = [0, 0, 0, 0], sizes = [2, 1, 8, 8], strides = [1, 1, 1, 1]} : vector<2x2x8x8xf32> to vector<2x1x8x8xf32>
    %681 = vector.extract_strided_slice %679 {offsets = [0, 1, 0, 0], sizes = [2, 1, 8, 8], strides = [1, 1, 1, 1]} : vector<2x2x8x8xf32> to vector<2x1x8x8xf32>
    %682 = arith.addf %680, %681 : vector<2x1x8x8xf32>
    %683 = tpu.reciprocal %682 {approx = true} : vector<2x1x8x8xf32> -> vector<2x1x8x8xf32>
    %684 = vector.broadcast %683 : vector<2x1x8x8xf32> to vector<2x2x8x8xf32>
    %685 = arith.mulf %679, %684 : vector<2x2x8x8xf32>
    %686 = vector.shape_cast %685 : vector<2x2x8x8xf32> to vector<32x8xf32>
    %687 = arith.truncf %686 : vector<32x8xf32> to vector<32x8xbf16>
    %cst_251 = arith.constant dense<0.000000e+00> : vector<32x32xf32>
    %688 = tpu.matmul %687, %1, %cst_251 {dimension_numbers = #tpu.dot_dimension_numbers<[1], [0], [0], [1], [0, 0, 1, 1], [], []>} : vector<32x8xbf16>, vector<8x32xbf16>, vector<32x32xf32> -> vector<32x32xf32>
    %689 = vector.shape_cast %688 : vector<32x32xf32> to vector<2x2x8x32xf32>
    %690 = vector.extract_strided_slice %689 {offsets = [0, 0, 0, 0], sizes = [2, 1, 8, 32], strides = [1, 1, 1, 1]} : vector<2x2x8x32xf32> to vector<2x1x8x32xf32>
    %691 = vector.shape_cast %690 : vector<2x1x8x32xf32> to vector<2x8x32xf32>
    %692 = vector.extract_strided_slice %666 {offsets = [0, 0, 0], sizes = [1, 8, 32], strides = [1, 1, 1]} : vector<2x8x32xf32> to vector<1x8x32xf32>
    %693 = vector.shape_cast %692 : vector<1x8x32xf32> to vector<8x32xf32>
    %694 = vector.shape_cast %693 : vector<8x32xf32> to vector<1x8x32xf32>
    %695 = vector.broadcast %694 : vector<1x8x32xf32> to vector<2x8x32xf32>
    %696 = arith.mulf %691, %695 : vector<2x8x32xf32>
    %697 = vector.extract_strided_slice %689 {offsets = [0, 1, 0, 0], sizes = [2, 1, 8, 32], strides = [1, 1, 1, 1]} : vector<2x2x8x32xf32> to vector<2x1x8x32xf32>
    %698 = vector.shape_cast %697 : vector<2x1x8x32xf32> to vector<2x8x32xf32>
    %699 = vector.extract_strided_slice %666 {offsets = [1, 0, 0], sizes = [1, 8, 32], strides = [1, 1, 1]} : vector<2x8x32xf32> to vector<1x8x32xf32>
    %700 = vector.shape_cast %699 : vector<1x8x32xf32> to vector<8x32xf32>
    %701 = vector.shape_cast %700 : vector<8x32xf32> to vector<1x8x32xf32>
    %702 = vector.broadcast %701 : vector<1x8x32xf32> to vector<2x8x32xf32>
    %703 = arith.mulf %698, %702 : vector<2x8x32xf32>
    %704 = arith.addf %696, %703 : vector<2x8x32xf32>
    %705 = vector.shape_cast %704 : vector<2x8x32xf32> to vector<16x32xf32>
    %c3_252 = arith.constant 3 : index
    %c0_253 = arith.constant 0 : index
    %c0_254 = arith.constant 0 : index
    %706 = vector.load %arg6[%c3_252, %c0_253, %c0_254] : memref<6x32x32xbf16, #tpu.memory_space<vmem>>, vector<1x32x32xbf16>
    %707 = vector.shape_cast %706 : vector<1x32x32xbf16> to vector<32x32xbf16>
    %708 = arith.truncf %705 : vector<16x32xf32> to vector<16x32xbf16>
    %cst_255 = arith.constant dense<0.000000e+00> : vector<16x32xf32>
    %709 = tpu.matmul %708, %707, %cst_255 {dimension_numbers = #tpu.dot_dimension_numbers<[1], [0], [0], [1], [0, 0, 1, 1], [], []>} : vector<16x32xbf16>, vector<32x32xbf16>, vector<16x32xf32> -> vector<16x32xf32>
    %c3_256 = arith.constant 3 : index
    %c0_257 = arith.constant 0 : index
    %c0_258 = arith.constant 0 : index
    %710 = vector.load %arg7[%c3_256, %c0_257, %c0_258] : memref<6x1x32xf32, #tpu.memory_space<vmem>>, vector<1x1x32xf32>
    %711 = vector.shape_cast %710 : vector<1x1x32xf32> to vector<1x32xf32>
    %712 = vector.broadcast %711 : vector<1x32xf32> to vector<16x32xf32>
    %713 = arith.addf %709, %712 : vector<16x32xf32>
    %714 = arith.addf %652, %713 : vector<16x32xf32>
    %c9 = arith.constant 9 : index
    %c0_259 = arith.constant 0 : index
    %c0_260 = arith.constant 0 : index
    %715 = vector.load %arg18[%c9, %c0_259, %c0_260] : memref<18x1x32xf32, #tpu.memory_space<vmem>>, vector<1x1x32xf32>
    %716 = vector.shape_cast %715 : vector<1x1x32xf32> to vector<1x32xf32>
    %c9_261 = arith.constant 9 : index
    %c0_262 = arith.constant 0 : index
    %c0_263 = arith.constant 0 : index
    %717 = vector.load %arg19[%c9_261, %c0_262, %c0_263] : memref<18x1x32xf32, #tpu.memory_space<vmem>>, vector<1x1x32xf32>
    %718 = vector.shape_cast %717 : vector<1x1x32xf32> to vector<1x32xf32>
    %cst_264 = arith.constant dense<0.000000e+00> : vector<16xf32>
    %719 = vector.multi_reduction <add>, %714, %cst_264 [1] : vector<16x32xf32> to vector<16xf32>
    %720 = vector.shape_cast %719 : vector<16xf32> to vector<16x1xf32>
    %cst_265 = arith.constant 3.200000e+01 : f32
    %721 = vector.broadcast %cst_265 : f32 to vector<16x1xf32>
    %722 = arith.divf %720, %721 : vector<16x1xf32>
    %723 = vector.broadcast %722 : vector<16x1xf32> to vector<16x32xf32>
    %724 = arith.subf %714, %723 : vector<16x32xf32>
    %725 = arith.mulf %724, %724 : vector<16x32xf32>
    %cst_266 = arith.constant dense<0.000000e+00> : vector<16xf32>
    %726 = vector.multi_reduction <add>, %725, %cst_266 [1] : vector<16x32xf32> to vector<16xf32>
    %727 = vector.shape_cast %726 : vector<16xf32> to vector<16x1xf32>
    %cst_267 = arith.constant 3.200000e+01 : f32
    %728 = vector.broadcast %cst_267 : f32 to vector<16x1xf32>
    %729 = arith.divf %727, %728 : vector<16x1xf32>
    %cst_268 = arith.constant 9.99999974E-6 : f32
    %730 = vector.broadcast %cst_268 : f32 to vector<16x1xf32>
    %731 = arith.addf %729, %730 : vector<16x1xf32>
    %732 = math.rsqrt %731 : vector<16x1xf32>
    %733 = vector.broadcast %732 : vector<16x1xf32> to vector<16x32xf32>
    %734 = arith.mulf %724, %733 : vector<16x32xf32>
    %735 = vector.broadcast %716 : vector<1x32xf32> to vector<16x32xf32>
    %736 = arith.mulf %734, %735 : vector<16x32xf32>
    %737 = vector.broadcast %718 : vector<1x32xf32> to vector<16x32xf32>
    %738 = arith.addf %736, %737 : vector<16x32xf32>
    %c3_269 = arith.constant 3 : index
    %c0_270 = arith.constant 0 : index
    %c0_271 = arith.constant 0 : index
    %739 = vector.load %arg8[%c3_269, %c0_270, %c0_271] : memref<6x32x32xbf16, #tpu.memory_space<vmem>>, vector<1x32x32xbf16>
    %740 = vector.shape_cast %739 : vector<1x32x32xbf16> to vector<32x32xbf16>
    %741 = arith.truncf %738 : vector<16x32xf32> to vector<16x32xbf16>
    %cst_272 = arith.constant dense<0.000000e+00> : vector<16x32xf32>
    %742 = tpu.matmul %741, %740, %cst_272 {dimension_numbers = #tpu.dot_dimension_numbers<[1], [0], [0], [1], [0, 0, 1, 1], [], []>} : vector<16x32xbf16>, vector<32x32xbf16>, vector<16x32xf32> -> vector<16x32xf32>
    %c3_273 = arith.constant 3 : index
    %c0_274 = arith.constant 0 : index
    %c0_275 = arith.constant 0 : index
    %743 = vector.load %arg9[%c3_273, %c0_274, %c0_275] : memref<6x1x32xf32, #tpu.memory_space<vmem>>, vector<1x1x32xf32>
    %744 = vector.shape_cast %743 : vector<1x1x32xf32> to vector<1x32xf32>
    %745 = vector.broadcast %744 : vector<1x32xf32> to vector<16x32xf32>
    %746 = arith.addf %742, %745 : vector<16x32xf32>
    %747 = vector.extract_strided_slice %10 {offsets = [0, 192], sizes = [16, 32], strides = [1, 1]} : vector<16x384xf32> to vector<16x32xf32>
    %748 = vector.extract_strided_slice %10 {offsets = [0, 224], sizes = [16, 32], strides = [1, 1]} : vector<16x384xf32> to vector<16x32xf32>
    %749 = vector.shape_cast %746 : vector<16x32xf32> to vector<2x1x8x32xf32>
    %750 = vector.shape_cast %747 : vector<16x32xf32> to vector<1x2x8x32xf32>
    %751 = vector.shape_cast %748 : vector<16x32xf32> to vector<2x8x32xf32>
    %752 = vector.broadcast %749 : vector<2x1x8x32xf32> to vector<2x2x8x32xf32>
    %753 = vector.broadcast %750 : vector<1x2x8x32xf32> to vector<2x2x8x32xf32>
    %754 = arith.mulf %752, %753 : vector<2x2x8x32xf32>
    %755 = vector.shape_cast %754 : vector<2x2x8x32xf32> to vector<32x32xf32>
    %756 = arith.truncf %755 : vector<32x32xf32> to vector<32x32xbf16>
    %cst_276 = arith.constant dense<0.000000e+00> : vector<32x8xf32>
    %757 = tpu.matmul %756, %0, %cst_276 {dimension_numbers = #tpu.dot_dimension_numbers<[1], [0], [0], [1], [0, 0, 1, 1], [], []>} : vector<32x32xbf16>, vector<32x8xbf16>, vector<32x8xf32> -> vector<32x8xf32>
    %758 = vector.shape_cast %757 : vector<32x8xf32> to vector<2x2x8x8xf32>
    %759 = vector.extract_strided_slice %758 {offsets = [0, 0, 0, 0], sizes = [2, 1, 8, 8], strides = [1, 1, 1, 1]} : vector<2x2x8x8xf32> to vector<2x1x8x8xf32>
    %760 = vector.extract_strided_slice %758 {offsets = [0, 1, 0, 0], sizes = [2, 1, 8, 8], strides = [1, 1, 1, 1]} : vector<2x2x8x8xf32> to vector<2x1x8x8xf32>
    %761 = arith.maximumf %759, %760 : vector<2x1x8x8xf32>
    %762 = vector.broadcast %761 : vector<2x1x8x8xf32> to vector<2x2x8x8xf32>
    %763 = arith.subf %758, %762 : vector<2x2x8x8xf32>
    %764 = math.exp %763 : vector<2x2x8x8xf32>
    %765 = vector.extract_strided_slice %764 {offsets = [0, 0, 0, 0], sizes = [2, 1, 8, 8], strides = [1, 1, 1, 1]} : vector<2x2x8x8xf32> to vector<2x1x8x8xf32>
    %766 = vector.extract_strided_slice %764 {offsets = [0, 1, 0, 0], sizes = [2, 1, 8, 8], strides = [1, 1, 1, 1]} : vector<2x2x8x8xf32> to vector<2x1x8x8xf32>
    %767 = arith.addf %765, %766 : vector<2x1x8x8xf32>
    %768 = tpu.reciprocal %767 {approx = true} : vector<2x1x8x8xf32> -> vector<2x1x8x8xf32>
    %769 = vector.broadcast %768 : vector<2x1x8x8xf32> to vector<2x2x8x8xf32>
    %770 = arith.mulf %764, %769 : vector<2x2x8x8xf32>
    %771 = vector.shape_cast %770 : vector<2x2x8x8xf32> to vector<32x8xf32>
    %772 = arith.truncf %771 : vector<32x8xf32> to vector<32x8xbf16>
    %cst_277 = arith.constant dense<0.000000e+00> : vector<32x32xf32>
    %773 = tpu.matmul %772, %1, %cst_277 {dimension_numbers = #tpu.dot_dimension_numbers<[1], [0], [0], [1], [0, 0, 1, 1], [], []>} : vector<32x8xbf16>, vector<8x32xbf16>, vector<32x32xf32> -> vector<32x32xf32>
    %774 = vector.shape_cast %773 : vector<32x32xf32> to vector<2x2x8x32xf32>
    %775 = vector.extract_strided_slice %774 {offsets = [0, 0, 0, 0], sizes = [2, 1, 8, 32], strides = [1, 1, 1, 1]} : vector<2x2x8x32xf32> to vector<2x1x8x32xf32>
    %776 = vector.shape_cast %775 : vector<2x1x8x32xf32> to vector<2x8x32xf32>
    %777 = vector.extract_strided_slice %751 {offsets = [0, 0, 0], sizes = [1, 8, 32], strides = [1, 1, 1]} : vector<2x8x32xf32> to vector<1x8x32xf32>
    %778 = vector.shape_cast %777 : vector<1x8x32xf32> to vector<8x32xf32>
    %779 = vector.shape_cast %778 : vector<8x32xf32> to vector<1x8x32xf32>
    %780 = vector.broadcast %779 : vector<1x8x32xf32> to vector<2x8x32xf32>
    %781 = arith.mulf %776, %780 : vector<2x8x32xf32>
    %782 = vector.extract_strided_slice %774 {offsets = [0, 1, 0, 0], sizes = [2, 1, 8, 32], strides = [1, 1, 1, 1]} : vector<2x2x8x32xf32> to vector<2x1x8x32xf32>
    %783 = vector.shape_cast %782 : vector<2x1x8x32xf32> to vector<2x8x32xf32>
    %784 = vector.extract_strided_slice %751 {offsets = [1, 0, 0], sizes = [1, 8, 32], strides = [1, 1, 1]} : vector<2x8x32xf32> to vector<1x8x32xf32>
    %785 = vector.shape_cast %784 : vector<1x8x32xf32> to vector<8x32xf32>
    %786 = vector.shape_cast %785 : vector<8x32xf32> to vector<1x8x32xf32>
    %787 = vector.broadcast %786 : vector<1x8x32xf32> to vector<2x8x32xf32>
    %788 = arith.mulf %783, %787 : vector<2x8x32xf32>
    %789 = arith.addf %781, %788 : vector<2x8x32xf32>
    %790 = vector.shape_cast %789 : vector<2x8x32xf32> to vector<16x32xf32>
    %c3_278 = arith.constant 3 : index
    %c0_279 = arith.constant 0 : index
    %c0_280 = arith.constant 0 : index
    %791 = vector.load %arg12[%c3_278, %c0_279, %c0_280] : memref<6x32x32xbf16, #tpu.memory_space<vmem>>, vector<1x32x32xbf16>
    %792 = vector.shape_cast %791 : vector<1x32x32xbf16> to vector<32x32xbf16>
    %793 = arith.truncf %790 : vector<16x32xf32> to vector<16x32xbf16>
    %cst_281 = arith.constant dense<0.000000e+00> : vector<16x32xf32>
    %794 = tpu.matmul %793, %792, %cst_281 {dimension_numbers = #tpu.dot_dimension_numbers<[1], [0], [0], [1], [0, 0, 1, 1], [], []>} : vector<16x32xbf16>, vector<32x32xbf16>, vector<16x32xf32> -> vector<16x32xf32>
    %c3_282 = arith.constant 3 : index
    %c0_283 = arith.constant 0 : index
    %c0_284 = arith.constant 0 : index
    %795 = vector.load %arg13[%c3_282, %c0_283, %c0_284] : memref<6x1x32xf32, #tpu.memory_space<vmem>>, vector<1x1x32xf32>
    %796 = vector.shape_cast %795 : vector<1x1x32xf32> to vector<1x32xf32>
    %797 = vector.broadcast %796 : vector<1x32xf32> to vector<16x32xf32>
    %798 = arith.addf %794, %797 : vector<16x32xf32>
    %799 = arith.addf %738, %798 : vector<16x32xf32>
    %c10 = arith.constant 10 : index
    %c0_285 = arith.constant 0 : index
    %c0_286 = arith.constant 0 : index
    %800 = vector.load %arg18[%c10, %c0_285, %c0_286] : memref<18x1x32xf32, #tpu.memory_space<vmem>>, vector<1x1x32xf32>
    %801 = vector.shape_cast %800 : vector<1x1x32xf32> to vector<1x32xf32>
    %c10_287 = arith.constant 10 : index
    %c0_288 = arith.constant 0 : index
    %c0_289 = arith.constant 0 : index
    %802 = vector.load %arg19[%c10_287, %c0_288, %c0_289] : memref<18x1x32xf32, #tpu.memory_space<vmem>>, vector<1x1x32xf32>
    %803 = vector.shape_cast %802 : vector<1x1x32xf32> to vector<1x32xf32>
    %cst_290 = arith.constant dense<0.000000e+00> : vector<16xf32>
    %804 = vector.multi_reduction <add>, %799, %cst_290 [1] : vector<16x32xf32> to vector<16xf32>
    %805 = vector.shape_cast %804 : vector<16xf32> to vector<16x1xf32>
    %cst_291 = arith.constant 3.200000e+01 : f32
    %806 = vector.broadcast %cst_291 : f32 to vector<16x1xf32>
    %807 = arith.divf %805, %806 : vector<16x1xf32>
    %808 = vector.broadcast %807 : vector<16x1xf32> to vector<16x32xf32>
    %809 = arith.subf %799, %808 : vector<16x32xf32>
    %810 = arith.mulf %809, %809 : vector<16x32xf32>
    %cst_292 = arith.constant dense<0.000000e+00> : vector<16xf32>
    %811 = vector.multi_reduction <add>, %810, %cst_292 [1] : vector<16x32xf32> to vector<16xf32>
    %812 = vector.shape_cast %811 : vector<16xf32> to vector<16x1xf32>
    %cst_293 = arith.constant 3.200000e+01 : f32
    %813 = vector.broadcast %cst_293 : f32 to vector<16x1xf32>
    %814 = arith.divf %812, %813 : vector<16x1xf32>
    %cst_294 = arith.constant 9.99999974E-6 : f32
    %815 = vector.broadcast %cst_294 : f32 to vector<16x1xf32>
    %816 = arith.addf %814, %815 : vector<16x1xf32>
    %817 = math.rsqrt %816 : vector<16x1xf32>
    %818 = vector.broadcast %817 : vector<16x1xf32> to vector<16x32xf32>
    %819 = arith.mulf %809, %818 : vector<16x32xf32>
    %820 = vector.broadcast %801 : vector<1x32xf32> to vector<16x32xf32>
    %821 = arith.mulf %819, %820 : vector<16x32xf32>
    %822 = vector.broadcast %803 : vector<1x32xf32> to vector<16x32xf32>
    %823 = arith.addf %821, %822 : vector<16x32xf32>
    %c3_295 = arith.constant 3 : index
    %c0_296 = arith.constant 0 : index
    %c0_297 = arith.constant 0 : index
    %824 = vector.load %arg14[%c3_295, %c0_296, %c0_297] : memref<6x32x256xbf16, #tpu.memory_space<vmem>>, vector<1x32x256xbf16>
    %825 = vector.shape_cast %824 : vector<1x32x256xbf16> to vector<32x256xbf16>
    %826 = arith.truncf %823 : vector<16x32xf32> to vector<16x32xbf16>
    %cst_298 = arith.constant dense<0.000000e+00> : vector<16x256xf32>
    %827 = tpu.matmul %826, %825, %cst_298 {dimension_numbers = #tpu.dot_dimension_numbers<[1], [0], [0], [1], [0, 0, 1, 1], [], []>} : vector<16x32xbf16>, vector<32x256xbf16>, vector<16x256xf32> -> vector<16x256xf32>
    %c3_299 = arith.constant 3 : index
    %c0_300 = arith.constant 0 : index
    %c0_301 = arith.constant 0 : index
    %828 = vector.load %arg15[%c3_299, %c0_300, %c0_301] : memref<6x1x256xf32, #tpu.memory_space<vmem>>, vector<1x1x256xf32>
    %829 = vector.shape_cast %828 : vector<1x1x256xf32> to vector<1x256xf32>
    %830 = vector.broadcast %829 : vector<1x256xf32> to vector<16x256xf32>
    %831 = arith.addf %827, %830 : vector<16x256xf32>
    %cst_302 = arith.constant 0.000000e+00 : f32
    %832 = vector.broadcast %cst_302 : f32 to vector<16x256xf32>
    %833 = arith.maximumf %831, %832 : vector<16x256xf32>
    %c3_303 = arith.constant 3 : index
    %c0_304 = arith.constant 0 : index
    %c0_305 = arith.constant 0 : index
    %834 = vector.load %arg16[%c3_303, %c0_304, %c0_305] : memref<6x256x32xbf16, #tpu.memory_space<vmem>>, vector<1x256x32xbf16>
    %835 = vector.shape_cast %834 : vector<1x256x32xbf16> to vector<256x32xbf16>
    %836 = arith.truncf %833 : vector<16x256xf32> to vector<16x256xbf16>
    %cst_306 = arith.constant dense<0.000000e+00> : vector<16x32xf32>
    %837 = tpu.matmul %836, %835, %cst_306 {dimension_numbers = #tpu.dot_dimension_numbers<[1], [0], [0], [1], [0, 0, 1, 1], [], []>} : vector<16x256xbf16>, vector<256x32xbf16>, vector<16x32xf32> -> vector<16x32xf32>
    %c3_307 = arith.constant 3 : index
    %c0_308 = arith.constant 0 : index
    %c0_309 = arith.constant 0 : index
    %838 = vector.load %arg17[%c3_307, %c0_308, %c0_309] : memref<6x1x32xf32, #tpu.memory_space<vmem>>, vector<1x1x32xf32>
    %839 = vector.shape_cast %838 : vector<1x1x32xf32> to vector<1x32xf32>
    %840 = vector.broadcast %839 : vector<1x32xf32> to vector<16x32xf32>
    %841 = arith.addf %837, %840 : vector<16x32xf32>
    %842 = arith.addf %823, %841 : vector<16x32xf32>
    %c11 = arith.constant 11 : index
    %c0_310 = arith.constant 0 : index
    %c0_311 = arith.constant 0 : index
    %843 = vector.load %arg18[%c11, %c0_310, %c0_311] : memref<18x1x32xf32, #tpu.memory_space<vmem>>, vector<1x1x32xf32>
    %844 = vector.shape_cast %843 : vector<1x1x32xf32> to vector<1x32xf32>
    %c11_312 = arith.constant 11 : index
    %c0_313 = arith.constant 0 : index
    %c0_314 = arith.constant 0 : index
    %845 = vector.load %arg19[%c11_312, %c0_313, %c0_314] : memref<18x1x32xf32, #tpu.memory_space<vmem>>, vector<1x1x32xf32>
    %846 = vector.shape_cast %845 : vector<1x1x32xf32> to vector<1x32xf32>
    %cst_315 = arith.constant dense<0.000000e+00> : vector<16xf32>
    %847 = vector.multi_reduction <add>, %842, %cst_315 [1] : vector<16x32xf32> to vector<16xf32>
    %848 = vector.shape_cast %847 : vector<16xf32> to vector<16x1xf32>
    %cst_316 = arith.constant 3.200000e+01 : f32
    %849 = vector.broadcast %cst_316 : f32 to vector<16x1xf32>
    %850 = arith.divf %848, %849 : vector<16x1xf32>
    %851 = vector.broadcast %850 : vector<16x1xf32> to vector<16x32xf32>
    %852 = arith.subf %842, %851 : vector<16x32xf32>
    %853 = arith.mulf %852, %852 : vector<16x32xf32>
    %cst_317 = arith.constant dense<0.000000e+00> : vector<16xf32>
    %854 = vector.multi_reduction <add>, %853, %cst_317 [1] : vector<16x32xf32> to vector<16xf32>
    %855 = vector.shape_cast %854 : vector<16xf32> to vector<16x1xf32>
    %cst_318 = arith.constant 3.200000e+01 : f32
    %856 = vector.broadcast %cst_318 : f32 to vector<16x1xf32>
    %857 = arith.divf %855, %856 : vector<16x1xf32>
    %cst_319 = arith.constant 9.99999974E-6 : f32
    %858 = vector.broadcast %cst_319 : f32 to vector<16x1xf32>
    %859 = arith.addf %857, %858 : vector<16x1xf32>
    %860 = math.rsqrt %859 : vector<16x1xf32>
    %861 = vector.broadcast %860 : vector<16x1xf32> to vector<16x32xf32>
    %862 = arith.mulf %852, %861 : vector<16x32xf32>
    %863 = vector.broadcast %844 : vector<1x32xf32> to vector<16x32xf32>
    %864 = arith.mulf %862, %863 : vector<16x32xf32>
    %865 = vector.broadcast %846 : vector<1x32xf32> to vector<16x32xf32>
    %866 = arith.addf %864, %865 : vector<16x32xf32>
    %c4_320 = arith.constant 4 : index
    %c0_321 = arith.constant 0 : index
    %c0_322 = arith.constant 0 : index
    %867 = vector.load %arg4[%c4_320, %c0_321, %c0_322] : memref<6x32x96xbf16, #tpu.memory_space<vmem>>, vector<1x32x96xbf16>
    %868 = vector.shape_cast %867 : vector<1x32x96xbf16> to vector<32x96xbf16>
    %869 = arith.truncf %866 : vector<16x32xf32> to vector<16x32xbf16>
    %cst_323 = arith.constant dense<0.000000e+00> : vector<16x96xf32>
    %870 = tpu.matmul %869, %868, %cst_323 {dimension_numbers = #tpu.dot_dimension_numbers<[1], [0], [0], [1], [0, 0, 1, 1], [], []>} : vector<16x32xbf16>, vector<32x96xbf16>, vector<16x96xf32> -> vector<16x96xf32>
    %c4_324 = arith.constant 4 : index
    %c0_325 = arith.constant 0 : index
    %c0_326 = arith.constant 0 : index
    %871 = vector.load %arg5[%c4_324, %c0_325, %c0_326] : memref<6x1x96xf32, #tpu.memory_space<vmem>>, vector<1x1x96xf32>
    %872 = vector.shape_cast %871 : vector<1x1x96xf32> to vector<1x96xf32>
    %873 = vector.broadcast %872 : vector<1x96xf32> to vector<16x96xf32>
    %874 = arith.addf %870, %873 : vector<16x96xf32>
    %875 = vector.extract_strided_slice %874 {offsets = [0, 0], sizes = [16, 32], strides = [1, 1]} : vector<16x96xf32> to vector<16x32xf32>
    %876 = vector.extract_strided_slice %874 {offsets = [0, 32], sizes = [16, 32], strides = [1, 1]} : vector<16x96xf32> to vector<16x32xf32>
    %877 = vector.extract_strided_slice %874 {offsets = [0, 64], sizes = [16, 32], strides = [1, 1]} : vector<16x96xf32> to vector<16x32xf32>
    %878 = vector.shape_cast %875 : vector<16x32xf32> to vector<2x1x8x32xf32>
    %879 = vector.shape_cast %876 : vector<16x32xf32> to vector<1x2x8x32xf32>
    %880 = vector.shape_cast %877 : vector<16x32xf32> to vector<2x8x32xf32>
    %881 = vector.broadcast %878 : vector<2x1x8x32xf32> to vector<2x2x8x32xf32>
    %882 = vector.broadcast %879 : vector<1x2x8x32xf32> to vector<2x2x8x32xf32>
    %883 = arith.mulf %881, %882 : vector<2x2x8x32xf32>
    %884 = vector.shape_cast %883 : vector<2x2x8x32xf32> to vector<32x32xf32>
    %885 = arith.truncf %884 : vector<32x32xf32> to vector<32x32xbf16>
    %cst_327 = arith.constant dense<0.000000e+00> : vector<32x8xf32>
    %886 = tpu.matmul %885, %0, %cst_327 {dimension_numbers = #tpu.dot_dimension_numbers<[1], [0], [0], [1], [0, 0, 1, 1], [], []>} : vector<32x32xbf16>, vector<32x8xbf16>, vector<32x8xf32> -> vector<32x8xf32>
    %887 = vector.shape_cast %886 : vector<32x8xf32> to vector<2x2x8x8xf32>
    %888 = vector.extract_strided_slice %887 {offsets = [0, 0, 0, 0], sizes = [2, 1, 8, 8], strides = [1, 1, 1, 1]} : vector<2x2x8x8xf32> to vector<2x1x8x8xf32>
    %889 = vector.extract_strided_slice %887 {offsets = [0, 1, 0, 0], sizes = [2, 1, 8, 8], strides = [1, 1, 1, 1]} : vector<2x2x8x8xf32> to vector<2x1x8x8xf32>
    %890 = arith.maximumf %888, %889 : vector<2x1x8x8xf32>
    %891 = vector.broadcast %890 : vector<2x1x8x8xf32> to vector<2x2x8x8xf32>
    %892 = arith.subf %887, %891 : vector<2x2x8x8xf32>
    %893 = math.exp %892 : vector<2x2x8x8xf32>
    %894 = vector.extract_strided_slice %893 {offsets = [0, 0, 0, 0], sizes = [2, 1, 8, 8], strides = [1, 1, 1, 1]} : vector<2x2x8x8xf32> to vector<2x1x8x8xf32>
    %895 = vector.extract_strided_slice %893 {offsets = [0, 1, 0, 0], sizes = [2, 1, 8, 8], strides = [1, 1, 1, 1]} : vector<2x2x8x8xf32> to vector<2x1x8x8xf32>
    %896 = arith.addf %894, %895 : vector<2x1x8x8xf32>
    %897 = tpu.reciprocal %896 {approx = true} : vector<2x1x8x8xf32> -> vector<2x1x8x8xf32>
    %898 = vector.broadcast %897 : vector<2x1x8x8xf32> to vector<2x2x8x8xf32>
    %899 = arith.mulf %893, %898 : vector<2x2x8x8xf32>
    %900 = vector.shape_cast %899 : vector<2x2x8x8xf32> to vector<32x8xf32>
    %901 = arith.truncf %900 : vector<32x8xf32> to vector<32x8xbf16>
    %cst_328 = arith.constant dense<0.000000e+00> : vector<32x32xf32>
    %902 = tpu.matmul %901, %1, %cst_328 {dimension_numbers = #tpu.dot_dimension_numbers<[1], [0], [0], [1], [0, 0, 1, 1], [], []>} : vector<32x8xbf16>, vector<8x32xbf16>, vector<32x32xf32> -> vector<32x32xf32>
    %903 = vector.shape_cast %902 : vector<32x32xf32> to vector<2x2x8x32xf32>
    %904 = vector.extract_strided_slice %903 {offsets = [0, 0, 0, 0], sizes = [2, 1, 8, 32], strides = [1, 1, 1, 1]} : vector<2x2x8x32xf32> to vector<2x1x8x32xf32>
    %905 = vector.shape_cast %904 : vector<2x1x8x32xf32> to vector<2x8x32xf32>
    %906 = vector.extract_strided_slice %880 {offsets = [0, 0, 0], sizes = [1, 8, 32], strides = [1, 1, 1]} : vector<2x8x32xf32> to vector<1x8x32xf32>
    %907 = vector.shape_cast %906 : vector<1x8x32xf32> to vector<8x32xf32>
    %908 = vector.shape_cast %907 : vector<8x32xf32> to vector<1x8x32xf32>
    %909 = vector.broadcast %908 : vector<1x8x32xf32> to vector<2x8x32xf32>
    %910 = arith.mulf %905, %909 : vector<2x8x32xf32>
    %911 = vector.extract_strided_slice %903 {offsets = [0, 1, 0, 0], sizes = [2, 1, 8, 32], strides = [1, 1, 1, 1]} : vector<2x2x8x32xf32> to vector<2x1x8x32xf32>
    %912 = vector.shape_cast %911 : vector<2x1x8x32xf32> to vector<2x8x32xf32>
    %913 = vector.extract_strided_slice %880 {offsets = [1, 0, 0], sizes = [1, 8, 32], strides = [1, 1, 1]} : vector<2x8x32xf32> to vector<1x8x32xf32>
    %914 = vector.shape_cast %913 : vector<1x8x32xf32> to vector<8x32xf32>
    %915 = vector.shape_cast %914 : vector<8x32xf32> to vector<1x8x32xf32>
    %916 = vector.broadcast %915 : vector<1x8x32xf32> to vector<2x8x32xf32>
    %917 = arith.mulf %912, %916 : vector<2x8x32xf32>
    %918 = arith.addf %910, %917 : vector<2x8x32xf32>
    %919 = vector.shape_cast %918 : vector<2x8x32xf32> to vector<16x32xf32>
    %c4_329 = arith.constant 4 : index
    %c0_330 = arith.constant 0 : index
    %c0_331 = arith.constant 0 : index
    %920 = vector.load %arg6[%c4_329, %c0_330, %c0_331] : memref<6x32x32xbf16, #tpu.memory_space<vmem>>, vector<1x32x32xbf16>
    %921 = vector.shape_cast %920 : vector<1x32x32xbf16> to vector<32x32xbf16>
    %922 = arith.truncf %919 : vector<16x32xf32> to vector<16x32xbf16>
    %cst_332 = arith.constant dense<0.000000e+00> : vector<16x32xf32>
    %923 = tpu.matmul %922, %921, %cst_332 {dimension_numbers = #tpu.dot_dimension_numbers<[1], [0], [0], [1], [0, 0, 1, 1], [], []>} : vector<16x32xbf16>, vector<32x32xbf16>, vector<16x32xf32> -> vector<16x32xf32>
    %c4_333 = arith.constant 4 : index
    %c0_334 = arith.constant 0 : index
    %c0_335 = arith.constant 0 : index
    %924 = vector.load %arg7[%c4_333, %c0_334, %c0_335] : memref<6x1x32xf32, #tpu.memory_space<vmem>>, vector<1x1x32xf32>
    %925 = vector.shape_cast %924 : vector<1x1x32xf32> to vector<1x32xf32>
    %926 = vector.broadcast %925 : vector<1x32xf32> to vector<16x32xf32>
    %927 = arith.addf %923, %926 : vector<16x32xf32>
    %928 = arith.addf %866, %927 : vector<16x32xf32>
    %c12 = arith.constant 12 : index
    %c0_336 = arith.constant 0 : index
    %c0_337 = arith.constant 0 : index
    %929 = vector.load %arg18[%c12, %c0_336, %c0_337] : memref<18x1x32xf32, #tpu.memory_space<vmem>>, vector<1x1x32xf32>
    %930 = vector.shape_cast %929 : vector<1x1x32xf32> to vector<1x32xf32>
    %c12_338 = arith.constant 12 : index
    %c0_339 = arith.constant 0 : index
    %c0_340 = arith.constant 0 : index
    %931 = vector.load %arg19[%c12_338, %c0_339, %c0_340] : memref<18x1x32xf32, #tpu.memory_space<vmem>>, vector<1x1x32xf32>
    %932 = vector.shape_cast %931 : vector<1x1x32xf32> to vector<1x32xf32>
    %cst_341 = arith.constant dense<0.000000e+00> : vector<16xf32>
    %933 = vector.multi_reduction <add>, %928, %cst_341 [1] : vector<16x32xf32> to vector<16xf32>
    %934 = vector.shape_cast %933 : vector<16xf32> to vector<16x1xf32>
    %cst_342 = arith.constant 3.200000e+01 : f32
    %935 = vector.broadcast %cst_342 : f32 to vector<16x1xf32>
    %936 = arith.divf %934, %935 : vector<16x1xf32>
    %937 = vector.broadcast %936 : vector<16x1xf32> to vector<16x32xf32>
    %938 = arith.subf %928, %937 : vector<16x32xf32>
    %939 = arith.mulf %938, %938 : vector<16x32xf32>
    %cst_343 = arith.constant dense<0.000000e+00> : vector<16xf32>
    %940 = vector.multi_reduction <add>, %939, %cst_343 [1] : vector<16x32xf32> to vector<16xf32>
    %941 = vector.shape_cast %940 : vector<16xf32> to vector<16x1xf32>
    %cst_344 = arith.constant 3.200000e+01 : f32
    %942 = vector.broadcast %cst_344 : f32 to vector<16x1xf32>
    %943 = arith.divf %941, %942 : vector<16x1xf32>
    %cst_345 = arith.constant 9.99999974E-6 : f32
    %944 = vector.broadcast %cst_345 : f32 to vector<16x1xf32>
    %945 = arith.addf %943, %944 : vector<16x1xf32>
    %946 = math.rsqrt %945 : vector<16x1xf32>
    %947 = vector.broadcast %946 : vector<16x1xf32> to vector<16x32xf32>
    %948 = arith.mulf %938, %947 : vector<16x32xf32>
    %949 = vector.broadcast %930 : vector<1x32xf32> to vector<16x32xf32>
    %950 = arith.mulf %948, %949 : vector<16x32xf32>
    %951 = vector.broadcast %932 : vector<1x32xf32> to vector<16x32xf32>
    %952 = arith.addf %950, %951 : vector<16x32xf32>
    %c4_346 = arith.constant 4 : index
    %c0_347 = arith.constant 0 : index
    %c0_348 = arith.constant 0 : index
    %953 = vector.load %arg8[%c4_346, %c0_347, %c0_348] : memref<6x32x32xbf16, #tpu.memory_space<vmem>>, vector<1x32x32xbf16>
    %954 = vector.shape_cast %953 : vector<1x32x32xbf16> to vector<32x32xbf16>
    %955 = arith.truncf %952 : vector<16x32xf32> to vector<16x32xbf16>
    %cst_349 = arith.constant dense<0.000000e+00> : vector<16x32xf32>
    %956 = tpu.matmul %955, %954, %cst_349 {dimension_numbers = #tpu.dot_dimension_numbers<[1], [0], [0], [1], [0, 0, 1, 1], [], []>} : vector<16x32xbf16>, vector<32x32xbf16>, vector<16x32xf32> -> vector<16x32xf32>
    %c4_350 = arith.constant 4 : index
    %c0_351 = arith.constant 0 : index
    %c0_352 = arith.constant 0 : index
    %957 = vector.load %arg9[%c4_350, %c0_351, %c0_352] : memref<6x1x32xf32, #tpu.memory_space<vmem>>, vector<1x1x32xf32>
    %958 = vector.shape_cast %957 : vector<1x1x32xf32> to vector<1x32xf32>
    %959 = vector.broadcast %958 : vector<1x32xf32> to vector<16x32xf32>
    %960 = arith.addf %956, %959 : vector<16x32xf32>
    %961 = vector.extract_strided_slice %10 {offsets = [0, 256], sizes = [16, 32], strides = [1, 1]} : vector<16x384xf32> to vector<16x32xf32>
    %962 = vector.extract_strided_slice %10 {offsets = [0, 288], sizes = [16, 32], strides = [1, 1]} : vector<16x384xf32> to vector<16x32xf32>
    %963 = vector.shape_cast %960 : vector<16x32xf32> to vector<2x1x8x32xf32>
    %964 = vector.shape_cast %961 : vector<16x32xf32> to vector<1x2x8x32xf32>
    %965 = vector.shape_cast %962 : vector<16x32xf32> to vector<2x8x32xf32>
    %966 = vector.broadcast %963 : vector<2x1x8x32xf32> to vector<2x2x8x32xf32>
    %967 = vector.broadcast %964 : vector<1x2x8x32xf32> to vector<2x2x8x32xf32>
    %968 = arith.mulf %966, %967 : vector<2x2x8x32xf32>
    %969 = vector.shape_cast %968 : vector<2x2x8x32xf32> to vector<32x32xf32>
    %970 = arith.truncf %969 : vector<32x32xf32> to vector<32x32xbf16>
    %cst_353 = arith.constant dense<0.000000e+00> : vector<32x8xf32>
    %971 = tpu.matmul %970, %0, %cst_353 {dimension_numbers = #tpu.dot_dimension_numbers<[1], [0], [0], [1], [0, 0, 1, 1], [], []>} : vector<32x32xbf16>, vector<32x8xbf16>, vector<32x8xf32> -> vector<32x8xf32>
    %972 = vector.shape_cast %971 : vector<32x8xf32> to vector<2x2x8x8xf32>
    %973 = vector.extract_strided_slice %972 {offsets = [0, 0, 0, 0], sizes = [2, 1, 8, 8], strides = [1, 1, 1, 1]} : vector<2x2x8x8xf32> to vector<2x1x8x8xf32>
    %974 = vector.extract_strided_slice %972 {offsets = [0, 1, 0, 0], sizes = [2, 1, 8, 8], strides = [1, 1, 1, 1]} : vector<2x2x8x8xf32> to vector<2x1x8x8xf32>
    %975 = arith.maximumf %973, %974 : vector<2x1x8x8xf32>
    %976 = vector.broadcast %975 : vector<2x1x8x8xf32> to vector<2x2x8x8xf32>
    %977 = arith.subf %972, %976 : vector<2x2x8x8xf32>
    %978 = math.exp %977 : vector<2x2x8x8xf32>
    %979 = vector.extract_strided_slice %978 {offsets = [0, 0, 0, 0], sizes = [2, 1, 8, 8], strides = [1, 1, 1, 1]} : vector<2x2x8x8xf32> to vector<2x1x8x8xf32>
    %980 = vector.extract_strided_slice %978 {offsets = [0, 1, 0, 0], sizes = [2, 1, 8, 8], strides = [1, 1, 1, 1]} : vector<2x2x8x8xf32> to vector<2x1x8x8xf32>
    %981 = arith.addf %979, %980 : vector<2x1x8x8xf32>
    %982 = tpu.reciprocal %981 {approx = true} : vector<2x1x8x8xf32> -> vector<2x1x8x8xf32>
    %983 = vector.broadcast %982 : vector<2x1x8x8xf32> to vector<2x2x8x8xf32>
    %984 = arith.mulf %978, %983 : vector<2x2x8x8xf32>
    %985 = vector.shape_cast %984 : vector<2x2x8x8xf32> to vector<32x8xf32>
    %986 = arith.truncf %985 : vector<32x8xf32> to vector<32x8xbf16>
    %cst_354 = arith.constant dense<0.000000e+00> : vector<32x32xf32>
    %987 = tpu.matmul %986, %1, %cst_354 {dimension_numbers = #tpu.dot_dimension_numbers<[1], [0], [0], [1], [0, 0, 1, 1], [], []>} : vector<32x8xbf16>, vector<8x32xbf16>, vector<32x32xf32> -> vector<32x32xf32>
    %988 = vector.shape_cast %987 : vector<32x32xf32> to vector<2x2x8x32xf32>
    %989 = vector.extract_strided_slice %988 {offsets = [0, 0, 0, 0], sizes = [2, 1, 8, 32], strides = [1, 1, 1, 1]} : vector<2x2x8x32xf32> to vector<2x1x8x32xf32>
    %990 = vector.shape_cast %989 : vector<2x1x8x32xf32> to vector<2x8x32xf32>
    %991 = vector.extract_strided_slice %965 {offsets = [0, 0, 0], sizes = [1, 8, 32], strides = [1, 1, 1]} : vector<2x8x32xf32> to vector<1x8x32xf32>
    %992 = vector.shape_cast %991 : vector<1x8x32xf32> to vector<8x32xf32>
    %993 = vector.shape_cast %992 : vector<8x32xf32> to vector<1x8x32xf32>
    %994 = vector.broadcast %993 : vector<1x8x32xf32> to vector<2x8x32xf32>
    %995 = arith.mulf %990, %994 : vector<2x8x32xf32>
    %996 = vector.extract_strided_slice %988 {offsets = [0, 1, 0, 0], sizes = [2, 1, 8, 32], strides = [1, 1, 1, 1]} : vector<2x2x8x32xf32> to vector<2x1x8x32xf32>
    %997 = vector.shape_cast %996 : vector<2x1x8x32xf32> to vector<2x8x32xf32>
    %998 = vector.extract_strided_slice %965 {offsets = [1, 0, 0], sizes = [1, 8, 32], strides = [1, 1, 1]} : vector<2x8x32xf32> to vector<1x8x32xf32>
    %999 = vector.shape_cast %998 : vector<1x8x32xf32> to vector<8x32xf32>
    %1000 = vector.shape_cast %999 : vector<8x32xf32> to vector<1x8x32xf32>
    %1001 = vector.broadcast %1000 : vector<1x8x32xf32> to vector<2x8x32xf32>
    %1002 = arith.mulf %997, %1001 : vector<2x8x32xf32>
    %1003 = arith.addf %995, %1002 : vector<2x8x32xf32>
    %1004 = vector.shape_cast %1003 : vector<2x8x32xf32> to vector<16x32xf32>
    %c4_355 = arith.constant 4 : index
    %c0_356 = arith.constant 0 : index
    %c0_357 = arith.constant 0 : index
    %1005 = vector.load %arg12[%c4_355, %c0_356, %c0_357] : memref<6x32x32xbf16, #tpu.memory_space<vmem>>, vector<1x32x32xbf16>
    %1006 = vector.shape_cast %1005 : vector<1x32x32xbf16> to vector<32x32xbf16>
    %1007 = arith.truncf %1004 : vector<16x32xf32> to vector<16x32xbf16>
    %cst_358 = arith.constant dense<0.000000e+00> : vector<16x32xf32>
    %1008 = tpu.matmul %1007, %1006, %cst_358 {dimension_numbers = #tpu.dot_dimension_numbers<[1], [0], [0], [1], [0, 0, 1, 1], [], []>} : vector<16x32xbf16>, vector<32x32xbf16>, vector<16x32xf32> -> vector<16x32xf32>
    %c4_359 = arith.constant 4 : index
    %c0_360 = arith.constant 0 : index
    %c0_361 = arith.constant 0 : index
    %1009 = vector.load %arg13[%c4_359, %c0_360, %c0_361] : memref<6x1x32xf32, #tpu.memory_space<vmem>>, vector<1x1x32xf32>
    %1010 = vector.shape_cast %1009 : vector<1x1x32xf32> to vector<1x32xf32>
    %1011 = vector.broadcast %1010 : vector<1x32xf32> to vector<16x32xf32>
    %1012 = arith.addf %1008, %1011 : vector<16x32xf32>
    %1013 = arith.addf %952, %1012 : vector<16x32xf32>
    %c13 = arith.constant 13 : index
    %c0_362 = arith.constant 0 : index
    %c0_363 = arith.constant 0 : index
    %1014 = vector.load %arg18[%c13, %c0_362, %c0_363] : memref<18x1x32xf32, #tpu.memory_space<vmem>>, vector<1x1x32xf32>
    %1015 = vector.shape_cast %1014 : vector<1x1x32xf32> to vector<1x32xf32>
    %c13_364 = arith.constant 13 : index
    %c0_365 = arith.constant 0 : index
    %c0_366 = arith.constant 0 : index
    %1016 = vector.load %arg19[%c13_364, %c0_365, %c0_366] : memref<18x1x32xf32, #tpu.memory_space<vmem>>, vector<1x1x32xf32>
    %1017 = vector.shape_cast %1016 : vector<1x1x32xf32> to vector<1x32xf32>
    %cst_367 = arith.constant dense<0.000000e+00> : vector<16xf32>
    %1018 = vector.multi_reduction <add>, %1013, %cst_367 [1] : vector<16x32xf32> to vector<16xf32>
    %1019 = vector.shape_cast %1018 : vector<16xf32> to vector<16x1xf32>
    %cst_368 = arith.constant 3.200000e+01 : f32
    %1020 = vector.broadcast %cst_368 : f32 to vector<16x1xf32>
    %1021 = arith.divf %1019, %1020 : vector<16x1xf32>
    %1022 = vector.broadcast %1021 : vector<16x1xf32> to vector<16x32xf32>
    %1023 = arith.subf %1013, %1022 : vector<16x32xf32>
    %1024 = arith.mulf %1023, %1023 : vector<16x32xf32>
    %cst_369 = arith.constant dense<0.000000e+00> : vector<16xf32>
    %1025 = vector.multi_reduction <add>, %1024, %cst_369 [1] : vector<16x32xf32> to vector<16xf32>
    %1026 = vector.shape_cast %1025 : vector<16xf32> to vector<16x1xf32>
    %cst_370 = arith.constant 3.200000e+01 : f32
    %1027 = vector.broadcast %cst_370 : f32 to vector<16x1xf32>
    %1028 = arith.divf %1026, %1027 : vector<16x1xf32>
    %cst_371 = arith.constant 9.99999974E-6 : f32
    %1029 = vector.broadcast %cst_371 : f32 to vector<16x1xf32>
    %1030 = arith.addf %1028, %1029 : vector<16x1xf32>
    %1031 = math.rsqrt %1030 : vector<16x1xf32>
    %1032 = vector.broadcast %1031 : vector<16x1xf32> to vector<16x32xf32>
    %1033 = arith.mulf %1023, %1032 : vector<16x32xf32>
    %1034 = vector.broadcast %1015 : vector<1x32xf32> to vector<16x32xf32>
    %1035 = arith.mulf %1033, %1034 : vector<16x32xf32>
    %1036 = vector.broadcast %1017 : vector<1x32xf32> to vector<16x32xf32>
    %1037 = arith.addf %1035, %1036 : vector<16x32xf32>
    %c4_372 = arith.constant 4 : index
    %c0_373 = arith.constant 0 : index
    %c0_374 = arith.constant 0 : index
    %1038 = vector.load %arg14[%c4_372, %c0_373, %c0_374] : memref<6x32x256xbf16, #tpu.memory_space<vmem>>, vector<1x32x256xbf16>
    %1039 = vector.shape_cast %1038 : vector<1x32x256xbf16> to vector<32x256xbf16>
    %1040 = arith.truncf %1037 : vector<16x32xf32> to vector<16x32xbf16>
    %cst_375 = arith.constant dense<0.000000e+00> : vector<16x256xf32>
    %1041 = tpu.matmul %1040, %1039, %cst_375 {dimension_numbers = #tpu.dot_dimension_numbers<[1], [0], [0], [1], [0, 0, 1, 1], [], []>} : vector<16x32xbf16>, vector<32x256xbf16>, vector<16x256xf32> -> vector<16x256xf32>
    %c4_376 = arith.constant 4 : index
    %c0_377 = arith.constant 0 : index
    %c0_378 = arith.constant 0 : index
    %1042 = vector.load %arg15[%c4_376, %c0_377, %c0_378] : memref<6x1x256xf32, #tpu.memory_space<vmem>>, vector<1x1x256xf32>
    %1043 = vector.shape_cast %1042 : vector<1x1x256xf32> to vector<1x256xf32>
    %1044 = vector.broadcast %1043 : vector<1x256xf32> to vector<16x256xf32>
    %1045 = arith.addf %1041, %1044 : vector<16x256xf32>
    %cst_379 = arith.constant 0.000000e+00 : f32
    %1046 = vector.broadcast %cst_379 : f32 to vector<16x256xf32>
    %1047 = arith.maximumf %1045, %1046 : vector<16x256xf32>
    %c4_380 = arith.constant 4 : index
    %c0_381 = arith.constant 0 : index
    %c0_382 = arith.constant 0 : index
    %1048 = vector.load %arg16[%c4_380, %c0_381, %c0_382] : memref<6x256x32xbf16, #tpu.memory_space<vmem>>, vector<1x256x32xbf16>
    %1049 = vector.shape_cast %1048 : vector<1x256x32xbf16> to vector<256x32xbf16>
    %1050 = arith.truncf %1047 : vector<16x256xf32> to vector<16x256xbf16>
    %cst_383 = arith.constant dense<0.000000e+00> : vector<16x32xf32>
    %1051 = tpu.matmul %1050, %1049, %cst_383 {dimension_numbers = #tpu.dot_dimension_numbers<[1], [0], [0], [1], [0, 0, 1, 1], [], []>} : vector<16x256xbf16>, vector<256x32xbf16>, vector<16x32xf32> -> vector<16x32xf32>
    %c4_384 = arith.constant 4 : index
    %c0_385 = arith.constant 0 : index
    %c0_386 = arith.constant 0 : index
    %1052 = vector.load %arg17[%c4_384, %c0_385, %c0_386] : memref<6x1x32xf32, #tpu.memory_space<vmem>>, vector<1x1x32xf32>
    %1053 = vector.shape_cast %1052 : vector<1x1x32xf32> to vector<1x32xf32>
    %1054 = vector.broadcast %1053 : vector<1x32xf32> to vector<16x32xf32>
    %1055 = arith.addf %1051, %1054 : vector<16x32xf32>
    %1056 = arith.addf %1037, %1055 : vector<16x32xf32>
    %c14 = arith.constant 14 : index
    %c0_387 = arith.constant 0 : index
    %c0_388 = arith.constant 0 : index
    %1057 = vector.load %arg18[%c14, %c0_387, %c0_388] : memref<18x1x32xf32, #tpu.memory_space<vmem>>, vector<1x1x32xf32>
    %1058 = vector.shape_cast %1057 : vector<1x1x32xf32> to vector<1x32xf32>
    %c14_389 = arith.constant 14 : index
    %c0_390 = arith.constant 0 : index
    %c0_391 = arith.constant 0 : index
    %1059 = vector.load %arg19[%c14_389, %c0_390, %c0_391] : memref<18x1x32xf32, #tpu.memory_space<vmem>>, vector<1x1x32xf32>
    %1060 = vector.shape_cast %1059 : vector<1x1x32xf32> to vector<1x32xf32>
    %cst_392 = arith.constant dense<0.000000e+00> : vector<16xf32>
    %1061 = vector.multi_reduction <add>, %1056, %cst_392 [1] : vector<16x32xf32> to vector<16xf32>
    %1062 = vector.shape_cast %1061 : vector<16xf32> to vector<16x1xf32>
    %cst_393 = arith.constant 3.200000e+01 : f32
    %1063 = vector.broadcast %cst_393 : f32 to vector<16x1xf32>
    %1064 = arith.divf %1062, %1063 : vector<16x1xf32>
    %1065 = vector.broadcast %1064 : vector<16x1xf32> to vector<16x32xf32>
    %1066 = arith.subf %1056, %1065 : vector<16x32xf32>
    %1067 = arith.mulf %1066, %1066 : vector<16x32xf32>
    %cst_394 = arith.constant dense<0.000000e+00> : vector<16xf32>
    %1068 = vector.multi_reduction <add>, %1067, %cst_394 [1] : vector<16x32xf32> to vector<16xf32>
    %1069 = vector.shape_cast %1068 : vector<16xf32> to vector<16x1xf32>
    %cst_395 = arith.constant 3.200000e+01 : f32
    %1070 = vector.broadcast %cst_395 : f32 to vector<16x1xf32>
    %1071 = arith.divf %1069, %1070 : vector<16x1xf32>
    %cst_396 = arith.constant 9.99999974E-6 : f32
    %1072 = vector.broadcast %cst_396 : f32 to vector<16x1xf32>
    %1073 = arith.addf %1071, %1072 : vector<16x1xf32>
    %1074 = math.rsqrt %1073 : vector<16x1xf32>
    %1075 = vector.broadcast %1074 : vector<16x1xf32> to vector<16x32xf32>
    %1076 = arith.mulf %1066, %1075 : vector<16x32xf32>
    %1077 = vector.broadcast %1058 : vector<1x32xf32> to vector<16x32xf32>
    %1078 = arith.mulf %1076, %1077 : vector<16x32xf32>
    %1079 = vector.broadcast %1060 : vector<1x32xf32> to vector<16x32xf32>
    %1080 = arith.addf %1078, %1079 : vector<16x32xf32>
    %c5_397 = arith.constant 5 : index
    %c0_398 = arith.constant 0 : index
    %c0_399 = arith.constant 0 : index
    %1081 = vector.load %arg4[%c5_397, %c0_398, %c0_399] : memref<6x32x96xbf16, #tpu.memory_space<vmem>>, vector<1x32x96xbf16>
    %1082 = vector.shape_cast %1081 : vector<1x32x96xbf16> to vector<32x96xbf16>
    %1083 = arith.truncf %1080 : vector<16x32xf32> to vector<16x32xbf16>
    %cst_400 = arith.constant dense<0.000000e+00> : vector<16x96xf32>
    %1084 = tpu.matmul %1083, %1082, %cst_400 {dimension_numbers = #tpu.dot_dimension_numbers<[1], [0], [0], [1], [0, 0, 1, 1], [], []>} : vector<16x32xbf16>, vector<32x96xbf16>, vector<16x96xf32> -> vector<16x96xf32>
    %c5_401 = arith.constant 5 : index
    %c0_402 = arith.constant 0 : index
    %c0_403 = arith.constant 0 : index
    %1085 = vector.load %arg5[%c5_401, %c0_402, %c0_403] : memref<6x1x96xf32, #tpu.memory_space<vmem>>, vector<1x1x96xf32>
    %1086 = vector.shape_cast %1085 : vector<1x1x96xf32> to vector<1x96xf32>
    %1087 = vector.broadcast %1086 : vector<1x96xf32> to vector<16x96xf32>
    %1088 = arith.addf %1084, %1087 : vector<16x96xf32>
    %1089 = vector.extract_strided_slice %1088 {offsets = [0, 0], sizes = [16, 32], strides = [1, 1]} : vector<16x96xf32> to vector<16x32xf32>
    %1090 = vector.extract_strided_slice %1088 {offsets = [0, 32], sizes = [16, 32], strides = [1, 1]} : vector<16x96xf32> to vector<16x32xf32>
    %1091 = vector.extract_strided_slice %1088 {offsets = [0, 64], sizes = [16, 32], strides = [1, 1]} : vector<16x96xf32> to vector<16x32xf32>
    %1092 = vector.shape_cast %1089 : vector<16x32xf32> to vector<2x1x8x32xf32>
    %1093 = vector.shape_cast %1090 : vector<16x32xf32> to vector<1x2x8x32xf32>
    %1094 = vector.shape_cast %1091 : vector<16x32xf32> to vector<2x8x32xf32>
    %1095 = vector.broadcast %1092 : vector<2x1x8x32xf32> to vector<2x2x8x32xf32>
    %1096 = vector.broadcast %1093 : vector<1x2x8x32xf32> to vector<2x2x8x32xf32>
    %1097 = arith.mulf %1095, %1096 : vector<2x2x8x32xf32>
    %1098 = vector.shape_cast %1097 : vector<2x2x8x32xf32> to vector<32x32xf32>
    %1099 = arith.truncf %1098 : vector<32x32xf32> to vector<32x32xbf16>
    %cst_404 = arith.constant dense<0.000000e+00> : vector<32x8xf32>
    %1100 = tpu.matmul %1099, %0, %cst_404 {dimension_numbers = #tpu.dot_dimension_numbers<[1], [0], [0], [1], [0, 0, 1, 1], [], []>} : vector<32x32xbf16>, vector<32x8xbf16>, vector<32x8xf32> -> vector<32x8xf32>
    %1101 = vector.shape_cast %1100 : vector<32x8xf32> to vector<2x2x8x8xf32>
    %1102 = vector.extract_strided_slice %1101 {offsets = [0, 0, 0, 0], sizes = [2, 1, 8, 8], strides = [1, 1, 1, 1]} : vector<2x2x8x8xf32> to vector<2x1x8x8xf32>
    %1103 = vector.extract_strided_slice %1101 {offsets = [0, 1, 0, 0], sizes = [2, 1, 8, 8], strides = [1, 1, 1, 1]} : vector<2x2x8x8xf32> to vector<2x1x8x8xf32>
    %1104 = arith.maximumf %1102, %1103 : vector<2x1x8x8xf32>
    %1105 = vector.broadcast %1104 : vector<2x1x8x8xf32> to vector<2x2x8x8xf32>
    %1106 = arith.subf %1101, %1105 : vector<2x2x8x8xf32>
    %1107 = math.exp %1106 : vector<2x2x8x8xf32>
    %1108 = vector.extract_strided_slice %1107 {offsets = [0, 0, 0, 0], sizes = [2, 1, 8, 8], strides = [1, 1, 1, 1]} : vector<2x2x8x8xf32> to vector<2x1x8x8xf32>
    %1109 = vector.extract_strided_slice %1107 {offsets = [0, 1, 0, 0], sizes = [2, 1, 8, 8], strides = [1, 1, 1, 1]} : vector<2x2x8x8xf32> to vector<2x1x8x8xf32>
    %1110 = arith.addf %1108, %1109 : vector<2x1x8x8xf32>
    %1111 = tpu.reciprocal %1110 {approx = true} : vector<2x1x8x8xf32> -> vector<2x1x8x8xf32>
    %1112 = vector.broadcast %1111 : vector<2x1x8x8xf32> to vector<2x2x8x8xf32>
    %1113 = arith.mulf %1107, %1112 : vector<2x2x8x8xf32>
    %1114 = vector.shape_cast %1113 : vector<2x2x8x8xf32> to vector<32x8xf32>
    %1115 = arith.truncf %1114 : vector<32x8xf32> to vector<32x8xbf16>
    %cst_405 = arith.constant dense<0.000000e+00> : vector<32x32xf32>
    %1116 = tpu.matmul %1115, %1, %cst_405 {dimension_numbers = #tpu.dot_dimension_numbers<[1], [0], [0], [1], [0, 0, 1, 1], [], []>} : vector<32x8xbf16>, vector<8x32xbf16>, vector<32x32xf32> -> vector<32x32xf32>
    %1117 = vector.shape_cast %1116 : vector<32x32xf32> to vector<2x2x8x32xf32>
    %1118 = vector.extract_strided_slice %1117 {offsets = [0, 0, 0, 0], sizes = [2, 1, 8, 32], strides = [1, 1, 1, 1]} : vector<2x2x8x32xf32> to vector<2x1x8x32xf32>
    %1119 = vector.shape_cast %1118 : vector<2x1x8x32xf32> to vector<2x8x32xf32>
    %1120 = vector.extract_strided_slice %1094 {offsets = [0, 0, 0], sizes = [1, 8, 32], strides = [1, 1, 1]} : vector<2x8x32xf32> to vector<1x8x32xf32>
    %1121 = vector.shape_cast %1120 : vector<1x8x32xf32> to vector<8x32xf32>
    %1122 = vector.shape_cast %1121 : vector<8x32xf32> to vector<1x8x32xf32>
    %1123 = vector.broadcast %1122 : vector<1x8x32xf32> to vector<2x8x32xf32>
    %1124 = arith.mulf %1119, %1123 : vector<2x8x32xf32>
    %1125 = vector.extract_strided_slice %1117 {offsets = [0, 1, 0, 0], sizes = [2, 1, 8, 32], strides = [1, 1, 1, 1]} : vector<2x2x8x32xf32> to vector<2x1x8x32xf32>
    %1126 = vector.shape_cast %1125 : vector<2x1x8x32xf32> to vector<2x8x32xf32>
    %1127 = vector.extract_strided_slice %1094 {offsets = [1, 0, 0], sizes = [1, 8, 32], strides = [1, 1, 1]} : vector<2x8x32xf32> to vector<1x8x32xf32>
    %1128 = vector.shape_cast %1127 : vector<1x8x32xf32> to vector<8x32xf32>
    %1129 = vector.shape_cast %1128 : vector<8x32xf32> to vector<1x8x32xf32>
    %1130 = vector.broadcast %1129 : vector<1x8x32xf32> to vector<2x8x32xf32>
    %1131 = arith.mulf %1126, %1130 : vector<2x8x32xf32>
    %1132 = arith.addf %1124, %1131 : vector<2x8x32xf32>
    %1133 = vector.shape_cast %1132 : vector<2x8x32xf32> to vector<16x32xf32>
    %c5_406 = arith.constant 5 : index
    %c0_407 = arith.constant 0 : index
    %c0_408 = arith.constant 0 : index
    %1134 = vector.load %arg6[%c5_406, %c0_407, %c0_408] : memref<6x32x32xbf16, #tpu.memory_space<vmem>>, vector<1x32x32xbf16>
    %1135 = vector.shape_cast %1134 : vector<1x32x32xbf16> to vector<32x32xbf16>
    %1136 = arith.truncf %1133 : vector<16x32xf32> to vector<16x32xbf16>
    %cst_409 = arith.constant dense<0.000000e+00> : vector<16x32xf32>
    %1137 = tpu.matmul %1136, %1135, %cst_409 {dimension_numbers = #tpu.dot_dimension_numbers<[1], [0], [0], [1], [0, 0, 1, 1], [], []>} : vector<16x32xbf16>, vector<32x32xbf16>, vector<16x32xf32> -> vector<16x32xf32>
    %c5_410 = arith.constant 5 : index
    %c0_411 = arith.constant 0 : index
    %c0_412 = arith.constant 0 : index
    %1138 = vector.load %arg7[%c5_410, %c0_411, %c0_412] : memref<6x1x32xf32, #tpu.memory_space<vmem>>, vector<1x1x32xf32>
    %1139 = vector.shape_cast %1138 : vector<1x1x32xf32> to vector<1x32xf32>
    %1140 = vector.broadcast %1139 : vector<1x32xf32> to vector<16x32xf32>
    %1141 = arith.addf %1137, %1140 : vector<16x32xf32>
    %1142 = arith.addf %1080, %1141 : vector<16x32xf32>
    %c15 = arith.constant 15 : index
    %c0_413 = arith.constant 0 : index
    %c0_414 = arith.constant 0 : index
    %1143 = vector.load %arg18[%c15, %c0_413, %c0_414] : memref<18x1x32xf32, #tpu.memory_space<vmem>>, vector<1x1x32xf32>
    %1144 = vector.shape_cast %1143 : vector<1x1x32xf32> to vector<1x32xf32>
    %c15_415 = arith.constant 15 : index
    %c0_416 = arith.constant 0 : index
    %c0_417 = arith.constant 0 : index
    %1145 = vector.load %arg19[%c15_415, %c0_416, %c0_417] : memref<18x1x32xf32, #tpu.memory_space<vmem>>, vector<1x1x32xf32>
    %1146 = vector.shape_cast %1145 : vector<1x1x32xf32> to vector<1x32xf32>
    %cst_418 = arith.constant dense<0.000000e+00> : vector<16xf32>
    %1147 = vector.multi_reduction <add>, %1142, %cst_418 [1] : vector<16x32xf32> to vector<16xf32>
    %1148 = vector.shape_cast %1147 : vector<16xf32> to vector<16x1xf32>
    %cst_419 = arith.constant 3.200000e+01 : f32
    %1149 = vector.broadcast %cst_419 : f32 to vector<16x1xf32>
    %1150 = arith.divf %1148, %1149 : vector<16x1xf32>
    %1151 = vector.broadcast %1150 : vector<16x1xf32> to vector<16x32xf32>
    %1152 = arith.subf %1142, %1151 : vector<16x32xf32>
    %1153 = arith.mulf %1152, %1152 : vector<16x32xf32>
    %cst_420 = arith.constant dense<0.000000e+00> : vector<16xf32>
    %1154 = vector.multi_reduction <add>, %1153, %cst_420 [1] : vector<16x32xf32> to vector<16xf32>
    %1155 = vector.shape_cast %1154 : vector<16xf32> to vector<16x1xf32>
    %cst_421 = arith.constant 3.200000e+01 : f32
    %1156 = vector.broadcast %cst_421 : f32 to vector<16x1xf32>
    %1157 = arith.divf %1155, %1156 : vector<16x1xf32>
    %cst_422 = arith.constant 9.99999974E-6 : f32
    %1158 = vector.broadcast %cst_422 : f32 to vector<16x1xf32>
    %1159 = arith.addf %1157, %1158 : vector<16x1xf32>
    %1160 = math.rsqrt %1159 : vector<16x1xf32>
    %1161 = vector.broadcast %1160 : vector<16x1xf32> to vector<16x32xf32>
    %1162 = arith.mulf %1152, %1161 : vector<16x32xf32>
    %1163 = vector.broadcast %1144 : vector<1x32xf32> to vector<16x32xf32>
    %1164 = arith.mulf %1162, %1163 : vector<16x32xf32>
    %1165 = vector.broadcast %1146 : vector<1x32xf32> to vector<16x32xf32>
    %1166 = arith.addf %1164, %1165 : vector<16x32xf32>
    %c5_423 = arith.constant 5 : index
    %c0_424 = arith.constant 0 : index
    %c0_425 = arith.constant 0 : index
    %1167 = vector.load %arg8[%c5_423, %c0_424, %c0_425] : memref<6x32x32xbf16, #tpu.memory_space<vmem>>, vector<1x32x32xbf16>
    %1168 = vector.shape_cast %1167 : vector<1x32x32xbf16> to vector<32x32xbf16>
    %1169 = arith.truncf %1166 : vector<16x32xf32> to vector<16x32xbf16>
    %cst_426 = arith.constant dense<0.000000e+00> : vector<16x32xf32>
    %1170 = tpu.matmul %1169, %1168, %cst_426 {dimension_numbers = #tpu.dot_dimension_numbers<[1], [0], [0], [1], [0, 0, 1, 1], [], []>} : vector<16x32xbf16>, vector<32x32xbf16>, vector<16x32xf32> -> vector<16x32xf32>
    %c5_427 = arith.constant 5 : index
    %c0_428 = arith.constant 0 : index
    %c0_429 = arith.constant 0 : index
    %1171 = vector.load %arg9[%c5_427, %c0_428, %c0_429] : memref<6x1x32xf32, #tpu.memory_space<vmem>>, vector<1x1x32xf32>
    %1172 = vector.shape_cast %1171 : vector<1x1x32xf32> to vector<1x32xf32>
    %1173 = vector.broadcast %1172 : vector<1x32xf32> to vector<16x32xf32>
    %1174 = arith.addf %1170, %1173 : vector<16x32xf32>
    %1175 = vector.extract_strided_slice %10 {offsets = [0, 320], sizes = [16, 32], strides = [1, 1]} : vector<16x384xf32> to vector<16x32xf32>
    %1176 = vector.extract_strided_slice %10 {offsets = [0, 352], sizes = [16, 32], strides = [1, 1]} : vector<16x384xf32> to vector<16x32xf32>
    %1177 = vector.shape_cast %1174 : vector<16x32xf32> to vector<2x1x8x32xf32>
    %1178 = vector.shape_cast %1175 : vector<16x32xf32> to vector<1x2x8x32xf32>
    %1179 = vector.shape_cast %1176 : vector<16x32xf32> to vector<2x8x32xf32>
    %1180 = vector.broadcast %1177 : vector<2x1x8x32xf32> to vector<2x2x8x32xf32>
    %1181 = vector.broadcast %1178 : vector<1x2x8x32xf32> to vector<2x2x8x32xf32>
    %1182 = arith.mulf %1180, %1181 : vector<2x2x8x32xf32>
    %1183 = vector.shape_cast %1182 : vector<2x2x8x32xf32> to vector<32x32xf32>
    %1184 = arith.truncf %1183 : vector<32x32xf32> to vector<32x32xbf16>
    %cst_430 = arith.constant dense<0.000000e+00> : vector<32x8xf32>
    %1185 = tpu.matmul %1184, %0, %cst_430 {dimension_numbers = #tpu.dot_dimension_numbers<[1], [0], [0], [1], [0, 0, 1, 1], [], []>} : vector<32x32xbf16>, vector<32x8xbf16>, vector<32x8xf32> -> vector<32x8xf32>
    %1186 = vector.shape_cast %1185 : vector<32x8xf32> to vector<2x2x8x8xf32>
    %1187 = vector.extract_strided_slice %1186 {offsets = [0, 0, 0, 0], sizes = [2, 1, 8, 8], strides = [1, 1, 1, 1]} : vector<2x2x8x8xf32> to vector<2x1x8x8xf32>
    %1188 = vector.extract_strided_slice %1186 {offsets = [0, 1, 0, 0], sizes = [2, 1, 8, 8], strides = [1, 1, 1, 1]} : vector<2x2x8x8xf32> to vector<2x1x8x8xf32>
    %1189 = arith.maximumf %1187, %1188 : vector<2x1x8x8xf32>
    %1190 = vector.broadcast %1189 : vector<2x1x8x8xf32> to vector<2x2x8x8xf32>
    %1191 = arith.subf %1186, %1190 : vector<2x2x8x8xf32>
    %1192 = math.exp %1191 : vector<2x2x8x8xf32>
    %1193 = vector.extract_strided_slice %1192 {offsets = [0, 0, 0, 0], sizes = [2, 1, 8, 8], strides = [1, 1, 1, 1]} : vector<2x2x8x8xf32> to vector<2x1x8x8xf32>
    %1194 = vector.extract_strided_slice %1192 {offsets = [0, 1, 0, 0], sizes = [2, 1, 8, 8], strides = [1, 1, 1, 1]} : vector<2x2x8x8xf32> to vector<2x1x8x8xf32>
    %1195 = arith.addf %1193, %1194 : vector<2x1x8x8xf32>
    %1196 = tpu.reciprocal %1195 {approx = true} : vector<2x1x8x8xf32> -> vector<2x1x8x8xf32>
    %1197 = vector.broadcast %1196 : vector<2x1x8x8xf32> to vector<2x2x8x8xf32>
    %1198 = arith.mulf %1192, %1197 : vector<2x2x8x8xf32>
    %1199 = vector.shape_cast %1198 : vector<2x2x8x8xf32> to vector<32x8xf32>
    %1200 = arith.truncf %1199 : vector<32x8xf32> to vector<32x8xbf16>
    %cst_431 = arith.constant dense<0.000000e+00> : vector<32x32xf32>
    %1201 = tpu.matmul %1200, %1, %cst_431 {dimension_numbers = #tpu.dot_dimension_numbers<[1], [0], [0], [1], [0, 0, 1, 1], [], []>} : vector<32x8xbf16>, vector<8x32xbf16>, vector<32x32xf32> -> vector<32x32xf32>
    %1202 = vector.shape_cast %1201 : vector<32x32xf32> to vector<2x2x8x32xf32>
    %1203 = vector.extract_strided_slice %1202 {offsets = [0, 0, 0, 0], sizes = [2, 1, 8, 32], strides = [1, 1, 1, 1]} : vector<2x2x8x32xf32> to vector<2x1x8x32xf32>
    %1204 = vector.shape_cast %1203 : vector<2x1x8x32xf32> to vector<2x8x32xf32>
    %1205 = vector.extract_strided_slice %1179 {offsets = [0, 0, 0], sizes = [1, 8, 32], strides = [1, 1, 1]} : vector<2x8x32xf32> to vector<1x8x32xf32>
    %1206 = vector.shape_cast %1205 : vector<1x8x32xf32> to vector<8x32xf32>
    %1207 = vector.shape_cast %1206 : vector<8x32xf32> to vector<1x8x32xf32>
    %1208 = vector.broadcast %1207 : vector<1x8x32xf32> to vector<2x8x32xf32>
    %1209 = arith.mulf %1204, %1208 : vector<2x8x32xf32>
    %1210 = vector.extract_strided_slice %1202 {offsets = [0, 1, 0, 0], sizes = [2, 1, 8, 32], strides = [1, 1, 1, 1]} : vector<2x2x8x32xf32> to vector<2x1x8x32xf32>
    %1211 = vector.shape_cast %1210 : vector<2x1x8x32xf32> to vector<2x8x32xf32>
    %1212 = vector.extract_strided_slice %1179 {offsets = [1, 0, 0], sizes = [1, 8, 32], strides = [1, 1, 1]} : vector<2x8x32xf32> to vector<1x8x32xf32>
    %1213 = vector.shape_cast %1212 : vector<1x8x32xf32> to vector<8x32xf32>
    %1214 = vector.shape_cast %1213 : vector<8x32xf32> to vector<1x8x32xf32>
    %1215 = vector.broadcast %1214 : vector<1x8x32xf32> to vector<2x8x32xf32>
    %1216 = arith.mulf %1211, %1215 : vector<2x8x32xf32>
    %1217 = arith.addf %1209, %1216 : vector<2x8x32xf32>
    %1218 = vector.shape_cast %1217 : vector<2x8x32xf32> to vector<16x32xf32>
    %c5_432 = arith.constant 5 : index
    %c0_433 = arith.constant 0 : index
    %c0_434 = arith.constant 0 : index
    %1219 = vector.load %arg12[%c5_432, %c0_433, %c0_434] : memref<6x32x32xbf16, #tpu.memory_space<vmem>>, vector<1x32x32xbf16>
    %1220 = vector.shape_cast %1219 : vector<1x32x32xbf16> to vector<32x32xbf16>
    %1221 = arith.truncf %1218 : vector<16x32xf32> to vector<16x32xbf16>
    %cst_435 = arith.constant dense<0.000000e+00> : vector<16x32xf32>
    %1222 = tpu.matmul %1221, %1220, %cst_435 {dimension_numbers = #tpu.dot_dimension_numbers<[1], [0], [0], [1], [0, 0, 1, 1], [], []>} : vector<16x32xbf16>, vector<32x32xbf16>, vector<16x32xf32> -> vector<16x32xf32>
    %c5_436 = arith.constant 5 : index
    %c0_437 = arith.constant 0 : index
    %c0_438 = arith.constant 0 : index
    %1223 = vector.load %arg13[%c5_436, %c0_437, %c0_438] : memref<6x1x32xf32, #tpu.memory_space<vmem>>, vector<1x1x32xf32>
    %1224 = vector.shape_cast %1223 : vector<1x1x32xf32> to vector<1x32xf32>
    %1225 = vector.broadcast %1224 : vector<1x32xf32> to vector<16x32xf32>
    %1226 = arith.addf %1222, %1225 : vector<16x32xf32>
    %1227 = arith.addf %1166, %1226 : vector<16x32xf32>
    %c16 = arith.constant 16 : index
    %c0_439 = arith.constant 0 : index
    %c0_440 = arith.constant 0 : index
    %1228 = vector.load %arg18[%c16, %c0_439, %c0_440] : memref<18x1x32xf32, #tpu.memory_space<vmem>>, vector<1x1x32xf32>
    %1229 = vector.shape_cast %1228 : vector<1x1x32xf32> to vector<1x32xf32>
    %c16_441 = arith.constant 16 : index
    %c0_442 = arith.constant 0 : index
    %c0_443 = arith.constant 0 : index
    %1230 = vector.load %arg19[%c16_441, %c0_442, %c0_443] : memref<18x1x32xf32, #tpu.memory_space<vmem>>, vector<1x1x32xf32>
    %1231 = vector.shape_cast %1230 : vector<1x1x32xf32> to vector<1x32xf32>
    %cst_444 = arith.constant dense<0.000000e+00> : vector<16xf32>
    %1232 = vector.multi_reduction <add>, %1227, %cst_444 [1] : vector<16x32xf32> to vector<16xf32>
    %1233 = vector.shape_cast %1232 : vector<16xf32> to vector<16x1xf32>
    %cst_445 = arith.constant 3.200000e+01 : f32
    %1234 = vector.broadcast %cst_445 : f32 to vector<16x1xf32>
    %1235 = arith.divf %1233, %1234 : vector<16x1xf32>
    %1236 = vector.broadcast %1235 : vector<16x1xf32> to vector<16x32xf32>
    %1237 = arith.subf %1227, %1236 : vector<16x32xf32>
    %1238 = arith.mulf %1237, %1237 : vector<16x32xf32>
    %cst_446 = arith.constant dense<0.000000e+00> : vector<16xf32>
    %1239 = vector.multi_reduction <add>, %1238, %cst_446 [1] : vector<16x32xf32> to vector<16xf32>
    %1240 = vector.shape_cast %1239 : vector<16xf32> to vector<16x1xf32>
    %cst_447 = arith.constant 3.200000e+01 : f32
    %1241 = vector.broadcast %cst_447 : f32 to vector<16x1xf32>
    %1242 = arith.divf %1240, %1241 : vector<16x1xf32>
    %cst_448 = arith.constant 9.99999974E-6 : f32
    %1243 = vector.broadcast %cst_448 : f32 to vector<16x1xf32>
    %1244 = arith.addf %1242, %1243 : vector<16x1xf32>
    %1245 = math.rsqrt %1244 : vector<16x1xf32>
    %1246 = vector.broadcast %1245 : vector<16x1xf32> to vector<16x32xf32>
    %1247 = arith.mulf %1237, %1246 : vector<16x32xf32>
    %1248 = vector.broadcast %1229 : vector<1x32xf32> to vector<16x32xf32>
    %1249 = arith.mulf %1247, %1248 : vector<16x32xf32>
    %1250 = vector.broadcast %1231 : vector<1x32xf32> to vector<16x32xf32>
    %1251 = arith.addf %1249, %1250 : vector<16x32xf32>
    %c5_449 = arith.constant 5 : index
    %c0_450 = arith.constant 0 : index
    %c0_451 = arith.constant 0 : index
    %1252 = vector.load %arg14[%c5_449, %c0_450, %c0_451] : memref<6x32x256xbf16, #tpu.memory_space<vmem>>, vector<1x32x256xbf16>
    %1253 = vector.shape_cast %1252 : vector<1x32x256xbf16> to vector<32x256xbf16>
    %1254 = arith.truncf %1251 : vector<16x32xf32> to vector<16x32xbf16>
    %cst_452 = arith.constant dense<0.000000e+00> : vector<16x256xf32>
    %1255 = tpu.matmul %1254, %1253, %cst_452 {dimension_numbers = #tpu.dot_dimension_numbers<[1], [0], [0], [1], [0, 0, 1, 1], [], []>} : vector<16x32xbf16>, vector<32x256xbf16>, vector<16x256xf32> -> vector<16x256xf32>
    %c5_453 = arith.constant 5 : index
    %c0_454 = arith.constant 0 : index
    %c0_455 = arith.constant 0 : index
    %1256 = vector.load %arg15[%c5_453, %c0_454, %c0_455] : memref<6x1x256xf32, #tpu.memory_space<vmem>>, vector<1x1x256xf32>
    %1257 = vector.shape_cast %1256 : vector<1x1x256xf32> to vector<1x256xf32>
    %1258 = vector.broadcast %1257 : vector<1x256xf32> to vector<16x256xf32>
    %1259 = arith.addf %1255, %1258 : vector<16x256xf32>
    %cst_456 = arith.constant 0.000000e+00 : f32
    %1260 = vector.broadcast %cst_456 : f32 to vector<16x256xf32>
    %1261 = arith.maximumf %1259, %1260 : vector<16x256xf32>
    %c5_457 = arith.constant 5 : index
    %c0_458 = arith.constant 0 : index
    %c0_459 = arith.constant 0 : index
    %1262 = vector.load %arg16[%c5_457, %c0_458, %c0_459] : memref<6x256x32xbf16, #tpu.memory_space<vmem>>, vector<1x256x32xbf16>
    %1263 = vector.shape_cast %1262 : vector<1x256x32xbf16> to vector<256x32xbf16>
    %1264 = arith.truncf %1261 : vector<16x256xf32> to vector<16x256xbf16>
    %cst_460 = arith.constant dense<0.000000e+00> : vector<16x32xf32>
    %1265 = tpu.matmul %1264, %1263, %cst_460 {dimension_numbers = #tpu.dot_dimension_numbers<[1], [0], [0], [1], [0, 0, 1, 1], [], []>} : vector<16x256xbf16>, vector<256x32xbf16>, vector<16x32xf32> -> vector<16x32xf32>
    %c5_461 = arith.constant 5 : index
    %c0_462 = arith.constant 0 : index
    %c0_463 = arith.constant 0 : index
    %1266 = vector.load %arg17[%c5_461, %c0_462, %c0_463] : memref<6x1x32xf32, #tpu.memory_space<vmem>>, vector<1x1x32xf32>
    %1267 = vector.shape_cast %1266 : vector<1x1x32xf32> to vector<1x32xf32>
    %1268 = vector.broadcast %1267 : vector<1x32xf32> to vector<16x32xf32>
    %1269 = arith.addf %1265, %1268 : vector<16x32xf32>
    %1270 = arith.addf %1251, %1269 : vector<16x32xf32>
    %c17 = arith.constant 17 : index
    %c0_464 = arith.constant 0 : index
    %c0_465 = arith.constant 0 : index
    %1271 = vector.load %arg18[%c17, %c0_464, %c0_465] : memref<18x1x32xf32, #tpu.memory_space<vmem>>, vector<1x1x32xf32>
    %1272 = vector.shape_cast %1271 : vector<1x1x32xf32> to vector<1x32xf32>
    %c17_466 = arith.constant 17 : index
    %c0_467 = arith.constant 0 : index
    %c0_468 = arith.constant 0 : index
    %1273 = vector.load %arg19[%c17_466, %c0_467, %c0_468] : memref<18x1x32xf32, #tpu.memory_space<vmem>>, vector<1x1x32xf32>
    %1274 = vector.shape_cast %1273 : vector<1x1x32xf32> to vector<1x32xf32>
    %cst_469 = arith.constant dense<0.000000e+00> : vector<16xf32>
    %1275 = vector.multi_reduction <add>, %1270, %cst_469 [1] : vector<16x32xf32> to vector<16xf32>
    %1276 = vector.shape_cast %1275 : vector<16xf32> to vector<16x1xf32>
    %cst_470 = arith.constant 3.200000e+01 : f32
    %1277 = vector.broadcast %cst_470 : f32 to vector<16x1xf32>
    %1278 = arith.divf %1276, %1277 : vector<16x1xf32>
    %1279 = vector.broadcast %1278 : vector<16x1xf32> to vector<16x32xf32>
    %1280 = arith.subf %1270, %1279 : vector<16x32xf32>
    %1281 = arith.mulf %1280, %1280 : vector<16x32xf32>
    %cst_471 = arith.constant dense<0.000000e+00> : vector<16xf32>
    %1282 = vector.multi_reduction <add>, %1281, %cst_471 [1] : vector<16x32xf32> to vector<16xf32>
    %1283 = vector.shape_cast %1282 : vector<16xf32> to vector<16x1xf32>
    %cst_472 = arith.constant 3.200000e+01 : f32
    %1284 = vector.broadcast %cst_472 : f32 to vector<16x1xf32>
    %1285 = arith.divf %1283, %1284 : vector<16x1xf32>
    %cst_473 = arith.constant 9.99999974E-6 : f32
    %1286 = vector.broadcast %cst_473 : f32 to vector<16x1xf32>
    %1287 = arith.addf %1285, %1286 : vector<16x1xf32>
    %1288 = math.rsqrt %1287 : vector<16x1xf32>
    %1289 = vector.broadcast %1288 : vector<16x1xf32> to vector<16x32xf32>
    %1290 = arith.mulf %1280, %1289 : vector<16x32xf32>
    %1291 = vector.broadcast %1272 : vector<1x32xf32> to vector<16x32xf32>
    %1292 = arith.mulf %1290, %1291 : vector<16x32xf32>
    %1293 = vector.broadcast %1274 : vector<1x32xf32> to vector<16x32xf32>
    %1294 = arith.addf %1292, %1293 : vector<16x32xf32>
    %c0_474 = arith.constant 0 : index
    %c0_475 = arith.constant 0 : index
    %1295 = vector.load %arg20[%c0_474, %c0_475] : memref<32x256xbf16, #tpu.memory_space<vmem>>, vector<32x256xbf16>
    %1296 = arith.truncf %1294 : vector<16x32xf32> to vector<16x32xbf16>
    %cst_476 = arith.constant dense<0.000000e+00> : vector<16x256xf32>
    %1297 = tpu.matmul %1296, %1295, %cst_476 {dimension_numbers = #tpu.dot_dimension_numbers<[1], [0], [0], [1], [0, 0, 1, 1], [], []>} : vector<16x32xbf16>, vector<32x256xbf16>, vector<16x256xf32> -> vector<16x256xf32>
    %c0_477 = arith.constant 0 : index
    %c0_478 = arith.constant 0 : index
    %1298 = vector.load %arg21[%c0_477, %c0_478] : memref<1x256xf32, #tpu.memory_space<vmem>>, vector<1x256xf32>
    %1299 = vector.broadcast %1298 : vector<1x256xf32> to vector<16x256xf32>
    %1300 = arith.addf %1297, %1299 : vector<16x256xf32>
    %c0_479 = arith.constant 0 : index
    %c0_480 = arith.constant 0 : index
    %1301 = vector.load %arg22[%c0_479, %c0_480] : memref<16x256xf32, #tpu.memory_space<vmem>>, vector<16x256xf32>
    tpu.vector_store %arg22[%c0_479, %c0_480], %1300 {strides = array<i32>} : memref<16x256xf32, #tpu.memory_space<vmem>>, vector<16x256xf32>,
    return
  }
}

</mosaic_0001>

<bundles_post_ra>
// kernel: conditional_transformer_forward.1
= control target key start
LH: loop header
LB: loop body
LE: loop exit
PB: predicated region body
PF: predicated region fallthrough
CT: control target
= control target key end

     0   :  { %v8123_v0 = vmov 0.0   ;;  %vm8124_vm0 = vmmov 0   ;;  %vm141_vm1 = vcmask 261120   ;;  %v8125_v11 = vmov 0   ;;  %s9673_s24 = smov 96   ;;  %s9640_s4 = inlined_call_operand.vmem [shape: bf16[6,32,96], index: 4, kind: input, shape index: {}]   ;;  %s9641_s0 = inlined_call_operand.vmem [shape: f32[16,32], index: 0, kind: input, shape index: {}]   ;;  %s9642_s1 = inlined_call_operand.vmem [shape: f32[16,32], index: 1, kind: input, shape index: {}]   ;;  %s9643_s10 = inlined_call_operand.vmem [shape: bf16[32,384], index: 10, kind: input, shape index: {}]   ;;  %s9644_s2 = inlined_call_operand.vmem [shape: bf16[32,8], index: 2, kind: input, shape index: {}]   ;;  %s9645_s5 = inlined_call_operand.vmem [shape: f32[6,1,96], index: 5, kind: input, shape index: {}]   ;;  %s9646_s11 = inlined_call_operand.vmem [shape: f32[1,384], index: 11, kind: input, shape index: {}]   ;;  %s9647_s3 = inlined_call_operand.vmem [shape: bf16[8,32], index: 3, kind: input, shape index: {}]   ;;  %s9648_s6 = inlined_call_operand.vmem [shape: bf16[6,32,32], index: 6, kind: input, shape index: {}]   ;;  %s9649_s7 = inlined_call_operand.vmem [shape: f32[6,1,32], index: 7, kind: input, shape index: {}]   ;;  %s9650_s8 = inlined_call_operand.vmem [shape: bf16[6,32,32], index: 8, kind: input, shape index: {}]   ;;  %s9651_s18 = inlined_call_operand.vmem [shape: f32[18,1,32], index: 18, kind: input, shape index: {}]   ;;  %s9652_s19 = inlined_call_operand.vmem [shape: f32[18,1,32], index: 19, kind: input, shape index: {}]   ;;  %s9653_s9 = inlined_call_operand.vmem [shape: f32[6,1,32], index: 9, kind: input, shape index: {}]   ;;  %s9654_s12 = inlined_call_operand.vmem [shape: bf16[6,32,32], index: 12, kind: input, shape index: {}]   ;;  %s9655_s13 = inlined_call_operand.vmem [shape: f32[6,1,32], index: 13, kind: input, shape index: {}]   ;;  %s9656_s14 = inlined_call_operand.vmem [shape: bf16[6,32,256], index: 14, kind: input, shape index: {}]   ;;  %s9657_s16 = inlined_call_operand.vmem [shape: bf16[6,256,32], index: 16, kind: input, shape index: {}]   ;;  %s9658_s15 = inlined_call_operand.vmem [shape: f32[6,1,256], index: 15, kind: input, shape index: {}]   ;;  %s9659_s17 = inlined_call_operand.vmem [shape: f32[6,1,32], index: 17, kind: input, shape index: {}]   ;;  %s9660_s20 = inlined_call_operand.vmem [shape: bf16[32,256], index: 20, kind: input, shape index: {}]   ;;  %s9661_s21 = inlined_call_operand.vmem [shape: f32[1,256], index: 21, kind: input, shape index: {}]   ;;  %s9662_s22 = inlined_call_operand.vmem [shape: f32[16,256], index: 22, kind: output, shape index: {}]  }
   0x1   :  { %9675 = sst [smem:[#allocation2_spill]] %s9640_s4  ;;  %7324 = vmatprep.subr.bf16.mxu0 %v8123_v0  ;;  %7328 = vmatprep.mubr.msk.bf16.mxu0 %vm8124_vm0, %v8123_v0  ;;  %v94_v20 = vlaneseq  ;;  %vm405_vm2 = vcmask 1043456   ;;  %v8351_v56 = vld [vmem:[%s9647_s3] sm:$0xf]  ;;  %vm398_vm3 = vcmask 64512   ;;  %s9669_s4 = smov 32  }
   0x2   :  { %9676 = sst [smem:[#allocation3_spill]] %s9641_s0  ;;  %s9682_s29 = sld [smem:[#allocation2_spill]]  ;;  %177 = vmatprep.mubr.bf16.mxu1 %v8125_v11  ;;  %v8357_v57 = vsel %vm405_vm2, %v8351_v56, 0 }
   0x3   :  { %9677 = sst [smem:[#allocation4_spill]] %s9642_s1  ;;  %s9683_s0 = sld [smem:[#allocation3_spill]]  ;;  %v95_v24 = vshrl.u32 %v94_v20, 7 }
   0x4   :  { %9678 = sst [smem:[#allocation5_spill]] %s9643_s10  ;;  %s9684_s26 = sld [smem:[#allocation4_spill]] }
   0x5   :  { %9679 = sst [smem:[#allocation6_spill]] %s9644_s2  ;;  %s9685_s30 = sld [smem:[#allocation5_spill]]  ;;  %v104_v27 = vsub.s32 2, %v95_v24  ;;  %v8323_v31 = vsub.s32 1, %v95_v24  ;;  %v8325_v32 = vsub.s32 0, %v95_v24 }
   0x6   :  { %9680 = sst [smem:[#allocation7_spill]] %s9645_s5  ;;  %s9686_s28 = sld [smem:[#allocation6_spill]] }
   0x7   :  { %9681 = sst [smem:[#allocation8_spill]] %s9646_s11  ;;  %s9671_s5 = smov 64  }
   0x8   :  { %v7702_v1 = vld [vmem:[%s9682_s29] sm:$0xff]   ;;  %v7703_v2 = vld [vmem:[%s9682_s29 + $0x8] sm:$0xff]   ;;  %s9689_s2 = smov 32   ;;  %s9690_s1 = smov 64  }
   0x9   :  { %7325 = vmatpush3.bf16.msra.mxu0 %v7702_v1  ;;  %v77_v3 = vld [vmem:[%s9683_s0] sm:$0xff]  ;;  %v78_v4 = vld [vmem:[%s9683_s0 + $0x8] sm:$0xff]  ;;  %s9687_s0 = sld [smem:[#allocation7_spill]] }
   0xa   :  { %v79_v5 = vld [vmem:[%s9684_s26] sm:$0xff]  ;;  %7326 = vmatprep.subr.bf16.mxu0 %v8123_v0  ;;  %v80_v6 = vld [vmem:[%s9684_s26 + $0x8] sm:$0xff]  ;;  %s9688_s26 = sld [smem:[#allocation8_spill]] }
   0xb   :  { %v8266_v7 = vadd.f32 %v79_v5, %v77_v3  ;;  %v8268_v8 = vadd.f32 %v80_v6, %v78_v4  ;;  %v7704_v10 = vld [vmem:[%s9685_s30 + $0x4] ss:$12 sps:$4 sm:$0xff]   ;;  %v7706_v12 = vld [vmem:[%s9685_s30] ss:$12 sps:$4 sm:$0xff]   ;;  %v7707_v13 = vld [vmem:[%s9685_s30 + $0x1c] ss:$12 sps:$4 sm:$0xff]  }
   0xc   :  { %145 = vmatprep.subr.bf16.mxu1 %v7704_v10  ;;  %v7709_v14 = vld [vmem:[%s9685_s30 + $0x18] ss:$12 sps:$4 sm:$0xff]   ;;  %v7710_v15 = vld [vmem:[%s9685_s30 + $0x8] ss:$12 sps:$4 sm:$0xff]   ;;  %v7711_v16 = vld [vmem:[%s9685_s30 + $0x20] ss:$12 sps:$4 sm:$0xff]  }
   0xd   :  { %7327 = vmatpush3.bf16.msra.mxu0 %v7703_v2  ;;  %v91_v9 = vpack.c.bf16 %v8268_v8, %v8266_v7  ;;  %146 = vmatpush1.bf16.msra.mxu1 %v7706_v12  ;;  %v8301_v17 = vld [vmem:[%s9686_s28] sm:$0xff]   ;;  %v8308_v18 = vld [vmem:[%s9686_s28 + $0x8] sm:$0xff]  }
   0xe   :  { %147 = vmatprep.subr.bf16.mxu1 %v7707_v13  ;;  %7684 = vmatprep.subr.msk.bf16.mxu0 %vm405_vm2, %v8351_v56 }
   0xf   :  { %v6382_v19 = vld [vmem:[%s9687_s0] ss:$0 sm:$0xff] }
  0x10   :  { %7329 = vmatmul.mubr.msk.bf16.vlgmr.msra.gmra.mrb[0].mxu0 %vm141_vm1, %v91_v9  ;;  %v92_v28 = vld [vmem:[%s9688_s26] sm:$0x7] }
  0x11   :  { %148 = vmatpush1.bf16.msra.mxu1 %v7709_v14  ;;  %v105_v30 = vrot.slane %v92_v28, %v104_v27  ;;  %v101_v33 = vrot.slane %v92_v28, %v8323_v31  ;;  %v8329_v34 = vrot.slane %v92_v28, %v8325_v32  ;;  %7341 = vmatpush3.bf16.msra.mxu0 %v8357_v57  ;;  %v7714_v28 = vld [vmem:[%s9648_s6] sm:$0xff]  }
  0x12   :  { %7316 = vmatprep.subr.bf16.mxu1 %v8123_v0  ;;  %7354 = vmatprep.subr.bf16.mxu0 %v8123_v0 }
  0x14   :  { %6380 = vmatmul.mubr.msk.bf16.vlgmr.msra.gmra.mrb[0].mxu1 %vm141_vm1, %v91_v9 }
  0x15   :  { %7317 = vmatpush3.bf16.msra.mxu1 %v7710_v15  ;;  %7320 = vmatprep.mubr.msk.bf16.mxu1 %vm8124_vm0, %v8123_v0 }
  0x16   :  { %7318 = vmatprep.subr.bf16.mxu1 %v8123_v0 }
  0x19   :  { %7319 = vmatpush3.bf16.msra.mxu1 %v7711_v16 }
  0x1a   :  { %7332 = vmatprep.subr.bf16.mxu1 %v8301_v17 }
  0x1c   :  { %7321 = vmatmul.mubr.msk.bf16.vlgmr.msra.gmra.mrb[4].mxu1 %vm141_vm1, %v91_v9 }
  0x1d   :  { %7333 = vmatpush3.bf16.msra.mxu1 %v8301_v17 }
  0x1e   :  { %7334 = vmatprep.subr.bf16.mxu1 %v8308_v18 }
  0x21   :  { %7335 = vmatpush3.bf16.msra.mxu1 %v8308_v18 }
  0x22   :  { %7346 = vmatprep.subr.bf16.mxu1 %v8123_v0 }
  0xe3   :  { %v286_v21 = vpop.f32.mrb[0].mxu0 }
  0xe4   :  { %v287_v22 = vadd.f32 %v6382_v19, %v286_v21  ;;  %v7330_v23 = vpop.f32.mrb[1].mxu0 }
  0xe5   :  { %v289_v25 = vpop.f32.mrb[2].mxu0 }
  0xe6   :  { %458 = vrot.lane.b32.xlu1 %v287_v22, %s9671_s5  ;;  %295 = vrot.lane.b32.xlu0 %v287_v22, %s9673_s24  ;;  %v7331_v26 = vpop.f32.mrb[3].mxu0  ;;  %v290_v29 = vadd.f32 %v6382_v19, %v289_v25 }
  0xe7   :  { %v8331_v35 = vpop.f32.mrb[0].mxu1 }
  0xe8   :  { %v181_v36 = vpop.f32.mrb[1].mxu1 }
  0xe9   :  { %v8333_v37 = vadd.f32 %v181_v36, %v101_v33  ;;  %v183_v38 = vpop.f32.mrb[2].mxu1 }
  0xea   :  { %463 = vrot.lane.b32.xlu1 %v290_v29, %s9671_s5  ;;  %297 = vrot.lane.b32.xlu0 %v290_v29, %s9673_s24  ;;  %v8336_v39 = vadd.f32 %v183_v38, %v8329_v34  ;;  %v185_v40 = vpop.f32.mrb[3].mxu1 }
  0xeb   :  { %v8338_v41 = vadd.f32 %v185_v40, %v101_v33 }
  0xef   :  { %v222_v42 = vpop.f32.mrb[4].mxu1 }
  0xf0   :  { %v8340_v43 = vadd.f32 %v222_v42, %v105_v30  ;;  %v7322_v44 = vpop.f32.mrb[5].mxu1 }
  0xf1   :  { %v225_v45 = vpop.f32.mrb[6].mxu1 }
  0xf2   :  { %v8342_v46 = vadd.f32 %v225_v45, %v105_v30  ;;  %v7323_v47 = vpop.f32.mrb[7].mxu1 }
 0x158   :  { %v296_v48 = vpop.permute.xlu0 %295  ;;  %v459_v30 = vpop.permute.xlu1 %458 }
 0x159   :  { %v301_v50 = vmul.f32 %v296_v48, %v287_v22  ;;  %v303_v51 = vmul.f32 %v296_v48, %v290_v29 }
 0x15c   :  { %v298_v49 = vpop.permute.xlu0 %297  ;;  %v464_v38 = vpop.permute.xlu1 %463 }
 0x15d   :  { %v302_v52 = vmul.f32 %v298_v49, %v287_v22  ;;  %v304_v53 = vmul.f32 %v298_v49, %v290_v29  ;;  %v7715_v29 = vld [vmem:[%s9648_s6 + $0x8] sm:$0xff]  }
 0x15f   :  { %v305_v54 = vpack.c.bf16 %v302_v52, %v301_v50  ;;  %v306_v55 = vpack.c.bf16 %v304_v53, %v303_v51  ;;  %v6392_v52 = vld [vmem:[%s9649_s7] ss:$0 sm:$0xff] }
 0x161   :  { %7336 = vmatprep.mubr.msk.bf16.mxu1 %vm141_vm1, %v305_v54 }
 0x162   :  { %7337 = vmatmul.mubr.msk.bf16.vlgmr.msra.gmra.mrb[8].mxu1 %vm141_vm1, %v306_v55 }
 0x163   :  { %7350 = vmatprep.mubr.msk.bf16.mxu1 %vm8124_vm0, %v8123_v0  ;;  %7347 = vmatpush3.bf16.msra.mxu1 %v7714_v28 }
 0x164   :  { %7348 = vmatprep.subr.bf16.mxu1 %v8123_v0 }
 0x167   :  { %7349 = vmatpush3.bf16.msra.mxu1 %v7715_v29 }
 0x168   :  { %7362 = vmatprep.subr.bf16.mxu1 %v8301_v17 }
 0x235   :  { %v7338_v58 = vpop.f32.mrb[8].mxu1 }
 0x236   :  { %v359_v59 = vpop.f32.mrb[9].mxu1 }
 0x237   :  { %v7339_v60 = vpop.f32.mrb[10].mxu1 }
 0x238   :  { %v375_v61 = vmax.f32 %v7338_v58, %v7339_v60  ;;  %v362_v62 = vpop.f32.mrb[11].mxu1 }
 0x239   :  { %v374_v63 = vmax.f32 %v359_v59, %v362_v62 }
 0x23a   :  { %v378_v1 = vsub.f32 %v7338_v58, %v375_v61  ;;  %v379_v2 = vsub.f32 %v7339_v60, %v375_v61 }
 0x23b   :  { %v376_v3 = vsub.f32 %v359_v59, %v374_v63  ;;  %v377_v4 = vsub.f32 %v362_v62, %v374_v63  ;;  %v8387_v63 = vadd.f32 %v8331_v35, %v8329_v34  ;;  %v7716_v34 = vld [vmem:[%s9650_s8] sm:$0xff]   ;;  %v7717_v35 = vld [vmem:[%s9650_s8 + $0x8] sm:$0xff]  }
 0x23c   :  { %v384_v5 = vmul.f32 1.442695, %v378_v1  ;;  %v386_v6 = vmul.f32 1.442695, %v379_v2 }
 0x23d   :  { %v380_v9 = vmul.f32 1.442695, %v376_v3  ;;  %v382_v10 = vmul.f32 1.442695, %v377_v4 }
 0x23e   :  { %7898 = vpow2.f32 %v384_v5 }
 0x23f   :  { %7900 = vpow2.f32 %v386_v6 }
 0x240   :  { %7902 = vpow2.f32 %v380_v9 }
 0x241   :  { %7904 = vpow2.f32 %v382_v10 }
 0x248   :  { %v7899_v12 = vpop.eup %7898 }
 0x249   :  { %v7901_v13 = vpop.eup %7900 }
 0x24a   :  { %v7903_v14 = vpop.eup %7902  ;;  %v389_v15 = vadd.f32 %v7901_v13, %v7899_v12 }
 0x24b   :  { %v7905_v16 = vpop.eup %7904 }
 0x24c   :  { %7906 = vrcp.f32 %v389_v15  ;;  %v388_v19 = vadd.f32 %v7905_v16, %v7903_v14 }
 0x24e   :  { %7908 = vrcp.f32 %v388_v19 }
 0x256   :  { %v7907_v20 = vpop.eup %7906 }
 0x257   :  { %v395_v21 = vmul.f32 %v7907_v20, %v7901_v13  ;;  %v394_v22 = vmul.f32 %v7907_v20, %v7899_v12 }
 0x258   :  { %v7909_v23 = vpop.eup %7908 }
 0x259   :  { %v392_v24 = vmul.f32 %v7909_v23, %v7903_v14  ;;  %v393_v25 = vmul.f32 %v7909_v23, %v7905_v16  ;;  %v397_v26 = vpack.c.bf16 %v395_v21, %v394_v22  ;;  %v6396_v22 = vld [vmem:[%s9651_s18] ss:$0 sm:$0xff] }
 0x25b   :  { %v396_v27 = vpack.c.bf16 %v393_v25, %v392_v24 }
 0x25d   :  { %7342 = vmatprep.mubr.msk.bf16.mxu0 %vm398_vm3, %v396_v27 }
 0x25e   :  { %7343 = vmatmul.mubr.msk.bf16.vlgmr.msra.gmra.mrb[4].mxu0 %vm398_vm3, %v397_v26 }
 0x25f   :  { %7358 = vmatprep.mubr.msk.bf16.mxu0 %vm8124_vm0, %v8123_v0  ;;  %7355 = vmatpush3.bf16.msra.mxu0 %v7716_v34 }
 0x260   :  { %7356 = vmatprep.subr.bf16.mxu0 %v8123_v0 }
 0x263   :  { %7357 = vmatpush3.bf16.msra.mxu0 %v7717_v35 }
 0x264   :  { %7685 = vmatprep.subr.msk.bf16.mxu0 %vm405_vm2, %v8351_v56  ;;  %v6397_v56 = vld [vmem:[%s9652_s19] ss:$0 sm:$0xff] }
 0x331   :  { %v7344_v33 = vpop.f32.mrb[4].mxu0 }
 0x332   :  { %v443_v36 = vpop.f32.mrb[5].mxu0  ;;  %v462_v42 = vmul.f32 %v7344_v33, %v459_v30 }
 0x333   :  { %v7345_v40 = vpop.f32.mrb[6].mxu0  ;;  %v461_v47 = vmul.f32 %v459_v30, %v443_v36  ;;  %v6398_v30 = vld [vmem:[%s9653_s9] ss:$0 sm:$0xff] }
 0x334   :  { %v467_v44 = vmul.f32 %v7345_v40, %v464_v38  ;;  %v446_v45 = vpop.f32.mrb[7].mxu0 }
 0x335   :  { %v466_v48 = vmul.f32 %v464_v38, %v446_v45 }
 0x336   :  { %v469_v49 = vadd.f32 %v467_v44, %v462_v42 }
 0x337   :  { %v468_v50 = vadd.f32 %v466_v48, %v461_v47 }
 0x339   :  { %v474_v51 = vpack.c.bf16 %v469_v49, %v468_v50 }
 0x33b   :  { %7351 = vmatmul.mubr.msk.bf16.vlgmr.msra.gmra.mrb[12].mxu1 %vm141_vm1, %v474_v51 }
 0x33c   :  { %7363 = vmatpush3.bf16.msra.mxu1 %v8301_v17 }
 0x33d   :  { %7364 = vmatprep.subr.bf16.mxu1 %v8308_v18 }
 0x340   :  { %7365 = vmatpush3.bf16.msra.mxu1 %v8308_v18 }
 0x341   :  { %7376 = vmatprep.subr.bf16.mxu1 %v8123_v0 }
 0x40e   :  { %v531_v53 = vpop.f32.mrb[12].mxu1 }
 0x40f   :  { %v532_v54 = vadd.f32 %v6392_v52, %v531_v53  ;;  %v7352_v55 = vpop.f32.mrb[13].mxu1 }
 0x410   :  { %v534_v58 = vpop.f32.mrb[14].mxu1 }
 0x411   :  { %v535_v59 = vadd.f32 %v6392_v52, %v534_v58  ;;  %v7353_v60 = vpop.f32.mrb[15].mxu1  ;;  %v538_v61 = vadd.f32 %v532_v54, %v8266_v7 }
 0x413   :  { %v542_v17 = vsel %vm141_vm1, %v538_v61, 0.0  ;;  %v539_v62 = vadd.f32 %v535_v59, %v8268_v8 }
 0x414   :  { %543 = vadd.xlane.f32.xlu0 %v542_v17 }
 0x415   :  { %v545_v18 = vsel %vm141_vm1, %v539_v62, 0.0 }
 0x416   :  { %546 = vadd.xlane.f32.xlu1 %v545_v18 }
 0x427   :  { %794 = vrot.lane.b32.xlu1 %v8387_v63, %s9673_s24 }
 0x4a1   :  { %v544_v1 = vpop.xlane.xlu0 %543 }
 0x4a2   :  { %v549_v2 = vmul.f32 0.03125, %v544_v1 }
 0x4a3   :  { %v547_v3 = vpop.xlane.xlu1 %546 }
 0x4a4   :  { %v551_v4 = vsub.f32 %v538_v61, %v549_v2  ;;  %v550_v7 = vmul.f32 0.03125, %v547_v3 }
 0x4a6   :  { %v552_v5 = vsub.f32 %v539_v62, %v550_v7  ;;  %v553_v6 = vmul.f32 %v551_v4, %v551_v4 }
 0x4a8   :  { %v555_v8 = vsel %vm141_vm1, %v553_v6, 0.0  ;;  %v554_v9 = vmul.f32 %v552_v5, %v552_v5 }
 0x4a9   :  { %556 = vadd.xlane.f32.xlu0 %v555_v8 }
 0x4aa   :  { %v558_v10 = vsel %vm141_vm1, %v554_v9, 0.0 }
 0x4ad   :  { %559 = vadd.xlane.f32.xlu0 %v558_v10 }
 0x4c3   :  { %800 = vrot.lane.b32.xlu0 %v8336_v39, %s9673_s24 }
 0x536   :  { %v557_v12 = vpop.xlane.xlu0 %556 }
 0x537   :  { %v561_v13 = vmul.f32 0.03125, %v557_v12 }
 0x539   :  { %v563_v14 = vadd.f32 1e-05, %v561_v13 }
 0x53a   :  { %v560_v15 = vpop.xlane.xlu0 %559 }
 0x53b   :  { %7910 = vrsqrt.f32 %v563_v14  ;;  %v562_v16 = vmul.f32 0.03125, %v560_v15 }
 0x53d   :  { %v564_v19 = vadd.f32 1e-05, %v562_v16 }
 0x53f   :  { %7912 = vrsqrt.f32 %v564_v19  ;;  %v7718_v19 = vld [vmem:[%s9654_s12] sm:$0xff]  }
 0x545   :  { %v7911_v20 = vpop.eup %7910 }
 0x546   :  { %v567_v21 = vmul.f32 %v7911_v20, %v551_v4  ;;  %v7719_v20 = vld [vmem:[%s9654_s12 + $0x8] sm:$0xff]  }
 0x548   :  { %v575_v24 = vmul.f32 %v6396_v22, %v567_v21 }
 0x549   :  { %v7913_v23 = vpop.eup %7912 }
 0x54a   :  { %v568_v25 = vmul.f32 %v7913_v23, %v552_v5  ;;  %v8410_v27 = vadd.f32 %v6397_v56, %v575_v24  ;;  %v801_v24 = vpop.permute.xlu0 %800 }
 0x54c   :  { %v576_v26 = vmul.f32 %v6396_v22, %v568_v25  ;;  %v795_v22 = vpop.permute.xlu1 %794 }
 0x54e   :  { %v8412_v28 = vadd.f32 %v6397_v56, %v576_v26 }
 0x550   :  { %v589_v29 = vpack.c.bf16 %v8412_v28, %v8410_v27 }
 0x552   :  { %7359 = vmatmul.mubr.msk.bf16.vlgmr.msra.gmra.mrb[8].mxu0 %vm141_vm1, %v589_v29 }
 0x553   :  { %7371 = vmatpush3.bf16.msra.mxu0 %v8357_v57 }
 0x625   :  { %v646_v33 = vpop.f32.mrb[8].mxu0 }
 0x626   :  { %v647_v36 = vadd.f32 %v6398_v30, %v646_v33  ;;  %v7360_v38 = vpop.f32.mrb[9].mxu0 }
 0x627   :  { %v649_v40 = vpop.f32.mrb[10].mxu0 }
 0x628   :  { %v653_v42 = vmul.f32 %v647_v36, %v8387_v63  ;;  %v654_v44 = vmul.f32 %v647_v36, %v8336_v39  ;;  %v650_v45 = vadd.f32 %v6398_v30, %v649_v40  ;;  %v7361_v47 = vpop.f32.mrb[11].mxu0 }
 0x62a   :  { %v657_v48 = vpack.c.bf16 %v654_v44, %v653_v42  ;;  %v655_v49 = vmul.f32 %v650_v45, %v8387_v63  ;;  %v656_v50 = vmul.f32 %v650_v45, %v8336_v39  ;;  %v6406_v42 = vld [vmem:[%s9655_s13] ss:$0 sm:$0xff] }
 0x62c   :  { %v658_v51 = vpack.c.bf16 %v656_v50, %v655_v49  ;;  %7366 = vmatprep.mubr.msk.bf16.mxu1 %vm141_vm1, %v657_v48 }
 0x62e   :  { %7367 = vmatmul.mubr.msk.bf16.vlgmr.msra.gmra.mrb[16].mxu1 %vm141_vm1, %v658_v51 }
 0x62f   :  { %7380 = vmatprep.mubr.msk.bf16.mxu1 %vm8124_vm0, %v8123_v0  ;;  %7377 = vmatpush3.bf16.msra.mxu1 %v7718_v19 }
 0x630   :  { %7378 = vmatprep.subr.bf16.mxu1 %v8123_v0 }
 0x633   :  { %7379 = vmatpush3.bf16.msra.mxu1 %v7719_v20 }
 0x701   :  { %v7368_v52 = vpop.f32.mrb[16].mxu1 }
 0x702   :  { %v699_v53 = vpop.f32.mrb[17].mxu1 }
 0x703   :  { %v7369_v54 = vpop.f32.mrb[18].mxu1 }
 0x704   :  { %v715_v55 = vmax.f32 %v7368_v52, %v7369_v54  ;;  %v702_v58 = vpop.f32.mrb[19].mxu1 }
 0x705   :  { %v714_v59 = vmax.f32 %v699_v53, %v702_v58 }
 0x706   :  { %v718_v60 = vsub.f32 %v7368_v52, %v715_v55  ;;  %v719_v61 = vsub.f32 %v7369_v54, %v715_v55 }
 0x707   :  { %v716_v17 = vsub.f32 %v699_v53, %v714_v59  ;;  %v717_v62 = vsub.f32 %v702_v58, %v714_v59 }
 0x708   :  { %v724_v18 = vmul.f32 1.442695, %v718_v60  ;;  %v726_v1 = vmul.f32 1.442695, %v719_v61 }
 0x709   :  { %v720_v2 = vmul.f32 1.442695, %v716_v17  ;;  %v722_v3 = vmul.f32 1.442695, %v717_v62 }
 0x70a   :  { %7914 = vpow2.f32 %v724_v18 }
 0x70b   :  { %7916 = vpow2.f32 %v726_v1 }
 0x70c   :  { %7918 = vpow2.f32 %v720_v2  ;;  %v7720_v2 = vld [vmem:[%s9656_s14] ss:$8 sps:$4 sm:$0xff]  }
 0x70d   :  { %7920 = vpow2.f32 %v722_v3  ;;  %v7723_v3 = vld [vmem:[%s9656_s14 + $0x10] ss:$8 sps:$4 sm:$0xff]  }
 0x714   :  { %v7915_v4 = vpop.eup %7914 }
 0x715   :  { %v7917_v7 = vpop.eup %7916 }
 0x716   :  { %v7919_v5 = vpop.eup %7918  ;;  %v729_v6 = vadd.f32 %v7917_v7, %v7915_v4 }
 0x717   :  { %v7921_v8 = vpop.eup %7920 }
 0x718   :  { %7922 = vrcp.f32 %v729_v6  ;;  %v728_v9 = vadd.f32 %v7921_v8, %v7919_v5  ;;  %v7728_v6 = vld [vmem:[%s9657_s16 + $0x48] sm:$0xff]  }
 0x71a   :  { %7924 = vrcp.f32 %v728_v9  ;;  %v7730_v9 = vld [vmem:[%s9657_s16 + $0x50] sm:$0xff]  }
 0x722   :  { %v7923_v10 = vpop.eup %7922 }
 0x723   :  { %v735_v34 = vmul.f32 %v7923_v10, %v7917_v7  ;;  %v734_v35 = vmul.f32 %v7923_v10, %v7915_v4  ;;  %v7725_v4 = vld [vmem:[%s9656_s14 + $0x14] ss:$8 sps:$4 sm:$0xff]   ;;  %v7726_v7 = vld [vmem:[%s9657_s16 + $0x40] sm:$0xff]  }
 0x724   :  { %v7925_v12 = vpop.eup %7924  ;;  %7054 = vmatprep.subr.bf16.mxu1 %v7726_v7  ;;  %v7731_v10 = vld [vmem:[%s9657_s16 + $0x10] sm:$0xff]  }
 0x725   :  { %v732_v13 = vmul.f32 %v7925_v12, %v7919_v5  ;;  %v733_v14 = vmul.f32 %v7925_v12, %v7921_v8  ;;  %v737_v15 = vpack.c.bf16 %v735_v34, %v734_v35  ;;  %v7727_v5 = vld [vmem:[%s9657_s16] sm:$0xff]   ;;  %v7729_v8 = vld [vmem:[%s9657_s16 + $0x8] sm:$0xff]   ;;  %v7732_v34 = vld [vmem:[%s9657_s16 + $0x58] sm:$0xff]  }
 0x726   :  { %v7733_v35 = vld [vmem:[%s9657_s16 + $0x18] sm:$0xff]   ;;  %v7734_v12 = vld [vmem:[%s9657_s16 + $0x60] sm:$0xff]  }
 0x727   :  { %v736_v16 = vpack.c.bf16 %v733_v14, %v732_v13  ;;  %v7735_v13 = vld [vmem:[%s9657_s16 + $0x20] sm:$0xff]   ;;  %v7736_v14 = vld [vmem:[%s9657_s16 + $0x68] sm:$0xff]  }
 0x729   :  { %7372 = vmatprep.mubr.msk.bf16.mxu0 %vm398_vm3, %v736_v16 }
 0x72a   :  { %7373 = vmatmul.mubr.msk.bf16.vlgmr.msra.gmra.mrb[12].mxu0 %vm398_vm3, %v737_v15 }
 0x72b   :  { %995 = vmatprep.mubr.bf16.mxu0 %v8125_v11 }
 0x7fd   :  { %v7374_v21 = vpop.f32.mrb[12].mxu0 }
 0x7fe   :  { %v778_v23 = vpop.f32.mrb[13].mxu0  ;;  %v798_v56 = vmul.f32 %v7374_v21, %v795_v22 }
 0x7ff   :  { %v7375_v25 = vpop.f32.mrb[14].mxu0  ;;  %v797_v30 = vmul.f32 %v795_v22, %v778_v23 }
 0x800   :  { %v804_v26 = vmul.f32 %v7375_v25, %v801_v24  ;;  %v781_v29 = vpop.f32.mrb[15].mxu0 }
 0x801   :  { %v803_v33 = vmul.f32 %v801_v24, %v781_v29  ;;  %v6412_v24 = vld [vmem:[%s9651_s18 + $0x1] ss:$0 sm:$0xff] }
 0x802   :  { %v806_v36 = vadd.f32 %v804_v26, %v798_v56 }
 0x803   :  { %v805_v38 = vadd.f32 %v803_v33, %v797_v30  ;;  %v6413_v30 = vld [vmem:[%s9652_s19 + $0x1] ss:$0 sm:$0xff] }
 0x805   :  { %v811_v40 = vpack.c.bf16 %v806_v36, %v805_v38 }
 0x807   :  { %7381 = vmatmul.mubr.msk.bf16.vlgmr.msra.gmra.mrb[20].mxu1 %vm141_vm1, %v811_v40 }
 0x808   :  { %7055 = vmatpush3.bf16.msra.mxu1 %v7727_v5 }
 0x809   :  { %7056 = vmatprep.subr.bf16.mxu1 %v7728_v6 }
 0x80c   :  { %7057 = vmatpush3.bf16.msra.mxu1 %v7729_v8 }
 0x80d   :  { %7058 = vmatprep.subr.bf16.mxu1 %v7730_v9 }
 0x810   :  { %7059 = vmatpush3.bf16.msra.mxu1 %v7731_v10 }
 0x811   :  { %7060 = vmatprep.subr.bf16.mxu1 %v7732_v34 }
 0x814   :  { %7061 = vmatpush3.bf16.msra.mxu1 %v7733_v35 }
 0x815   :  { %7062 = vmatprep.subr.bf16.mxu1 %v7734_v12 }
 0x818   :  { %7063 = vmatpush3.bf16.msra.mxu1 %v7735_v13 }
 0x819   :  { %7064 = vmatprep.subr.bf16.mxu1 %v7736_v14 }
 0x8da   :  { %v868_v44 = vpop.f32.mrb[20].mxu1 }
 0x8db   :  { %v869_v45 = vadd.f32 %v6406_v42, %v868_v44  ;;  %v7382_v47 = vpop.f32.mrb[21].mxu1  ;;  %v7738_v44 = vld [vmem:[%s9657_s16 + $0x70] sm:$0xff]  }
 0x8dc   :  { %v871_v48 = vpop.f32.mrb[22].mxu1  ;;  %v7740_v47 = vld [vmem:[%s9657_s16 + $0x78] sm:$0xff]  }
 0x8dd   :  { %v872_v49 = vadd.f32 %v6406_v42, %v871_v48  ;;  %v7383_v50 = vpop.f32.mrb[23].mxu1  ;;  %v875_v51 = vadd.f32 %v869_v45, %v8410_v27  ;;  %v7737_v42 = vld [vmem:[%s9657_s16 + $0x28] sm:$0xff]   ;;  %v7739_v45 = vld [vmem:[%s9657_s16 + $0x30] sm:$0xff]   ;;  %v7741_v48 = vld [vmem:[%s9657_s16 + $0x38] sm:$0xff]  }
 0x8de   :  { %7065 = vmatpush3.bf16.msra.mxu1 %v7737_v42 }
 0x8df   :  { %v881_v52 = vsel %vm141_vm1, %v875_v51, 0.0  ;;  %v876_v53 = vadd.f32 %v872_v49, %v8412_v28  ;;  %v7722_v28 = vld [vmem:[%s9656_s14 + $0x4] ss:$8 sps:$4 sm:$0xff]   ;;  %7066 = vmatprep.subr.bf16.mxu1 %v7738_v44  ;;  %v928_v49 = vld [vmem:[%s9658_s15] sm:$0x3] }
 0x8e0   :  { %882 = vadd.xlane.f32.xlu1 %v881_v52  ;;  %963 = vmatprep.subr.bf16.mxu0 %v7722_v28  ;;  %v933_v50 = vrot.slane %v928_v49, %v8325_v32 }
 0x8e1   :  { %v884_v54 = vsel %vm141_vm1, %v876_v53, 0.0  ;;  %964 = vmatpush1.bf16.msra.mxu0 %v7720_v2 }
 0x8e2   :  { %885 = vadd.xlane.f32.xlu0 %v884_v54  ;;  %965 = vmatprep.subr.bf16.mxu0 %v7725_v4 }
 0x8e3   :  { %7067 = vmatpush3.bf16.msra.mxu1 %v7739_v45  ;;  %v6438_v45 = vld [vmem:[%s9651_s18 + $0x2] ss:$0 sm:$0xff] }
 0x8e4   :  { %7068 = vmatprep.subr.bf16.mxu1 %v7740_v47 }
 0x8e5   :  { %966 = vmatpush1.bf16.msra.mxu0 %v7723_v3  ;;  %v6419_v3 = vld [vmem:[%s9659_s17] ss:$0 sm:$0xff] }
 0x8e6   :  { %7384 = vmatprep.subr.bf16.mxu0 %v8123_v0 }
 0x8e7   :  { %7069 = vmatpush3.bf16.msra.mxu1 %v7741_v48 }
 0x8e8   :  { %7414 = vmatprep.subr.bf16.mxu1 %v8123_v0 }
 0x96d   :  { %v883_v55 = vpop.xlane.xlu1 %882 }
 0x96e   :  { %v887_v58 = vmul.f32 0.03125, %v883_v55 }
 0x96f   :  { %v886_v59 = vpop.xlane.xlu0 %885 }
 0x970   :  { %v889_v60 = vsub.f32 %v875_v51, %v887_v58  ;;  %v888_v61 = vmul.f32 0.03125, %v886_v59  ;;  %v937_v51 = vrot.slane %v928_v49, %v8323_v31 }
 0x972   :  { %v890_v17 = vsub.f32 %v876_v53, %v888_v61  ;;  %v891_v62 = vmul.f32 %v889_v60, %v889_v60 }
 0x974   :  { %v893_v18 = vsel %vm141_vm1, %v891_v62, 0.0  ;;  %v892_v1 = vmul.f32 %v890_v17, %v890_v17 }
 0x975   :  { %894 = vadd.xlane.f32.xlu1 %v893_v18 }
 0x976   :  { %v896_v27 = vsel %vm141_vm1, %v892_v1, 0.0 }
 0x977   :  { %897 = vadd.xlane.f32.xlu0 %v896_v27 }
 0xa02   :  { %v895_v15 = vpop.xlane.xlu1 %894 }
 0xa03   :  { %v899_v16 = vmul.f32 0.03125, %v895_v15 }
 0xa04   :  { %v898_v19 = vpop.xlane.xlu0 %897 }
 0xa05   :  { %v901_v20 = vadd.f32 1e-05, %v899_v16  ;;  %v900_v21 = vmul.f32 0.03125, %v898_v19 }
 0xa07   :  { %7926 = vrsqrt.f32 %v901_v20  ;;  %v902_v22 = vadd.f32 1e-05, %v900_v21 }
 0xa09   :  { %7928 = vrsqrt.f32 %v902_v22 }
 0xa11   :  { %v7927_v23 = vpop.eup %7926 }
 0xa12   :  { %v905_v25 = vmul.f32 %v7927_v23, %v889_v60 }
 0xa13   :  { %v7929_v56 = vpop.eup %7928 }
 0xa14   :  { %v913_v26 = vmul.f32 %v6412_v24, %v905_v25  ;;  %v906_v29 = vmul.f32 %v7929_v56, %v890_v17  ;;  %v7742_v56 = vld [vmem:[%s9682_s29 + $0x10] sm:$0xff]  }
 0xa16   :  { %v914_v33 = vmul.f32 %v6412_v24, %v906_v29  ;;  %v921_v36 = vadd.f32 %v6413_v30, %v913_v26  ;;  %v7743_v26 = vld [vmem:[%s9682_s29 + $0x18] sm:$0xff]   ;;  %v8544_v29 = vld [vmem:[%s9686_s28] sm:$0xff]  }
 0xa18   :  { %v922_v38 = vadd.f32 %v6413_v30, %v914_v33 }
 0xa1a   :  { %v927_v40 = vpack.c.bf16 %v922_v38, %v921_v36 }
 0xa1c   :  { %6418 = vmatmul.mubr.msk.bf16.vlgmr.msra.gmra.mrb[16].mxu0 %vm141_vm1, %v927_v40 }
 0xa1d   :  { %7388 = vmatprep.mubr.msk.bf16.mxu0 %vm8124_vm0, %v8123_v0  ;;  %7385 = vmatpush3.bf16.msra.mxu0 %v7742_v56 }
 0xa1e   :  { %7386 = vmatprep.subr.bf16.mxu0 %v8123_v0 }
 0xa21   :  { %7387 = vmatpush3.bf16.msra.mxu0 %v7743_v26 }
 0xa22   :  { %7392 = vmatprep.subr.bf16.mxu0 %v8544_v29 }
 0xaef   :  { %v997_v52 = vpop.f32.mrb[16].mxu0 }
 0xaf0   :  { %v998_v53 = vadd.f32 %v997_v52, %v933_v50  ;;  %v999_v54 = vpop.f32.mrb[17].mxu0 }
 0xaf1   :  { %v1000_v55 = vadd.f32 %v999_v54, %v937_v51  ;;  %v1001_v58 = vpop.f32.mrb[18].mxu0 }
 0xaf2   :  { %v1002_v59 = vadd.f32 %v1001_v58, %v933_v50  ;;  %v1003_v60 = vpop.f32.mrb[19].mxu0  ;;  %v1006_v17 = vmax.f32 %v998_v53, 0.0  ;;  %v8564_v58 = vld [vmem:[%s9686_s28 + $0x8] sm:$0xff]  }
 0xaf3   :  { %v1004_v61 = vadd.f32 %v1003_v60, %v937_v51  ;;  %v1007_v18 = vmax.f32 %v1000_v55, 0.0  ;;  %v6439_v51 = vld [vmem:[%s9652_s19 + $0x2] ss:$0 sm:$0xff]  ;;  %v6445_v60 = vld [vmem:[%s9687_s0 + $0x1] ss:$0 sm:$0xff] }
 0xaf4   :  { %v1008_v62 = vmax.f32 %v1002_v59, 0.0  ;;  %v8571_v59 = vld [vmem:[%s9647_s3] sm:$0xf] }
 0xaf5   :  { %v1009_v1 = vmax.f32 %v1004_v61, 0.0 }
 0xaf6   :  { %v1042_v27 = vpack.c.bf16 %v1008_v62, %v1006_v17 }
 0xaf7   :  { %v1043_v28 = vpack.c.bf16 %v1009_v1, %v1007_v18 }
 0xaf9   :  { %1179 = vmatprep.mubr.bf16.mxu1 %v1043_v28 }
 0xafa   :  { %1180 = vmatmul.mubr.bf16.vlgmr.msra.gmra.mrb[24].mxu1 %v1042_v27 }
 0xafb   :  { %7418 = vmatprep.mubr.msk.bf16.mxu1 %vm8124_vm0, %v8123_v0 }
 0xbcd   :  { %v7070_v2 = vpop.f32.mrb[24].mxu1 }
 0xbce   :  { %v7071_v4 = vpop.f32.mrb[25].mxu1 }
 0xbcf   :  { %v7072_v7 = vadd.f32 %v7071_v4, %v7070_v2  ;;  %v7073_v5 = vpop.f32.mrb[26].mxu1 }
 0xbd0   :  { %v7074_v6 = vpop.f32.mrb[27].mxu1 }
 0xbd1   :  { %v1182_v8 = vadd.f32 %v7072_v7, %v6419_v3  ;;  %v7075_v9 = vadd.f32 %v7074_v6, %v7073_v5 }
 0xbd3   :  { %v1185_v10 = vadd.f32 %v7075_v9, %v6419_v3  ;;  %v1188_v34 = vadd.f32 %v1182_v8, %v921_v36 }
 0xbd5   :  { %v1194_v35 = vsel %vm141_vm1, %v1188_v34, 0.0  ;;  %v1189_v12 = vadd.f32 %v1185_v10, %v922_v38 }
 0xbd6   :  { %1195 = vadd.xlane.f32.xlu1 %v1194_v35 }
 0xbd7   :  { %v1197_v13 = vsel %vm141_vm1, %v1189_v12, 0.0 }
 0xbd8   :  { %1198 = vadd.xlane.f32.xlu0 %v1197_v13 }
 0xc63   :  { %v1196_v14 = vpop.xlane.xlu1 %1195 }
 0xc64   :  { %v1200_v15 = vmul.f32 0.03125, %v1196_v14 }
 0xc65   :  { %v1199_v16 = vpop.xlane.xlu0 %1198 }
 0xc66   :  { %v1202_v19 = vsub.f32 %v1188_v34, %v1200_v15  ;;  %v1201_v20 = vmul.f32 0.03125, %v1199_v16 }
 0xc68   :  { %v1203_v21 = vsub.f32 %v1189_v12, %v1201_v20  ;;  %v1204_v22 = vmul.f32 %v1202_v19, %v1202_v19 }
 0xc6a   :  { %v1206_v23 = vsel %vm141_vm1, %v1204_v22, 0.0  ;;  %v1205_v24 = vmul.f32 %v1203_v21, %v1203_v21 }
 0xc6b   :  { %1207 = vadd.xlane.f32.xlu1 %v1206_v23 }
 0xc6c   :  { %v1209_v25 = vsel %vm141_vm1, %v1205_v24, 0.0 }
 0xc6d   :  { %1210 = vadd.xlane.f32.xlu0 %v1209_v25 }
 0xcf8   :  { %v1208_v30 = vpop.xlane.xlu1 %1207 }
 0xcf9   :  { %v1212_v33 = vmul.f32 0.03125, %v1208_v30 }
 0xcfa   :  { %v1211_v36 = vpop.xlane.xlu0 %1210 }
 0xcfb   :  { %v1214_v38 = vadd.f32 1e-05, %v1212_v33  ;;  %v1213_v40 = vmul.f32 0.03125, %v1211_v36 }
 0xcfd   :  { %7930 = vrsqrt.f32 %v1214_v38  ;;  %v1215_v42 = vadd.f32 1e-05, %v1213_v40 }
 0xcff   :  { %7932 = vrsqrt.f32 %v1215_v42 }
 0xd07   :  { %v7931_v44 = vpop.eup %7930 }
 0xd08   :  { %v1218_v47 = vmul.f32 %v7931_v44, %v1202_v19 }
 0xd09   :  { %v7933_v48 = vpop.eup %7932 }
 0xd0a   :  { %v1226_v49 = vmul.f32 %v6438_v45, %v1218_v47  ;;  %v1219_v50 = vmul.f32 %v7933_v48, %v1203_v21 }
 0xd0c   :  { %v1227_v52 = vmul.f32 %v6438_v45, %v1219_v50  ;;  %v8553_v53 = vadd.f32 %v6439_v51, %v1226_v49  ;;  %v7744_v49 = vld [vmem:[%s9648_s6 + $0x10] sm:$0xff]   ;;  %v7745_v50 = vld [vmem:[%s9648_s6 + $0x18] sm:$0xff]  }
 0xd0e   :  { %v8555_v54 = vadd.f32 %v6439_v51, %v1227_v52 }
 0xd10   :  { %v1241_v55 = vpack.c.bf16 %v8555_v54, %v8553_v53 }
 0xd12   :  { %7389 = vmatmul.mubr.msk.bf16.vlgmr.msra.gmra.mrb[20].mxu0 %vm141_vm1, %v1241_v55 }
 0xd13   :  { %7393 = vmatpush3.bf16.msra.mxu0 %v8544_v29 }
 0xd14   :  { %7394 = vmatprep.subr.bf16.mxu0 %v8564_v58 }
 0xd17   :  { %7395 = vmatpush3.bf16.msra.mxu0 %v8564_v58 }
 0xd18   :  { %7686 = vmatprep.subr.msk.bf16.mxu0 %vm405_vm2, %v8571_v59 }
 0xde5   :  { %v1299_v61 = vpop.f32.mrb[20].mxu0 }
 0xde6   :  { %v1300_v17 = vadd.f32 %v6445_v60, %v1299_v61  ;;  %v7390_v62 = vpop.f32.mrb[21].mxu0 }
 0xde7   :  { %v1302_v18 = vpop.f32.mrb[22].mxu0 }
 0xde8   :  { %v1303_v1 = vadd.f32 %v6445_v60, %v1302_v18  ;;  %1308 = vrot.lane.b32.xlu1 %v1300_v17, %s9673_s24  ;;  %v7391_v27 = vpop.f32.mrb[23].mxu0 }
 0xdea   :  { %1310 = vrot.lane.b32.xlu0 %v1303_v1, %s9673_s24 }
 0xdec   :  { %1454 = vrot.lane.b32.xlu1 %v1300_v17, %s9671_s5 }
 0xdf0   :  { %1459 = vrot.lane.b32.xlu1 %v1303_v1, %s9671_s5 }
 0xe5a   :  { %v1309_v28 = vpop.permute.xlu1 %1308 }
 0xe5b   :  { %v1314_v3 = vmul.f32 %v1309_v28, %v1300_v17  ;;  %v1316_v4 = vmul.f32 %v1309_v28, %v1303_v1 }
 0xe5c   :  { %v1311_v2 = vpop.permute.xlu0 %1310 }
 0xe5d   :  { %v1315_v7 = vmul.f32 %v1311_v2, %v1300_v17  ;;  %v1317_v5 = vmul.f32 %v1311_v2, %v1303_v1 }
 0xe5e   :  { %v1455_v51 = vpop.permute.xlu1 %1454 }
 0xe5f   :  { %v1318_v6 = vpack.c.bf16 %v1315_v7, %v1314_v3  ;;  %v1319_v8 = vpack.c.bf16 %v1317_v5, %v1316_v4  ;;  %v6458_v4 = vld [vmem:[%s9649_s7 + $0x1] ss:$0 sm:$0xff] }
 0xe61   :  { %7396 = vmatprep.mubr.msk.bf16.mxu0 %vm141_vm1, %v1318_v6 }
 0xe62   :  { %7397 = vmatmul.mubr.msk.bf16.vlgmr.msra.gmra.mrb[24].mxu0 %vm141_vm1, %v1319_v8  ;;  %v1460_v60 = vpop.permute.xlu1 %1459 }
 0xe63   :  { %7401 = vmatpush3.bf16.msra.mxu0 %v8357_v57 }
 0xe64   :  { %7406 = vmatprep.subr.bf16.mxu0 %v8123_v0 }
 0xf35   :  { %v7398_v9 = vpop.f32.mrb[24].mxu0 }
 0xf36   :  { %v1360_v10 = vpop.f32.mrb[25].mxu0 }
 0xf37   :  { %v7399_v34 = vpop.f32.mrb[26].mxu0 }
 0xf38   :  { %v1376_v35 = vmax.f32 %v7398_v9, %v7399_v34  ;;  %v1363_v12 = vpop.f32.mrb[27].mxu0 }
 0xf39   :  { %v1375_v13 = vmax.f32 %v1360_v10, %v1363_v12 }
 0xf3a   :  { %v1379_v14 = vsub.f32 %v7398_v9, %v1376_v35  ;;  %v1380_v15 = vsub.f32 %v7399_v34, %v1376_v35 }
 0xf3b   :  { %v1377_v16 = vsub.f32 %v1360_v10, %v1375_v13  ;;  %v1378_v19 = vsub.f32 %v1363_v12, %v1375_v13 }
 0xf3c   :  { %v1385_v20 = vmul.f32 1.442695, %v1379_v14  ;;  %v1387_v21 = vmul.f32 1.442695, %v1380_v15 }
 0xf3d   :  { %v1381_v22 = vmul.f32 1.442695, %v1377_v16  ;;  %v1383_v23 = vmul.f32 1.442695, %v1378_v19 }
 0xf3e   :  { %7934 = vpow2.f32 %v1385_v20 }
 0xf3f   :  { %7936 = vpow2.f32 %v1387_v21 }
 0xf40   :  { %7938 = vpow2.f32 %v1381_v22 }
 0xf41   :  { %7940 = vpow2.f32 %v1383_v23 }
 0xf48   :  { %v7935_v24 = vpop.eup %7934 }
 0xf49   :  { %v7937_v25 = vpop.eup %7936 }
 0xf4a   :  { %v7939_v56 = vpop.eup %7938  ;;  %v1390_v26 = vadd.f32 %v7937_v25, %v7935_v24 }
 0xf4b   :  { %v7941_v30 = vpop.eup %7940 }
 0xf4c   :  { %7942 = vrcp.f32 %v1390_v26  ;;  %v1389_v33 = vadd.f32 %v7941_v30, %v7939_v56 }
 0xf4e   :  { %7944 = vrcp.f32 %v1389_v33 }
 0xf56   :  { %v7943_v36 = vpop.eup %7942 }
 0xf57   :  { %v1396_v38 = vmul.f32 %v7943_v36, %v7937_v25  ;;  %v1395_v40 = vmul.f32 %v7943_v36, %v7935_v24  ;;  %v7747_v24 = vld [vmem:[%s9650_s8 + $0x18] sm:$0xff]  }
 0xf58   :  { %v7945_v42 = vpop.eup %7944 }
 0xf59   :  { %v1393_v44 = vmul.f32 %v7945_v42, %v7939_v56  ;;  %v1394_v45 = vmul.f32 %v7945_v42, %v7941_v30  ;;  %v1398_v47 = vpack.c.bf16 %v1396_v38, %v1395_v40  ;;  %v6464_v40 = vld [vmem:[%s9651_s18 + $0x3] ss:$0 sm:$0xff] }
 0xf5b   :  { %v1397_v48 = vpack.c.bf16 %v1394_v45, %v1393_v44 }
 0xf5d   :  { %7402 = vmatprep.mubr.msk.bf16.mxu0 %vm398_vm3, %v1397_v48 }
 0xf5e   :  { %7403 = vmatmul.mubr.msk.bf16.vlgmr.msra.gmra.mrb[28].mxu0 %vm398_vm3, %v1398_v47  ;;  %v6465_v47 = vld [vmem:[%s9652_s19 + $0x3] ss:$0 sm:$0xff] }
 0xf5f   :  { %7410 = vmatprep.mubr.msk.bf16.mxu0 %vm8124_vm0, %v8123_v0  ;;  %7407 = vmatpush3.bf16.msra.mxu0 %v7744_v49 }
 0xf60   :  { %7408 = vmatprep.subr.bf16.mxu0 %v8123_v0 }
 0xf63   :  { %7409 = vmatpush3.bf16.msra.mxu0 %v7745_v50 }
 0xf64   :  { %7422 = vmatprep.subr.bf16.mxu0 %v8544_v29 }
0x1031   :  { %v7404_v52 = vpop.f32.mrb[28].mxu0 }
0x1032   :  { %v1439_v55 = vpop.f32.mrb[29].mxu0  ;;  %v1458_v17 = vmul.f32 %v7404_v52, %v1455_v51  ;;  %v6471_v52 = vld [vmem:[%s9653_s9 + $0x1] ss:$0 sm:$0xff] }
0x1033   :  { %v7405_v61 = vpop.f32.mrb[30].mxu0  ;;  %v1457_v1 = vmul.f32 %v1455_v51, %v1439_v55 }
0x1034   :  { %v1463_v62 = vmul.f32 %v7405_v61, %v1460_v60  ;;  %v1442_v18 = vpop.f32.mrb[31].mxu0 }
0x1035   :  { %v1462_v27 = vmul.f32 %v1460_v60, %v1442_v18 }
0x1036   :  { %v1465_v28 = vadd.f32 %v1463_v62, %v1458_v17 }
0x1037   :  { %v1464_v2 = vadd.f32 %v1462_v27, %v1457_v1 }
0x1039   :  { %v1471_v3 = vpack.c.bf16 %v1465_v28, %v1464_v2 }
0x103b   :  { %7411 = vmatmul.mubr.msk.bf16.vlgmr.msra.gmra.mrb[32].mxu0 %vm141_vm1, %v1471_v3 }
0x103c   :  { %7423 = vmatpush3.bf16.msra.mxu0 %v8544_v29 }
0x103d   :  { %7424 = vmatprep.subr.bf16.mxu0 %v8564_v58 }
0x1040   :  { %7425 = vmatpush3.bf16.msra.mxu0 %v8564_v58 }
0x1041   :  { %7436 = vmatprep.subr.bf16.mxu0 %v8123_v0 }
0x110e   :  { %v1529_v7 = vpop.f32.mrb[32].mxu0 }
0x110f   :  { %v1530_v5 = vadd.f32 %v6458_v4, %v1529_v7  ;;  %v7412_v6 = vpop.f32.mrb[33].mxu0 }
0x1110   :  { %v1532_v8 = vpop.f32.mrb[34].mxu0 }
0x1111   :  { %v1533_v9 = vadd.f32 %v6458_v4, %v1532_v8  ;;  %v7413_v10 = vpop.f32.mrb[35].mxu0  ;;  %v1536_v34 = vadd.f32 %v1530_v5, %v8553_v53 }
0x1113   :  { %v1542_v35 = vsel %vm141_vm1, %v1536_v34, 0.0  ;;  %v1537_v12 = vadd.f32 %v1533_v9, %v8555_v54 }
0x1114   :  { %1543 = vadd.xlane.f32.xlu0 %v1542_v35 }
0x1115   :  { %v1545_v13 = vsel %vm141_vm1, %v1537_v12, 0.0 }
0x1116   :  { %1546 = vadd.xlane.f32.xlu1 %v1545_v13 }
0x1127   :  { %1654 = vrot.lane.b32.xlu1 %v8387_v63, %s9671_s5 }
0x112b   :  { %1800 = vrot.lane.b32.xlu1 %v8387_v63, %s9669_s4  ;;  %v7746_v63 = vld [vmem:[%s9650_s8 + $0x10] sm:$0xff]  }
0x112c   :  { %7415 = vmatpush3.bf16.msra.mxu1 %v7746_v63 }
0x112d   :  { %7416 = vmatprep.subr.bf16.mxu1 %v8123_v0 }
0x112f   :  { %1805 = vrot.lane.b32.xlu1 %v8336_v39, %s9669_s4 }
0x1130   :  { %7417 = vmatpush3.bf16.msra.mxu1 %v7747_v24 }
0x1131   :  { %7687 = vmatprep.subr.msk.bf16.mxu1 %vm405_vm2, %v8571_v59 }
0x11a1   :  { %v1544_v14 = vpop.xlane.xlu0 %1543 }
0x11a2   :  { %v1548_v53 = vmul.f32 0.03125, %v1544_v14 }
0x11a3   :  { %v1547_v15 = vpop.xlane.xlu1 %1546 }
0x11a4   :  { %v1550_v16 = vsub.f32 %v1536_v34, %v1548_v53  ;;  %v1549_v19 = vmul.f32 0.03125, %v1547_v15 }
0x11a6   :  { %v1551_v54 = vsub.f32 %v1537_v12, %v1549_v19  ;;  %v1552_v20 = vmul.f32 %v1550_v16, %v1550_v16 }
0x11a7   :  { %v1655_v60 = vpop.permute.xlu1 %1654 }
0x11a8   :  { %v1554_v21 = vsel %vm141_vm1, %v1552_v20, 0.0  ;;  %v1553_v22 = vmul.f32 %v1551_v54, %v1551_v54 }
0x11a9   :  { %1555 = vadd.xlane.f32.xlu0 %v1554_v21 }
0x11aa   :  { %v1557_v23 = vsel %vm141_vm1, %v1553_v22, 0.0 }
0x11ad   :  { %1558 = vadd.xlane.f32.xlu0 %v1557_v23 }
0x11c3   :  { %1656 = vrot.lane.b32.xlu0 %v8336_v39, %s9671_s5 }
0x1236   :  { %v1556_v25 = vpop.xlane.xlu0 %1555 }
0x1237   :  { %v1560_v56 = vmul.f32 0.03125, %v1556_v25 }
0x1239   :  { %v1562_v26 = vadd.f32 1e-05, %v1560_v56 }
0x123a   :  { %v1559_v30 = vpop.xlane.xlu0 %1558 }
0x123b   :  { %7946 = vrsqrt.f32 %v1562_v26  ;;  %v1561_v39 = vmul.f32 0.03125, %v1559_v30 }
0x123d   :  { %v1563_v33 = vadd.f32 1e-05, %v1561_v39 }
0x123e   :  { %v1657_v62 = vpop.permute.xlu0 %1656 }
0x123f   :  { %7948 = vrsqrt.f32 %v1563_v33 }
0x1245   :  { %v7947_v36 = vpop.eup %7946 }
0x1246   :  { %v1566_v38 = vmul.f32 %v7947_v36, %v1550_v16 }
0x1248   :  { %v1574_v44 = vmul.f32 %v6464_v40, %v1566_v38 }
0x1249   :  { %v7949_v42 = vpop.eup %7948 }
0x124a   :  { %v1567_v45 = vmul.f32 %v7949_v42, %v1551_v54  ;;  %v8635_v49 = vadd.f32 %v6465_v47, %v1574_v44  ;;  %v7749_v42 = vld [vmem:[%s9654_s12 + $0x18] sm:$0xff]   ;;  %v1801_v44 = vpop.permute.xlu1 %1800 }
0x124c   :  { %v1575_v48 = vmul.f32 %v6464_v40, %v1567_v45  ;;  %v7748_v40 = vld [vmem:[%s9654_s12 + $0x10] sm:$0xff]  }
0x124e   :  { %v8637_v50 = vadd.f32 %v6465_v47, %v1575_v48  ;;  %v1806_v48 = vpop.permute.xlu1 %1805 }
0x1250   :  { %v1589_v51 = vpack.c.bf16 %v8637_v50, %v8635_v49 }
0x1252   :  { %7419 = vmatmul.mubr.msk.bf16.vlgmr.msra.gmra.mrb[28].mxu1 %vm141_vm1, %v1589_v51 }
0x1253   :  { %7431 = vmatpush3.bf16.msra.mxu1 %v8357_v57 }
0x1325   :  { %v1647_v55 = vpop.f32.mrb[28].mxu1 }
0x1326   :  { %v1648_v61 = vadd.f32 %v6471_v52, %v1647_v55  ;;  %v7420_v17 = vpop.f32.mrb[29].mxu1 }
0x1327   :  { %v1650_v18 = vpop.f32.mrb[30].mxu1 }
0x1328   :  { %v1660_v1 = vmul.f32 %v1655_v60, %v1648_v61  ;;  %v1661_v27 = vmul.f32 %v1657_v62, %v1648_v61  ;;  %v1651_v28 = vadd.f32 %v6471_v52, %v1650_v18  ;;  %v7421_v2 = vpop.f32.mrb[31].mxu1 }
0x132a   :  { %v1664_v3 = vpack.c.bf16 %v1661_v27, %v1660_v1  ;;  %v1662_v4 = vmul.f32 %v1655_v60, %v1651_v28  ;;  %v1663_v7 = vmul.f32 %v1657_v62, %v1651_v28  ;;  %v6484_v27 = vld [vmem:[%s9655_s13 + $0x1] ss:$0 sm:$0xff] }
0x132c   :  { %v1665_v5 = vpack.c.bf16 %v1663_v7, %v1662_v4  ;;  %7426 = vmatprep.mubr.msk.bf16.mxu0 %vm141_vm1, %v1664_v3 }
0x132e   :  { %7427 = vmatmul.mubr.msk.bf16.vlgmr.msra.gmra.mrb[36].mxu0 %vm141_vm1, %v1665_v5 }
0x132f   :  { %7440 = vmatprep.mubr.msk.bf16.mxu0 %vm8124_vm0, %v8123_v0  ;;  %7437 = vmatpush3.bf16.msra.mxu0 %v7748_v40 }
0x1330   :  { %7438 = vmatprep.subr.bf16.mxu0 %v8123_v0 }
0x1333   :  { %7439 = vmatpush3.bf16.msra.mxu0 %v7749_v42 }
0x1401   :  { %v7428_v6 = vpop.f32.mrb[36].mxu0 }
0x1402   :  { %v1706_v8 = vpop.f32.mrb[37].mxu0 }
0x1403   :  { %v7429_v9 = vpop.f32.mrb[38].mxu0 }
0x1404   :  { %v1722_v10 = vmax.f32 %v7428_v6, %v7429_v9  ;;  %v1709_v34 = vpop.f32.mrb[39].mxu0 }
0x1405   :  { %v1721_v35 = vmax.f32 %v1706_v8, %v1709_v34 }
0x1406   :  { %v1725_v12 = vsub.f32 %v7428_v6, %v1722_v10  ;;  %v1726_v13 = vsub.f32 %v7429_v9, %v1722_v10 }
0x1407   :  { %v1723_v14 = vsub.f32 %v1706_v8, %v1721_v35  ;;  %v1724_v53 = vsub.f32 %v1709_v34, %v1721_v35 }
0x1408   :  { %v1731_v15 = vmul.f32 1.442695, %v1725_v12  ;;  %v1733_v16 = vmul.f32 1.442695, %v1726_v13 }
0x1409   :  { %v1727_v19 = vmul.f32 1.442695, %v1723_v14  ;;  %v1729_v54 = vmul.f32 1.442695, %v1724_v53 }
0x140a   :  { %7950 = vpow2.f32 %v1731_v15 }
0x140b   :  { %7952 = vpow2.f32 %v1733_v16 }
0x140c   :  { %7954 = vpow2.f32 %v1727_v19 }
0x140d   :  { %7956 = vpow2.f32 %v1729_v54  ;;  %v7750_v54 = vld [vmem:[%s9656_s14 + $0x20] ss:$8 sps:$4 sm:$0xff]  }
0x1414   :  { %v7951_v20 = vpop.eup %7950 }
0x1415   :  { %v7953_v21 = vpop.eup %7952 }
0x1416   :  { %v7955_v22 = vpop.eup %7954  ;;  %v1736_v23 = vadd.f32 %v7953_v21, %v7951_v20 }
0x1417   :  { %v7957_v63 = vpop.eup %7956 }
0x1418   :  { %7958 = vrcp.f32 %v1736_v23  ;;  %v1735_v24 = vadd.f32 %v7957_v63, %v7955_v22  ;;  %v7757_v23 = vld [vmem:[%s9657_s16 + $0x80] sm:$0xff]  }
0x141a   :  { %7960 = vrcp.f32 %v1735_v24  ;;  %v7759_v24 = vld [vmem:[%s9657_s16 + $0x88] sm:$0xff]  }
0x1422   :  { %v7959_v25 = vpop.eup %7958 }
0x1423   :  { %v1742_v56 = vmul.f32 %v7959_v25, %v7953_v21  ;;  %v1741_v26 = vmul.f32 %v7959_v25, %v7951_v20  ;;  %v7753_v20 = vld [vmem:[%s9656_s14 + $0x30] ss:$8 sps:$4 sm:$0xff]   ;;  %v7755_v21 = vld [vmem:[%s9656_s14 + $0x34] ss:$8 sps:$4 sm:$0xff]  }
0x1424   :  { %v7961_v30 = vpop.eup %7960  ;;  %v7760_v25 = vld [vmem:[%s9657_s16 + $0xd0] sm:$0xff]  }
0x1425   :  { %v1739_v39 = vmul.f32 %v7961_v30, %v7955_v22  ;;  %v1740_v33 = vmul.f32 %v7961_v30, %v7957_v63  ;;  %v1744_v36 = vpack.c.bf16 %v1742_v56, %v1741_v26  ;;  %v7756_v22 = vld [vmem:[%s9657_s16 + $0xc0] sm:$0xff]   ;;  %v7758_v63 = vld [vmem:[%s9657_s16 + $0xc8] sm:$0xff]   ;;  %v7761_v56 = vld [vmem:[%s9657_s16 + $0x90] sm:$0xff]  }
0x1426   :  { %7102 = vmatprep.subr.bf16.mxu0 %v7756_v22  ;;  %v7762_v26 = vld [vmem:[%s9657_s16 + $0xd8] sm:$0xff]  }
0x1427   :  { %v1743_v38 = vpack.c.bf16 %v1740_v33, %v1739_v39  ;;  %v7763_v30 = vld [vmem:[%s9657_s16 + $0x98] sm:$0xff]   ;;  %v7764_v39 = vld [vmem:[%s9657_s16 + $0xe0] sm:$0xff]  }
0x1428   :  { %v7765_v33 = vld [vmem:[%s9657_s16 + $0xa0] sm:$0xff]  }
0x1429   :  { %7432 = vmatprep.mubr.msk.bf16.mxu1 %vm398_vm3, %v1743_v38 }
0x142a   :  { %7433 = vmatmul.mubr.msk.bf16.vlgmr.msra.gmra.mrb[32].mxu1 %vm398_vm3, %v1744_v36  ;;  %v7766_v36 = vld [vmem:[%s9657_s16 + $0xe8] sm:$0xff]  }
0x142b   :  { %2004 = vmatprep.mubr.bf16.mxu1 %v8125_v11 }
0x14fd   :  { %v7434_v45 = vpop.f32.mrb[32].mxu1 }
0x14fe   :  { %v1785_v47 = vpop.f32.mrb[33].mxu1  ;;  %v1804_v52 = vmul.f32 %v7434_v45, %v1801_v44 }
0x14ff   :  { %v7435_v51 = vpop.f32.mrb[34].mxu1  ;;  %v1803_v61 = vmul.f32 %v1801_v44, %v1785_v47 }
0x1500   :  { %v1809_v55 = vmul.f32 %v7435_v51, %v1806_v48  ;;  %v1788_v60 = vpop.f32.mrb[35].mxu1 }
0x1501   :  { %v1808_v17 = vmul.f32 %v1806_v48, %v1788_v60 }
0x1502   :  { %v1811_v62 = vadd.f32 %v1809_v55, %v1804_v52  ;;  %v6490_v52 = vld [vmem:[%s9651_s18 + $0x4] ss:$0 sm:$0xff] }
0x1503   :  { %v1810_v18 = vadd.f32 %v1808_v17, %v1803_v61  ;;  %v6491_v17 = vld [vmem:[%s9652_s19 + $0x4] ss:$0 sm:$0xff] }
0x1505   :  { %v1817_v1 = vpack.c.bf16 %v1811_v62, %v1810_v18 }
0x1507   :  { %7441 = vmatmul.mubr.msk.bf16.vlgmr.msra.gmra.mrb[40].mxu0 %vm141_vm1, %v1817_v1 }
0x1508   :  { %7103 = vmatpush3.bf16.msra.mxu0 %v7757_v23 }
0x1509   :  { %7104 = vmatprep.subr.bf16.mxu0 %v7758_v63 }
0x150c   :  { %7105 = vmatpush3.bf16.msra.mxu0 %v7759_v24 }
0x150d   :  { %7106 = vmatprep.subr.bf16.mxu0 %v7760_v25 }
0x1510   :  { %7107 = vmatpush3.bf16.msra.mxu0 %v7761_v56 }
0x1511   :  { %7108 = vmatprep.subr.bf16.mxu0 %v7762_v26 }
0x1514   :  { %7109 = vmatpush3.bf16.msra.mxu0 %v7763_v30 }
0x1515   :  { %7110 = vmatprep.subr.bf16.mxu0 %v7764_v39 }
0x1518   :  { %7111 = vmatpush3.bf16.msra.mxu0 %v7765_v33 }
0x1519   :  { %7112 = vmatprep.subr.bf16.mxu0 %v7766_v36 }
0x15da   :  { %v1875_v28 = vpop.f32.mrb[40].mxu0 }
0x15db   :  { %v1876_v2 = vadd.f32 %v6484_v27, %v1875_v28  ;;  %v7442_v3 = vpop.f32.mrb[41].mxu0  ;;  %v7767_v28 = vld [vmem:[%s9657_s16 + $0xa8] sm:$0xff]  }
0x15dc   :  { %v1878_v4 = vpop.f32.mrb[42].mxu0  ;;  %7113 = vmatpush3.bf16.msra.mxu0 %v7767_v28  ;;  %v7769_v3 = vld [vmem:[%s9657_s16 + $0xb0] sm:$0xff]  }
0x15dd   :  { %v1879_v7 = vadd.f32 %v6484_v27, %v1878_v4  ;;  %v7443_v5 = vpop.f32.mrb[43].mxu0  ;;  %v1882_v6 = vadd.f32 %v1876_v2, %v8635_v49  ;;  %v7768_v2 = vld [vmem:[%s9657_s16 + $0xf0] sm:$0xff]   ;;  %v7770_v4 = vld [vmem:[%s9657_s16 + $0xf8] sm:$0xff]  }
0x15de   :  { %7114 = vmatprep.subr.bf16.mxu0 %v7768_v2  ;;  %v6496_v5 = vld [vmem:[%s9658_s15 + $0x2] sm:$0x3] }
0x15df   :  { %v1888_v8 = vsel %vm141_vm1, %v1882_v6, 0.0  ;;  %v1883_v9 = vadd.f32 %v1879_v7, %v8637_v50  ;;  %v7752_v50 = vld [vmem:[%s9656_s14 + $0x24] ss:$8 sps:$4 sm:$0xff]   ;;  %v7771_v7 = vld [vmem:[%s9657_s16 + $0xb8] sm:$0xff]  }
0x15e0   :  { %1889 = vadd.xlane.f32.xlu0 %v1888_v8  ;;  %1972 = vmatprep.subr.bf16.mxu1 %v7752_v50  ;;  %v1946_v8 = vrot.slane %v6496_v5, %v8323_v31 }
0x15e1   :  { %v1891_v10 = vsel %vm141_vm1, %v1883_v9, 0.0  ;;  %1973 = vmatpush1.bf16.msra.mxu1 %v7750_v54  ;;  %7115 = vmatpush3.bf16.msra.mxu0 %v7769_v3  ;;  %v6554_v3 = vld [vmem:[%s9651_s18 + $0x5] ss:$0 sm:$0xff] }
0x15e2   :  { %1892 = vadd.xlane.f32.xlu1 %v1891_v10  ;;  %1974 = vmatprep.subr.bf16.mxu1 %v7755_v21  ;;  %v6535_v21 = vld [vmem:[%s9659_s17 + $0x1] ss:$0 sm:$0xff] }
0x15e3   :  { %7116 = vmatprep.subr.bf16.mxu0 %v7770_v4 }
0x15e5   :  { %1975 = vmatpush1.bf16.msra.mxu1 %v7753_v20  ;;  %7117 = vmatpush3.bf16.msra.mxu0 %v7771_v7 }
0x15e6   :  { %7444 = vmatprep.subr.bf16.mxu1 %v8123_v0  ;;  %7474 = vmatprep.subr.bf16.mxu0 %v8123_v0 }
0x166d   :  { %v1890_v34 = vpop.xlane.xlu0 %1889 }
0x166e   :  { %v1894_v35 = vmul.f32 0.03125, %v1890_v34 }
0x166f   :  { %v1893_v12 = vpop.xlane.xlu1 %1892 }
0x1670   :  { %v1896_v13 = vsub.f32 %v1882_v6, %v1894_v35  ;;  %v1895_v14 = vmul.f32 0.03125, %v1893_v12  ;;  %v1942_v6 = vrot.slane %v6496_v5, %v8325_v32 }
0x1672   :  { %v1897_v53 = vsub.f32 %v1883_v9, %v1895_v14  ;;  %v1898_v15 = vmul.f32 %v1896_v13, %v1896_v13 }
0x1674   :  { %v1900_v16 = vsel %vm141_vm1, %v1898_v15, 0.0  ;;  %v1899_v19 = vmul.f32 %v1897_v53, %v1897_v53 }
0x1675   :  { %1901 = vadd.xlane.f32.xlu0 %v1900_v16 }
0x1676   :  { %v1903_v49 = vsel %vm141_vm1, %v1899_v19, 0.0 }
0x1679   :  { %1904 = vadd.xlane.f32.xlu0 %v1903_v49 }
0x1702   :  { %v1902_v38 = vpop.xlane.xlu0 %1901 }
0x1703   :  { %v1906_v40 = vmul.f32 0.03125, %v1902_v38 }
0x1705   :  { %v1908_v42 = vadd.f32 1e-05, %v1906_v40 }
0x1706   :  { %v1905_v44 = vpop.xlane.xlu0 %1904 }
0x1707   :  { %7962 = vrsqrt.f32 %v1908_v42  ;;  %v1907_v45 = vmul.f32 0.03125, %v1905_v44 }
0x1709   :  { %v1909_v47 = vadd.f32 1e-05, %v1907_v45 }
0x170b   :  { %7964 = vrsqrt.f32 %v1909_v47 }
0x1711   :  { %v7963_v48 = vpop.eup %7962 }
0x1712   :  { %v1912_v51 = vmul.f32 %v7963_v48, %v1896_v13 }
0x1714   :  { %v1920_v60 = vmul.f32 %v6490_v52, %v1912_v51 }
0x1715   :  { %v7965_v55 = vpop.eup %7964 }
0x1716   :  { %v1913_v61 = vmul.f32 %v7965_v55, %v1897_v53  ;;  %v1928_v18 = vadd.f32 %v6491_v17, %v1920_v60  ;;  %v7772_v60 = vld [vmem:[%s9682_s29 + $0x20] sm:$0xff]  }
0x1718   :  { %v1921_v62 = vmul.f32 %v6490_v52, %v1913_v61  ;;  %v7773_v61 = vld [vmem:[%s9682_s29 + $0x28] sm:$0xff]  }
0x171a   :  { %v1929_v1 = vadd.f32 %v6491_v17, %v1921_v62 }
0x171c   :  { %v1935_v27 = vpack.c.bf16 %v1929_v1, %v1928_v18 }
0x171e   :  { %6501 = vmatmul.mubr.msk.bf16.vlgmr.msra.gmra.mrb[36].mxu1 %vm141_vm1, %v1935_v27 }
0x171f   :  { %7448 = vmatprep.mubr.msk.bf16.mxu1 %vm8124_vm0, %v8123_v0  ;;  %7445 = vmatpush3.bf16.msra.mxu1 %v7772_v60 }
0x1720   :  { %7446 = vmatprep.subr.bf16.mxu1 %v8123_v0 }
0x1723   :  { %7447 = vmatpush3.bf16.msra.mxu1 %v7773_v61 }
0x1724   :  { %7452 = vmatprep.subr.bf16.mxu1 %v8544_v29 }
0x17f1   :  { %v2006_v9 = vpop.f32.mrb[36].mxu1 }
0x17f2   :  { %v2007_v10 = vadd.f32 %v2006_v9, %v1942_v6  ;;  %v2008_v34 = vpop.f32.mrb[37].mxu1 }
0x17f3   :  { %v2009_v35 = vadd.f32 %v2008_v34, %v1946_v8  ;;  %v2010_v12 = vpop.f32.mrb[38].mxu1 }
0x17f4   :  { %v2011_v13 = vadd.f32 %v2010_v12, %v1942_v6  ;;  %v2012_v14 = vpop.f32.mrb[39].mxu1  ;;  %v2015_v15 = vmax.f32 %v2007_v10, 0.0  ;;  %v6561_v12 = vld [vmem:[%s9687_s0 + $0x2] ss:$0 sm:$0xff] }
0x17f5   :  { %v2013_v53 = vadd.f32 %v2012_v14, %v1946_v8  ;;  %v2016_v19 = vmax.f32 %v2009_v35, 0.0  ;;  %v6555_v8 = vld [vmem:[%s9652_s19 + $0x5] ss:$0 sm:$0xff] }
0x17f6   :  { %v2017_v16 = vmax.f32 %v2011_v13, 0.0 }
0x17f7   :  { %v2018_v49 = vmax.f32 %v2013_v53, 0.0 }
0x17f8   :  { %v2052_v50 = vpack.c.bf16 %v2017_v16, %v2015_v15 }
0x17f9   :  { %v2053_v54 = vpack.c.bf16 %v2018_v49, %v2016_v19 }
0x17fb   :  { %2190 = vmatprep.mubr.bf16.mxu0 %v2053_v54 }
0x17fc   :  { %2191 = vmatmul.mubr.bf16.vlgmr.msra.gmra.mrb[44].mxu0 %v2052_v50 }
0x17fd   :  { %7478 = vmatprep.mubr.msk.bf16.mxu0 %vm8124_vm0, %v8123_v0 }
0x18cf   :  { %v7118_v20 = vpop.f32.mrb[44].mxu0 }
0x18d0   :  { %v7119_v22 = vpop.f32.mrb[45].mxu0 }
0x18d1   :  { %v7120_v23 = vadd.f32 %v7119_v22, %v7118_v20  ;;  %v7121_v63 = vpop.f32.mrb[46].mxu0 }
0x18d2   :  { %v7122_v24 = vpop.f32.mrb[47].mxu0 }
0x18d3   :  { %v2193_v25 = vadd.f32 %v7120_v23, %v6535_v21  ;;  %v7123_v56 = vadd.f32 %v7122_v24, %v7121_v63 }
0x18d5   :  { %v2196_v26 = vadd.f32 %v7123_v56, %v6535_v21  ;;  %v2199_v30 = vadd.f32 %v2193_v25, %v1928_v18 }
0x18d7   :  { %v2205_v39 = vsel %vm141_vm1, %v2199_v30, 0.0  ;;  %v2200_v33 = vadd.f32 %v2196_v26, %v1929_v1 }
0x18d8   :  { %2206 = vadd.xlane.f32.xlu1 %v2205_v39 }
0x18d9   :  { %v2208_v36 = vsel %vm141_vm1, %v2200_v33, 0.0 }
0x18da   :  { %2209 = vadd.xlane.f32.xlu0 %v2208_v36 }
0x1965   :  { %v2207_v38 = vpop.xlane.xlu1 %2206 }
0x1966   :  { %v2211_v40 = vmul.f32 0.03125, %v2207_v38 }
0x1967   :  { %v2210_v42 = vpop.xlane.xlu0 %2209 }
0x1968   :  { %v2213_v44 = vsub.f32 %v2199_v30, %v2211_v40  ;;  %v2212_v45 = vmul.f32 0.03125, %v2210_v42 }
0x196a   :  { %v2214_v47 = vsub.f32 %v2200_v33, %v2212_v45  ;;  %v2215_v48 = vmul.f32 %v2213_v44, %v2213_v44 }
0x196c   :  { %v2217_v51 = vsel %vm141_vm1, %v2215_v48, 0.0  ;;  %v2216_v52 = vmul.f32 %v2214_v47, %v2214_v47 }
0x196d   :  { %2218 = vadd.xlane.f32.xlu1 %v2217_v51 }
0x196e   :  { %v2220_v55 = vsel %vm141_vm1, %v2216_v52, 0.0 }
0x196f   :  { %2221 = vadd.xlane.f32.xlu0 %v2220_v55 }
0x19fa   :  { %v2219_v17 = vpop.xlane.xlu1 %2218 }
0x19fb   :  { %v2223_v62 = vmul.f32 0.03125, %v2219_v17 }
0x19fc   :  { %v2222_v18 = vpop.xlane.xlu0 %2221 }
0x19fd   :  { %v2225_v1 = vadd.f32 1e-05, %v2223_v62  ;;  %v2224_v27 = vmul.f32 0.03125, %v2222_v18 }
0x19ff   :  { %7966 = vrsqrt.f32 %v2225_v1  ;;  %v2226_v28 = vadd.f32 1e-05, %v2224_v27 }
0x1a01   :  { %7968 = vrsqrt.f32 %v2226_v28 }
0x1a09   :  { %v7967_v2 = vpop.eup %7966 }
0x1a0a   :  { %v2229_v4 = vmul.f32 %v7967_v2, %v2213_v44 }
0x1a0b   :  { %v7969_v7 = vpop.eup %7968 }
0x1a0c   :  { %v2237_v5 = vmul.f32 %v6554_v3, %v2229_v4  ;;  %v2230_v6 = vmul.f32 %v7969_v7, %v2214_v47  ;;  %v7774_v4 = vld [vmem:[%s9648_s6 + $0x20] sm:$0xff]   ;;  %v7775_v7 = vld [vmem:[%s9648_s6 + $0x28] sm:$0xff]  }
0x1a0e   :  { %v2238_v9 = vmul.f32 %v6554_v3, %v2230_v6  ;;  %v8769_v10 = vadd.f32 %v6555_v8, %v2237_v5 }
0x1a10   :  { %v8771_v34 = vadd.f32 %v6555_v8, %v2238_v9 }
0x1a12   :  { %v2252_v35 = vpack.c.bf16 %v8771_v34, %v8769_v10 }
0x1a14   :  { %7449 = vmatmul.mubr.msk.bf16.vlgmr.msra.gmra.mrb[40].mxu1 %vm141_vm1, %v2252_v35 }
0x1a15   :  { %7453 = vmatpush3.bf16.msra.mxu1 %v8544_v29 }
0x1a16   :  { %7454 = vmatprep.subr.bf16.mxu1 %v8564_v58 }
0x1a19   :  { %7455 = vmatpush3.bf16.msra.mxu1 %v8564_v58 }
0x1a1a   :  { %7688 = vmatprep.subr.msk.bf16.mxu1 %vm405_vm2, %v8571_v59 }
0x1ae7   :  { %v2310_v13 = vpop.f32.mrb[40].mxu1 }
0x1ae8   :  { %v2311_v14 = vadd.f32 %v6561_v12, %v2310_v13  ;;  %v7450_v53 = vpop.f32.mrb[41].mxu1 }
0x1ae9   :  { %v2313_v15 = vpop.f32.mrb[42].mxu1 }
0x1aea   :  { %v2314_v16 = vadd.f32 %v6561_v12, %v2313_v15  ;;  %2319 = vrot.lane.b32.xlu1 %v2311_v14, %s9673_s24  ;;  %v7451_v19 = vpop.f32.mrb[43].mxu1 }
0x1aec   :  { %2321 = vrot.lane.b32.xlu0 %v2314_v16, %s9673_s24 }
0x1aee   :  { %2465 = vrot.lane.b32.xlu1 %v2311_v14, %s9671_s5 }
0x1af2   :  { %2470 = vrot.lane.b32.xlu1 %v2314_v16, %s9671_s5 }
0x1b5c   :  { %v2320_v49 = vpop.permute.xlu1 %2319 }
0x1b5d   :  { %v2325_v54 = vmul.f32 %v2320_v49, %v2311_v14  ;;  %v2327_v20 = vmul.f32 %v2320_v49, %v2314_v16 }
0x1b5e   :  { %v2322_v50 = vpop.permute.xlu0 %2321 }
0x1b5f   :  { %v2326_v21 = vmul.f32 %v2322_v50, %v2311_v14  ;;  %v2328_v22 = vmul.f32 %v2322_v50, %v2314_v16  ;;  %v6574_v50 = vld [vmem:[%s9649_s7 + $0x2] ss:$0 sm:$0xff] }
0x1b60   :  { %v2466_v5 = vpop.permute.xlu1 %2465 }
0x1b61   :  { %v2329_v23 = vpack.c.bf16 %v2326_v21, %v2325_v54  ;;  %v2330_v63 = vpack.c.bf16 %v2328_v22, %v2327_v20 }
0x1b63   :  { %7456 = vmatprep.mubr.msk.bf16.mxu1 %vm141_vm1, %v2329_v23 }
0x1b64   :  { %7457 = vmatmul.mubr.msk.bf16.vlgmr.msra.gmra.mrb[44].mxu1 %vm141_vm1, %v2330_v63  ;;  %v2471_v9 = vpop.permute.xlu1 %2470 }
0x1b65   :  { %7461 = vmatpush3.bf16.msra.mxu1 %v8357_v57 }
0x1b66   :  { %7466 = vmatprep.subr.bf16.mxu1 %v8123_v0 }
0x1c37   :  { %v7458_v24 = vpop.f32.mrb[44].mxu1 }
0x1c38   :  { %v2371_v25 = vpop.f32.mrb[45].mxu1 }
0x1c39   :  { %v7459_v56 = vpop.f32.mrb[46].mxu1 }
0x1c3a   :  { %v2387_v26 = vmax.f32 %v7458_v24, %v7459_v56  ;;  %v2374_v30 = vpop.f32.mrb[47].mxu1 }
0x1c3b   :  { %v2386_v39 = vmax.f32 %v2371_v25, %v2374_v30 }
0x1c3c   :  { %v2390_v33 = vsub.f32 %v7458_v24, %v2387_v26  ;;  %v2391_v36 = vsub.f32 %v7459_v56, %v2387_v26 }
0x1c3d   :  { %v2388_v38 = vsub.f32 %v2371_v25, %v2386_v39  ;;  %v2389_v40 = vsub.f32 %v2374_v30, %v2386_v39 }
0x1c3e   :  { %v2396_v42 = vmul.f32 1.442695, %v2390_v33  ;;  %v2398_v44 = vmul.f32 1.442695, %v2391_v36 }
0x1c3f   :  { %v2392_v45 = vmul.f32 1.442695, %v2388_v38  ;;  %v2394_v47 = vmul.f32 1.442695, %v2389_v40 }
0x1c40   :  { %7970 = vpow2.f32 %v2396_v42  ;;  %v7776_v42 = vld [vmem:[%s9650_s8 + $0x20] sm:$0xff]  }
0x1c41   :  { %7972 = vpow2.f32 %v2398_v44  ;;  %7475 = vmatpush3.bf16.msra.mxu0 %v7776_v42  ;;  %v7777_v44 = vld [vmem:[%s9650_s8 + $0x28] sm:$0xff]  }
0x1c42   :  { %7974 = vpow2.f32 %v2392_v45  ;;  %7476 = vmatprep.subr.bf16.mxu0 %v8123_v0 }
0x1c43   :  { %7976 = vpow2.f32 %v2394_v47 }
0x1c45   :  { %7477 = vmatpush3.bf16.msra.mxu0 %v7777_v44 }
0x1c46   :  { %7689 = vmatprep.subr.msk.bf16.mxu0 %vm405_vm2, %v8571_v59  ;;  %v6581_v59 = vld [vmem:[%s9652_s19 + $0x6] ss:$0 sm:$0xff] }
0x1c4a   :  { %v7971_v48 = vpop.eup %7970 }
0x1c4b   :  { %v7973_v51 = vpop.eup %7972 }
0x1c4c   :  { %v7975_v52 = vpop.eup %7974  ;;  %v2401_v55 = vadd.f32 %v7973_v51, %v7971_v48 }
0x1c4d   :  { %v7977_v60 = vpop.eup %7976 }
0x1c4e   :  { %7978 = vrcp.f32 %v2401_v55  ;;  %v2400_v61 = vadd.f32 %v7977_v60, %v7975_v52 }
0x1c50   :  { %7980 = vrcp.f32 %v2400_v61 }
0x1c58   :  { %v7979_v17 = vpop.eup %7978 }
0x1c59   :  { %v2407_v62 = vmul.f32 %v7979_v17, %v7973_v51  ;;  %v2406_v18 = vmul.f32 %v7979_v17, %v7971_v48  ;;  %v6580_v17 = vld [vmem:[%s9651_s18 + $0x6] ss:$0 sm:$0xff] }
0x1c5a   :  { %v7981_v1 = vpop.eup %7980 }
0x1c5b   :  { %v2404_v27 = vmul.f32 %v7981_v1, %v7975_v52  ;;  %v2405_v28 = vmul.f32 %v7981_v1, %v7977_v60  ;;  %v2409_v2 = vpack.c.bf16 %v2407_v62, %v2406_v18 }
0x1c5d   :  { %v2408_v3 = vpack.c.bf16 %v2405_v28, %v2404_v27 }
0x1c5f   :  { %7462 = vmatprep.mubr.msk.bf16.mxu1 %vm398_vm3, %v2408_v3 }
0x1c60   :  { %7463 = vmatmul.mubr.msk.bf16.vlgmr.msra.gmra.mrb[48].mxu1 %vm398_vm3, %v2409_v2 }
0x1c61   :  { %7470 = vmatprep.mubr.msk.bf16.mxu1 %vm8124_vm0, %v8123_v0  ;;  %7467 = vmatpush3.bf16.msra.mxu1 %v7774_v4  ;;  %v6587_v4 = vld [vmem:[%s9653_s9 + $0x2] ss:$0 sm:$0xff] }
0x1c62   :  { %7468 = vmatprep.subr.bf16.mxu1 %v8123_v0 }
0x1c65   :  { %7469 = vmatpush3.bf16.msra.mxu1 %v7775_v7 }
0x1c66   :  { %7482 = vmatprep.subr.bf16.mxu1 %v8544_v29 }
0x1d33   :  { %v7464_v6 = vpop.f32.mrb[48].mxu1 }
0x1d34   :  { %v2450_v8 = vpop.f32.mrb[49].mxu1  ;;  %v2469_v12 = vmul.f32 %v7464_v6, %v2466_v5 }
0x1d35   :  { %v7465_v35 = vpop.f32.mrb[50].mxu1  ;;  %v2468_v53 = vmul.f32 %v2466_v5, %v2450_v8 }
0x1d36   :  { %v2474_v13 = vmul.f32 %v7465_v35, %v2471_v9  ;;  %v2453_v14 = vpop.f32.mrb[51].mxu1 }
0x1d37   :  { %v2473_v15 = vmul.f32 %v2471_v9, %v2453_v14 }
0x1d38   :  { %v2476_v16 = vadd.f32 %v2474_v13, %v2469_v12 }
0x1d39   :  { %v2475_v19 = vadd.f32 %v2473_v15, %v2468_v53 }
0x1d3b   :  { %v2482_v49 = vpack.c.bf16 %v2476_v16, %v2475_v19 }
0x1d3d   :  { %7471 = vmatmul.mubr.msk.bf16.vlgmr.msra.gmra.mrb[52].mxu1 %vm141_vm1, %v2482_v49 }
0x1d3e   :  { %7483 = vmatpush3.bf16.msra.mxu1 %v8544_v29 }
0x1d3f   :  { %7484 = vmatprep.subr.bf16.mxu1 %v8564_v58 }
0x1d42   :  { %7485 = vmatpush3.bf16.msra.mxu1 %v8564_v58 }
0x1d43   :  { %7496 = vmatprep.subr.bf16.mxu1 %v8123_v0 }
0x1e10   :  { %v2540_v54 = vpop.f32.mrb[52].mxu1 }
0x1e11   :  { %v2541_v20 = vadd.f32 %v6574_v50, %v2540_v54  ;;  %v7472_v21 = vpop.f32.mrb[53].mxu1 }
0x1e12   :  { %v2543_v22 = vpop.f32.mrb[54].mxu1 }
0x1e13   :  { %v2544_v23 = vadd.f32 %v6574_v50, %v2543_v22  ;;  %v7473_v63 = vpop.f32.mrb[55].mxu1  ;;  %v2547_v24 = vadd.f32 %v2541_v20, %v8769_v10 }
0x1e15   :  { %v2553_v29 = vsel %vm141_vm1, %v2547_v24, 0.0  ;;  %v2548_v25 = vadd.f32 %v2544_v23, %v8771_v34 }
0x1e16   :  { %2554 = vadd.xlane.f32.xlu0 %v2553_v29 }
0x1e17   :  { %v2556_v58 = vsel %vm141_vm1, %v2548_v25, 0.0 }
0x1e18   :  { %2557 = vadd.xlane.f32.xlu1 %v2556_v58 }
0x1e29   :  { %2806 = vrot.lane.b32.xlu1 %v8333_v37, %s9673_s24 }
0x1ea3   :  { %v2555_v56 = vpop.xlane.xlu0 %2554 }
0x1ea4   :  { %v2559_v26 = vmul.f32 0.03125, %v2555_v56 }
0x1ea5   :  { %v2558_v30 = vpop.xlane.xlu1 %2557 }
0x1ea6   :  { %v2561_v39 = vsub.f32 %v2547_v24, %v2559_v26  ;;  %v2560_v33 = vmul.f32 0.03125, %v2558_v30 }
0x1ea8   :  { %v2562_v36 = vsub.f32 %v2548_v25, %v2560_v33  ;;  %v2563_v38 = vmul.f32 %v2561_v39, %v2561_v39 }
0x1eaa   :  { %v2565_v10 = vsel %vm141_vm1, %v2563_v38, 0.0  ;;  %v2564_v40 = vmul.f32 %v2562_v36, %v2562_v36 }
0x1eab   :  { %2566 = vadd.xlane.f32.xlu0 %v2565_v10 }
0x1eac   :  { %v2568_v34 = vsel %vm141_vm1, %v2564_v40, 0.0 }
0x1eaf   :  { %2569 = vadd.xlane.f32.xlu0 %v2568_v34 }
0x1ec5   :  { %2812 = vrot.lane.b32.xlu0 %v8338_v41, %s9673_s24 }
0x1f38   :  { %v2567_v45 = vpop.xlane.xlu0 %2566 }
0x1f39   :  { %v2571_v47 = vmul.f32 0.03125, %v2567_v45 }
0x1f3b   :  { %v2573_v48 = vadd.f32 1e-05, %v2571_v47 }
0x1f3c   :  { %v2570_v51 = vpop.xlane.xlu0 %2569 }
0x1f3d   :  { %7982 = vrsqrt.f32 %v2573_v48  ;;  %v2572_v52 = vmul.f32 0.03125, %v2570_v51  ;;  %v7778_v51 = vld [vmem:[%s9654_s12 + $0x20] sm:$0xff]  }
0x1f3f   :  { %v2574_v55 = vadd.f32 1e-05, %v2572_v52  ;;  %v7779_v52 = vld [vmem:[%s9654_s12 + $0x28] sm:$0xff]  }
0x1f41   :  { %7984 = vrsqrt.f32 %v2574_v55 }
0x1f47   :  { %v7983_v60 = vpop.eup %7982 }
0x1f48   :  { %v2577_v61 = vmul.f32 %v7983_v60, %v2561_v39  ;;  %v2807_v60 = vpop.permute.xlu1 %2806 }
0x1f4a   :  { %v2585_v18 = vmul.f32 %v6580_v17, %v2577_v61 }
0x1f4b   :  { %v7985_v62 = vpop.eup %7984 }
0x1f4c   :  { %v2578_v1 = vmul.f32 %v7985_v62, %v2562_v36  ;;  %v8837_v28 = vadd.f32 %v6581_v59, %v2585_v18 }
0x1f4e   :  { %v2586_v27 = vmul.f32 %v6580_v17, %v2578_v1  ;;  %v2813_v17 = vpop.permute.xlu0 %2812 }
0x1f50   :  { %v8839_v2 = vadd.f32 %v6581_v59, %v2586_v27 }
0x1f52   :  { %v2600_v3 = vpack.c.bf16 %v8839_v2, %v8837_v28 }
0x1f54   :  { %7479 = vmatmul.mubr.msk.bf16.vlgmr.msra.gmra.mrb[48].mxu0 %vm141_vm1, %v2600_v3 }
0x1f55   :  { %7491 = vmatpush3.bf16.msra.mxu0 %v8357_v57 }
0x2027   :  { %v2658_v7 = vpop.f32.mrb[48].mxu0 }
0x2028   :  { %v2659_v5 = vadd.f32 %v6587_v4, %v2658_v7  ;;  %v7480_v6 = vpop.f32.mrb[49].mxu0 }
0x2029   :  { %v2661_v8 = vpop.f32.mrb[50].mxu0  ;;  %v6600_v6 = vld [vmem:[%s9655_s13 + $0x2] ss:$0 sm:$0xff] }
0x202a   :  { %v2665_v9 = vmul.f32 %v2659_v5, %v8333_v37  ;;  %v2666_v35 = vmul.f32 %v2659_v5, %v8338_v41  ;;  %v2662_v12 = vadd.f32 %v6587_v4, %v2661_v8  ;;  %v7481_v13 = vpop.f32.mrb[51].mxu0 }
0x202c   :  { %v2669_v14 = vpack.c.bf16 %v2666_v35, %v2665_v9  ;;  %v2667_v53 = vmul.f32 %v2662_v12, %v8333_v37  ;;  %v2668_v15 = vmul.f32 %v2662_v12, %v8338_v41 }
0x202e   :  { %v2670_v16 = vpack.c.bf16 %v2668_v15, %v2667_v53  ;;  %7486 = vmatprep.mubr.msk.bf16.mxu1 %vm141_vm1, %v2669_v14 }
0x2030   :  { %7487 = vmatmul.mubr.msk.bf16.vlgmr.msra.gmra.mrb[56].mxu1 %vm141_vm1, %v2670_v16 }
0x2031   :  { %7500 = vmatprep.mubr.msk.bf16.mxu1 %vm8124_vm0, %v8123_v0  ;;  %7497 = vmatpush3.bf16.msra.mxu1 %v7778_v51 }
0x2032   :  { %7498 = vmatprep.subr.bf16.mxu1 %v8123_v0 }
0x2035   :  { %7499 = vmatpush3.bf16.msra.mxu1 %v7779_v52 }
0x2103   :  { %v7488_v19 = vpop.f32.mrb[56].mxu1 }
0x2104   :  { %v2711_v49 = vpop.f32.mrb[57].mxu1 }
0x2105   :  { %v7489_v50 = vpop.f32.mrb[58].mxu1 }
0x2106   :  { %v2727_v54 = vmax.f32 %v7488_v19, %v7489_v50  ;;  %v2714_v20 = vpop.f32.mrb[59].mxu1 }
0x2107   :  { %v2726_v21 = vmax.f32 %v2711_v49, %v2714_v20 }
0x2108   :  { %v2730_v22 = vsub.f32 %v7488_v19, %v2727_v54  ;;  %v2731_v23 = vsub.f32 %v7489_v50, %v2727_v54 }
0x2109   :  { %v2728_v63 = vsub.f32 %v2711_v49, %v2726_v21  ;;  %v2729_v24 = vsub.f32 %v2714_v20, %v2726_v21 }
0x210a   :  { %v2736_v29 = vmul.f32 1.442695, %v2730_v22  ;;  %v2738_v25 = vmul.f32 1.442695, %v2731_v23 }
0x210b   :  { %v2732_v58 = vmul.f32 1.442695, %v2728_v63  ;;  %v2734_v56 = vmul.f32 1.442695, %v2729_v24 }
0x210c   :  { %7986 = vpow2.f32 %v2736_v29  ;;  %v7780_v29 = vld [vmem:[%s9656_s14 + $0x40] ss:$8 sps:$4 sm:$0xff]  }
0x210d   :  { %7988 = vpow2.f32 %v2738_v25  ;;  %v7783_v25 = vld [vmem:[%s9656_s14 + $0x50] ss:$8 sps:$4 sm:$0xff]  }
0x210e   :  { %7990 = vpow2.f32 %v2732_v58  ;;  %v7785_v58 = vld [vmem:[%s9656_s14 + $0x54] ss:$8 sps:$4 sm:$0xff]  }
0x210f   :  { %7992 = vpow2.f32 %v2734_v56  ;;  %v7786_v56 = vld [vmem:[%s9657_s16 + $0x140] sm:$0xff]  }
0x2110   :  { %7150 = vmatprep.subr.bf16.mxu1 %v7786_v56 }
0x2116   :  { %v7987_v26 = vpop.eup %7986 }
0x2117   :  { %v7989_v30 = vpop.eup %7988 }
0x2118   :  { %v7991_v39 = vpop.eup %7990  ;;  %v2741_v33 = vadd.f32 %v7989_v30, %v7987_v26 }
0x2119   :  { %v7993_v36 = vpop.eup %7992 }
0x211a   :  { %7994 = vrcp.f32 %v2741_v33  ;;  %v2740_v38 = vadd.f32 %v7993_v36, %v7991_v39  ;;  %v7790_v33 = vld [vmem:[%s9657_s16 + $0x150] sm:$0xff]  }
0x211c   :  { %7996 = vrcp.f32 %v2740_v38  ;;  %v7792_v38 = vld [vmem:[%s9657_s16 + $0x158] sm:$0xff]  }
0x2124   :  { %v7995_v10 = vpop.eup %7994 }
0x2125   :  { %v2747_v40 = vmul.f32 %v7995_v10, %v7989_v30  ;;  %v2746_v34 = vmul.f32 %v7995_v10, %v7987_v26  ;;  %v7787_v26 = vld [vmem:[%s9657_s16 + $0x100] sm:$0xff]   ;;  %v7788_v30 = vld [vmem:[%s9657_s16 + $0x148] sm:$0xff]   ;;  %v7793_v10 = vld [vmem:[%s9657_s16 + $0x118] sm:$0xff]  }
0x2126   :  { %v7997_v42 = vpop.eup %7996 }
0x2127   :  { %v2744_v44 = vmul.f32 %v7997_v42, %v7991_v39  ;;  %v2745_v45 = vmul.f32 %v7997_v42, %v7993_v36  ;;  %v2749_v47 = vpack.c.bf16 %v2747_v40, %v2746_v34  ;;  %v7789_v39 = vld [vmem:[%s9657_s16 + $0x108] sm:$0xff]   ;;  %v7791_v36 = vld [vmem:[%s9657_s16 + $0x110] sm:$0xff]   ;;  %v7794_v40 = vld [vmem:[%s9657_s16 + $0x160] sm:$0xff]  }
0x2128   :  { %v7795_v34 = vld [vmem:[%s9657_s16 + $0x120] sm:$0xff]   ;;  %v7796_v42 = vld [vmem:[%s9657_s16 + $0x168] sm:$0xff]  }
0x2129   :  { %v2748_v48 = vpack.c.bf16 %v2745_v45, %v2744_v44 }
0x212b   :  { %7492 = vmatprep.mubr.msk.bf16.mxu0 %vm398_vm3, %v2748_v48 }
0x212c   :  { %7493 = vmatmul.mubr.msk.bf16.vlgmr.msra.gmra.mrb[52].mxu0 %vm398_vm3, %v2749_v47 }
0x212d   :  { %3011 = vmatprep.mubr.bf16.mxu0 %v8125_v11 }
0x21ff   :  { %v7494_v55 = vpop.f32.mrb[52].mxu0 }
0x2200   :  { %v2790_v61 = vpop.f32.mrb[53].mxu0  ;;  %v2810_v18 = vmul.f32 %v7494_v55, %v2807_v60 }
0x2201   :  { %v7495_v62 = vpop.f32.mrb[54].mxu0  ;;  %v2809_v27 = vmul.f32 %v2807_v60, %v2790_v61  ;;  %v6606_v60 = vld [vmem:[%s9651_s18 + $0x7] ss:$0 sm:$0xff] }
0x2202   :  { %v2816_v1 = vmul.f32 %v7495_v62, %v2813_v17  ;;  %v2793_v59 = vpop.f32.mrb[55].mxu0 }
0x2203   :  { %v2815_v3 = vmul.f32 %v2813_v17, %v2793_v59 }
0x2204   :  { %v2818_v4 = vadd.f32 %v2816_v1, %v2810_v18  ;;  %v6607_v1 = vld [vmem:[%s9652_s19 + $0x7] ss:$0 sm:$0xff] }
0x2205   :  { %v2817_v7 = vadd.f32 %v2815_v3, %v2809_v27 }
0x2207   :  { %v2824_v5 = vpack.c.bf16 %v2818_v4, %v2817_v7  ;;  %v7797_v7 = vld [vmem:[%s9657_s16 + $0x128] sm:$0xff]  }
0x2209   :  { %7501 = vmatmul.mubr.msk.bf16.vlgmr.msra.gmra.mrb[60].mxu1 %vm141_vm1, %v2824_v5  ;;  %v7798_v5 = vld [vmem:[%s9657_s16 + $0x170] sm:$0xff]  }
0x220a   :  { %7151 = vmatpush3.bf16.msra.mxu1 %v7787_v26 }
0x220b   :  { %7152 = vmatprep.subr.bf16.mxu1 %v7788_v30 }
0x220e   :  { %7153 = vmatpush3.bf16.msra.mxu1 %v7789_v39 }
0x220f   :  { %7154 = vmatprep.subr.bf16.mxu1 %v7790_v33 }
0x2212   :  { %7155 = vmatpush3.bf16.msra.mxu1 %v7791_v36 }
0x2213   :  { %7156 = vmatprep.subr.bf16.mxu1 %v7792_v38 }
0x2216   :  { %7157 = vmatpush3.bf16.msra.mxu1 %v7793_v10 }
0x2217   :  { %7158 = vmatprep.subr.bf16.mxu1 %v7794_v40 }
0x221a   :  { %7159 = vmatpush3.bf16.msra.mxu1 %v7795_v34 }
0x221b   :  { %7160 = vmatprep.subr.bf16.mxu1 %v7796_v42 }
0x221e   :  { %7161 = vmatpush3.bf16.msra.mxu1 %v7797_v7  ;;  %v6670_v7 = vld [vmem:[%s9651_s18 + $0x8] ss:$0 sm:$0xff] }
0x221f   :  { %7162 = vmatprep.subr.bf16.mxu1 %v7798_v5 }
0x22dc   :  { %v2882_v8 = vpop.f32.mrb[60].mxu1 }
0x22dd   :  { %v2883_v9 = vadd.f32 %v6600_v6, %v2882_v8  ;;  %v7502_v35 = vpop.f32.mrb[61].mxu1  ;;  %v7800_v8 = vld [vmem:[%s9657_s16 + $0x178] sm:$0xff]  }
0x22de   :  { %v2885_v12 = vpop.f32.mrb[62].mxu1  ;;  %v6612_v35 = vld [vmem:[%s9658_s15 + $0x4] sm:$0x3] }
0x22df   :  { %v2886_v13 = vadd.f32 %v6600_v6, %v2885_v12  ;;  %v7503_v14 = vpop.f32.mrb[63].mxu1  ;;  %v2889_v53 = vadd.f32 %v2883_v9, %v8837_v28  ;;  %v7799_v6 = vld [vmem:[%s9657_s16 + $0x130] sm:$0xff]   ;;  %v7801_v9 = vld [vmem:[%s9657_s16 + $0x138] sm:$0xff]   ;;  %v2949_v12 = vrot.slane %v6612_v35, %v8325_v32 }
0x22e0   :  { %7163 = vmatpush3.bf16.msra.mxu1 %v7799_v6 }
0x22e1   :  { %v2895_v15 = vsel %vm141_vm1, %v2889_v53, 0.0  ;;  %v2890_v16 = vadd.f32 %v2886_v13, %v8839_v2  ;;  %v7782_v2 = vld [vmem:[%s9656_s14 + $0x44] ss:$8 sps:$4 sm:$0xff]   ;;  %7164 = vmatprep.subr.bf16.mxu1 %v7800_v8  ;;  %v2953_v13 = vrot.slane %v6612_v35, %v8323_v31  ;;  %v6671_v35 = vld [vmem:[%s9652_s19 + $0x8] ss:$0 sm:$0xff] }
0x22e2   :  { %2896 = vadd.xlane.f32.xlu1 %v2895_v15  ;;  %2979 = vmatprep.subr.bf16.mxu0 %v7782_v2  ;;  %v6651_v2 = vld [vmem:[%s9659_s17 + $0x2] ss:$0 sm:$0xff] }
0x22e3   :  { %v2898_v19 = vsel %vm141_vm1, %v2890_v16, 0.0  ;;  %2980 = vmatpush1.bf16.msra.mxu0 %v7780_v29 }
0x22e4   :  { %2899 = vadd.xlane.f32.xlu0 %v2898_v19  ;;  %2981 = vmatprep.subr.bf16.mxu0 %v7785_v58 }
0x22e5   :  { %7165 = vmatpush3.bf16.msra.mxu1 %v7801_v9 }
0x22e6   :  { %7534 = vmatprep.subr.bf16.mxu1 %v8123_v0 }
0x22e7   :  { %2982 = vmatpush1.bf16.msra.mxu0 %v7783_v25 }
0x22e8   :  { %7504 = vmatprep.subr.bf16.mxu0 %v8123_v0 }
0x236f   :  { %v2897_v49 = vpop.xlane.xlu1 %2896 }
0x2370   :  { %v2901_v50 = vmul.f32 0.03125, %v2897_v49 }
0x2371   :  { %v2900_v54 = vpop.xlane.xlu0 %2899 }
0x2372   :  { %v2903_v20 = vsub.f32 %v2889_v53, %v2901_v50  ;;  %v2902_v21 = vmul.f32 0.03125, %v2900_v54 }
0x2374   :  { %v2904_v22 = vsub.f32 %v2890_v16, %v2902_v21  ;;  %v2905_v23 = vmul.f32 %v2903_v20, %v2903_v20 }
0x2376   :  { %v2907_v63 = vsel %vm141_vm1, %v2905_v23, 0.0  ;;  %v2906_v24 = vmul.f32 %v2904_v22, %v2904_v22 }
0x2377   :  { %2908 = vadd.xlane.f32.xlu1 %v2907_v63 }
0x2378   :  { %v2910_v28 = vsel %vm141_vm1, %v2906_v24, 0.0 }
0x2379   :  { %2911 = vadd.xlane.f32.xlu0 %v2910_v28 }
0x2404   :  { %v2909_v44 = vpop.xlane.xlu1 %2908 }
0x2405   :  { %v2913_v45 = vmul.f32 0.03125, %v2909_v44 }
0x2406   :  { %v2912_v47 = vpop.xlane.xlu0 %2911 }
0x2407   :  { %v2915_v48 = vadd.f32 1e-05, %v2913_v45  ;;  %v2914_v51 = vmul.f32 0.03125, %v2912_v47 }
0x2409   :  { %7998 = vrsqrt.f32 %v2915_v48  ;;  %v2916_v52 = vadd.f32 1e-05, %v2914_v51 }
0x240b   :  { %8000 = vrsqrt.f32 %v2916_v52 }
0x2413   :  { %v7999_v55 = vpop.eup %7998 }
0x2414   :  { %v2919_v61 = vmul.f32 %v7999_v55, %v2903_v20 }
0x2415   :  { %v8001_v17 = vpop.eup %8000 }
0x2416   :  { %v2927_v62 = vmul.f32 %v6606_v60, %v2919_v61  ;;  %v2920_v18 = vmul.f32 %v8001_v17, %v2904_v22  ;;  %v7803_v61 = vld [vmem:[%s9682_s29 + $0x38] sm:$0xff]   ;;  %v8971_v17 = vld [vmem:[%s9686_s28] sm:$0xff]  }
0x2418   :  { %v2928_v59 = vmul.f32 %v6606_v60, %v2920_v18  ;;  %v2935_v27 = vadd.f32 %v6607_v1, %v2927_v62  ;;  %v7802_v60 = vld [vmem:[%s9682_s29 + $0x30] sm:$0xff]  }
0x241a   :  { %v2936_v3 = vadd.f32 %v6607_v1, %v2928_v59 }
0x241c   :  { %v2942_v4 = vpack.c.bf16 %v2936_v3, %v2935_v27 }
0x241e   :  { %6617 = vmatmul.mubr.msk.bf16.vlgmr.msra.gmra.mrb[56].mxu0 %vm141_vm1, %v2942_v4 }
0x241f   :  { %7508 = vmatprep.mubr.msk.bf16.mxu0 %vm8124_vm0, %v8123_v0  ;;  %7505 = vmatpush3.bf16.msra.mxu0 %v7802_v60 }
0x2420   :  { %7506 = vmatprep.subr.bf16.mxu0 %v8123_v0 }
0x2423   :  { %7507 = vmatpush3.bf16.msra.mxu0 %v7803_v61 }
0x2424   :  { %7512 = vmatprep.subr.bf16.mxu0 %v8971_v17 }
0x24f1   :  { %v3013_v14 = vpop.f32.mrb[56].mxu0 }
0x24f2   :  { %v3014_v53 = vadd.f32 %v3013_v14, %v2949_v12  ;;  %v3015_v15 = vpop.f32.mrb[57].mxu0 }
0x24f3   :  { %v3016_v16 = vadd.f32 %v3015_v15, %v2953_v13  ;;  %v3017_v19 = vpop.f32.mrb[58].mxu0  ;;  %v8991_v15 = vld [vmem:[%s9686_s28 + $0x8] sm:$0xff]  }
0x24f4   :  { %v3018_v49 = vadd.f32 %v3017_v19, %v2949_v12  ;;  %v3019_v50 = vpop.f32.mrb[59].mxu0  ;;  %v3022_v20 = vmax.f32 %v3014_v53, 0.0  ;;  %v6677_v19 = vld [vmem:[%s9687_s0 + $0x3] ss:$0 sm:$0xff] }
0x24f5   :  { %v3020_v54 = vadd.f32 %v3019_v50, %v2953_v13  ;;  %v3023_v22 = vmax.f32 %v3016_v16, 0.0  ;;  %v8998_v16 = vld [vmem:[%s9647_s3] sm:$0xf] }
0x24f6   :  { %v3024_v21 = vmax.f32 %v3018_v49, 0.0 }
0x24f7   :  { %v3025_v23 = vmax.f32 %v3020_v54, 0.0 }
0x24f8   :  { %v3059_v63 = vpack.c.bf16 %v3024_v21, %v3022_v20 }
0x24f9   :  { %v3060_v24 = vpack.c.bf16 %v3025_v23, %v3023_v22 }
0x24fb   :  { %3197 = vmatprep.mubr.bf16.mxu1 %v3060_v24 }
0x24fc   :  { %3198 = vmatmul.mubr.bf16.vlgmr.msra.gmra.mrb[64].mxu1 %v3059_v63 }
0x24fd   :  { %7538 = vmatprep.mubr.msk.bf16.mxu1 %vm8124_vm0, %v8123_v0 }
0x25cf   :  { %v7166_v28 = vpop.f32.mrb[64].mxu1 }
0x25d0   :  { %v7167_v29 = vpop.f32.mrb[65].mxu1 }
0x25d1   :  { %v7168_v25 = vadd.f32 %v7167_v29, %v7166_v28  ;;  %v7169_v58 = vpop.f32.mrb[66].mxu1 }
0x25d2   :  { %v7170_v56 = vpop.f32.mrb[67].mxu1 }
0x25d3   :  { %v3200_v26 = vadd.f32 %v7168_v25, %v6651_v2  ;;  %v7171_v30 = vadd.f32 %v7170_v56, %v7169_v58 }
0x25d5   :  { %v3203_v39 = vadd.f32 %v7171_v30, %v6651_v2  ;;  %v3206_v33 = vadd.f32 %v3200_v26, %v2935_v27 }
0x25d7   :  { %v3212_v36 = vsel %vm141_vm1, %v3206_v33, 0.0  ;;  %v3207_v38 = vadd.f32 %v3203_v39, %v2936_v3 }
0x25d8   :  { %3213 = vadd.xlane.f32.xlu1 %v3212_v36 }
0x25d9   :  { %v3215_v10 = vsel %vm141_vm1, %v3207_v38, 0.0 }
0x25da   :  { %3216 = vadd.xlane.f32.xlu0 %v3215_v10 }
0x2665   :  { %v3214_v40 = vpop.xlane.xlu1 %3213 }
0x2666   :  { %v3218_v34 = vmul.f32 0.03125, %v3214_v40 }
0x2667   :  { %v3217_v42 = vpop.xlane.xlu0 %3216 }
0x2668   :  { %v3220_v44 = vsub.f32 %v3206_v33, %v3218_v34  ;;  %v3219_v45 = vmul.f32 0.03125, %v3217_v42 }
0x266a   :  { %v3221_v47 = vsub.f32 %v3207_v38, %v3219_v45  ;;  %v3222_v48 = vmul.f32 %v3220_v44, %v3220_v44 }
0x266c   :  { %v3224_v51 = vsel %vm141_vm1, %v3222_v48, 0.0  ;;  %v3223_v52 = vmul.f32 %v3221_v47, %v3221_v47 }
0x266d   :  { %3225 = vadd.xlane.f32.xlu1 %v3224_v51 }
0x266e   :  { %v3227_v55 = vsel %vm141_vm1, %v3223_v52, 0.0 }
0x266f   :  { %3228 = vadd.xlane.f32.xlu0 %v3227_v55 }
0x26fa   :  { %v3226_v62 = vpop.xlane.xlu1 %3225 }
0x26fb   :  { %v3230_v18 = vmul.f32 0.03125, %v3226_v62 }
0x26fc   :  { %v3229_v1 = vpop.xlane.xlu0 %3228 }
0x26fd   :  { %v3232_v59 = vadd.f32 1e-05, %v3230_v18  ;;  %v3231_v27 = vmul.f32 0.03125, %v3229_v1 }
0x26ff   :  { %8002 = vrsqrt.f32 %v3232_v59  ;;  %v3233_v3 = vadd.f32 1e-05, %v3231_v27 }
0x2701   :  { %8004 = vrsqrt.f32 %v3233_v3 }
0x2709   :  { %v8003_v4 = vpop.eup %8002 }
0x270a   :  { %v3236_v5 = vmul.f32 %v8003_v4, %v3220_v44 }
0x270b   :  { %v8005_v6 = vpop.eup %8004 }
0x270c   :  { %v3244_v8 = vmul.f32 %v6670_v7, %v3236_v5  ;;  %v3237_v9 = vmul.f32 %v8005_v6, %v3221_v47  ;;  %v7804_v5 = vld [vmem:[%s9648_s6 + $0x30] sm:$0xff]   ;;  %v7805_v6 = vld [vmem:[%s9648_s6 + $0x38] sm:$0xff]  }
0x270e   :  { %v3245_v12 = vmul.f32 %v6670_v7, %v3237_v9  ;;  %v8980_v13 = vadd.f32 %v6671_v35, %v3244_v8 }
0x2710   :  { %v8982_v14 = vadd.f32 %v6671_v35, %v3245_v12 }
0x2712   :  { %v3259_v53 = vpack.c.bf16 %v8982_v14, %v8980_v13 }
0x2714   :  { %7509 = vmatmul.mubr.msk.bf16.vlgmr.msra.gmra.mrb[60].mxu0 %vm141_vm1, %v3259_v53 }
0x2715   :  { %7513 = vmatpush3.bf16.msra.mxu0 %v8971_v17 }
0x2716   :  { %7514 = vmatprep.subr.bf16.mxu0 %v8991_v15 }
0x2719   :  { %7515 = vmatpush3.bf16.msra.mxu0 %v8991_v15 }
0x271a   :  { %7690 = vmatprep.subr.msk.bf16.mxu0 %vm405_vm2, %v8998_v16 }
0x27e7   :  { %v3317_v49 = vpop.f32.mrb[60].mxu0 }
0x27e8   :  { %v3318_v50 = vadd.f32 %v6677_v19, %v3317_v49  ;;  %v7510_v54 = vpop.f32.mrb[61].mxu0 }
0x27e9   :  { %v3320_v20 = vpop.f32.mrb[62].mxu0 }
0x27ea   :  { %v3321_v21 = vadd.f32 %v6677_v19, %v3320_v20  ;;  %3326 = vrot.lane.b32.xlu1 %v3318_v50, %s9673_s24  ;;  %v7511_v22 = vpop.f32.mrb[63].mxu0 }
0x27ec   :  { %3328 = vrot.lane.b32.xlu0 %v3321_v21, %s9673_s24 }
0x27ee   :  { %3472 = vrot.lane.b32.xlu1 %v3318_v50, %s9671_s5 }
0x27f2   :  { %3477 = vrot.lane.b32.xlu1 %v3321_v21, %s9671_s5 }
0x285c   :  { %v3327_v23 = vpop.permute.xlu1 %3326 }
0x285d   :  { %v3332_v24 = vmul.f32 %v3327_v23, %v3318_v50  ;;  %v3334_v28 = vmul.f32 %v3327_v23, %v3321_v21 }
0x285e   :  { %v3329_v63 = vpop.permute.xlu0 %3328 }
0x285f   :  { %v3333_v2 = vmul.f32 %v3329_v63, %v3318_v50  ;;  %v3335_v29 = vmul.f32 %v3329_v63, %v3321_v21  ;;  %v6690_v63 = vld [vmem:[%s9649_s7 + $0x3] ss:$0 sm:$0xff] }
0x2860   :  { %v3473_v8 = vpop.permute.xlu1 %3472 }
0x2861   :  { %v3336_v25 = vpack.c.bf16 %v3333_v2, %v3332_v24  ;;  %v3337_v58 = vpack.c.bf16 %v3335_v29, %v3334_v28 }
0x2863   :  { %7516 = vmatprep.mubr.msk.bf16.mxu0 %vm141_vm1, %v3336_v25 }
0x2864   :  { %7517 = vmatmul.mubr.msk.bf16.vlgmr.msra.gmra.mrb[64].mxu0 %vm141_vm1, %v3337_v58  ;;  %v3478_v12 = vpop.permute.xlu1 %3477 }
0x2865   :  { %7521 = vmatpush3.bf16.msra.mxu0 %v8357_v57 }
0x2866   :  { %7526 = vmatprep.subr.bf16.mxu0 %v8123_v0 }
0x2937   :  { %v7518_v56 = vpop.f32.mrb[64].mxu0 }
0x2938   :  { %v3378_v26 = vpop.f32.mrb[65].mxu0 }
0x2939   :  { %v7519_v30 = vpop.f32.mrb[66].mxu0 }
0x293a   :  { %v3394_v39 = vmax.f32 %v7518_v56, %v7519_v30  ;;  %v3381_v33 = vpop.f32.mrb[67].mxu0 }
0x293b   :  { %v3393_v36 = vmax.f32 %v3378_v26, %v3381_v33 }
0x293c   :  { %v3397_v38 = vsub.f32 %v7518_v56, %v3394_v39  ;;  %v3398_v10 = vsub.f32 %v7519_v30, %v3394_v39 }
0x293d   :  { %v3395_v40 = vsub.f32 %v3378_v26, %v3393_v36  ;;  %v3396_v34 = vsub.f32 %v3381_v33, %v3393_v36 }
0x293e   :  { %v3403_v42 = vmul.f32 1.442695, %v3397_v38  ;;  %v3405_v44 = vmul.f32 1.442695, %v3398_v10 }
0x293f   :  { %v3399_v45 = vmul.f32 1.442695, %v3395_v40  ;;  %v3401_v47 = vmul.f32 1.442695, %v3396_v34 }
0x2940   :  { %8006 = vpow2.f32 %v3403_v42 }
0x2941   :  { %8008 = vpow2.f32 %v3405_v44 }
0x2942   :  { %8010 = vpow2.f32 %v3399_v45  ;;  %v7807_v45 = vld [vmem:[%s9650_s8 + $0x38] sm:$0xff]  }
0x2943   :  { %8012 = vpow2.f32 %v3401_v47 }
0x294a   :  { %v8007_v48 = vpop.eup %8006 }
0x294b   :  { %v8009_v51 = vpop.eup %8008 }
0x294c   :  { %v8011_v52 = vpop.eup %8010  ;;  %v3408_v55 = vadd.f32 %v8009_v51, %v8007_v48 }
0x294d   :  { %v8013_v60 = vpop.eup %8012 }
0x294e   :  { %8014 = vrcp.f32 %v3408_v55  ;;  %v3407_v61 = vadd.f32 %v8013_v60, %v8011_v52 }
0x2950   :  { %8016 = vrcp.f32 %v3407_v61 }
0x2958   :  { %v8015_v62 = vpop.eup %8014 }
0x2959   :  { %v3414_v18 = vmul.f32 %v8015_v62, %v8009_v51  ;;  %v3413_v1 = vmul.f32 %v8015_v62, %v8007_v48  ;;  %v6696_v62 = vld [vmem:[%s9651_s18 + $0x9] ss:$0 sm:$0xff] }
0x295a   :  { %v8017_v59 = vpop.eup %8016 }
0x295b   :  { %v3411_v27 = vmul.f32 %v8017_v59, %v8011_v52  ;;  %v3412_v3 = vmul.f32 %v8017_v59, %v8013_v60  ;;  %v3416_v4 = vpack.c.bf16 %v3414_v18, %v3413_v1 }
0x295d   :  { %v3415_v7 = vpack.c.bf16 %v3412_v3, %v3411_v27  ;;  %v6697_v27 = vld [vmem:[%s9652_s19 + $0x9] ss:$0 sm:$0xff] }
0x295f   :  { %7522 = vmatprep.mubr.msk.bf16.mxu0 %vm398_vm3, %v3415_v7 }
0x2960   :  { %7523 = vmatmul.mubr.msk.bf16.vlgmr.msra.gmra.mrb[68].mxu0 %vm398_vm3, %v3416_v4 }
0x2961   :  { %7530 = vmatprep.mubr.msk.bf16.mxu0 %vm8124_vm0, %v8123_v0  ;;  %7527 = vmatpush3.bf16.msra.mxu0 %v7804_v5 }
0x2962   :  { %7528 = vmatprep.subr.bf16.mxu0 %v8123_v0 }
0x2965   :  { %7529 = vmatpush3.bf16.msra.mxu0 %v7805_v6  ;;  %v6703_v6 = vld [vmem:[%s9653_s9 + $0x3] ss:$0 sm:$0xff] }
0x2966   :  { %7542 = vmatprep.subr.bf16.mxu0 %v8971_v17 }
0x2a33   :  { %v7524_v9 = vpop.f32.mrb[68].mxu0 }
0x2a34   :  { %v3457_v35 = vpop.f32.mrb[69].mxu0  ;;  %v3476_v19 = vmul.f32 %v7524_v9, %v3473_v8 }
0x2a35   :  { %v7525_v53 = vpop.f32.mrb[70].mxu0  ;;  %v3475_v54 = vmul.f32 %v3473_v8, %v3457_v35 }
0x2a36   :  { %v3481_v49 = vmul.f32 %v7525_v53, %v3478_v12  ;;  %v3460_v50 = vpop.f32.mrb[71].mxu0 }
0x2a37   :  { %v3480_v20 = vmul.f32 %v3478_v12, %v3460_v50 }
0x2a38   :  { %v3483_v21 = vadd.f32 %v3481_v49, %v3476_v19 }
0x2a39   :  { %v3482_v22 = vadd.f32 %v3480_v20, %v3475_v54 }
0x2a3b   :  { %v3489_v23 = vpack.c.bf16 %v3483_v21, %v3482_v22 }
0x2a3d   :  { %7531 = vmatmul.mubr.msk.bf16.vlgmr.msra.gmra.mrb[72].mxu0 %vm141_vm1, %v3489_v23 }
0x2a3e   :  { %7543 = vmatpush3.bf16.msra.mxu0 %v8971_v17 }
0x2a3f   :  { %7544 = vmatprep.subr.bf16.mxu0 %v8991_v15 }
0x2a42   :  { %7545 = vmatpush3.bf16.msra.mxu0 %v8991_v15 }
0x2a43   :  { %7556 = vmatprep.subr.bf16.mxu0 %v8123_v0 }
0x2b10   :  { %v3547_v24 = vpop.f32.mrb[72].mxu0 }
0x2b11   :  { %v3548_v28 = vadd.f32 %v6690_v63, %v3547_v24  ;;  %v7532_v2 = vpop.f32.mrb[73].mxu0 }
0x2b12   :  { %v3550_v29 = vpop.f32.mrb[74].mxu0 }
0x2b13   :  { %v3551_v25 = vadd.f32 %v6690_v63, %v3550_v29  ;;  %v7533_v58 = vpop.f32.mrb[75].mxu0  ;;  %v3554_v56 = vadd.f32 %v3548_v28, %v8980_v13 }
0x2b15   :  { %v3560_v26 = vsel %vm141_vm1, %v3554_v56, 0.0  ;;  %v3555_v30 = vadd.f32 %v3551_v25, %v8982_v14 }
0x2b16   :  { %3561 = vadd.xlane.f32.xlu0 %v3560_v26 }
0x2b17   :  { %v3563_v39 = vsel %vm141_vm1, %v3555_v30, 0.0 }
0x2b18   :  { %3564 = vadd.xlane.f32.xlu1 %v3563_v39 }
0x2b29   :  { %3672 = vrot.lane.b32.xlu1 %v8333_v37, %s9671_s5 }
0x2b2d   :  { %3818 = vrot.lane.b32.xlu1 %v8333_v37, %s9689_s2  ;;  %v7806_v37 = vld [vmem:[%s9650_s8 + $0x30] sm:$0xff]  }
0x2b2e   :  { %7535 = vmatpush3.bf16.msra.mxu1 %v7806_v37 }
0x2b2f   :  { %7536 = vmatprep.subr.bf16.mxu1 %v8123_v0 }
0x2b31   :  { %3823 = vrot.lane.b32.xlu1 %v8338_v41, %s9689_s2 }
0x2b32   :  { %7537 = vmatpush3.bf16.msra.mxu1 %v7807_v45 }
0x2b33   :  { %7691 = vmatprep.subr.msk.bf16.mxu1 %vm405_vm2, %v8998_v16 }
0x2ba3   :  { %v3562_v33 = vpop.xlane.xlu0 %3561 }
0x2ba4   :  { %v3566_v36 = vmul.f32 0.03125, %v3562_v33 }
0x2ba5   :  { %v3565_v13 = vpop.xlane.xlu1 %3564 }
0x2ba6   :  { %v3568_v38 = vsub.f32 %v3554_v56, %v3566_v36  ;;  %v3567_v10 = vmul.f32 0.03125, %v3565_v13 }
0x2ba8   :  { %v3569_v40 = vsub.f32 %v3555_v30, %v3567_v10  ;;  %v3570_v14 = vmul.f32 %v3568_v38, %v3568_v38 }
0x2ba9   :  { %v3673_v9 = vpop.permute.xlu1 %3672 }
0x2baa   :  { %v3572_v34 = vsel %vm141_vm1, %v3570_v14, 0.0  ;;  %v3571_v42 = vmul.f32 %v3569_v40, %v3569_v40 }
0x2bab   :  { %3573 = vadd.xlane.f32.xlu0 %v3572_v34 }
0x2bac   :  { %v3575_v44 = vsel %vm141_vm1, %v3571_v42, 0.0 }
0x2baf   :  { %3576 = vadd.xlane.f32.xlu0 %v3575_v44 }
0x2bc5   :  { %3674 = vrot.lane.b32.xlu0 %v8338_v41, %s9671_s5 }
0x2c38   :  { %v3574_v47 = vpop.xlane.xlu0 %3573 }
0x2c39   :  { %v3578_v48 = vmul.f32 0.03125, %v3574_v47 }
0x2c3b   :  { %v3580_v51 = vadd.f32 1e-05, %v3578_v48 }
0x2c3c   :  { %v3577_v52 = vpop.xlane.xlu0 %3576 }
0x2c3d   :  { %8018 = vrsqrt.f32 %v3580_v51  ;;  %v3579_v41 = vmul.f32 0.03125, %v3577_v52 }
0x2c3f   :  { %v3581_v55 = vadd.f32 1e-05, %v3579_v41 }
0x2c40   :  { %v3675_v53 = vpop.permute.xlu0 %3674 }
0x2c41   :  { %8020 = vrsqrt.f32 %v3581_v55 }
0x2c47   :  { %v8019_v60 = vpop.eup %8018 }
0x2c48   :  { %v3584_v61 = vmul.f32 %v8019_v60, %v3568_v38  ;;  %v7808_v60 = vld [vmem:[%s9654_s12 + $0x30] sm:$0xff]  }
0x2c4a   :  { %v3592_v1 = vmul.f32 %v6696_v62, %v3584_v61  ;;  %v7809_v61 = vld [vmem:[%s9654_s12 + $0x38] sm:$0xff]  }
0x2c4b   :  { %v8021_v18 = vpop.eup %8020 }
0x2c4c   :  { %v3585_v59 = vmul.f32 %v8021_v18, %v3569_v40  ;;  %v9062_v4 = vadd.f32 %v6697_v27, %v3592_v1 }
0x2c4e   :  { %v3593_v3 = vmul.f32 %v6696_v62, %v3585_v59  ;;  %v3819_v62 = vpop.permute.xlu1 %3818 }
0x2c50   :  { %v9064_v7 = vadd.f32 %v6697_v27, %v3593_v3 }
0x2c52   :  { %v3607_v5 = vpack.c.bf16 %v9064_v7, %v9062_v4  ;;  %v3824_v59 = vpop.permute.xlu1 %3823 }
0x2c54   :  { %7539 = vmatmul.mubr.msk.bf16.vlgmr.msra.gmra.mrb[68].mxu1 %vm141_vm1, %v3607_v5 }
0x2c55   :  { %7551 = vmatpush3.bf16.msra.mxu1 %v8357_v57 }
0x2d27   :  { %v3665_v8 = vpop.f32.mrb[68].mxu1 }
0x2d28   :  { %v3666_v35 = vadd.f32 %v6703_v6, %v3665_v8  ;;  %v7540_v12 = vpop.f32.mrb[69].mxu1 }
0x2d29   :  { %v3668_v19 = vpop.f32.mrb[70].mxu1 }
0x2d2a   :  { %v3678_v49 = vmul.f32 %v3673_v9, %v3666_v35  ;;  %v3679_v50 = vmul.f32 %v3675_v53, %v3666_v35  ;;  %v3669_v54 = vadd.f32 %v6703_v6, %v3668_v19  ;;  %v7541_v20 = vpop.f32.mrb[71].mxu1  ;;  %v6716_v19 = vld [vmem:[%s9655_s13 + $0x3] ss:$0 sm:$0xff] }
0x2d2c   :  { %v3682_v21 = vpack.c.bf16 %v3679_v50, %v3678_v49  ;;  %v3680_v22 = vmul.f32 %v3673_v9, %v3669_v54  ;;  %v3681_v23 = vmul.f32 %v3675_v53, %v3669_v54 }
0x2d2e   :  { %v3683_v63 = vpack.c.bf16 %v3681_v23, %v3680_v22  ;;  %7546 = vmatprep.mubr.msk.bf16.mxu0 %vm141_vm1, %v3682_v21 }
0x2d30   :  { %7547 = vmatmul.mubr.msk.bf16.vlgmr.msra.gmra.mrb[76].mxu0 %vm141_vm1, %v3683_v63 }
0x2d31   :  { %7560 = vmatprep.mubr.msk.bf16.mxu0 %vm8124_vm0, %v8123_v0  ;;  %7557 = vmatpush3.bf16.msra.mxu0 %v7808_v60 }
0x2d32   :  { %7558 = vmatprep.subr.bf16.mxu0 %v8123_v0 }
0x2d35   :  { %7559 = vmatpush3.bf16.msra.mxu0 %v7809_v61 }
0x2e03   :  { %v7548_v24 = vpop.f32.mrb[76].mxu0 }
0x2e04   :  { %v3724_v28 = vpop.f32.mrb[77].mxu0 }
0x2e05   :  { %v7549_v2 = vpop.f32.mrb[78].mxu0 }
0x2e06   :  { %v3740_v29 = vmax.f32 %v7548_v24, %v7549_v2  ;;  %v3727_v25 = vpop.f32.mrb[79].mxu0 }
0x2e07   :  { %v3739_v58 = vmax.f32 %v3724_v28, %v3727_v25 }
0x2e08   :  { %v3743_v56 = vsub.f32 %v7548_v24, %v3740_v29  ;;  %v3744_v26 = vsub.f32 %v7549_v2, %v3740_v29 }
0x2e09   :  { %v3741_v30 = vsub.f32 %v3724_v28, %v3739_v58  ;;  %v3742_v39 = vsub.f32 %v3727_v25, %v3739_v58 }
0x2e0a   :  { %v3749_v33 = vmul.f32 1.442695, %v3743_v56  ;;  %v3751_v36 = vmul.f32 1.442695, %v3744_v26 }
0x2e0b   :  { %v3745_v13 = vmul.f32 1.442695, %v3741_v30  ;;  %v3747_v38 = vmul.f32 1.442695, %v3742_v39 }
0x2e0c   :  { %8022 = vpow2.f32 %v3749_v33 }
0x2e0d   :  { %8024 = vpow2.f32 %v3751_v36  ;;  %v7810_v36 = vld [vmem:[%s9656_s14 + $0x60] ss:$8 sps:$4 sm:$0xff]  }
0x2e0e   :  { %8026 = vpow2.f32 %v3745_v13  ;;  %v7813_v13 = vld [vmem:[%s9656_s14 + $0x70] ss:$8 sps:$4 sm:$0xff]  }
0x2e0f   :  { %8028 = vpow2.f32 %v3747_v38  ;;  %v7815_v38 = vld [vmem:[%s9656_s14 + $0x74] ss:$8 sps:$4 sm:$0xff]  }
0x2e16   :  { %v8023_v10 = vpop.eup %8022 }
0x2e17   :  { %v8025_v40 = vpop.eup %8024 }
0x2e18   :  { %v8027_v14 = vpop.eup %8026  ;;  %v3754_v34 = vadd.f32 %v8025_v40, %v8023_v10 }
0x2e19   :  { %v8029_v42 = vpop.eup %8028 }
0x2e1a   :  { %8030 = vrcp.f32 %v3754_v34  ;;  %v3753_v44 = vadd.f32 %v8029_v42, %v8027_v14  ;;  %v7819_v34 = vld [vmem:[%s9657_s16 + $0x188] sm:$0xff]  }
0x2e1c   :  { %8032 = vrcp.f32 %v3753_v44  ;;  %v7821_v44 = vld [vmem:[%s9657_s16 + $0x190] sm:$0xff]  }
0x2e24   :  { %v8031_v37 = vpop.eup %8030 }
0x2e25   :  { %v3760_v45 = vmul.f32 %v8031_v37, %v8025_v40  ;;  %v3759_v47 = vmul.f32 %v8031_v37, %v8023_v10  ;;  %v7816_v10 = vld [vmem:[%s9657_s16 + $0x1c0] sm:$0xff]   ;;  %v7822_v37 = vld [vmem:[%s9657_s16 + $0x1d8] sm:$0xff]  }
0x2e26   :  { %v8033_v48 = vpop.eup %8032  ;;  %v7817_v40 = vld [vmem:[%s9657_s16 + $0x180] sm:$0xff]   ;;  %7198 = vmatprep.subr.bf16.mxu0 %v7816_v10 }
0x2e27   :  { %v3757_v51 = vmul.f32 %v8033_v48, %v8027_v14  ;;  %v3758_v52 = vmul.f32 %v8033_v48, %v8029_v42  ;;  %v3762_v41 = vpack.c.bf16 %v3760_v45, %v3759_v47  ;;  %v7818_v14 = vld [vmem:[%s9657_s16 + $0x1c8] sm:$0xff]   ;;  %v7820_v42 = vld [vmem:[%s9657_s16 + $0x1d0] sm:$0xff]   ;;  %v7823_v45 = vld [vmem:[%s9657_s16 + $0x198] sm:$0xff]  }
0x2e28   :  { %v7824_v47 = vld [vmem:[%s9657_s16 + $0x1e0] sm:$0xff]  }
0x2e29   :  { %v3761_v55 = vpack.c.bf16 %v3758_v52, %v3757_v51  ;;  %v7825_v48 = vld [vmem:[%s9657_s16 + $0x1a0] sm:$0xff]   ;;  %v7826_v51 = vld [vmem:[%s9657_s16 + $0x1e8] sm:$0xff]  }
0x2e2b   :  { %7552 = vmatprep.mubr.msk.bf16.mxu1 %vm398_vm3, %v3761_v55 }
0x2e2c   :  { %7553 = vmatmul.mubr.msk.bf16.vlgmr.msra.gmra.mrb[72].mxu1 %vm398_vm3, %v3762_v41 }
0x2e2d   :  { %4022 = vmatprep.mubr.bf16.mxu1 %v8125_v11 }
0x2eff   :  { %v7554_v18 = vpop.f32.mrb[72].mxu1 }
0x2f00   :  { %v3803_v1 = vpop.f32.mrb[73].mxu1  ;;  %v3822_v3 = vmul.f32 %v7554_v18, %v3819_v62 }
0x2f01   :  { %v7555_v27 = vpop.f32.mrb[74].mxu1  ;;  %v3821_v8 = vmul.f32 %v3819_v62, %v3803_v1 }
0x2f02   :  { %v3827_v5 = vmul.f32 %v7555_v27, %v3824_v59  ;;  %v3806_v6 = vpop.f32.mrb[75].mxu1 }
0x2f03   :  { %v3826_v9 = vmul.f32 %v3824_v59, %v3806_v6  ;;  %v6722_v59 = vld [vmem:[%s9651_s18 + $0xa] ss:$0 sm:$0xff] }
0x2f04   :  { %v3829_v35 = vadd.f32 %v3827_v5, %v3822_v3  ;;  %v6723_v6 = vld [vmem:[%s9652_s19 + $0xa] ss:$0 sm:$0xff] }
0x2f05   :  { %v3828_v12 = vadd.f32 %v3826_v9, %v3821_v8 }
0x2f07   :  { %v3835_v53 = vpack.c.bf16 %v3829_v35, %v3828_v12 }
0x2f09   :  { %7561 = vmatmul.mubr.msk.bf16.vlgmr.msra.gmra.mrb[80].mxu0 %vm141_vm1, %v3835_v53  ;;  %v7827_v53 = vld [vmem:[%s9657_s16 + $0x1a8] sm:$0xff]  }
0x2f0a   :  { %7199 = vmatpush3.bf16.msra.mxu0 %v7817_v40 }
0x2f0b   :  { %7200 = vmatprep.subr.bf16.mxu0 %v7818_v14 }
0x2f0e   :  { %7201 = vmatpush3.bf16.msra.mxu0 %v7819_v34 }
0x2f0f   :  { %7202 = vmatprep.subr.bf16.mxu0 %v7820_v42 }
0x2f12   :  { %7203 = vmatpush3.bf16.msra.mxu0 %v7821_v44 }
0x2f13   :  { %7204 = vmatprep.subr.bf16.mxu0 %v7822_v37 }
0x2f16   :  { %7205 = vmatpush3.bf16.msra.mxu0 %v7823_v45 }
0x2f17   :  { %7206 = vmatprep.subr.bf16.mxu0 %v7824_v47 }
0x2f1a   :  { %7207 = vmatpush3.bf16.msra.mxu0 %v7825_v48 }
0x2f1b   :  { %7208 = vmatprep.subr.bf16.mxu0 %v7826_v51 }
0x2f1e   :  { %7209 = vmatpush3.bf16.msra.mxu0 %v7827_v53  ;;  %v6786_v53 = vld [vmem:[%s9651_s18 + $0xb] ss:$0 sm:$0xff] }
0x2fdc   :  { %v3893_v49 = vpop.f32.mrb[80].mxu0 }
0x2fdd   :  { %v3894_v50 = vadd.f32 %v6716_v19, %v3893_v49  ;;  %v7562_v54 = vpop.f32.mrb[81].mxu0  ;;  %v7829_v49 = vld [vmem:[%s9657_s16 + $0x1b0] sm:$0xff]  }
0x2fde   :  { %v3896_v20 = vpop.f32.mrb[82].mxu0  ;;  %v7831_v54 = vld [vmem:[%s9657_s16 + $0x1b8] sm:$0xff]  }
0x2fdf   :  { %v3897_v21 = vadd.f32 %v6716_v19, %v3896_v20  ;;  %v7563_v22 = vpop.f32.mrb[83].mxu0  ;;  %v3900_v23 = vadd.f32 %v3894_v50, %v9062_v4  ;;  %v7828_v19 = vld [vmem:[%s9657_s16 + $0x1f0] sm:$0xff]   ;;  %v7830_v50 = vld [vmem:[%s9657_s16 + $0x1f8] sm:$0xff]   ;;  %v6728_v20 = vld [vmem:[%s9658_s15 + $0x6] sm:$0x3] }
0x2fe0   :  { %7210 = vmatprep.subr.bf16.mxu0 %v7828_v19  ;;  %v3964_v22 = vrot.slane %v6728_v20, %v8323_v31 }
0x2fe1   :  { %v3906_v63 = vsel %vm141_vm1, %v3900_v23, 0.0  ;;  %v3901_v24 = vadd.f32 %v3897_v21, %v9064_v7  ;;  %v7812_v7 = vld [vmem:[%s9656_s14 + $0x64] ss:$8 sps:$4 sm:$0xff]   ;;  %7211 = vmatpush3.bf16.msra.mxu0 %v7829_v49  ;;  %v3960_v21 = vrot.slane %v6728_v20, %v8325_v32  ;;  %v6787_v20 = vld [vmem:[%s9652_s19 + $0xb] ss:$0 sm:$0xff] }
0x2fe2   :  { %3907 = vadd.xlane.f32.xlu0 %v3906_v63  ;;  %3990 = vmatprep.subr.bf16.mxu1 %v7812_v7 }
0x2fe3   :  { %v3909_v28 = vsel %vm141_vm1, %v3901_v24, 0.0  ;;  %3991 = vmatpush1.bf16.msra.mxu1 %v7810_v36  ;;  %7212 = vmatprep.subr.bf16.mxu0 %v7830_v50  ;;  %v6767_v36 = vld [vmem:[%s9659_s17 + $0x3] ss:$0 sm:$0xff] }
0x2fe4   :  { %3910 = vadd.xlane.f32.xlu1 %v3909_v28  ;;  %3992 = vmatprep.subr.bf16.mxu1 %v7815_v38 }
0x2fe5   :  { %7213 = vmatpush3.bf16.msra.mxu0 %v7831_v54 }
0x2fe6   :  { %7594 = vmatprep.subr.bf16.mxu0 %v8123_v0 }
0x2fe7   :  { %3993 = vmatpush1.bf16.msra.mxu1 %v7813_v13 }
0x2fe8   :  { %7564 = vmatprep.subr.bf16.mxu1 %v8123_v0 }
0x306f   :  { %v3908_v2 = vpop.xlane.xlu0 %3907 }
0x3070   :  { %v3912_v29 = vmul.f32 0.03125, %v3908_v2 }
0x3071   :  { %v3911_v25 = vpop.xlane.xlu1 %3910 }
0x3072   :  { %v3914_v58 = vsub.f32 %v3900_v23, %v3912_v29  ;;  %v3913_v56 = vmul.f32 0.03125, %v3911_v25 }
0x3074   :  { %v3915_v26 = vsub.f32 %v3901_v24, %v3913_v56  ;;  %v3916_v30 = vmul.f32 %v3914_v58, %v3914_v58 }
0x3076   :  { %v3918_v39 = vsel %vm141_vm1, %v3916_v30, 0.0  ;;  %v3917_v33 = vmul.f32 %v3915_v26, %v3915_v26 }
0x3077   :  { %3919 = vadd.xlane.f32.xlu0 %v3918_v39 }
0x3078   :  { %v3921_v4 = vsel %vm141_vm1, %v3917_v33, 0.0 }
0x307b   :  { %3922 = vadd.xlane.f32.xlu0 %v3921_v4 }
0x3104   :  { %v3920_v52 = vpop.xlane.xlu0 %3919 }
0x3105   :  { %v3924_v41 = vmul.f32 0.03125, %v3920_v52 }
0x3107   :  { %v3926_v55 = vadd.f32 1e-05, %v3924_v41 }
0x3108   :  { %v3923_v60 = vpop.xlane.xlu0 %3922 }
0x3109   :  { %8034 = vrsqrt.f32 %v3926_v55  ;;  %v3925_v61 = vmul.f32 0.03125, %v3923_v60 }
0x310b   :  { %v3927_v62 = vadd.f32 1e-05, %v3925_v61 }
0x310d   :  { %8036 = vrsqrt.f32 %v3927_v62 }
0x3113   :  { %v8035_v18 = vpop.eup %8034 }
0x3114   :  { %v3930_v1 = vmul.f32 %v8035_v18, %v3914_v58 }
0x3116   :  { %v3938_v3 = vmul.f32 %v6722_v59, %v3930_v1 }
0x3117   :  { %v8037_v27 = vpop.eup %8036 }
0x3118   :  { %v3931_v5 = vmul.f32 %v8037_v27, %v3915_v26  ;;  %v3946_v9 = vadd.f32 %v6723_v6, %v3938_v3  ;;  %v7833_v27 = vld [vmem:[%s9682_s29 + $0x48] sm:$0xff]  }
0x311a   :  { %v3939_v8 = vmul.f32 %v6722_v59, %v3931_v5  ;;  %v7832_v59 = vld [vmem:[%s9682_s29 + $0x40] sm:$0xff]  }
0x311c   :  { %v3947_v35 = vadd.f32 %v6723_v6, %v3939_v8 }
0x311e   :  { %v3953_v12 = vpack.c.bf16 %v3947_v35, %v3946_v9 }
0x3120   :  { %6733 = vmatmul.mubr.msk.bf16.vlgmr.msra.gmra.mrb[76].mxu1 %vm141_vm1, %v3953_v12 }
0x3121   :  { %7568 = vmatprep.mubr.msk.bf16.mxu1 %vm8124_vm0, %v8123_v0  ;;  %7565 = vmatpush3.bf16.msra.mxu1 %v7832_v59 }
0x3122   :  { %7566 = vmatprep.subr.bf16.mxu1 %v8123_v0 }
0x3125   :  { %7567 = vmatpush3.bf16.msra.mxu1 %v7833_v27 }
0x3126   :  { %7572 = vmatprep.subr.bf16.mxu1 %v8971_v17 }
0x31f3   :  { %v4024_v23 = vpop.f32.mrb[76].mxu1 }
0x31f4   :  { %v4025_v63 = vadd.f32 %v4024_v23, %v3960_v21  ;;  %v4026_v24 = vpop.f32.mrb[77].mxu1 }
0x31f5   :  { %v4027_v28 = vadd.f32 %v4026_v24, %v3964_v22  ;;  %v4028_v2 = vpop.f32.mrb[78].mxu1  ;;  %v6793_v24 = vld [vmem:[%s9687_s0 + $0x4] ss:$0 sm:$0xff] }
0x31f6   :  { %v4029_v29 = vadd.f32 %v4028_v2, %v3960_v21  ;;  %v4030_v25 = vpop.f32.mrb[79].mxu1  ;;  %v4033_v56 = vmax.f32 %v4025_v63, 0.0 }
0x31f7   :  { %v4031_v58 = vadd.f32 %v4030_v25, %v3964_v22  ;;  %v4034_v30 = vmax.f32 %v4027_v28, 0.0 }
0x31f8   :  { %v4035_v26 = vmax.f32 %v4029_v29, 0.0 }
0x31f9   :  { %v4036_v39 = vmax.f32 %v4031_v58, 0.0 }
0x31fa   :  { %v4070_v33 = vpack.c.bf16 %v4035_v26, %v4033_v56 }
0x31fb   :  { %v4071_v4 = vpack.c.bf16 %v4036_v39, %v4034_v30 }
0x31fd   :  { %4208 = vmatprep.mubr.bf16.mxu0 %v4071_v4 }
0x31fe   :  { %4209 = vmatmul.mubr.bf16.vlgmr.msra.gmra.mrb[84].mxu0 %v4070_v33 }
0x31ff   :  { %7598 = vmatprep.mubr.msk.bf16.mxu0 %vm8124_vm0, %v8123_v0 }
0x32d1   :  { %v7214_v7 = vpop.f32.mrb[84].mxu0 }
0x32d2   :  { %v7215_v13 = vpop.f32.mrb[85].mxu0 }
0x32d3   :  { %v7216_v38 = vadd.f32 %v7215_v13, %v7214_v7  ;;  %v7217_v10 = vpop.f32.mrb[86].mxu0 }
0x32d4   :  { %v7218_v40 = vpop.f32.mrb[87].mxu0 }
0x32d5   :  { %v4211_v14 = vadd.f32 %v7216_v38, %v6767_v36  ;;  %v7219_v34 = vadd.f32 %v7218_v40, %v7217_v10 }
0x32d7   :  { %v4214_v42 = vadd.f32 %v7219_v34, %v6767_v36  ;;  %v4217_v44 = vadd.f32 %v4211_v14, %v3946_v9 }
0x32d9   :  { %v4223_v37 = vsel %vm141_vm1, %v4217_v44, 0.0  ;;  %v4218_v45 = vadd.f32 %v4214_v42, %v3947_v35 }
0x32da   :  { %4224 = vadd.xlane.f32.xlu1 %v4223_v37 }
0x32db   :  { %v4226_v47 = vsel %vm141_vm1, %v4218_v45, 0.0 }
0x32dc   :  { %4227 = vadd.xlane.f32.xlu0 %v4226_v47 }
0x3367   :  { %v4225_v48 = vpop.xlane.xlu1 %4224 }
0x3368   :  { %v4229_v51 = vmul.f32 0.03125, %v4225_v48 }
0x3369   :  { %v4228_v52 = vpop.xlane.xlu0 %4227 }
0x336a   :  { %v4231_v41 = vsub.f32 %v4217_v44, %v4229_v51  ;;  %v4230_v55 = vmul.f32 0.03125, %v4228_v52 }
0x336c   :  { %v4232_v60 = vsub.f32 %v4218_v45, %v4230_v55  ;;  %v4233_v61 = vmul.f32 %v4231_v41, %v4231_v41 }
0x336e   :  { %v4235_v62 = vsel %vm141_vm1, %v4233_v61, 0.0  ;;  %v4234_v18 = vmul.f32 %v4232_v60, %v4232_v60 }
0x336f   :  { %4236 = vadd.xlane.f32.xlu1 %v4235_v62 }
0x3370   :  { %v4238_v1 = vsel %vm141_vm1, %v4234_v18, 0.0 }
0x3371   :  { %4239 = vadd.xlane.f32.xlu0 %v4238_v1 }
0x33fc   :  { %v4237_v3 = vpop.xlane.xlu1 %4236 }
0x33fd   :  { %v4241_v5 = vmul.f32 0.03125, %v4237_v3 }
0x33fe   :  { %v4240_v6 = vpop.xlane.xlu0 %4239 }
0x33ff   :  { %v4243_v8 = vadd.f32 1e-05, %v4241_v5  ;;  %v4242_v9 = vmul.f32 0.03125, %v4240_v6 }
0x3401   :  { %8038 = vrsqrt.f32 %v4243_v8  ;;  %v4244_v35 = vadd.f32 1e-05, %v4242_v9 }
0x3403   :  { %8040 = vrsqrt.f32 %v4244_v35 }
0x340b   :  { %v8039_v12 = vpop.eup %8038 }
0x340c   :  { %v4247_v19 = vmul.f32 %v8039_v12, %v4231_v41  ;;  %v7834_v12 = vld [vmem:[%s9648_s6 + $0x40] sm:$0xff]  }
0x340d   :  { %v8041_v49 = vpop.eup %8040 }
0x340e   :  { %v4255_v50 = vmul.f32 %v6786_v53, %v4247_v19  ;;  %v4248_v54 = vmul.f32 %v8041_v49, %v4232_v60 }
0x3410   :  { %v4256_v21 = vmul.f32 %v6786_v53, %v4248_v54  ;;  %v9196_v22 = vadd.f32 %v6787_v20, %v4255_v50  ;;  %v7835_v53 = vld [vmem:[%s9648_s6 + $0x48] sm:$0xff]  }
0x3412   :  { %v9198_v23 = vadd.f32 %v6787_v20, %v4256_v21 }
0x3414   :  { %v4270_v63 = vpack.c.bf16 %v9198_v23, %v9196_v22 }
0x3416   :  { %7569 = vmatmul.mubr.msk.bf16.vlgmr.msra.gmra.mrb[80].mxu1 %vm141_vm1, %v4270_v63 }
0x3417   :  { %7573 = vmatpush3.bf16.msra.mxu1 %v8971_v17 }
0x3418   :  { %7574 = vmatprep.subr.bf16.mxu1 %v8991_v15 }
0x341b   :  { %7575 = vmatpush3.bf16.msra.mxu1 %v8991_v15 }
0x341c   :  { %7692 = vmatprep.subr.msk.bf16.mxu1 %vm405_vm2, %v8998_v16 }
0x34e9   :  { %v4328_v28 = vpop.f32.mrb[80].mxu1 }
0x34ea   :  { %v4329_v2 = vadd.f32 %v6793_v24, %v4328_v28  ;;  %v7570_v29 = vpop.f32.mrb[81].mxu1 }
0x34eb   :  { %v4331_v25 = vpop.f32.mrb[82].mxu1 }
0x34ec   :  { %v4332_v58 = vadd.f32 %v6793_v24, %v4331_v25  ;;  %4337 = vrot.lane.b32.xlu1 %v4329_v2, %s9673_s24  ;;  %v7571_v56 = vpop.f32.mrb[83].mxu1 }
0x34ed   :  { %v6806_v56 = vld [vmem:[%s9649_s7 + $0x4] ss:$0 sm:$0xff] }
0x34ee   :  { %4339 = vrot.lane.b32.xlu0 %v4332_v58, %s9673_s24 }
0x34f0   :  { %4483 = vrot.lane.b32.xlu1 %v4329_v2, %s9690_s1 }
0x34f4   :  { %4488 = vrot.lane.b32.xlu1 %v4332_v58, %s9690_s1 }
0x355e   :  { %v4338_v26 = vpop.permute.xlu1 %4337 }
0x355f   :  { %v4343_v39 = vmul.f32 %v4338_v26, %v4329_v2  ;;  %v4345_v33 = vmul.f32 %v4338_v26, %v4332_v58 }
0x3560   :  { %v4340_v30 = vpop.permute.xlu0 %4339 }
0x3561   :  { %v4344_v4 = vmul.f32 %v4340_v30, %v4329_v2  ;;  %v4346_v7 = vmul.f32 %v4340_v30, %v4332_v58 }
0x3562   :  { %v4484_v19 = vpop.permute.xlu1 %4483 }
0x3563   :  { %v4347_v36 = vpack.c.bf16 %v4344_v4, %v4343_v39  ;;  %v4348_v13 = vpack.c.bf16 %v4346_v7, %v4345_v33 }
0x3565   :  { %7576 = vmatprep.mubr.msk.bf16.mxu1 %vm141_vm1, %v4347_v36 }
0x3566   :  { %7577 = vmatmul.mubr.msk.bf16.vlgmr.msra.gmra.mrb[84].mxu1 %vm141_vm1, %v4348_v13  ;;  %v4489_v54 = vpop.permute.xlu1 %4488 }
0x3567   :  { %7581 = vmatpush3.bf16.msra.mxu1 %v8357_v57 }
0x3568   :  { %7586 = vmatprep.subr.bf16.mxu1 %v8123_v0 }
0x3639   :  { %v7578_v38 = vpop.f32.mrb[84].mxu1 }
0x363a   :  { %v4389_v10 = vpop.f32.mrb[85].mxu1 }
0x363b   :  { %v7579_v40 = vpop.f32.mrb[86].mxu1 }
0x363c   :  { %v4405_v14 = vmax.f32 %v7578_v38, %v7579_v40  ;;  %v4392_v34 = vpop.f32.mrb[87].mxu1 }
0x363d   :  { %v4404_v42 = vmax.f32 %v4389_v10, %v4392_v34 }
0x363e   :  { %v4408_v44 = vsub.f32 %v7578_v38, %v4405_v14  ;;  %v4409_v37 = vsub.f32 %v7579_v40, %v4405_v14 }
0x363f   :  { %v4406_v45 = vsub.f32 %v4389_v10, %v4404_v42  ;;  %v4407_v47 = vsub.f32 %v4392_v34, %v4404_v42 }
0x3640   :  { %v4414_v48 = vmul.f32 1.442695, %v4408_v44  ;;  %v4416_v51 = vmul.f32 1.442695, %v4409_v37 }
0x3641   :  { %v4410_v52 = vmul.f32 1.442695, %v4406_v45  ;;  %v4412_v41 = vmul.f32 1.442695, %v4407_v47  ;;  %v7836_v45 = vld [vmem:[%s9650_s8 + $0x40] sm:$0xff]   ;;  %v7837_v47 = vld [vmem:[%s9650_s8 + $0x48] sm:$0xff]  }
0x3642   :  { %8042 = vpow2.f32 %v4414_v48  ;;  %7595 = vmatpush3.bf16.msra.mxu0 %v7836_v45 }
0x3643   :  { %8044 = vpow2.f32 %v4416_v51  ;;  %7596 = vmatprep.subr.bf16.mxu0 %v8123_v0 }
0x3644   :  { %8046 = vpow2.f32 %v4410_v52 }
0x3645   :  { %8048 = vpow2.f32 %v4412_v41 }
0x3646   :  { %7597 = vmatpush3.bf16.msra.mxu0 %v7837_v47 }
0x3647   :  { %7693 = vmatprep.subr.msk.bf16.mxu0 %vm405_vm2, %v8998_v16  ;;  %v6813_v16 = vld [vmem:[%s9652_s19 + $0xc] ss:$0 sm:$0xff] }
0x364c   :  { %v8043_v55 = vpop.eup %8042 }
0x364d   :  { %v8045_v60 = vpop.eup %8044 }
0x364e   :  { %v8047_v61 = vpop.eup %8046  ;;  %v4419_v62 = vadd.f32 %v8045_v60, %v8043_v55 }
0x364f   :  { %v8049_v18 = vpop.eup %8048 }
0x3650   :  { %8050 = vrcp.f32 %v4419_v62  ;;  %v4418_v1 = vadd.f32 %v8049_v18, %v8047_v61 }
0x3652   :  { %8052 = vrcp.f32 %v4418_v1 }
0x365a   :  { %v8051_v59 = vpop.eup %8050 }
0x365b   :  { %v4425_v27 = vmul.f32 %v8051_v59, %v8045_v60  ;;  %v4424_v3 = vmul.f32 %v8051_v59, %v8043_v55 }
0x365c   :  { %v8053_v5 = vpop.eup %8052 }
0x365d   :  { %v4422_v6 = vmul.f32 %v8053_v5, %v8047_v61  ;;  %v4423_v8 = vmul.f32 %v8053_v5, %v8049_v18  ;;  %v4427_v9 = vpack.c.bf16 %v4425_v27, %v4424_v3  ;;  %v6812_v18 = vld [vmem:[%s9651_s18 + $0xc] ss:$0 sm:$0xff] }
0x365f   :  { %v4426_v35 = vpack.c.bf16 %v4423_v8, %v4422_v6 }
0x3661   :  { %7582 = vmatprep.mubr.msk.bf16.mxu1 %vm398_vm3, %v4426_v35 }
0x3662   :  { %7583 = vmatmul.mubr.msk.bf16.vlgmr.msra.gmra.mrb[88].mxu1 %vm398_vm3, %v4427_v9  ;;  %v6819_v9 = vld [vmem:[%s9653_s9 + $0x4] ss:$0 sm:$0xff] }
0x3663   :  { %7590 = vmatprep.mubr.msk.bf16.mxu1 %vm8124_vm0, %v8123_v0  ;;  %7587 = vmatpush3.bf16.msra.mxu1 %v7834_v12 }
0x3664   :  { %7588 = vmatprep.subr.bf16.mxu1 %v8123_v0 }
0x3667   :  { %7589 = vmatpush3.bf16.msra.mxu1 %v7835_v53 }
0x3668   :  { %7602 = vmatprep.subr.bf16.mxu1 %v8971_v17 }
0x3735   :  { %v7584_v49 = vpop.f32.mrb[88].mxu1 }
0x3736   :  { %v4468_v50 = vpop.f32.mrb[89].mxu1  ;;  %v4487_v21 = vmul.f32 %v7584_v49, %v4484_v19 }
0x3737   :  { %v7585_v20 = vpop.f32.mrb[90].mxu1  ;;  %v4486_v28 = vmul.f32 %v4484_v19, %v4468_v50 }
0x3738   :  { %v4492_v63 = vmul.f32 %v7585_v20, %v4489_v54  ;;  %v4471_v24 = vpop.f32.mrb[91].mxu1 }
0x3739   :  { %v4491_v2 = vmul.f32 %v4489_v54, %v4471_v24 }
0x373a   :  { %v4494_v29 = vadd.f32 %v4492_v63, %v4487_v21 }
0x373b   :  { %v4493_v25 = vadd.f32 %v4491_v2, %v4486_v28 }
0x373d   :  { %v4500_v58 = vpack.c.bf16 %v4494_v29, %v4493_v25 }
0x373f   :  { %7591 = vmatmul.mubr.msk.bf16.vlgmr.msra.gmra.mrb[92].mxu1 %vm141_vm1, %v4500_v58 }
0x3740   :  { %7603 = vmatpush3.bf16.msra.mxu1 %v8971_v17 }
0x3741   :  { %7604 = vmatprep.subr.bf16.mxu1 %v8991_v15 }
0x3744   :  { %7605 = vmatpush3.bf16.msra.mxu1 %v8991_v15 }
0x3745   :  { %7616 = vmatprep.subr.bf16.mxu1 %v8123_v0 }
0x3812   :  { %v4558_v26 = vpop.f32.mrb[92].mxu1 }
0x3813   :  { %v4559_v30 = vadd.f32 %v6806_v56, %v4558_v26  ;;  %v7592_v39 = vpop.f32.mrb[93].mxu1 }
0x3814   :  { %v4561_v33 = vpop.f32.mrb[94].mxu1 }
0x3815   :  { %v4562_v4 = vadd.f32 %v6806_v56, %v4561_v33  ;;  %v7593_v7 = vpop.f32.mrb[95].mxu1  ;;  %v4565_v36 = vadd.f32 %v4559_v30, %v9196_v22 }
0x3817   :  { %v4571_v17 = vsel %vm141_vm1, %v4565_v36, 0.0  ;;  %v4566_v13 = vadd.f32 %v4562_v4, %v9198_v23 }
0x3818   :  { %4572 = vadd.xlane.f32.xlu0 %v4571_v17 }
0x3819   :  { %v4574_v15 = vsel %vm141_vm1, %v4566_v13, 0.0 }
0x381a   :  { %4575 = vadd.xlane.f32.xlu1 %v4574_v15 }
0x382b   :  { %4824 = vrot.lane.b32.xlu1 %v8340_v43, %s9673_s24 }
0x38a5   :  { %v4573_v38 = vpop.xlane.xlu0 %4572 }
0x38a6   :  { %v4577_v10 = vmul.f32 0.03125, %v4573_v38 }
0x38a7   :  { %v4576_v40 = vpop.xlane.xlu1 %4575 }
0x38a8   :  { %v4579_v14 = vsub.f32 %v4565_v36, %v4577_v10  ;;  %v4578_v34 = vmul.f32 0.03125, %v4576_v40 }
0x38aa   :  { %v4580_v42 = vsub.f32 %v4566_v13, %v4578_v34  ;;  %v4581_v44 = vmul.f32 %v4579_v14, %v4579_v14 }
0x38ac   :  { %v4583_v22 = vsel %vm141_vm1, %v4581_v44, 0.0  ;;  %v4582_v37 = vmul.f32 %v4580_v42, %v4580_v42 }
0x38ad   :  { %4584 = vadd.xlane.f32.xlu0 %v4583_v22 }
0x38ae   :  { %v4586_v23 = vsel %vm141_vm1, %v4582_v37, 0.0 }
0x38b1   :  { %4587 = vadd.xlane.f32.xlu0 %v4586_v23 }
0x38c7   :  { %4830 = vrot.lane.b32.xlu0 %v8342_v46, %s9673_s24 }
0x393a   :  { %v4585_v48 = vpop.xlane.xlu0 %4584 }
0x393b   :  { %v4589_v51 = vmul.f32 0.03125, %v4585_v48 }
0x393d   :  { %v4591_v52 = vadd.f32 1e-05, %v4589_v51  ;;  %v7838_v51 = vld [vmem:[%s9654_s12 + $0x40] sm:$0xff]  }
0x393e   :  { %v4588_v41 = vpop.xlane.xlu0 %4587 }
0x393f   :  { %8054 = vrsqrt.f32 %v4591_v52  ;;  %v4590_v55 = vmul.f32 0.03125, %v4588_v41  ;;  %v7839_v52 = vld [vmem:[%s9654_s12 + $0x48] sm:$0xff]  }
0x3941   :  { %v4592_v60 = vadd.f32 1e-05, %v4590_v55  ;;  %v4825_v55 = vpop.permute.xlu1 %4824 }
0x3943   :  { %8056 = vrsqrt.f32 %v4592_v60 }
0x3949   :  { %v8055_v61 = vpop.eup %8054 }
0x394a   :  { %v4595_v62 = vmul.f32 %v8055_v61, %v4579_v14  ;;  %v4831_v61 = vpop.permute.xlu0 %4830 }
0x394c   :  { %v4603_v59 = vmul.f32 %v6812_v18, %v4595_v62 }
0x394d   :  { %v8057_v1 = vpop.eup %8056 }
0x394e   :  { %v4596_v27 = vmul.f32 %v8057_v1, %v4580_v42  ;;  %v9264_v5 = vadd.f32 %v6813_v16, %v4603_v59 }
0x3950   :  { %v4604_v3 = vmul.f32 %v6812_v18, %v4596_v27 }
0x3952   :  { %v9266_v6 = vadd.f32 %v6813_v16, %v4604_v3 }
0x3954   :  { %v4618_v8 = vpack.c.bf16 %v9266_v6, %v9264_v5 }
0x3956   :  { %7599 = vmatmul.mubr.msk.bf16.vlgmr.msra.gmra.mrb[88].mxu0 %vm141_vm1, %v4618_v8 }
0x3957   :  { %7611 = vmatpush3.bf16.msra.mxu0 %v8357_v57 }
0x3a29   :  { %v4676_v35 = vpop.f32.mrb[88].mxu0 }
0x3a2a   :  { %v4677_v12 = vadd.f32 %v6819_v9, %v4676_v35  ;;  %v7600_v53 = vpop.f32.mrb[89].mxu0  ;;  %v6832_v35 = vld [vmem:[%s9655_s13 + $0x4] ss:$0 sm:$0xff] }
0x3a2b   :  { %v4679_v19 = vpop.f32.mrb[90].mxu0 }
0x3a2c   :  { %v4683_v49 = vmul.f32 %v4677_v12, %v8340_v43  ;;  %v4684_v50 = vmul.f32 %v4677_v12, %v8342_v46  ;;  %v4680_v54 = vadd.f32 %v6819_v9, %v4679_v19  ;;  %v7601_v20 = vpop.f32.mrb[91].mxu0 }
0x3a2e   :  { %v4687_v21 = vpack.c.bf16 %v4684_v50, %v4683_v49  ;;  %v4685_v63 = vmul.f32 %v4680_v54, %v8340_v43  ;;  %v4686_v24 = vmul.f32 %v4680_v54, %v8342_v46 }
0x3a30   :  { %v4688_v28 = vpack.c.bf16 %v4686_v24, %v4685_v63  ;;  %7606 = vmatprep.mubr.msk.bf16.mxu1 %vm141_vm1, %v4687_v21 }
0x3a32   :  { %7607 = vmatmul.mubr.msk.bf16.vlgmr.msra.gmra.mrb[96].mxu1 %vm141_vm1, %v4688_v28 }
0x3a33   :  { %7620 = vmatprep.mubr.msk.bf16.mxu1 %vm8124_vm0, %v8123_v0  ;;  %7617 = vmatpush3.bf16.msra.mxu1 %v7838_v51 }
0x3a34   :  { %7618 = vmatprep.subr.bf16.mxu1 %v8123_v0 }
0x3a37   :  { %7619 = vmatpush3.bf16.msra.mxu1 %v7839_v52  ;;  %v6838_v52 = vld [vmem:[%s9651_s18 + $0xd] ss:$0 sm:$0xff] }
0x3b05   :  { %v7608_v2 = vpop.f32.mrb[96].mxu1 }
0x3b06   :  { %v4729_v29 = vpop.f32.mrb[97].mxu1 }
0x3b07   :  { %v7609_v25 = vpop.f32.mrb[98].mxu1 }
0x3b08   :  { %v4745_v58 = vmax.f32 %v7608_v2, %v7609_v25  ;;  %v4732_v56 = vpop.f32.mrb[99].mxu1 }
0x3b09   :  { %v4744_v26 = vmax.f32 %v4729_v29, %v4732_v56 }
0x3b0a   :  { %v4748_v30 = vsub.f32 %v7608_v2, %v4745_v58  ;;  %v4749_v39 = vsub.f32 %v7609_v25, %v4745_v58 }
0x3b0b   :  { %v4746_v33 = vsub.f32 %v4729_v29, %v4744_v26  ;;  %v4747_v4 = vsub.f32 %v4732_v56, %v4744_v26 }
0x3b0c   :  { %v4754_v7 = vmul.f32 1.442695, %v4748_v30  ;;  %v4756_v36 = vmul.f32 1.442695, %v4749_v39 }
0x3b0d   :  { %v4750_v17 = vmul.f32 1.442695, %v4746_v33  ;;  %v4752_v13 = vmul.f32 1.442695, %v4747_v4  ;;  %v7840_v33 = vld [vmem:[%s9656_s14 + $0x80] ss:$8 sps:$4 sm:$0xff]  }
0x3b0e   :  { %8058 = vpow2.f32 %v4754_v7  ;;  %v7843_v4 = vld [vmem:[%s9656_s14 + $0x90] ss:$8 sps:$4 sm:$0xff]   ;;  %v7845_v7 = vld [vmem:[%s9656_s14 + $0x94] ss:$8 sps:$4 sm:$0xff]  }
0x3b0f   :  { %8060 = vpow2.f32 %v4756_v36  ;;  %v7846_v36 = vld [vmem:[%s9657_s16 + $0x240] sm:$0xff]  }
0x3b10   :  { %8062 = vpow2.f32 %v4750_v17  ;;  %v7847_v17 = vld [vmem:[%s9657_s16 + $0x200] sm:$0xff]   ;;  %7246 = vmatprep.subr.bf16.mxu1 %v7846_v36 }
0x3b11   :  { %8064 = vpow2.f32 %v4752_v13  ;;  %v7848_v13 = vld [vmem:[%s9657_s16 + $0x248] sm:$0xff]  }
0x3b18   :  { %v8059_v15 = vpop.eup %8058 }
0x3b19   :  { %v8061_v38 = vpop.eup %8060 }
0x3b1a   :  { %v8063_v10 = vpop.eup %8062  ;;  %v4759_v40 = vadd.f32 %v8061_v38, %v8059_v15 }
0x3b1b   :  { %v8065_v14 = vpop.eup %8064 }
0x3b1c   :  { %8066 = vrcp.f32 %v4759_v40  ;;  %v4758_v34 = vadd.f32 %v8065_v14, %v8063_v10  ;;  %v7852_v40 = vld [vmem:[%s9657_s16 + $0x258] sm:$0xff]  }
0x3b1e   :  { %8068 = vrcp.f32 %v4758_v34  ;;  %v7854_v34 = vld [vmem:[%s9657_s16 + $0x260] sm:$0xff]  }
0x3b26   :  { %v8067_v42 = vpop.eup %8066 }
0x3b27   :  { %v4765_v44 = vmul.f32 %v8067_v42, %v8061_v38  ;;  %v4764_v22 = vmul.f32 %v8067_v42, %v8059_v15  ;;  %v7849_v15 = vld [vmem:[%s9657_s16 + $0x208] sm:$0xff]   ;;  %v7850_v38 = vld [vmem:[%s9657_s16 + $0x250] sm:$0xff]   ;;  %v7855_v42 = vld [vmem:[%s9657_s16 + $0x220] sm:$0xff]  }
0x3b28   :  { %v8069_v37 = vpop.eup %8068 }
0x3b29   :  { %v4762_v23 = vmul.f32 %v8069_v37, %v8063_v10  ;;  %v4763_v45 = vmul.f32 %v8069_v37, %v8065_v14  ;;  %v4767_v47 = vpack.c.bf16 %v4765_v44, %v4764_v22  ;;  %v7851_v10 = vld [vmem:[%s9657_s16 + $0x210] sm:$0xff]   ;;  %v7853_v14 = vld [vmem:[%s9657_s16 + $0x218] sm:$0xff]   ;;  %v7856_v44 = vld [vmem:[%s9657_s16 + $0x268] sm:$0xff]  }
0x3b2b   :  { %v4766_v48 = vpack.c.bf16 %v4763_v45, %v4762_v23 }
0x3b2d   :  { %7612 = vmatprep.mubr.msk.bf16.mxu0 %vm398_vm3, %v4766_v48 }
0x3b2e   :  { %7613 = vmatmul.mubr.msk.bf16.vlgmr.msra.gmra.mrb[92].mxu0 %vm398_vm3, %v4767_v47 }
0x3b2f   :  { %5029 = vmatprep.mubr.bf16.mxu0 %v8125_v11 }
0x3c01   :  { %v7614_v41 = vpop.f32.mrb[92].mxu0 }
0x3c02   :  { %v4808_v60 = vpop.f32.mrb[93].mxu0  ;;  %v4828_v18 = vmul.f32 %v7614_v41, %v4825_v55 }
0x3c03   :  { %v7615_v62 = vpop.f32.mrb[94].mxu0  ;;  %v4827_v27 = vmul.f32 %v4825_v55, %v4808_v60 }
0x3c04   :  { %v4834_v1 = vmul.f32 %v7615_v62, %v4831_v61  ;;  %v4811_v59 = vpop.f32.mrb[95].mxu0  ;;  %v6839_v62 = vld [vmem:[%s9652_s19 + $0xd] ss:$0 sm:$0xff] }
0x3c05   :  { %v4833_v16 = vmul.f32 %v4831_v61, %v4811_v59 }
0x3c06   :  { %v4836_v3 = vadd.f32 %v4834_v1, %v4828_v18 }
0x3c07   :  { %v4835_v8 = vadd.f32 %v4833_v16, %v4827_v27  ;;  %v7857_v16 = vld [vmem:[%s9657_s16 + $0x228] sm:$0xff]  }
0x3c09   :  { %v4842_v9 = vpack.c.bf16 %v4836_v3, %v4835_v8  ;;  %v7858_v3 = vld [vmem:[%s9657_s16 + $0x270] sm:$0xff]  }
0x3c0a   :  { %v7859_v8 = vld [vmem:[%s9657_s16 + $0x230] sm:$0xff]  }
0x3c0b   :  { %7621 = vmatmul.mubr.msk.bf16.vlgmr.msra.gmra.mrb[100].mxu1 %vm141_vm1, %v4842_v9  ;;  %v7860_v9 = vld [vmem:[%s9657_s16 + $0x278] sm:$0xff]  }
0x3c0c   :  { %7247 = vmatpush3.bf16.msra.mxu1 %v7847_v17 }
0x3c0d   :  { %7248 = vmatprep.subr.bf16.mxu1 %v7848_v13 }
0x3c10   :  { %7249 = vmatpush3.bf16.msra.mxu1 %v7849_v15 }
0x3c11   :  { %7250 = vmatprep.subr.bf16.mxu1 %v7850_v38 }
0x3c14   :  { %7251 = vmatpush3.bf16.msra.mxu1 %v7851_v10 }
0x3c15   :  { %7252 = vmatprep.subr.bf16.mxu1 %v7852_v40 }
0x3c18   :  { %7253 = vmatpush3.bf16.msra.mxu1 %v7853_v14 }
0x3c19   :  { %7254 = vmatprep.subr.bf16.mxu1 %v7854_v34 }
0x3c1c   :  { %7255 = vmatpush3.bf16.msra.mxu1 %v7855_v42 }
0x3c1d   :  { %7256 = vmatprep.subr.bf16.mxu1 %v7856_v44 }
0x3c20   :  { %7257 = vmatpush3.bf16.msra.mxu1 %v7857_v16 }
0x3c21   :  { %7258 = vmatprep.subr.bf16.mxu1 %v7858_v3 }
0x3c24   :  { %7259 = vmatpush3.bf16.msra.mxu1 %v7859_v8 }
0x3c25   :  { %7260 = vmatprep.subr.bf16.mxu1 %v7860_v9  ;;  %v6903_v9 = vld [vmem:[%s9652_s19 + $0xe] ss:$0 sm:$0xff] }
0x3cde   :  { %v4900_v12 = vpop.f32.mrb[100].mxu1 }
0x3cdf   :  { %v4901_v53 = vadd.f32 %v6832_v35, %v4900_v12  ;;  %v7622_v19 = vpop.f32.mrb[101].mxu1  ;;  %v6844_v12 = vld [vmem:[%s9658_s15 + $0x8] sm:$0x3] }
0x3ce0   :  { %v4903_v49 = vpop.f32.mrb[102].mxu1  ;;  %v4971_v19 = vrot.slane %v6844_v12, %v8323_v31 }
0x3ce1   :  { %v4904_v50 = vadd.f32 %v6832_v35, %v4903_v49  ;;  %v7623_v54 = vpop.f32.mrb[103].mxu1  ;;  %v4907_v20 = vadd.f32 %v4901_v53, %v9264_v5  ;;  %v7861_v35 = vld [vmem:[%s9657_s16 + $0x238] sm:$0xff]   ;;  %v4967_v53 = vrot.slane %v6844_v12, %v8325_v32 }
0x3ce2   :  { %7261 = vmatpush3.bf16.msra.mxu1 %v7861_v35 }
0x3ce3   :  { %v4913_v21 = vsel %vm141_vm1, %v4907_v20, 0.0  ;;  %v4908_v63 = vadd.f32 %v4904_v50, %v9266_v6  ;;  %v7842_v6 = vld [vmem:[%s9656_s14 + $0x84] ss:$8 sps:$4 sm:$0xff]   ;;  %7654 = vmatprep.subr.bf16.mxu1 %v8123_v0 }
0x3ce4   :  { %4914 = vadd.xlane.f32.xlu1 %v4913_v21  ;;  %4997 = vmatprep.subr.bf16.mxu0 %v7842_v6 }
0x3ce5   :  { %v4916_v24 = vsel %vm141_vm1, %v4908_v63, 0.0  ;;  %4998 = vmatpush1.bf16.msra.mxu0 %v7840_v33 }
0x3ce6   :  { %4917 = vadd.xlane.f32.xlu0 %v4916_v24  ;;  %4999 = vmatprep.subr.bf16.mxu0 %v7845_v7 }
0x3ce9   :  { %5000 = vmatpush1.bf16.msra.mxu0 %v7843_v4 }
0x3cea   :  { %7624 = vmatprep.subr.bf16.mxu0 %v8123_v0 }
0x3d71   :  { %v4915_v28 = vpop.xlane.xlu1 %4914 }
0x3d72   :  { %v4919_v2 = vmul.f32 0.03125, %v4915_v28 }
0x3d73   :  { %v4918_v29 = vpop.xlane.xlu0 %4917 }
0x3d74   :  { %v4921_v25 = vsub.f32 %v4907_v20, %v4919_v2  ;;  %v4920_v58 = vmul.f32 0.03125, %v4918_v29 }
0x3d76   :  { %v4922_v56 = vsub.f32 %v4908_v63, %v4920_v58  ;;  %v4923_v26 = vmul.f32 %v4921_v25, %v4921_v25 }
0x3d78   :  { %v4925_v30 = vsel %vm141_vm1, %v4923_v26, 0.0  ;;  %v4924_v39 = vmul.f32 %v4922_v56, %v4922_v56 }
0x3d79   :  { %4926 = vadd.xlane.f32.xlu1 %v4925_v30 }
0x3d7a   :  { %v4928_v5 = vsel %vm141_vm1, %v4924_v39, 0.0  ;;  %v6883_v39 = vld [vmem:[%s9659_s17 + $0x4] ss:$0 sm:$0xff] }
0x3d7b   :  { %4929 = vadd.xlane.f32.xlu0 %v4928_v5 }
0x3e06   :  { %v4927_v22 = vpop.xlane.xlu1 %4926 }
0x3e07   :  { %v4931_v37 = vmul.f32 0.03125, %v4927_v22 }
0x3e08   :  { %v4930_v23 = vpop.xlane.xlu0 %4929 }
0x3e09   :  { %v4933_v45 = vadd.f32 1e-05, %v4931_v37  ;;  %v4932_v47 = vmul.f32 0.03125, %v4930_v23 }
0x3e0b   :  { %8070 = vrsqrt.f32 %v4933_v45  ;;  %v4934_v48 = vadd.f32 1e-05, %v4932_v47 }
0x3e0d   :  { %8072 = vrsqrt.f32 %v4934_v48  ;;  %v7862_v48 = vld [vmem:[%s9682_s29 + $0x50] sm:$0xff]  }
0x3e15   :  { %v8071_v51 = vpop.eup %8070 }
0x3e16   :  { %v4937_v41 = vmul.f32 %v8071_v51, %v4921_v25  ;;  %v7863_v51 = vld [vmem:[%s9682_s29 + $0x58] sm:$0xff]  }
0x3e17   :  { %v8073_v55 = vpop.eup %8072 }
0x3e18   :  { %v4945_v60 = vmul.f32 %v6838_v52, %v4937_v41  ;;  %v4938_v61 = vmul.f32 %v8073_v55, %v4922_v56 }
0x3e1a   :  { %v4946_v18 = vmul.f32 %v6838_v52, %v4938_v61  ;;  %v4953_v1 = vadd.f32 %v6839_v62, %v4945_v60  ;;  %v9398_v52 = vld [vmem:[%s9686_s28] sm:$0xff]  }
0x3e1c   :  { %v4954_v59 = vadd.f32 %v6839_v62, %v4946_v18 }
0x3e1e   :  { %v4960_v27 = vpack.c.bf16 %v4954_v59, %v4953_v1 }
0x3e20   :  { %6849 = vmatmul.mubr.msk.bf16.vlgmr.msra.gmra.mrb[96].mxu0 %vm141_vm1, %v4960_v27 }
0x3e21   :  { %7628 = vmatprep.mubr.msk.bf16.mxu0 %vm8124_vm0, %v8123_v0  ;;  %7625 = vmatpush3.bf16.msra.mxu0 %v7862_v48 }
0x3e22   :  { %7626 = vmatprep.subr.bf16.mxu0 %v8123_v0 }
0x3e25   :  { %7627 = vmatpush3.bf16.msra.mxu0 %v7863_v51 }
0x3e26   :  { %7632 = vmatprep.subr.bf16.mxu0 %v9398_v52 }
0x3ef3   :  { %v5031_v49 = vpop.f32.mrb[96].mxu0 }
0x3ef4   :  { %v5032_v50 = vadd.f32 %v5031_v49, %v4967_v53  ;;  %v5033_v54 = vpop.f32.mrb[97].mxu0  ;;  %v9418_v49 = vld [vmem:[%s9686_s28 + $0x8] sm:$0xff]   ;;  %s9691_s28 = smov 96  }
0x3ef5   :  { %v5034_v20 = vadd.f32 %v5033_v54, %v4971_v19  ;;  %v5035_v21 = vpop.f32.mrb[98].mxu0  ;;  %v6909_v54 = vld [vmem:[%s9687_s0 + $0x5] ss:$0 sm:$0xff] }
0x3ef6   :  { %v5036_v63 = vadd.f32 %v5035_v21, %v4967_v53  ;;  %v5037_v24 = vpop.f32.mrb[99].mxu0  ;;  %v5040_v2 = vmax.f32 %v5032_v50, 0.0  ;;  %v9425_v50 = vld [vmem:[%s9647_s3] sm:$0xf] }
0x3ef7   :  { %v5038_v28 = vadd.f32 %v5037_v24, %v4971_v19  ;;  %v5041_v25 = vmax.f32 %v5034_v20, 0.0 }
0x3ef8   :  { %v5042_v29 = vmax.f32 %v5036_v63, 0.0 }
0x3ef9   :  { %v5043_v58 = vmax.f32 %v5038_v28, 0.0 }
0x3efa   :  { %v5077_v56 = vpack.c.bf16 %v5042_v29, %v5040_v2 }
0x3efb   :  { %v5078_v26 = vpack.c.bf16 %v5043_v58, %v5041_v25 }
0x3efd   :  { %5215 = vmatprep.mubr.bf16.mxu1 %v5078_v26 }
0x3efe   :  { %5216 = vmatmul.mubr.bf16.vlgmr.msra.gmra.mrb[104].mxu1 %v5077_v56 }
0x3eff   :  { %7658 = vmatprep.mubr.msk.bf16.mxu1 %vm8124_vm0, %v8123_v0 }
0x3fd1   :  { %v7262_v30 = vpop.f32.mrb[104].mxu1 }
0x3fd2   :  { %v7263_v5 = vpop.f32.mrb[105].mxu1 }
0x3fd3   :  { %v7264_v6 = vadd.f32 %v7263_v5, %v7262_v30  ;;  %v7265_v33 = vpop.f32.mrb[106].mxu1 }
0x3fd4   :  { %v7266_v4 = vpop.f32.mrb[107].mxu1 }
0x3fd5   :  { %v5218_v7 = vadd.f32 %v7264_v6, %v6883_v39  ;;  %v7267_v36 = vadd.f32 %v7266_v4, %v7265_v33 }
0x3fd7   :  { %v5221_v17 = vadd.f32 %v7267_v36, %v6883_v39  ;;  %v5224_v13 = vadd.f32 %v5218_v7, %v4953_v1 }
0x3fd9   :  { %v5230_v15 = vsel %vm141_vm1, %v5224_v13, 0.0  ;;  %v5225_v38 = vadd.f32 %v5221_v17, %v4954_v59  ;;  %v6902_v59 = vld [vmem:[%s9651_s18 + $0xe] ss:$0 sm:$0xff] }
0x3fda   :  { %5231 = vadd.xlane.f32.xlu1 %v5230_v15 }
0x3fdb   :  { %v5233_v10 = vsel %vm141_vm1, %v5225_v38, 0.0 }
0x3fdc   :  { %5234 = vadd.xlane.f32.xlu0 %v5233_v10 }
0x4067   :  { %v5232_v40 = vpop.xlane.xlu1 %5231 }
0x4068   :  { %v5236_v14 = vmul.f32 0.03125, %v5232_v40 }
0x4069   :  { %v5235_v34 = vpop.xlane.xlu0 %5234 }
0x406a   :  { %v5238_v42 = vsub.f32 %v5224_v13, %v5236_v14  ;;  %v5237_v44 = vmul.f32 0.03125, %v5235_v34 }
0x406c   :  { %v5239_v22 = vsub.f32 %v5225_v38, %v5237_v44  ;;  %v5240_v37 = vmul.f32 %v5238_v42, %v5238_v42 }
0x406e   :  { %v5242_v23 = vsel %vm141_vm1, %v5240_v37, 0.0  ;;  %v5241_v45 = vmul.f32 %v5239_v22, %v5239_v22 }
0x406f   :  { %5243 = vadd.xlane.f32.xlu1 %v5242_v23 }
0x4070   :  { %v5245_v47 = vsel %vm141_vm1, %v5241_v45, 0.0 }
0x4071   :  { %5246 = vadd.xlane.f32.xlu0 %v5245_v47 }
0x40fc   :  { %v5244_v41 = vpop.xlane.xlu1 %5243 }
0x40fd   :  { %v5248_v55 = vmul.f32 0.03125, %v5244_v41 }
0x40fe   :  { %v5247_v60 = vpop.xlane.xlu0 %5246 }
0x40ff   :  { %v5250_v61 = vadd.f32 1e-05, %v5248_v55  ;;  %v5249_v62 = vmul.f32 0.03125, %v5247_v60 }
0x4101   :  { %8074 = vrsqrt.f32 %v5250_v61  ;;  %v5251_v18 = vadd.f32 1e-05, %v5249_v62 }
0x4103   :  { %8076 = vrsqrt.f32 %v5251_v18 }
0x410b   :  { %v8075_v1 = vpop.eup %8074 }
0x410c   :  { %v5254_v27 = vmul.f32 %v8075_v1, %v5238_v42  ;;  %v7864_v1 = vld [vmem:[%s9648_s6 + $0x50] sm:$0xff]  }
0x410d   :  { %v8077_v16 = vpop.eup %8076 }
0x410e   :  { %v5262_v3 = vmul.f32 %v6902_v59, %v5254_v27  ;;  %v5255_v8 = vmul.f32 %v8077_v16, %v5239_v22 }
0x4110   :  { %v5263_v35 = vmul.f32 %v6902_v59, %v5255_v8  ;;  %v9407_v12 = vadd.f32 %v6903_v9, %v5262_v3  ;;  %v7865_v59 = vld [vmem:[%s9648_s6 + $0x58] sm:$0xff]  }
0x4112   :  { %v9409_v53 = vadd.f32 %v6903_v9, %v5263_v35 }
0x4114   :  { %v5277_v19 = vpack.c.bf16 %v9409_v53, %v9407_v12 }
0x4116   :  { %7629 = vmatmul.mubr.msk.bf16.vlgmr.msra.gmra.mrb[100].mxu0 %vm141_vm1, %v5277_v19 }
0x4117   :  { %7633 = vmatpush3.bf16.msra.mxu0 %v9398_v52 }
0x4118   :  { %7634 = vmatprep.subr.bf16.mxu0 %v9418_v49 }
0x411b   :  { %7635 = vmatpush3.bf16.msra.mxu0 %v9418_v49 }
0x411c   :  { %7694 = vmatprep.subr.msk.bf16.mxu0 %vm405_vm2, %v9425_v50 }
0x41e9   :  { %v5335_v20 = vpop.f32.mrb[100].mxu0 }
0x41ea   :  { %v5336_v21 = vadd.f32 %v6909_v54, %v5335_v20  ;;  %v7630_v63 = vpop.f32.mrb[101].mxu0 }
0x41eb   :  { %v5338_v24 = vpop.f32.mrb[102].mxu0 }
0x41ec   :  { %v5339_v28 = vadd.f32 %v6909_v54, %v5338_v24  ;;  %5344 = vrot.lane.b32.xlu1 %v5336_v21, %s9691_s28  ;;  %v7631_v2 = vpop.f32.mrb[103].mxu0 }
0x41ed   :  { %v6922_v2 = vld [vmem:[%s9649_s7 + $0x5] ss:$0 sm:$0xff] }
0x41ee   :  { %5346 = vrot.lane.b32.xlu0 %v5339_v28, %s9691_s28 }
0x41f0   :  { %5490 = vrot.lane.b32.xlu1 %v5336_v21, %s9690_s1 }
0x41f4   :  { %5495 = vrot.lane.b32.xlu1 %v5339_v28, %s9690_s1 }
0x425e   :  { %v5345_v29 = vpop.permute.xlu1 %5344 }
0x425f   :  { %v5350_v58 = vmul.f32 %v5345_v29, %v5336_v21  ;;  %v5352_v56 = vmul.f32 %v5345_v29, %v5339_v28 }
0x4260   :  { %v5347_v25 = vpop.permute.xlu0 %5346 }
0x4261   :  { %v5351_v26 = vmul.f32 %v5347_v25, %v5336_v21  ;;  %v5353_v30 = vmul.f32 %v5347_v25, %v5339_v28 }
0x4262   :  { %v5491_v27 = vpop.permute.xlu1 %5490 }
0x4263   :  { %v5354_v39 = vpack.c.bf16 %v5351_v26, %v5350_v58  ;;  %v5355_v5 = vpack.c.bf16 %v5353_v30, %v5352_v56 }
0x4265   :  { %7636 = vmatprep.mubr.msk.bf16.mxu0 %vm141_vm1, %v5354_v39 }
0x4266   :  { %7637 = vmatmul.mubr.msk.bf16.vlgmr.msra.gmra.mrb[104].mxu0 %vm141_vm1, %v5355_v5  ;;  %v5496_v8 = vpop.permute.xlu1 %5495 }
0x4267   :  { %7641 = vmatpush3.bf16.msra.mxu0 %v8357_v57 }
0x4268   :  { %7646 = vmatprep.subr.bf16.mxu0 %v8123_v0 }
0x4339   :  { %v7638_v6 = vpop.f32.mrb[104].mxu0 }
0x433a   :  { %v5396_v33 = vpop.f32.mrb[105].mxu0 }
0x433b   :  { %v7639_v4 = vpop.f32.mrb[106].mxu0 }
0x433c   :  { %v5412_v7 = vmax.f32 %v7638_v6, %v7639_v4  ;;  %v5399_v36 = vpop.f32.mrb[107].mxu0 }
0x433d   :  { %v5411_v17 = vmax.f32 %v5396_v33, %v5399_v36 }
0x433e   :  { %v5415_v13 = vsub.f32 %v7638_v6, %v5412_v7  ;;  %v5416_v15 = vsub.f32 %v7639_v4, %v5412_v7 }
0x433f   :  { %v5413_v38 = vsub.f32 %v5396_v33, %v5411_v17  ;;  %v5414_v10 = vsub.f32 %v5399_v36, %v5411_v17 }
0x4340   :  { %v5421_v40 = vmul.f32 1.442695, %v5415_v13  ;;  %v5423_v14 = vmul.f32 1.442695, %v5416_v15 }
0x4341   :  { %v5417_v34 = vmul.f32 1.442695, %v5413_v38  ;;  %v5419_v42 = vmul.f32 1.442695, %v5414_v10  ;;  %v7867_v38 = vld [vmem:[%s9650_s8 + $0x58] sm:$0xff]  }
0x4342   :  { %8078 = vpow2.f32 %v5421_v40 }
0x4343   :  { %8080 = vpow2.f32 %v5423_v14 }
0x4344   :  { %8082 = vpow2.f32 %v5417_v34 }
0x4345   :  { %8084 = vpow2.f32 %v5419_v42 }
0x434c   :  { %v8079_v44 = vpop.eup %8078 }
0x434d   :  { %v8081_v22 = vpop.eup %8080 }
0x434e   :  { %v8083_v37 = vpop.eup %8082  ;;  %v5426_v23 = vadd.f32 %v8081_v22, %v8079_v44 }
0x434f   :  { %v8085_v45 = vpop.eup %8084 }
0x4350   :  { %8086 = vrcp.f32 %v5426_v23  ;;  %v5425_v47 = vadd.f32 %v8085_v45, %v8083_v37 }
0x4352   :  { %8088 = vrcp.f32 %v5425_v47 }
0x435a   :  { %v8087_v48 = vpop.eup %8086 }
0x435b   :  { %v5432_v51 = vmul.f32 %v8087_v48, %v8081_v22  ;;  %v5431_v41 = vmul.f32 %v8087_v48, %v8079_v44 }
0x435c   :  { %v8089_v55 = vpop.eup %8088 }
0x435d   :  { %v5429_v60 = vmul.f32 %v8089_v55, %v8083_v37  ;;  %v5430_v61 = vmul.f32 %v8089_v55, %v8085_v45  ;;  %v5434_v62 = vpack.c.bf16 %v5432_v51, %v5431_v41  ;;  %v6928_v37 = vld [vmem:[%s9651_s18 + $0xf] ss:$0 sm:$0xff] }
0x435f   :  { %v5433_v18 = vpack.c.bf16 %v5430_v61, %v5429_v60  ;;  %v6935_v60 = vld [vmem:[%s9653_s9 + $0x5] ss:$0 sm:$0xff] }
0x4361   :  { %7642 = vmatprep.mubr.msk.bf16.mxu0 %vm398_vm3, %v5433_v18 }
0x4362   :  { %7643 = vmatmul.mubr.msk.bf16.vlgmr.msra.gmra.mrb[108].mxu0 %vm398_vm3, %v5434_v62 }
0x4363   :  { %7650 = vmatprep.mubr.msk.bf16.mxu0 %vm8124_vm0, %v8123_v0  ;;  %7647 = vmatpush3.bf16.msra.mxu0 %v7864_v1 }
0x4364   :  { %7648 = vmatprep.subr.bf16.mxu0 %v8123_v0 }
0x4367   :  { %7649 = vmatpush3.bf16.msra.mxu0 %v7865_v59 }
0x4368   :  { %7662 = vmatprep.subr.bf16.mxu0 %v9398_v52 }
0x4435   :  { %v7644_v16 = vpop.f32.mrb[108].mxu0 }
0x4436   :  { %v5475_v3 = vpop.f32.mrb[109].mxu0  ;;  %v5494_v35 = vmul.f32 %v7644_v16, %v5491_v27 }
0x4437   :  { %v7645_v9 = vpop.f32.mrb[110].mxu0  ;;  %v5493_v20 = vmul.f32 %v5491_v27, %v5475_v3 }
0x4438   :  { %v5499_v19 = vmul.f32 %v7645_v9, %v5496_v8  ;;  %v5478_v54 = vpop.f32.mrb[111].mxu0 }
0x4439   :  { %v5498_v21 = vmul.f32 %v5496_v8, %v5478_v54 }
0x443a   :  { %v5501_v63 = vadd.f32 %v5499_v19, %v5494_v35 }
0x443b   :  { %v5500_v24 = vadd.f32 %v5498_v21, %v5493_v20 }
0x443d   :  { %v5507_v28 = vpack.c.bf16 %v5501_v63, %v5500_v24 }
0x443f   :  { %7651 = vmatmul.mubr.msk.bf16.vlgmr.msra.gmra.mrb[112].mxu0 %vm141_vm1, %v5507_v28 }
0x4440   :  { %7663 = vmatpush3.bf16.msra.mxu0 %v9398_v52 }
0x4441   :  { %7664 = vmatprep.subr.bf16.mxu0 %v9418_v49 }
0x4444   :  { %7665 = vmatpush3.bf16.msra.mxu0 %v9418_v49 }
0x4445   :  { %7676 = vmatprep.subr.bf16.mxu0 %v8123_v0 }
0x4512   :  { %v5565_v29 = vpop.f32.mrb[112].mxu0 }
0x4513   :  { %v5566_v25 = vadd.f32 %v6922_v2, %v5565_v29  ;;  %v7652_v58 = vpop.f32.mrb[113].mxu0 }
0x4514   :  { %v5568_v56 = vpop.f32.mrb[114].mxu0 }
0x4515   :  { %v5572_v26 = vadd.f32 %v5566_v25, %v9407_v12  ;;  %v5569_v30 = vadd.f32 %v6922_v2, %v5568_v56  ;;  %v7653_v39 = vpop.f32.mrb[115].mxu0 }
0x4517   :  { %v5573_v52 = vadd.f32 %v5569_v30, %v9409_v53  ;;  %v5578_v5 = vsel %vm141_vm1, %v5572_v26, 0.0 }
0x4518   :  { %5579 = vadd.xlane.f32.xlu0 %v5578_v5 }
0x4519   :  { %v5581_v49 = vsel %vm141_vm1, %v5573_v52, 0.0 }
0x451a   :  { %5582 = vadd.xlane.f32.xlu1 %v5581_v49 }
0x452b   :  { %5690 = vrot.lane.b32.xlu1 %v8340_v43, %s9690_s1 }
0x452f   :  { %5836 = vrot.lane.b32.xlu1 %v8340_v43, %s9689_s2  ;;  %v7866_v43 = vld [vmem:[%s9650_s8 + $0x50] sm:$0xff]  }
0x4530   :  { %7655 = vmatpush3.bf16.msra.mxu1 %v7866_v43 }
0x4531   :  { %7656 = vmatprep.subr.bf16.mxu1 %v8123_v0 }
0x4533   :  { %5841 = vrot.lane.b32.xlu1 %v8342_v46, %s9689_s2 }
0x4534   :  { %7657 = vmatpush3.bf16.msra.mxu1 %v7867_v38 }
0x4535   :  { %7695 = vmatprep.subr.msk.bf16.mxu1 %vm405_vm2, %v9425_v50  ;;  %v6929_v50 = vld [vmem:[%s9652_s19 + $0xf] ss:$0 sm:$0xff] }
0x45a5   :  { %v5580_v12 = vpop.xlane.xlu0 %5579 }
0x45a6   :  { %v5584_v6 = vmul.f32 0.03125, %v5580_v12 }
0x45a7   :  { %v5583_v33 = vpop.xlane.xlu1 %5582 }
0x45a8   :  { %v5586_v4 = vsub.f32 %v5572_v26, %v5584_v6  ;;  %v5585_v53 = vmul.f32 0.03125, %v5583_v33 }
0x45aa   :  { %v5587_v7 = vsub.f32 %v5573_v52, %v5585_v53  ;;  %v5588_v36 = vmul.f32 %v5586_v4, %v5586_v4 }
0x45ab   :  { %v5691_v62 = vpop.permute.xlu1 %5690 }
0x45ac   :  { %v5590_v17 = vsel %vm141_vm1, %v5588_v36, 0.0  ;;  %v5589_v13 = vmul.f32 %v5587_v7, %v5587_v7 }
0x45ad   :  { %5591 = vadd.xlane.f32.xlu0 %v5590_v17 }
0x45ae   :  { %v5593_v15 = vsel %vm141_vm1, %v5589_v13, 0.0 }
0x45b1   :  { %5594 = vadd.xlane.f32.xlu0 %v5593_v15 }
0x45c7   :  { %5692 = vrot.lane.b32.xlu0 %v8342_v46, %s9690_s1 }
0x463a   :  { %v5592_v10 = vpop.xlane.xlu0 %5591 }
0x463b   :  { %v5596_v40 = vmul.f32 0.03125, %v5592_v10  ;;  %v7868_v10 = vld [vmem:[%s9654_s12 + $0x50] sm:$0xff]  }
0x463d   :  { %v5598_v14 = vadd.f32 1e-05, %v5596_v40  ;;  %v7869_v40 = vld [vmem:[%s9654_s12 + $0x58] sm:$0xff]  }
0x463e   :  { %v5595_v34 = vpop.xlane.xlu0 %5594 }
0x463f   :  { %8090 = vrsqrt.f32 %v5598_v14  ;;  %v5597_v46 = vmul.f32 0.03125, %v5595_v34  ;;  %v5837_v14 = vpop.permute.xlu1 %5836 }
0x4641   :  { %v5599_v42 = vadd.f32 1e-05, %v5597_v46 }
0x4642   :  { %v5693_v59 = vpop.permute.xlu0 %5692 }
0x4643   :  { %8092 = vrsqrt.f32 %v5599_v42  ;;  %v5842_v42 = vpop.permute.xlu1 %5841 }
0x4649   :  { %v8091_v44 = vpop.eup %8090 }
0x464a   :  { %v5602_v22 = vmul.f32 %v8091_v44, %v5586_v4 }
0x464c   :  { %v5610_v45 = vmul.f32 %v6928_v37, %v5602_v22 }
0x464d   :  { %v8093_v23 = vpop.eup %8092 }
0x464e   :  { %v5603_v47 = vmul.f32 %v8093_v23, %v5587_v7  ;;  %v9489_v51 = vadd.f32 %v6929_v50, %v5610_v45 }
0x4650   :  { %v5611_v48 = vmul.f32 %v6928_v37, %v5603_v47 }
0x4652   :  { %v9491_v41 = vadd.f32 %v6929_v50, %v5611_v48 }
0x4654   :  { %v5625_v55 = vpack.c.bf16 %v9491_v41, %v9489_v51 }
0x4656   :  { %7659 = vmatmul.mubr.msk.bf16.vlgmr.msra.gmra.mrb[108].mxu1 %vm141_vm1, %v5625_v55 }
0x4657   :  { %7671 = vmatpush3.bf16.msra.mxu1 %v8357_v57 }
0x4729   :  { %v5683_v61 = vpop.f32.mrb[108].mxu1 }
0x472a   :  { %v5684_v18 = vadd.f32 %v6935_v60, %v5683_v61  ;;  %v7660_v1 = vpop.f32.mrb[109].mxu1 }
0x472b   :  { %v5686_v27 = vpop.f32.mrb[110].mxu1 }
0x472c   :  { %v5696_v16 = vmul.f32 %v5691_v62, %v5684_v18  ;;  %v5697_v3 = vmul.f32 %v5693_v59, %v5684_v18  ;;  %v5687_v8 = vadd.f32 %v6935_v60, %v5686_v27  ;;  %v7661_v9 = vpop.f32.mrb[111].mxu1 }
0x472e   :  { %v5700_v35 = vpack.c.bf16 %v5697_v3, %v5696_v16  ;;  %v5698_v19 = vmul.f32 %v5691_v62, %v5687_v8  ;;  %v5699_v54 = vmul.f32 %v5693_v59, %v5687_v8 }
0x4730   :  { %v5701_v20 = vpack.c.bf16 %v5699_v54, %v5698_v19  ;;  %7666 = vmatprep.mubr.msk.bf16.mxu0 %vm141_vm1, %v5700_v35 }
0x4732   :  { %7667 = vmatmul.mubr.msk.bf16.vlgmr.msra.gmra.mrb[116].mxu0 %vm141_vm1, %v5701_v20 }
0x4733   :  { %7680 = vmatprep.mubr.msk.bf16.mxu0 %vm8124_vm0, %v8123_v0  ;;  %7677 = vmatpush3.bf16.msra.mxu0 %v7868_v10 }
0x4734   :  { %7678 = vmatprep.subr.bf16.mxu0 %v8123_v0  ;;  %v6948_v0 = vld [vmem:[%s9655_s13 + $0x5] ss:$0 sm:$0xff] }
0x4737   :  { %7679 = vmatpush3.bf16.msra.mxu0 %v7869_v40 }
0x4805   :  { %v7668_v57 = vpop.f32.mrb[116].mxu0 }
0x4806   :  { %v5742_v21 = vpop.f32.mrb[117].mxu0 }
0x4807   :  { %v7669_v63 = vpop.f32.mrb[118].mxu0 }
0x4808   :  { %v5758_v24 = vmax.f32 %v7668_v57, %v7669_v63  ;;  %v5745_v28 = vpop.f32.mrb[119].mxu0 }
0x4809   :  { %v5757_v2 = vmax.f32 %v5742_v21, %v5745_v28 }
0x480a   :  { %v5761_v29 = vsub.f32 %v7668_v57, %v5758_v24  ;;  %v5762_v25 = vsub.f32 %v7669_v63, %v5758_v24 }
0x480b   :  { %v5759_v58 = vsub.f32 %v5742_v21, %v5757_v2  ;;  %v5760_v56 = vsub.f32 %v5745_v28, %v5757_v2  ;;  %v7870_v28 = vld [vmem:[%s9656_s14 + $0xa0] ss:$8 sps:$4 sm:$0xff]   ;;  %v7873_v2 = vld [vmem:[%s9656_s14 + $0xb0] ss:$8 sps:$4 sm:$0xff]  }
0x480c   :  { %v5767_v26 = vmul.f32 1.442695, %v5761_v29  ;;  %v5769_v30 = vmul.f32 1.442695, %v5762_v25  ;;  %v7875_v29 = vld [vmem:[%s9656_s14 + $0xb4] ss:$8 sps:$4 sm:$0xff]  }
0x480d   :  { %v5763_v39 = vmul.f32 1.442695, %v5759_v58  ;;  %v5765_v52 = vmul.f32 1.442695, %v5760_v56  ;;  %v7876_v25 = vld [vmem:[%s9657_s16 + $0x2c0] sm:$0xff]   ;;  %v7878_v56 = vld [vmem:[%s9657_s16 + $0x2c8] sm:$0xff]  }
0x480e   :  { %8094 = vpow2.f32 %v5767_v26  ;;  %v7877_v58 = vld [vmem:[%s9657_s16 + $0x280] sm:$0xff]   ;;  %7294 = vmatprep.subr.bf16.mxu0 %v7876_v25  ;;  %v7879_v26 = vld [vmem:[%s9657_s16 + $0x288] sm:$0xff]  }
0x480f   :  { %8096 = vpow2.f32 %v5769_v30  ;;  %v7880_v30 = vld [vmem:[%s9657_s16 + $0x2d0] sm:$0xff]  }
0x4810   :  { %8098 = vpow2.f32 %v5763_v39  ;;  %v7881_v39 = vld [vmem:[%s9657_s16 + $0x290] sm:$0xff]  }
0x4811   :  { %8100 = vpow2.f32 %v5765_v52  ;;  %v7882_v52 = vld [vmem:[%s9657_s16 + $0x2d8] sm:$0xff]  }
0x4818   :  { %v8095_v5 = vpop.eup %8094 }
0x4819   :  { %v8097_v49 = vpop.eup %8096 }
0x481a   :  { %v8099_v12 = vpop.eup %8098  ;;  %v5772_v6 = vadd.f32 %v8097_v49, %v8095_v5 }
0x481b   :  { %v8101_v33 = vpop.eup %8100 }
0x481c   :  { %8102 = vrcp.f32 %v5772_v6  ;;  %v5771_v4 = vadd.f32 %v8101_v33, %v8099_v12  ;;  %v7886_v6 = vld [vmem:[%s9657_s16 + $0x2e8] sm:$0xff]  }
0x481e   :  { %8104 = vrcp.f32 %v5771_v4 }
0x4826   :  { %v8103_v53 = vpop.eup %8102 }
0x4827   :  { %v5778_v7 = vmul.f32 %v8103_v53, %v8097_v49  ;;  %v5777_v36 = vmul.f32 %v8103_v53, %v8095_v5  ;;  %v7883_v5 = vld [vmem:[%s9657_s16 + $0x298] sm:$0xff]   ;;  %v7884_v49 = vld [vmem:[%s9657_s16 + $0x2e0] sm:$0xff]  }
0x4828   :  { %v8105_v17 = vpop.eup %8104 }
0x4829   :  { %v5775_v13 = vmul.f32 %v8105_v17, %v8099_v12  ;;  %v5776_v15 = vmul.f32 %v8105_v17, %v8101_v33  ;;  %v5780_v43 = vpack.c.bf16 %v5778_v7, %v5777_v36  ;;  %v7885_v12 = vld [vmem:[%s9657_s16 + $0x2a0] sm:$0xff]  }
0x482b   :  { %v5779_v38 = vpack.c.bf16 %v5776_v15, %v5775_v13 }
0x482d   :  { %7672 = vmatprep.mubr.msk.bf16.mxu1 %vm398_vm3, %v5779_v38 }
0x482e   :  { %7673 = vmatmul.mubr.msk.bf16.vlgmr.msra.gmra.mrb[112].mxu1 %vm398_vm3, %v5780_v43  ;;  %v6954_v43 = vld [vmem:[%s9651_s18 + $0x10] ss:$0 sm:$0xff] }
0x482f   :  { %6040 = vmatprep.mubr.bf16.mxu1 %v8125_v11 }
0x4901   :  { %v7674_v34 = vpop.f32.mrb[112].mxu1 }
0x4902   :  { %v5821_v46 = vpop.f32.mrb[113].mxu1  ;;  %v5840_v22 = vmul.f32 %v7674_v34, %v5837_v14 }
0x4903   :  { %v7675_v44 = vpop.f32.mrb[114].mxu1  ;;  %v5839_v45 = vmul.f32 %v5837_v14, %v5821_v46  ;;  %v6955_v14 = vld [vmem:[%s9652_s19 + $0x10] ss:$0 sm:$0xff] }
0x4904   :  { %v5845_v37 = vmul.f32 %v7675_v44, %v5842_v42  ;;  %v5824_v23 = vpop.f32.mrb[115].mxu1 }
0x4905   :  { %v5844_v47 = vmul.f32 %v5842_v42, %v5824_v23  ;;  %v7889_v23 = vld [vmem:[%s9657_s16 + $0x2b0] sm:$0xff]  }
0x4906   :  { %v5847_v50 = vadd.f32 %v5845_v37, %v5840_v22  ;;  %v7887_v22 = vld [vmem:[%s9657_s16 + $0x2a8] sm:$0xff]   ;;  %v7888_v37 = vld [vmem:[%s9657_s16 + $0x2f0] sm:$0xff]  }
0x4907   :  { %v5846_v48 = vadd.f32 %v5844_v47, %v5839_v45  ;;  %v7890_v45 = vld [vmem:[%s9657_s16 + $0x2f8] sm:$0xff]   ;;  %v6960_v47 = vld [vmem:[%s9658_s15 + $0xa] sm:$0x3] }
0x4909   :  { %v5853_v55 = vpack.c.bf16 %v5847_v50, %v5846_v48  ;;  %v5978_v50 = vrot.slane %v6960_v47, %v8325_v32  ;;  %v5982_v48 = vrot.slane %v6960_v47, %v8323_v31 }
0x490b   :  { %7681 = vmatmul.mubr.msk.bf16.vlgmr.msra.gmra.mrb[120].mxu0 %vm141_vm1, %v5853_v55 }
0x490c   :  { %7295 = vmatpush3.bf16.msra.mxu0 %v7877_v58 }
0x490d   :  { %7296 = vmatprep.subr.bf16.mxu0 %v7878_v56 }
0x4910   :  { %7297 = vmatpush3.bf16.msra.mxu0 %v7879_v26 }
0x4911   :  { %7298 = vmatprep.subr.bf16.mxu0 %v7880_v30 }
0x4914   :  { %7299 = vmatpush3.bf16.msra.mxu0 %v7881_v39 }
0x4915   :  { %7300 = vmatprep.subr.bf16.mxu0 %v7882_v52 }
0x4918   :  { %7301 = vmatpush3.bf16.msra.mxu0 %v7883_v5 }
0x4919   :  { %7302 = vmatprep.subr.bf16.mxu0 %v7884_v49 }
0x491c   :  { %7303 = vmatpush3.bf16.msra.mxu0 %v7885_v12 }
0x491d   :  { %7304 = vmatprep.subr.bf16.mxu0 %v7886_v6 }
0x4920   :  { %7305 = vmatpush3.bf16.msra.mxu0 %v7887_v22 }
0x4921   :  { %7306 = vmatprep.subr.bf16.mxu0 %v7888_v37 }
0x4924   :  { %7307 = vmatpush3.bf16.msra.mxu0 %v7889_v23 }
0x4925   :  { %7308 = vmatprep.subr.bf16.mxu0 %v7890_v45 }
0x49de   :  { %v5911_v60 = vpop.f32.mrb[120].mxu0 }
0x49df   :  { %v5912_v61 = vadd.f32 %v6948_v0, %v5911_v60  ;;  %v7682_v62 = vpop.f32.mrb[121].mxu0 }
0x49e0   :  { %v5914_v18 = vpop.f32.mrb[122].mxu0 }
0x49e1   :  { %v5918_v1 = vadd.f32 %v5912_v61, %v9489_v51  ;;  %v5915_v59 = vadd.f32 %v6948_v0, %v5914_v18  ;;  %v7683_v27 = vpop.f32.mrb[123].mxu0 }
0x49e3   :  { %v5919_v16 = vadd.f32 %v5915_v59, %v9491_v41  ;;  %v5924_v3 = vsel %vm141_vm1, %v5918_v1, 0.0  ;;  %v7872_v41 = vld [vmem:[%s9656_s14 + $0xa4] ss:$8 sps:$4 sm:$0xff]  }
0x49e4   :  { %5925 = vadd.xlane.f32.xlu0 %v5924_v3  ;;  %6008 = vmatprep.subr.bf16.mxu1 %v7872_v41 }
0x49e5   :  { %v5927_v8 = vsel %vm141_vm1, %v5919_v16, 0.0  ;;  %6009 = vmatpush1.bf16.msra.mxu1 %v7870_v28 }
0x49e6   :  { %5928 = vadd.xlane.f32.xlu1 %v5927_v8  ;;  %6010 = vmatprep.subr.bf16.mxu1 %v7875_v29 }
0x49e9   :  { %6011 = vmatpush1.bf16.msra.mxu1 %v7873_v2 }
0x4a71   :  { %v5926_v9 = vpop.xlane.xlu0 %5925 }
0x4a72   :  { %v5930_v35 = vmul.f32 0.03125, %v5926_v9 }
0x4a73   :  { %v5929_v19 = vpop.xlane.xlu1 %5928 }
0x4a74   :  { %v5932_v54 = vsub.f32 %v5918_v1, %v5930_v35  ;;  %v5931_v20 = vmul.f32 0.03125, %v5929_v19 }
0x4a76   :  { %v5933_v57 = vsub.f32 %v5919_v16, %v5931_v20  ;;  %v5934_v21 = vmul.f32 %v5932_v54, %v5932_v54 }
0x4a78   :  { %v5936_v63 = vsel %vm141_vm1, %v5934_v21, 0.0  ;;  %v5935_v51 = vmul.f32 %v5933_v57, %v5933_v57 }
0x4a79   :  { %5937 = vadd.xlane.f32.xlu0 %v5936_v63 }
0x4a7a   :  { %v5939_v24 = vsel %vm141_vm1, %v5935_v51, 0.0 }
0x4a7d   :  { %5940 = vadd.xlane.f32.xlu0 %v5939_v24 }
0x4b06   :  { %v5938_v33 = vpop.xlane.xlu0 %5937 }
0x4b07   :  { %v5942_v4 = vmul.f32 0.03125, %v5938_v33  ;;  %v7894_v33 = vld [vmem:[%s9660_s20 + $0x4] ss:$8 sps:$4 sm:$0xff]  }
0x4b08   :  { %6323 = vmatprep.subr.bf16.mxu1 %v7894_v33 }
0x4b09   :  { %v5944_v53 = vadd.f32 1e-05, %v5942_v4  ;;  %v7892_v4 = vld [vmem:[%s9660_s20] ss:$8 sps:$4 sm:$0xff]  }
0x4b0a   :  { %v5941_v7 = vpop.xlane.xlu0 %5940 }
0x4b0b   :  { %8106 = vrsqrt.f32 %v5944_v53  ;;  %v5943_v36 = vmul.f32 0.03125, %v5941_v7  ;;  %v7895_v53 = vld [vmem:[%s9660_s20 + $0x10] ss:$8 sps:$4 sm:$0xff]   ;;  %v7897_v7 = vld [vmem:[%s9660_s20 + $0x14] ss:$8 sps:$4 sm:$0xff]  }
0x4b0d   :  { %v5945_v17 = vadd.f32 1e-05, %v5943_v36 }
0x4b0f   :  { %8108 = vrsqrt.f32 %v5945_v17 }
0x4b15   :  { %v8107_v13 = vpop.eup %8106 }
0x4b16   :  { %v5948_v15 = vmul.f32 %v8107_v13, %v5932_v54  ;;  %v6999_v54 = vld [vmem:[%s9659_s17 + $0x5] ss:$0 sm:$0xff] }
0x4b18   :  { %v5956_v10 = vmul.f32 %v6954_v43, %v5948_v15 }
0x4b19   :  { %v8109_v38 = vpop.eup %8108 }
0x4b1a   :  { %v5949_v40 = vmul.f32 %v8109_v38, %v5933_v57  ;;  %v5964_v46 = vadd.f32 %v6955_v14, %v5956_v10 }
0x4b1c   :  { %v5957_v34 = vmul.f32 %v6954_v43, %v5949_v40  ;;  %v7018_v40 = vld [vmem:[%s9651_s18 + $0x11] ss:$0 sm:$0xff] }
0x4b1e   :  { %v5965_v42 = vadd.f32 %v6955_v14, %v5957_v34 }
0x4b20   :  { %v5971_v44 = vpack.c.bf16 %v5965_v42, %v5964_v46 }
0x4b22   :  { %6965 = vmatmul.mubr.msk.bf16.vlgmr.msra.gmra.mrb[116].mxu1 %vm141_vm1, %v5971_v44  ;;  %v7019_v44 = vld [vmem:[%s9652_s19 + $0x11] ss:$0 sm:$0xff] }
0x4b23   :  { %6355 = vmatprep.mubr.bf16.mxu1 %v8125_v11  ;;  %v7891_v11 = vld [vmem:[%s9657_s16 + $0x2b8] sm:$0xff]   ;;  %6324 = vmatpush1.bf16.msra.mxu1 %v7892_v4 }
0x4b24   :  { %7309 = vmatpush3.bf16.msra.mxu0 %v7891_v11  ;;  %6325 = vmatprep.subr.bf16.mxu1 %v7897_v7  ;;  %v6288_v11 = vld [vmem:[%s9661_s21] sm:$0x3] }
0x4b25   :  { %v6293_v47 = vrot.slane %v6288_v11, %v8325_v32 }
0x4b27   :  { %6326 = vmatpush1.bf16.msra.mxu1 %v7895_v53 }
0x4bf5   :  { %v6042_v55 = vpop.f32.mrb[116].mxu1 }
0x4bf6   :  { %v6043_v0 = vadd.f32 %v6042_v55, %v5978_v50  ;;  %v6044_v60 = vpop.f32.mrb[117].mxu1 }
0x4bf7   :  { %v6045_v61 = vadd.f32 %v6044_v60, %v5982_v48  ;;  %v6046_v62 = vpop.f32.mrb[118].mxu1 }
0x4bf8   :  { %v6047_v18 = vadd.f32 %v6046_v62, %v5978_v50  ;;  %v6048_v1 = vpop.f32.mrb[119].mxu1  ;;  %v6051_v27 = vmax.f32 %v6043_v0, 0.0  ;;  %v6297_v50 = vrot.slane %v6288_v11, %v8323_v31 }
0x4bf9   :  { %v6049_v59 = vadd.f32 %v6048_v1, %v5982_v48  ;;  %v6052_v3 = vmax.f32 %v6045_v61, 0.0 }
0x4bfa   :  { %v6053_v16 = vmax.f32 %v6047_v18, 0.0 }
0x4bfb   :  { %v6054_v8 = vmax.f32 %v6049_v59, 0.0 }
0x4bfc   :  { %v6088_v9 = vpack.c.bf16 %v6053_v16, %v6051_v27 }
0x4bfd   :  { %v6089_v35 = vpack.c.bf16 %v6054_v8, %v6052_v3 }
0x4bff   :  { %6226 = vmatprep.mubr.bf16.mxu0 %v6089_v35 }
0x4c00   :  { %6227 = vmatmul.mubr.bf16.vlgmr.msra.gmra.mrb[124].mxu0 %v6088_v9 }
0x4cd3   :  { %v7310_v19 = vpop.f32.mrb[124].mxu0 }
0x4cd4   :  { %v7311_v20 = vpop.f32.mrb[125].mxu0 }
0x4cd5   :  { %v7312_v57 = vadd.f32 %v7311_v20, %v7310_v19  ;;  %v7313_v21 = vpop.f32.mrb[126].mxu0 }
0x4cd6   :  { %v7314_v63 = vpop.f32.mrb[127].mxu0 }
0x4cd7   :  { %v6229_v51 = vadd.f32 %v7312_v57, %v6999_v54  ;;  %v7315_v24 = vadd.f32 %v7314_v63, %v7313_v21 }
0x4cd9   :  { %v6232_v41 = vadd.f32 %v7315_v24, %v6999_v54  ;;  %v6235_v28 = vadd.f32 %v6229_v51, %v5964_v46 }
0x4cdb   :  { %v6241_v2 = vsel %vm141_vm1, %v6235_v28, 0.0  ;;  %v6236_v29 = vadd.f32 %v6232_v41, %v5965_v42 }
0x4cdc   :  { %6242 = vadd.xlane.f32.xlu1 %v6241_v2 }
0x4cdd   :  { %v6244_v25 = vsel %vm141_vm1, %v6236_v29, 0.0 }
0x4cde   :  { %6245 = vadd.xlane.f32.xlu0 %v6244_v25 }
0x4d69   :  { %v6243_v58 = vpop.xlane.xlu1 %6242 }
0x4d6a   :  { %v6247_v56 = vmul.f32 0.03125, %v6243_v58 }
0x4d6b   :  { %v6246_v26 = vpop.xlane.xlu0 %6245 }
0x4d6c   :  { %v6249_v30 = vsub.f32 %v6235_v28, %v6247_v56  ;;  %v6248_v39 = vmul.f32 0.03125, %v6246_v26 }
0x4d6e   :  { %v6250_v52 = vsub.f32 %v6236_v29, %v6248_v39  ;;  %v6251_v5 = vmul.f32 %v6249_v30, %v6249_v30 }
0x4d70   :  { %v6253_v49 = vsel %vm141_vm1, %v6251_v5, 0.0  ;;  %v6252_v12 = vmul.f32 %v6250_v52, %v6250_v52 }
0x4d71   :  { %6254 = vadd.xlane.f32.xlu1 %v6253_v49 }
0x4d72   :  { %v6256_v6 = vsel %vm141_vm1, %v6252_v12, 0.0 }
0x4d73   :  { %6257 = vadd.xlane.f32.xlu0 %v6256_v6 }
0x4dfe   :  { %v6255_v36 = vpop.xlane.xlu1 %6254 }
0x4dff   :  { %v6259_v17 = vmul.f32 0.03125, %v6255_v36 }
0x4e00   :  { %v6258_v13 = vpop.xlane.xlu0 %6257 }
0x4e01   :  { %v6261_v15 = vadd.f32 1e-05, %v6259_v17  ;;  %v6260_v43 = vmul.f32 0.03125, %v6258_v13 }
0x4e03   :  { %8110 = vrsqrt.f32 %v6261_v15  ;;  %v6262_v38 = vadd.f32 1e-05, %v6260_v43 }
0x4e05   :  { %8112 = vrsqrt.f32 %v6262_v38 }
0x4e0d   :  { %v8111_v10 = vpop.eup %8110 }
0x4e0e   :  { %v6265_v14 = vmul.f32 %v8111_v10, %v6249_v30 }
0x4e0f   :  { %v8113_v34 = vpop.eup %8112 }
0x4e10   :  { %v6273_v46 = vmul.f32 %v7018_v40, %v6265_v14  ;;  %v6266_v42 = vmul.f32 %v8113_v34, %v6250_v52 }
0x4e12   :  { %v6274_v22 = vmul.f32 %v7018_v40, %v6266_v42  ;;  %v6281_v37 = vadd.f32 %v7019_v44, %v6273_v46 }
0x4e14   :  { %v6282_v23 = vadd.f32 %v7019_v44, %v6274_v22 }
0x4e16   :  { %v6287_v45 = vpack.c.bf16 %v6282_v23, %v6281_v37 }
0x4e18   :  { %7024 = vmatmul.mubr.msk.bf16.vlgmr.msra.gmra.mrb[120].mxu1 %vm141_vm1, %v6287_v45 }
0x4eeb   :  { %v6357_v48 = vpop.f32.mrb[120].mxu1 }
0x4eec   :  { %v6358_v55 = vadd.f32 %v6357_v48, %v6293_v47  ;;  %v6359_v0 = vpop.f32.mrb[121].mxu1 }
0x4eed   :  { %v6360_v60 = vadd.f32 %v6359_v0, %v6297_v50  ;;  %v6361_v61 = vpop.f32.mrb[122].mxu1 }
0x4eee   :  { %6366 = vst [vmem:[%s9662_s22] sm:$0xff] %v6358_v55  ;;  %v6362_v62 = vadd.f32 %v6361_v61, %v6293_v47  ;;  %v6363_v18 = vpop.f32.mrb[123].mxu1 }
0x4eef   :  { %6367 = vst [vmem:[%s9662_s22 + $0x8] sm:$0xff] %v6360_v60  ;;  %v6364_v1 = vadd.f32 %v6363_v18, %v6297_v50 }
0x4ef0   :  { %6368 = vst [vmem:[%s9662_s22 + $0x10] sm:$0xff] %v6362_v62 }
0x4ef1   :  { %6369 = vst [vmem:[%s9662_s22 + $0x18] sm:$0xff] %v6364_v1 }

</bundles_post_ra>
